<compile_context>
chip_gen: v5e
topology: v5e:2x2
jax: 0.10.0
libtpu: 0.0.40
codegen_flags: <defaults>
</compile_context>

<pallas_src>
from functools import partial

import numpy as np
import jax
import jax.numpy as jnp
from jax.experimental import pallas as pl
from jax.experimental.pallas import tpu as pltpu


# ------------------------------ fused kernel -------------------------------

def _nn_fused_kernel(
    x_ref,
    m1_ref, br1_ref, m2_ref, br2_ref, m3_ref, br3_ref,
    p1lh_ref, p1rh_ref, p1lw_ref, p1rw_ref,
    p2lh_ref, p2rh_ref, p2lw_ref, p2rw_ref,
    p3lh_ref, p3rh_ref, p3lw_ref, p3rw_ref,
    g0_ref, g1_ref, bf1_ref, w2t_ref, bf2_ref, w3t_ref, bf3_ref,
    o_ref,
):
    def dot(a, b):
        return jnp.dot(a, b, preferred_element_type=jnp.float32)

    def silu(v):
        return v * jax.nn.sigmoid(v)

    def conv_block(act, m_ref, brow_ref):
        # act: (H, C_in*W), channel-blocked columns (w fastest inside a block).
        # m_ref: (kh, C_in*W, C_out*Wo) structured per-tap GEMM matrices.
        kh = m_ref.shape[0]
        ho = act.shape[0] - kh + 1
        acc = dot(act[0:ho, :], m_ref[0])
        for dh in range(1, kh):
            acc = acc + dot(act[dh:dh + ho, :], m_ref[dh])
        return silu(acc + brow_ref[...])

    def max_pool(act, lh_ref, rh_ref, lw_ref, rw_ref):
        # 2x2 max-pool (optionally PyTorch padding=1 semantics, baked into the
        # one-hot selection matrices): rows first, then channel-blocked cols.
        r = jnp.maximum(dot(lh_ref[...], act), dot(rh_ref[...], act))
        return jnp.maximum(dot(r, lw_ref[...]), dot(r, rw_ref[...]))

    tb = x_ref.shape[0]                                        # images per tile

    # --- per-image conv/pool stack (unrolled over the batch tile) ----------
    f0_rows, f1_rows = [], []
    for i in range(tb):
        x = x_ref[i]                                           # (40, 40)

        y = conv_block(x, m1_ref, br1_ref)                     # (38, 8*38)
        y = max_pool(y, p1lh_ref, p1rh_ref, p1lw_ref, p1rw_ref)  # (20, 8*20)

        y = conv_block(y, m2_ref, br2_ref)                     # (16, 16*16)
        y = max_pool(y, p2lh_ref, p2rh_ref, p2lw_ref, p2rw_ref)  # (9, 16*9)
        y = silu(y)                                            # extra SiLU after pool 2

        y = conv_block(y, m3_ref, br3_ref)                     # (5, 32*5)
        y = max_pool(y, p3lh_ref, p3rh_ref, p3lw_ref, p3rw_ref)  # (2, 32*2)

        f0_rows.append(y[0:1, :])
        f1_rows.append(y[1:2, :])

    # --- MLP head, batched across the tile (M = tb GEMMs) -------------------
    if tb > 1:
        f0 = jnp.concatenate(f0_rows, axis=0)                  # (tb, 64)
        f1 = jnp.concatenate(f1_rows, axis=0)                  # (tb, 64)
    else:
        f0, f1 = f0_rows[0], f1_rows[0]

    # Flatten's PyTorch (C,H,W) ordering is folded into the row-permuted fc1
    # weight slabs g0/g1:  z = row0 @ G0 + row1 @ G1 + b1
    z = dot(f0, g0_ref[...]) + dot(f1, g1_ref[...]) + bf1_ref[...]
    z = silu(z)
    z = silu(dot(z, w2t_ref[...]) + bf2_ref[...])
    z = dot(z, w3t_ref[...]) + bf3_ref[...]                    # (tb, out_dim)

    for i in range(tb):
        o_ref[i] = z[i:i + 1, :]


_PACK_ORDER = (
    "m1", "br1", "m2", "br2", "m3", "br3",
    "p1lh", "p1rh", "p1lw", "p1rw",
    "p2lh", "p2rh", "p2lw", "p2rw",
    "p3lh", "p3rh", "p3lw", "p3rw",
    "g0", "g1", "bf1", "w2t", "bf2", "w3t", "bf3",
)


# -------------------------- one-time weight packing -------------------------

def pack_params(params):
    """Precompute all structured matrices (conv row-GEMM slabs, pool selection
    matrices, permuted/transposed FC weights).  Runs once, outside jit."""

    def conv_mats(w, b, w_in):
        w = np.asarray(w, np.float32)
        b = np.asarray(b, np.float32)
        c_out, c_in, kh, kw = w.shape
        wo = w_in - kw + 1
        mats = np.zeros((kh, c_in * w_in, c_out * wo), np.float32)
        idx = np.arange(wo)
        for dh in range(kh):
            for o in range(c_out):
                for c in range(c_in):
                    for dw in range(kw):
                        mats[dh, c * w_in + idx + dw, o * wo + idx] = w[o, c, dh, dw]
        brow = np.repeat(b, wo)[None, :]
        return mats, brow, wo

    def pool_sel(n, pad):
        # one-hot row-selection matrices picking the left/right member of each
        # 2-wide pooling window (PyTorch MaxPool2d(2[, padding=1]) semantics).
        if pad:
            n_out = n // 2 + 1
            src = lambda j: (max(2 * j - 1, 0), min(2 * j, n - 1))
        else:
            n_out = n // 2
            src = lambda j: (2 * j, 2 * j + 1)
        left = np.zeros((n_out, n), np.float32)
        right = np.zeros((n_out, n), np.float32)
        for j in range(n_out):
            l, r = src(j)
            left[j, l] = 1.0
            right[j, r] = 1.0
        return left, right, n_out

    def pool_col_sel(w_in, c, pad):
        lb, rb, wp = pool_sel(w_in, pad)
        left = np.zeros((c * w_in, c * wp), np.float32)
        right = np.zeros((c * w_in, c * wp), np.float32)
        for cc in range(c):
            left[cc * w_in:(cc + 1) * w_in, cc * wp:(cc + 1) * wp] = lb.T
            right[cc * w_in:(cc + 1) * w_in, cc * wp:(cc + 1) * wp] = rb.T
        return left, right, wp

    H = W = 40

    # stage 1: conv 3x3 (1->8), pool(pad=1)
    m1, br1, w1o = conv_mats(params["w1"], params["b1"], W)
    h1o = H - 3 + 1
    p1lh, p1rh, h1p = pool_sel(h1o, True)
    p1lw, p1rw, w1p = pool_col_sel(w1o, 8, True)

    # stage 2: conv 5x5 (8->16), pool(pad=1)
    m2, br2, w2o = conv_mats(params["w2"], params["b2"], w1p)
    h2o = h1p - 5 + 1
    p2lh, p2rh, h2p = pool_sel(h2o, True)
    p2lw, p2rw, w2p = pool_col_sel(w2o, 16, True)

    # stage 3: conv 5x5 (16->32), pool(no pad)
    m3, br3, w3o = conv_mats(params["w3"], params["b3"], w2p)
    h3o = h2p - 5 + 1
    p3lh, p3rh, h3p = pool_sel(h3o, False)
    p3lw, p3rw, w3p = pool_col_sel(w3o, 32, False)

    # fc1: fold Flatten's (C,H,W) ordering into per-conv-row weight slabs.
    lw1 = np.asarray(params["lw1"], np.float32)            # (hidden, 128)
    hidden = lw1.shape[0]
    wt = lw1.T                                             # rows: c*(h*w)+h*w_idx
    g = np.zeros((h3p, 32 * w3p, hidden), np.float32)
    for c in range(32):
        for hh in range(h3p):
            for ww in range(w3p):
                g[hh, c * w3p + ww, :] = wt[c * (h3p * w3p) + hh * w3p + ww, :]

    packed = {
        "m1": m1, "br1": br1, "m2": m2, "br2": br2, "m3": m3, "br3": br3,
        "p1lh": p1lh, "p1rh": p1rh, "p1lw": p1lw, "p1rw": p1rw,
        "p2lh": p2lh, "p2rh": p2rh, "p2lw": p2lw, "p2rw": p2rw,
        "p3lh": p3lh, "p3rh": p3rh, "p3lw": p3lw, "p3rw": p3rw,
        "g0": g[0], "g1": g[1],
        "bf1": np.asarray(params["lb1"], np.float32)[None, :],
        "w2t": np.asarray(params["lw2"], np.float32).T,
        "bf2": np.asarray(params["lb2"], np.float32)[None, :],
        "w3t": np.asarray(params["lw3"], np.float32).T,
        "bf3": np.asarray(params["lb3"], np.float32)[None, :],
    }
    return {k: jnp.asarray(v) for k, v in packed.items()}


# --------------------------------- forward ----------------------------------

def nn_forward_pallas(x_nchw, packed, batch_tile=2):
    N, C, H, W = x_nchw.shape
    assert C == 1 and H == 40 and W == 40, "architecture requires (N,1,40,40)"
    out_dim = packed["bf3"].shape[1]

    tb = max(1, min(batch_tile, N))
    n_pad = ((N + tb - 1) // tb) * tb

    x = x_nchw.reshape(N, H, W).astype(jnp.float32)
    if n_pad != N:
        x = jnp.pad(x, ((0, n_pad - N), (0, 0), (0, 0)))

    weights = [packed[k] for k in _PACK_ORDER]
    in_specs = [pl.BlockSpec((tb, H, W), lambda n: (n, 0, 0))]
    in_specs += [pl.BlockSpec(w.shape, lambda n, nd=w.ndim: (0,) * nd)
                 for w in weights]

    out = pl.pallas_call(
        _nn_fused_kernel,
        out_shape=jax.ShapeDtypeStruct((n_pad, 1, out_dim), jnp.float32),
        grid=(n_pad // tb,),
        in_specs=in_specs,
        out_specs=pl.BlockSpec((tb, 1, out_dim), lambda n: (n, 0, 0)),
        compiler_params=pltpu.CompilerParams(
            dimension_semantics=("parallel",)),   # batch tiles shard across TCs (v7x)
    )(x, *weights)
    return out.reshape(n_pad, out_dim)[:N]


# ------------------------------- parameters ---------------------------------

def init_params(key, output_dim=3, hidden=128):
    ks = jax.random.split(key, 12)

    def w(k, shape, fan_in):
        return jax.random.normal(k, shape, dtype=jnp.float32) / jnp.sqrt(float(fan_in))

    return {
        "w1": w(ks[0], (8, 1, 3, 3), 9),        "b1": w(ks[1], (8,), 9),
        "w2": w(ks[2], (16, 8, 5, 5), 200),     "b2": w(ks[3], (16,), 200),
        "w3": w(ks[4], (32, 16, 5, 5), 400),    "b3": w(ks[5], (32,), 400),
        "lw1": w(ks[6], (hidden, 128), 128),    "lb1": w(ks[7], (hidden,), 128),
        "lw2": w(ks[8], (hidden, hidden), hidden), "lb2": w(ks[9], (hidden,), hidden),
        "lw3": w(ks[10], (output_dim, hidden), hidden),
        "lb3": w(ks[11], (output_dim,), hidden),
    }


# ------------------------- pure-JAX reference check -------------------------

def reference_forward(x_nchw, params):
    silu = lambda v: v * jax.nn.sigmoid(v)
    HI = jax.lax.Precision.HIGHEST

    def conv(x, w, b):
        y = jax.lax.conv_general_dilated(
            x, w, (1, 1), "VALID",
            dimension_numbers=("NCHW", "OIHW", "NCHW"), precision=HI)
        return y + b[None, :, None, None]

    def pool(x, pad):
        if pad:
            x = jnp.pad(x, ((0, 0), (0, 0), (1, 1), (1, 1)),
                        constant_values=-jnp.inf)
        return jax.lax.reduce_window(x, -jnp.inf, jax.lax.max,
                                     (1, 1, 2, 2), (1, 1, 2, 2), "VALID")

    x = x_nchw.astype(jnp.float32)
    x = pool(silu(conv(x, params["w1"], params["b1"])), True)
    x = silu(pool(silu(conv(x, params["w2"], params["b2"])), True))
    x = pool(silu(conv(x, params["w3"], params["b3"])), False)
    x = x.reshape(x.shape[0], -1)
    x = silu(jnp.dot(x, params["lw1"].T, precision=HI) + params["lb1"])
    x = silu(jnp.dot(x, params["lw2"].T, precision=HI) + params["lb2"])
    x = jnp.dot(x, params["lw3"].T, precision=HI) + params["lb3"]
    return x


# ----------------------------------- main -----------------------------------

if __name__ == "__main__":
    # 40x40 input -> conv/pool stack yields 32*2*2 = 128 flat features,
    # matching nn.Linear(128, hidden_layer_size) in the module.
    key = jax.random.PRNGKey(0)
    x = jax.random.normal(key, (2, 1, 40, 40), dtype=jnp.float32)

    params = init_params(jax.random.PRNGKey(42), output_dim=3, hidden=128)
    packed = pack_params(params)          # one-time weight packing (host side)

    fwd = jax.jit(partial(nn_forward_pallas, batch_tile=2))
    y = jax.block_until_ready(fwd(x, packed))

    y_ref = reference_forward(x, params)
    assert y.shape == (2, 3), y.shape
    if not bool(jnp.allclose(y, y_ref, atol=1e-3, rtol=1e-3)):
        raise AssertionError(f"mismatch vs reference:\n{y}\n{y_ref}")

    print("KERNEL_OK")
</pallas_src>

<mosaic_0001>
module attributes {stable_mosaic.version = 11 : i64} {
  func.func @_nn_fused_kernel(%arg0: i32, %arg1: memref<2x40x40xf32, #tpu.memory_space<vmem>>, %arg2: memref<3x40x304xf32, #tpu.memory_space<vmem>>, %arg3: memref<1x304xf32, #tpu.memory_space<vmem>>, %arg4: memref<5x160x256xf32, #tpu.memory_space<vmem>>, %arg5: memref<1x256xf32, #tpu.memory_space<vmem>>, %arg6: memref<5x144x160xf32, #tpu.memory_space<vmem>>, %arg7: memref<1x160xf32, #tpu.memory_space<vmem>>, %arg8: memref<20x38xf32, #tpu.memory_space<vmem>>, %arg9: memref<20x38xf32, #tpu.memory_space<vmem>>, %arg10: memref<304x160xf32, #tpu.memory_space<vmem>>, %arg11: memref<304x160xf32, #tpu.memory_space<vmem>>, %arg12: memref<9x16xf32, #tpu.memory_space<vmem>>, %arg13: memref<9x16xf32, #tpu.memory_space<vmem>>, %arg14: memref<256x144xf32, #tpu.memory_space<vmem>>, %arg15: memref<256x144xf32, #tpu.memory_space<vmem>>, %arg16: memref<2x5xf32, #tpu.memory_space<vmem>>, %arg17: memref<2x5xf32, #tpu.memory_space<vmem>>, %arg18: memref<160x64xf32, #tpu.memory_space<vmem>>, %arg19: memref<160x64xf32, #tpu.memory_space<vmem>>, %arg20: memref<64x128xf32, #tpu.memory_space<vmem>>, %arg21: memref<64x128xf32, #tpu.memory_space<vmem>>, %arg22: memref<1x128xf32, #tpu.memory_space<vmem>>, %arg23: memref<128x128xf32, #tpu.memory_space<vmem>>, %arg24: memref<1x128xf32, #tpu.memory_space<vmem>>, %arg25: memref<128x3xf32, #tpu.memory_space<vmem>>, %arg26: memref<1x3xf32, #tpu.memory_space<vmem>>, %arg27: memref<2x1x3xf32, #tpu.memory_space<vmem>>) attributes {dimension_semantics = [#tpu.dimension_semantics<parallel>], iteration_bounds = array<i64: 1>, scalar_prefetch = 0 : i64, scratch_operands = 0 : i64, tpu.core_type = #tpu.core_type<tc>, window_params = [{transform_indices = @transform_0, window_bounds = array<i64: 2, 40, 40>}, {pipeline_mode = #tpu.pipeline_mode<synchronous>, transform_indices = @transform_1, window_bounds = array<i64: 3, 40, 304>}, {pipeline_mode = #tpu.pipeline_mode<synchronous>, transform_indices = @transform_2, window_bounds = array<i64: 1, 304>}, {pipeline_mode = #tpu.pipeline_mode<synchronous>, transform_indices = @transform_3, window_bounds = array<i64: 5, 160, 256>}, {pipeline_mode = #tpu.pipeline_mode<synchronous>, transform_indices = @transform_4, window_bounds = array<i64: 1, 256>}, {pipeline_mode = #tpu.pipeline_mode<synchronous>, transform_indices = @transform_5, window_bounds = array<i64: 5, 144, 160>}, {pipeline_mode = #tpu.pipeline_mode<synchronous>, transform_indices = @transform_6, window_bounds = array<i64: 1, 160>}, {pipeline_mode = #tpu.pipeline_mode<synchronous>, transform_indices = @transform_7, window_bounds = array<i64: 20, 38>}, {pipeline_mode = #tpu.pipeline_mode<synchronous>, transform_indices = @transform_8, window_bounds = array<i64: 20, 38>}, {pipeline_mode = #tpu.pipeline_mode<synchronous>, transform_indices = @transform_9, window_bounds = array<i64: 304, 160>}, {pipeline_mode = #tpu.pipeline_mode<synchronous>, transform_indices = @transform_10, window_bounds = array<i64: 304, 160>}, {pipeline_mode = #tpu.pipeline_mode<synchronous>, transform_indices = @transform_11, window_bounds = array<i64: 9, 16>}, {pipeline_mode = #tpu.pipeline_mode<synchronous>, transform_indices = @transform_12, window_bounds = array<i64: 9, 16>}, {pipeline_mode = #tpu.pipeline_mode<synchronous>, transform_indices = @transform_13, window_bounds = array<i64: 256, 144>}, {pipeline_mode = #tpu.pipeline_mode<synchronous>, transform_indices = @transform_14, window_bounds = array<i64: 256, 144>}, {pipeline_mode = #tpu.pipeline_mode<synchronous>, transform_indices = @transform_15, window_bounds = array<i64: 2, 5>}, {pipeline_mode = #tpu.pipeline_mode<synchronous>, transform_indices = @transform_16, window_bounds = array<i64: 2, 5>}, {pipeline_mode = #tpu.pipeline_mode<synchronous>, transform_indices = @transform_17, window_bounds = array<i64: 160, 64>}, {pipeline_mode = #tpu.pipeline_mode<synchronous>, transform_indices = @transform_18, window_bounds = array<i64: 160, 64>}, {pipeline_mode = #tpu.pipeline_mode<synchronous>, transform_indices = @transform_19, window_bounds = array<i64: 64, 128>}, {pipeline_mode = #tpu.pipeline_mode<synchronous>, transform_indices = @transform_20, window_bounds = array<i64: 64, 128>}, {pipeline_mode = #tpu.pipeline_mode<synchronous>, transform_indices = @transform_21, window_bounds = array<i64: 1, 128>}, {pipeline_mode = #tpu.pipeline_mode<synchronous>, transform_indices = @transform_22, window_bounds = array<i64: 128, 128>}, {pipeline_mode = #tpu.pipeline_mode<synchronous>, transform_indices = @transform_23, window_bounds = array<i64: 1, 128>}, {pipeline_mode = #tpu.pipeline_mode<synchronous>, transform_indices = @transform_24, window_bounds = array<i64: 128, 3>}, {pipeline_mode = #tpu.pipeline_mode<synchronous>, transform_indices = @transform_25, window_bounds = array<i64: 1, 3>}, {transform_indices = @transform_26, window_bounds = array<i64: 2, 1, 3>}]} {
    %c0 = arith.constant 0 : index
    %c0_0 = arith.constant 0 : index
    %c0_1 = arith.constant 0 : index
    %0 = vector.load %arg1[%c0, %c0_0, %c0_1] : memref<2x40x40xf32, #tpu.memory_space<vmem>>, vector<1x40x40xf32>
    %1 = vector.shape_cast %0 : vector<1x40x40xf32> to vector<40x40xf32>
    %2 = vector.extract_strided_slice %1 {offsets = [0, 0], sizes = [38, 40], strides = [1, 1]} : vector<40x40xf32> to vector<38x40xf32>
    %c0_2 = arith.constant 0 : index
    %c0_3 = arith.constant 0 : index
    %c0_4 = arith.constant 0 : index
    %3 = vector.load %arg2[%c0_2, %c0_3, %c0_4] : memref<3x40x304xf32, #tpu.memory_space<vmem>>, vector<1x40x304xf32>
    %4 = vector.shape_cast %3 : vector<1x40x304xf32> to vector<40x304xf32>
    %cst = arith.constant dense<0.000000e+00> : vector<38x304xf32>
    %5 = tpu.matmul %2, %4, %cst {dimension_numbers = #tpu.dot_dimension_numbers<[1], [0], [0], [1], [0, 0, 1, 1], [], []>} : vector<38x40xf32>, vector<40x304xf32>, vector<38x304xf32> -> vector<38x304xf32>
    %6 = vector.extract_strided_slice %1 {offsets = [1, 0], sizes = [38, 40], strides = [1, 1]} : vector<40x40xf32> to vector<38x40xf32>
    %c1 = arith.constant 1 : index
    %c0_5 = arith.constant 0 : index
    %c0_6 = arith.constant 0 : index
    %7 = vector.load %arg2[%c1, %c0_5, %c0_6] : memref<3x40x304xf32, #tpu.memory_space<vmem>>, vector<1x40x304xf32>
    %8 = vector.shape_cast %7 : vector<1x40x304xf32> to vector<40x304xf32>
    %cst_7 = arith.constant dense<0.000000e+00> : vector<38x304xf32>
    %9 = tpu.matmul %6, %8, %cst_7 {dimension_numbers = #tpu.dot_dimension_numbers<[1], [0], [0], [1], [0, 0, 1, 1], [], []>} : vector<38x40xf32>, vector<40x304xf32>, vector<38x304xf32> -> vector<38x304xf32>
    %10 = arith.addf %5, %9 : vector<38x304xf32>
    %11 = vector.extract_strided_slice %1 {offsets = [2, 0], sizes = [38, 40], strides = [1, 1]} : vector<40x40xf32> to vector<38x40xf32>
    %c2 = arith.constant 2 : index
    %c0_8 = arith.constant 0 : index
    %c0_9 = arith.constant 0 : index
    %12 = vector.load %arg2[%c2, %c0_8, %c0_9] : memref<3x40x304xf32, #tpu.memory_space<vmem>>, vector<1x40x304xf32>
    %13 = vector.shape_cast %12 : vector<1x40x304xf32> to vector<40x304xf32>
    %cst_10 = arith.constant dense<0.000000e+00> : vector<38x304xf32>
    %14 = tpu.matmul %11, %13, %cst_10 {dimension_numbers = #tpu.dot_dimension_numbers<[1], [0], [0], [1], [0, 0, 1, 1], [], []>} : vector<38x40xf32>, vector<40x304xf32>, vector<38x304xf32> -> vector<38x304xf32>
    %15 = arith.addf %10, %14 : vector<38x304xf32>
    %c0_11 = arith.constant 0 : index
    %c0_12 = arith.constant 0 : index
    %16 = vector.load %arg3[%c0_11, %c0_12] : memref<1x304xf32, #tpu.memory_space<vmem>>, vector<1x304xf32>
    %17 = vector.broadcast %16 : vector<1x304xf32> to vector<38x304xf32>
    %18 = arith.addf %15, %17 : vector<38x304xf32>
    %19 = arith.negf %18 : vector<38x304xf32>
    %20 = math.exp %19 : vector<38x304xf32>
    %cst_13 = arith.constant 1.000000e+00 : f32
    %21 = vector.broadcast %cst_13 : f32 to vector<38x304xf32>
    %22 = arith.addf %21, %20 : vector<38x304xf32>
    %23 = arith.divf %21, %22 : vector<38x304xf32>
    %24 = arith.mulf %18, %23 : vector<38x304xf32>
    %c0_14 = arith.constant 0 : index
    %c0_15 = arith.constant 0 : index
    %25 = vector.load %arg8[%c0_14, %c0_15] : memref<20x38xf32, #tpu.memory_space<vmem>>, vector<20x38xf32>
    %cst_16 = arith.constant dense<0.000000e+00> : vector<20x304xf32>
    %26 = tpu.matmul %25, %24, %cst_16 {dimension_numbers = #tpu.dot_dimension_numbers<[1], [0], [0], [1], [0, 0, 1, 1], [], []>} : vector<20x38xf32>, vector<38x304xf32>, vector<20x304xf32> -> vector<20x304xf32>
    %c0_17 = arith.constant 0 : index
    %c0_18 = arith.constant 0 : index
    %27 = vector.load %arg9[%c0_17, %c0_18] : memref<20x38xf32, #tpu.memory_space<vmem>>, vector<20x38xf32>
    %cst_19 = arith.constant dense<0.000000e+00> : vector<20x304xf32>
    %28 = tpu.matmul %27, %24, %cst_19 {dimension_numbers = #tpu.dot_dimension_numbers<[1], [0], [0], [1], [0, 0, 1, 1], [], []>} : vector<20x38xf32>, vector<38x304xf32>, vector<20x304xf32> -> vector<20x304xf32>
    %29 = arith.maximumf %26, %28 : vector<20x304xf32>
    %c0_20 = arith.constant 0 : index
    %c0_21 = arith.constant 0 : index
    %30 = vector.load %arg10[%c0_20, %c0_21] : memref<304x160xf32, #tpu.memory_space<vmem>>, vector<304x160xf32>
    %cst_22 = arith.constant dense<0.000000e+00> : vector<20x160xf32>
    %31 = tpu.matmul %29, %30, %cst_22 {dimension_numbers = #tpu.dot_dimension_numbers<[1], [0], [0], [1], [0, 0, 1, 1], [], []>} : vector<20x304xf32>, vector<304x160xf32>, vector<20x160xf32> -> vector<20x160xf32>
    %c0_23 = arith.constant 0 : index
    %c0_24 = arith.constant 0 : index
    %32 = vector.load %arg11[%c0_23, %c0_24] : memref<304x160xf32, #tpu.memory_space<vmem>>, vector<304x160xf32>
    %cst_25 = arith.constant dense<0.000000e+00> : vector<20x160xf32>
    %33 = tpu.matmul %29, %32, %cst_25 {dimension_numbers = #tpu.dot_dimension_numbers<[1], [0], [0], [1], [0, 0, 1, 1], [], []>} : vector<20x304xf32>, vector<304x160xf32>, vector<20x160xf32> -> vector<20x160xf32>
    %34 = arith.maximumf %31, %33 : vector<20x160xf32>
    %35 = vector.extract_strided_slice %34 {offsets = [0, 0], sizes = [16, 160], strides = [1, 1]} : vector<20x160xf32> to vector<16x160xf32>
    %c0_26 = arith.constant 0 : index
    %c0_27 = arith.constant 0 : index
    %c0_28 = arith.constant 0 : index
    %36 = vector.load %arg4[%c0_26, %c0_27, %c0_28] : memref<5x160x256xf32, #tpu.memory_space<vmem>>, vector<1x160x256xf32>
    %37 = vector.shape_cast %36 : vector<1x160x256xf32> to vector<160x256xf32>
    %cst_29 = arith.constant dense<0.000000e+00> : vector<16x256xf32>
    %38 = tpu.matmul %35, %37, %cst_29 {dimension_numbers = #tpu.dot_dimension_numbers<[1], [0], [0], [1], [0, 0, 1, 1], [], []>} : vector<16x160xf32>, vector<160x256xf32>, vector<16x256xf32> -> vector<16x256xf32>
    %39 = vector.extract_strided_slice %34 {offsets = [1, 0], sizes = [16, 160], strides = [1, 1]} : vector<20x160xf32> to vector<16x160xf32>
    %c1_30 = arith.constant 1 : index
    %c0_31 = arith.constant 0 : index
    %c0_32 = arith.constant 0 : index
    %40 = vector.load %arg4[%c1_30, %c0_31, %c0_32] : memref<5x160x256xf32, #tpu.memory_space<vmem>>, vector<1x160x256xf32>
    %41 = vector.shape_cast %40 : vector<1x160x256xf32> to vector<160x256xf32>
    %cst_33 = arith.constant dense<0.000000e+00> : vector<16x256xf32>
    %42 = tpu.matmul %39, %41, %cst_33 {dimension_numbers = #tpu.dot_dimension_numbers<[1], [0], [0], [1], [0, 0, 1, 1], [], []>} : vector<16x160xf32>, vector<160x256xf32>, vector<16x256xf32> -> vector<16x256xf32>
    %43 = arith.addf %38, %42 : vector<16x256xf32>
    %44 = vector.extract_strided_slice %34 {offsets = [2, 0], sizes = [16, 160], strides = [1, 1]} : vector<20x160xf32> to vector<16x160xf32>
    %c2_34 = arith.constant 2 : index
    %c0_35 = arith.constant 0 : index
    %c0_36 = arith.constant 0 : index
    %45 = vector.load %arg4[%c2_34, %c0_35, %c0_36] : memref<5x160x256xf32, #tpu.memory_space<vmem>>, vector<1x160x256xf32>
    %46 = vector.shape_cast %45 : vector<1x160x256xf32> to vector<160x256xf32>
    %cst_37 = arith.constant dense<0.000000e+00> : vector<16x256xf32>
    %47 = tpu.matmul %44, %46, %cst_37 {dimension_numbers = #tpu.dot_dimension_numbers<[1], [0], [0], [1], [0, 0, 1, 1], [], []>} : vector<16x160xf32>, vector<160x256xf32>, vector<16x256xf32> -> vector<16x256xf32>
    %48 = arith.addf %43, %47 : vector<16x256xf32>
    %49 = vector.extract_strided_slice %34 {offsets = [3, 0], sizes = [16, 160], strides = [1, 1]} : vector<20x160xf32> to vector<16x160xf32>
    %c3 = arith.constant 3 : index
    %c0_38 = arith.constant 0 : index
    %c0_39 = arith.constant 0 : index
    %50 = vector.load %arg4[%c3, %c0_38, %c0_39] : memref<5x160x256xf32, #tpu.memory_space<vmem>>, vector<1x160x256xf32>
    %51 = vector.shape_cast %50 : vector<1x160x256xf32> to vector<160x256xf32>
    %cst_40 = arith.constant dense<0.000000e+00> : vector<16x256xf32>
    %52 = tpu.matmul %49, %51, %cst_40 {dimension_numbers = #tpu.dot_dimension_numbers<[1], [0], [0], [1], [0, 0, 1, 1], [], []>} : vector<16x160xf32>, vector<160x256xf32>, vector<16x256xf32> -> vector<16x256xf32>
    %53 = arith.addf %48, %52 : vector<16x256xf32>
    %54 = vector.extract_strided_slice %34 {offsets = [4, 0], sizes = [16, 160], strides = [1, 1]} : vector<20x160xf32> to vector<16x160xf32>
    %c4 = arith.constant 4 : index
    %c0_41 = arith.constant 0 : index
    %c0_42 = arith.constant 0 : index
    %55 = vector.load %arg4[%c4, %c0_41, %c0_42] : memref<5x160x256xf32, #tpu.memory_space<vmem>>, vector<1x160x256xf32>
    %56 = vector.shape_cast %55 : vector<1x160x256xf32> to vector<160x256xf32>
    %cst_43 = arith.constant dense<0.000000e+00> : vector<16x256xf32>
    %57 = tpu.matmul %54, %56, %cst_43 {dimension_numbers = #tpu.dot_dimension_numbers<[1], [0], [0], [1], [0, 0, 1, 1], [], []>} : vector<16x160xf32>, vector<160x256xf32>, vector<16x256xf32> -> vector<16x256xf32>
    %58 = arith.addf %53, %57 : vector<16x256xf32>
    %c0_44 = arith.constant 0 : index
    %c0_45 = arith.constant 0 : index
    %59 = vector.load %arg5[%c0_44, %c0_45] : memref<1x256xf32, #tpu.memory_space<vmem>>, vector<1x256xf32>
    %60 = vector.broadcast %59 : vector<1x256xf32> to vector<16x256xf32>
    %61 = arith.addf %58, %60 : vector<16x256xf32>
    %62 = arith.negf %61 : vector<16x256xf32>
    %63 = math.exp %62 : vector<16x256xf32>
    %cst_46 = arith.constant 1.000000e+00 : f32
    %64 = vector.broadcast %cst_46 : f32 to vector<16x256xf32>
    %65 = arith.addf %64, %63 : vector<16x256xf32>
    %66 = arith.divf %64, %65 : vector<16x256xf32>
    %67 = arith.mulf %61, %66 : vector<16x256xf32>
    %c0_47 = arith.constant 0 : index
    %c0_48 = arith.constant 0 : index
    %68 = vector.load %arg12[%c0_47, %c0_48] : memref<9x16xf32, #tpu.memory_space<vmem>>, vector<9x16xf32>
    %cst_49 = arith.constant dense<0.000000e+00> : vector<9x256xf32>
    %69 = tpu.matmul %68, %67, %cst_49 {dimension_numbers = #tpu.dot_dimension_numbers<[1], [0], [0], [1], [0, 0, 1, 1], [], []>} : vector<9x16xf32>, vector<16x256xf32>, vector<9x256xf32> -> vector<9x256xf32>
    %c0_50 = arith.constant 0 : index
    %c0_51 = arith.constant 0 : index
    %70 = vector.load %arg13[%c0_50, %c0_51] : memref<9x16xf32, #tpu.memory_space<vmem>>, vector<9x16xf32>
    %cst_52 = arith.constant dense<0.000000e+00> : vector<9x256xf32>
    %71 = tpu.matmul %70, %67, %cst_52 {dimension_numbers = #tpu.dot_dimension_numbers<[1], [0], [0], [1], [0, 0, 1, 1], [], []>} : vector<9x16xf32>, vector<16x256xf32>, vector<9x256xf32> -> vector<9x256xf32>
    %72 = arith.maximumf %69, %71 : vector<9x256xf32>
    %c0_53 = arith.constant 0 : index
    %c0_54 = arith.constant 0 : index
    %73 = vector.load %arg14[%c0_53, %c0_54] : memref<256x144xf32, #tpu.memory_space<vmem>>, vector<256x144xf32>
    %cst_55 = arith.constant dense<0.000000e+00> : vector<9x144xf32>
    %74 = tpu.matmul %72, %73, %cst_55 {dimension_numbers = #tpu.dot_dimension_numbers<[1], [0], [0], [1], [0, 0, 1, 1], [], []>} : vector<9x256xf32>, vector<256x144xf32>, vector<9x144xf32> -> vector<9x144xf32>
    %c0_56 = arith.constant 0 : index
    %c0_57 = arith.constant 0 : index
    %75 = vector.load %arg15[%c0_56, %c0_57] : memref<256x144xf32, #tpu.memory_space<vmem>>, vector<256x144xf32>
    %cst_58 = arith.constant dense<0.000000e+00> : vector<9x144xf32>
    %76 = tpu.matmul %72, %75, %cst_58 {dimension_numbers = #tpu.dot_dimension_numbers<[1], [0], [0], [1], [0, 0, 1, 1], [], []>} : vector<9x256xf32>, vector<256x144xf32>, vector<9x144xf32> -> vector<9x144xf32>
    %77 = arith.maximumf %74, %76 : vector<9x144xf32>
    %78 = arith.negf %77 : vector<9x144xf32>
    %79 = math.exp %78 : vector<9x144xf32>
    %cst_59 = arith.constant 1.000000e+00 : f32
    %80 = vector.broadcast %cst_59 : f32 to vector<9x144xf32>
    %81 = arith.addf %80, %79 : vector<9x144xf32>
    %82 = arith.divf %80, %81 : vector<9x144xf32>
    %83 = arith.mulf %77, %82 : vector<9x144xf32>
    %84 = vector.extract_strided_slice %83 {offsets = [0, 0], sizes = [5, 144], strides = [1, 1]} : vector<9x144xf32> to vector<5x144xf32>
    %c0_60 = arith.constant 0 : index
    %c0_61 = arith.constant 0 : index
    %c0_62 = arith.constant 0 : index
    %85 = vector.load %arg6[%c0_60, %c0_61, %c0_62] : memref<5x144x160xf32, #tpu.memory_space<vmem>>, vector<1x144x160xf32>
    %86 = vector.shape_cast %85 : vector<1x144x160xf32> to vector<144x160xf32>
    %cst_63 = arith.constant dense<0.000000e+00> : vector<5x160xf32>
    %87 = tpu.matmul %84, %86, %cst_63 {dimension_numbers = #tpu.dot_dimension_numbers<[1], [0], [0], [1], [0, 0, 1, 1], [], []>} : vector<5x144xf32>, vector<144x160xf32>, vector<5x160xf32> -> vector<5x160xf32>
    %88 = vector.extract_strided_slice %83 {offsets = [1, 0], sizes = [5, 144], strides = [1, 1]} : vector<9x144xf32> to vector<5x144xf32>
    %c1_64 = arith.constant 1 : index
    %c0_65 = arith.constant 0 : index
    %c0_66 = arith.constant 0 : index
    %89 = vector.load %arg6[%c1_64, %c0_65, %c0_66] : memref<5x144x160xf32, #tpu.memory_space<vmem>>, vector<1x144x160xf32>
    %90 = vector.shape_cast %89 : vector<1x144x160xf32> to vector<144x160xf32>
    %cst_67 = arith.constant dense<0.000000e+00> : vector<5x160xf32>
    %91 = tpu.matmul %88, %90, %cst_67 {dimension_numbers = #tpu.dot_dimension_numbers<[1], [0], [0], [1], [0, 0, 1, 1], [], []>} : vector<5x144xf32>, vector<144x160xf32>, vector<5x160xf32> -> vector<5x160xf32>
    %92 = arith.addf %87, %91 : vector<5x160xf32>
    %93 = vector.extract_strided_slice %83 {offsets = [2, 0], sizes = [5, 144], strides = [1, 1]} : vector<9x144xf32> to vector<5x144xf32>
    %c2_68 = arith.constant 2 : index
    %c0_69 = arith.constant 0 : index
    %c0_70 = arith.constant 0 : index
    %94 = vector.load %arg6[%c2_68, %c0_69, %c0_70] : memref<5x144x160xf32, #tpu.memory_space<vmem>>, vector<1x144x160xf32>
    %95 = vector.shape_cast %94 : vector<1x144x160xf32> to vector<144x160xf32>
    %cst_71 = arith.constant dense<0.000000e+00> : vector<5x160xf32>
    %96 = tpu.matmul %93, %95, %cst_71 {dimension_numbers = #tpu.dot_dimension_numbers<[1], [0], [0], [1], [0, 0, 1, 1], [], []>} : vector<5x144xf32>, vector<144x160xf32>, vector<5x160xf32> -> vector<5x160xf32>
    %97 = arith.addf %92, %96 : vector<5x160xf32>
    %98 = vector.extract_strided_slice %83 {offsets = [3, 0], sizes = [5, 144], strides = [1, 1]} : vector<9x144xf32> to vector<5x144xf32>
    %c3_72 = arith.constant 3 : index
    %c0_73 = arith.constant 0 : index
    %c0_74 = arith.constant 0 : index
    %99 = vector.load %arg6[%c3_72, %c0_73, %c0_74] : memref<5x144x160xf32, #tpu.memory_space<vmem>>, vector<1x144x160xf32>
    %100 = vector.shape_cast %99 : vector<1x144x160xf32> to vector<144x160xf32>
    %cst_75 = arith.constant dense<0.000000e+00> : vector<5x160xf32>
    %101 = tpu.matmul %98, %100, %cst_75 {dimension_numbers = #tpu.dot_dimension_numbers<[1], [0], [0], [1], [0, 0, 1, 1], [], []>} : vector<5x144xf32>, vector<144x160xf32>, vector<5x160xf32> -> vector<5x160xf32>
    %102 = arith.addf %97, %101 : vector<5x160xf32>
    %103 = vector.extract_strided_slice %83 {offsets = [4, 0], sizes = [5, 144], strides = [1, 1]} : vector<9x144xf32> to vector<5x144xf32>
    %c4_76 = arith.constant 4 : index
    %c0_77 = arith.constant 0 : index
    %c0_78 = arith.constant 0 : index
    %104 = vector.load %arg6[%c4_76, %c0_77, %c0_78] : memref<5x144x160xf32, #tpu.memory_space<vmem>>, vector<1x144x160xf32>
    %105 = vector.shape_cast %104 : vector<1x144x160xf32> to vector<144x160xf32>
    %cst_79 = arith.constant dense<0.000000e+00> : vector<5x160xf32>
    %106 = tpu.matmul %103, %105, %cst_79 {dimension_numbers = #tpu.dot_dimension_numbers<[1], [0], [0], [1], [0, 0, 1, 1], [], []>} : vector<5x144xf32>, vector<144x160xf32>, vector<5x160xf32> -> vector<5x160xf32>
    %107 = arith.addf %102, %106 : vector<5x160xf32>
    %c0_80 = arith.constant 0 : index
    %c0_81 = arith.constant 0 : index
    %108 = vector.load %arg7[%c0_80, %c0_81] : memref<1x160xf32, #tpu.memory_space<vmem>>, vector<1x160xf32>
    %109 = vector.broadcast %108 : vector<1x160xf32> to vector<5x160xf32>
    %110 = arith.addf %107, %109 : vector<5x160xf32>
    %111 = arith.negf %110 : vector<5x160xf32>
    %112 = math.exp %111 : vector<5x160xf32>
    %cst_82 = arith.constant 1.000000e+00 : f32
    %113 = vector.broadcast %cst_82 : f32 to vector<5x160xf32>
    %114 = arith.addf %113, %112 : vector<5x160xf32>
    %115 = arith.divf %113, %114 : vector<5x160xf32>
    %116 = arith.mulf %110, %115 : vector<5x160xf32>
    %c0_83 = arith.constant 0 : index
    %c0_84 = arith.constant 0 : index
    %117 = vector.load %arg16[%c0_83, %c0_84] : memref<2x5xf32, #tpu.memory_space<vmem>>, vector<2x5xf32>
    %cst_85 = arith.constant dense<0.000000e+00> : vector<2x160xf32>
    %118 = tpu.matmul %117, %116, %cst_85 {dimension_numbers = #tpu.dot_dimension_numbers<[1], [0], [0], [1], [0, 0, 1, 1], [], []>} : vector<2x5xf32>, vector<5x160xf32>, vector<2x160xf32> -> vector<2x160xf32>
    %c0_86 = arith.constant 0 : index
    %c0_87 = arith.constant 0 : index
    %119 = vector.load %arg17[%c0_86, %c0_87] : memref<2x5xf32, #tpu.memory_space<vmem>>, vector<2x5xf32>
    %cst_88 = arith.constant dense<0.000000e+00> : vector<2x160xf32>
    %120 = tpu.matmul %119, %116, %cst_88 {dimension_numbers = #tpu.dot_dimension_numbers<[1], [0], [0], [1], [0, 0, 1, 1], [], []>} : vector<2x5xf32>, vector<5x160xf32>, vector<2x160xf32> -> vector<2x160xf32>
    %121 = arith.maximumf %118, %120 : vector<2x160xf32>
    %c0_89 = arith.constant 0 : index
    %c0_90 = arith.constant 0 : index
    %122 = vector.load %arg18[%c0_89, %c0_90] : memref<160x64xf32, #tpu.memory_space<vmem>>, vector<160x64xf32>
    %cst_91 = arith.constant dense<0.000000e+00> : vector<2x64xf32>
    %123 = tpu.matmul %121, %122, %cst_91 {dimension_numbers = #tpu.dot_dimension_numbers<[1], [0], [0], [1], [0, 0, 1, 1], [], []>} : vector<2x160xf32>, vector<160x64xf32>, vector<2x64xf32> -> vector<2x64xf32>
    %c0_92 = arith.constant 0 : index
    %c0_93 = arith.constant 0 : index
    %124 = vector.load %arg19[%c0_92, %c0_93] : memref<160x64xf32, #tpu.memory_space<vmem>>, vector<160x64xf32>
    %cst_94 = arith.constant dense<0.000000e+00> : vector<2x64xf32>
    %125 = tpu.matmul %121, %124, %cst_94 {dimension_numbers = #tpu.dot_dimension_numbers<[1], [0], [0], [1], [0, 0, 1, 1], [], []>} : vector<2x160xf32>, vector<160x64xf32>, vector<2x64xf32> -> vector<2x64xf32>
    %126 = arith.maximumf %123, %125 : vector<2x64xf32>
    %127 = vector.extract_strided_slice %126 {offsets = [0, 0], sizes = [1, 64], strides = [1, 1]} : vector<2x64xf32> to vector<1x64xf32>
    %128 = vector.extract_strided_slice %126 {offsets = [1, 0], sizes = [1, 64], strides = [1, 1]} : vector<2x64xf32> to vector<1x64xf32>
    %c1_95 = arith.constant 1 : index
    %c0_96 = arith.constant 0 : index
    %c0_97 = arith.constant 0 : index
    %129 = vector.load %arg1[%c1_95, %c0_96, %c0_97] : memref<2x40x40xf32, #tpu.memory_space<vmem>>, vector<1x40x40xf32>
    %130 = vector.shape_cast %129 : vector<1x40x40xf32> to vector<40x40xf32>
    %131 = vector.extract_strided_slice %130 {offsets = [0, 0], sizes = [38, 40], strides = [1, 1]} : vector<40x40xf32> to vector<38x40xf32>
    %c0_98 = arith.constant 0 : index
    %c0_99 = arith.constant 0 : index
    %c0_100 = arith.constant 0 : index
    %132 = vector.load %arg2[%c0_98, %c0_99, %c0_100] : memref<3x40x304xf32, #tpu.memory_space<vmem>>, vector<1x40x304xf32>
    %133 = vector.shape_cast %132 : vector<1x40x304xf32> to vector<40x304xf32>
    %cst_101 = arith.constant dense<0.000000e+00> : vector<38x304xf32>
    %134 = tpu.matmul %131, %133, %cst_101 {dimension_numbers = #tpu.dot_dimension_numbers<[1], [0], [0], [1], [0, 0, 1, 1], [], []>} : vector<38x40xf32>, vector<40x304xf32>, vector<38x304xf32> -> vector<38x304xf32>
    %135 = vector.extract_strided_slice %130 {offsets = [1, 0], sizes = [38, 40], strides = [1, 1]} : vector<40x40xf32> to vector<38x40xf32>
    %c1_102 = arith.constant 1 : index
    %c0_103 = arith.constant 0 : index
    %c0_104 = arith.constant 0 : index
    %136 = vector.load %arg2[%c1_102, %c0_103, %c0_104] : memref<3x40x304xf32, #tpu.memory_space<vmem>>, vector<1x40x304xf32>
    %137 = vector.shape_cast %136 : vector<1x40x304xf32> to vector<40x304xf32>
    %cst_105 = arith.constant dense<0.000000e+00> : vector<38x304xf32>
    %138 = tpu.matmul %135, %137, %cst_105 {dimension_numbers = #tpu.dot_dimension_numbers<[1], [0], [0], [1], [0, 0, 1, 1], [], []>} : vector<38x40xf32>, vector<40x304xf32>, vector<38x304xf32> -> vector<38x304xf32>
    %139 = arith.addf %134, %138 : vector<38x304xf32>
    %140 = vector.extract_strided_slice %130 {offsets = [2, 0], sizes = [38, 40], strides = [1, 1]} : vector<40x40xf32> to vector<38x40xf32>
    %c2_106 = arith.constant 2 : index
    %c0_107 = arith.constant 0 : index
    %c0_108 = arith.constant 0 : index
    %141 = vector.load %arg2[%c2_106, %c0_107, %c0_108] : memref<3x40x304xf32, #tpu.memory_space<vmem>>, vector<1x40x304xf32>
    %142 = vector.shape_cast %141 : vector<1x40x304xf32> to vector<40x304xf32>
    %cst_109 = arith.constant dense<0.000000e+00> : vector<38x304xf32>
    %143 = tpu.matmul %140, %142, %cst_109 {dimension_numbers = #tpu.dot_dimension_numbers<[1], [0], [0], [1], [0, 0, 1, 1], [], []>} : vector<38x40xf32>, vector<40x304xf32>, vector<38x304xf32> -> vector<38x304xf32>
    %144 = arith.addf %139, %143 : vector<38x304xf32>
    %c0_110 = arith.constant 0 : index
    %c0_111 = arith.constant 0 : index
    %145 = vector.load %arg3[%c0_110, %c0_111] : memref<1x304xf32, #tpu.memory_space<vmem>>, vector<1x304xf32>
    %146 = vector.broadcast %145 : vector<1x304xf32> to vector<38x304xf32>
    %147 = arith.addf %144, %146 : vector<38x304xf32>
    %148 = arith.negf %147 : vector<38x304xf32>
    %149 = math.exp %148 : vector<38x304xf32>
    %cst_112 = arith.constant 1.000000e+00 : f32
    %150 = vector.broadcast %cst_112 : f32 to vector<38x304xf32>
    %151 = arith.addf %150, %149 : vector<38x304xf32>
    %152 = arith.divf %150, %151 : vector<38x304xf32>
    %153 = arith.mulf %147, %152 : vector<38x304xf32>
    %c0_113 = arith.constant 0 : index
    %c0_114 = arith.constant 0 : index
    %154 = vector.load %arg8[%c0_113, %c0_114] : memref<20x38xf32, #tpu.memory_space<vmem>>, vector<20x38xf32>
    %cst_115 = arith.constant dense<0.000000e+00> : vector<20x304xf32>
    %155 = tpu.matmul %154, %153, %cst_115 {dimension_numbers = #tpu.dot_dimension_numbers<[1], [0], [0], [1], [0, 0, 1, 1], [], []>} : vector<20x38xf32>, vector<38x304xf32>, vector<20x304xf32> -> vector<20x304xf32>
    %c0_116 = arith.constant 0 : index
    %c0_117 = arith.constant 0 : index
    %156 = vector.load %arg9[%c0_116, %c0_117] : memref<20x38xf32, #tpu.memory_space<vmem>>, vector<20x38xf32>
    %cst_118 = arith.constant dense<0.000000e+00> : vector<20x304xf32>
    %157 = tpu.matmul %156, %153, %cst_118 {dimension_numbers = #tpu.dot_dimension_numbers<[1], [0], [0], [1], [0, 0, 1, 1], [], []>} : vector<20x38xf32>, vector<38x304xf32>, vector<20x304xf32> -> vector<20x304xf32>
    %158 = arith.maximumf %155, %157 : vector<20x304xf32>
    %c0_119 = arith.constant 0 : index
    %c0_120 = arith.constant 0 : index
    %159 = vector.load %arg10[%c0_119, %c0_120] : memref<304x160xf32, #tpu.memory_space<vmem>>, vector<304x160xf32>
    %cst_121 = arith.constant dense<0.000000e+00> : vector<20x160xf32>
    %160 = tpu.matmul %158, %159, %cst_121 {dimension_numbers = #tpu.dot_dimension_numbers<[1], [0], [0], [1], [0, 0, 1, 1], [], []>} : vector<20x304xf32>, vector<304x160xf32>, vector<20x160xf32> -> vector<20x160xf32>
    %c0_122 = arith.constant 0 : index
    %c0_123 = arith.constant 0 : index
    %161 = vector.load %arg11[%c0_122, %c0_123] : memref<304x160xf32, #tpu.memory_space<vmem>>, vector<304x160xf32>
    %cst_124 = arith.constant dense<0.000000e+00> : vector<20x160xf32>
    %162 = tpu.matmul %158, %161, %cst_124 {dimension_numbers = #tpu.dot_dimension_numbers<[1], [0], [0], [1], [0, 0, 1, 1], [], []>} : vector<20x304xf32>, vector<304x160xf32>, vector<20x160xf32> -> vector<20x160xf32>
    %163 = arith.maximumf %160, %162 : vector<20x160xf32>
    %164 = vector.extract_strided_slice %163 {offsets = [0, 0], sizes = [16, 160], strides = [1, 1]} : vector<20x160xf32> to vector<16x160xf32>
    %c0_125 = arith.constant 0 : index
    %c0_126 = arith.constant 0 : index
    %c0_127 = arith.constant 0 : index
    %165 = vector.load %arg4[%c0_125, %c0_126, %c0_127] : memref<5x160x256xf32, #tpu.memory_space<vmem>>, vector<1x160x256xf32>
    %166 = vector.shape_cast %165 : vector<1x160x256xf32> to vector<160x256xf32>
    %cst_128 = arith.constant dense<0.000000e+00> : vector<16x256xf32>
    %167 = tpu.matmul %164, %166, %cst_128 {dimension_numbers = #tpu.dot_dimension_numbers<[1], [0], [0], [1], [0, 0, 1, 1], [], []>} : vector<16x160xf32>, vector<160x256xf32>, vector<16x256xf32> -> vector<16x256xf32>
    %168 = vector.extract_strided_slice %163 {offsets = [1, 0], sizes = [16, 160], strides = [1, 1]} : vector<20x160xf32> to vector<16x160xf32>
    %c1_129 = arith.constant 1 : index
    %c0_130 = arith.constant 0 : index
    %c0_131 = arith.constant 0 : index
    %169 = vector.load %arg4[%c1_129, %c0_130, %c0_131] : memref<5x160x256xf32, #tpu.memory_space<vmem>>, vector<1x160x256xf32>
    %170 = vector.shape_cast %169 : vector<1x160x256xf32> to vector<160x256xf32>
    %cst_132 = arith.constant dense<0.000000e+00> : vector<16x256xf32>
    %171 = tpu.matmul %168, %170, %cst_132 {dimension_numbers = #tpu.dot_dimension_numbers<[1], [0], [0], [1], [0, 0, 1, 1], [], []>} : vector<16x160xf32>, vector<160x256xf32>, vector<16x256xf32> -> vector<16x256xf32>
    %172 = arith.addf %167, %171 : vector<16x256xf32>
    %173 = vector.extract_strided_slice %163 {offsets = [2, 0], sizes = [16, 160], strides = [1, 1]} : vector<20x160xf32> to vector<16x160xf32>
    %c2_133 = arith.constant 2 : index
    %c0_134 = arith.constant 0 : index
    %c0_135 = arith.constant 0 : index
    %174 = vector.load %arg4[%c2_133, %c0_134, %c0_135] : memref<5x160x256xf32, #tpu.memory_space<vmem>>, vector<1x160x256xf32>
    %175 = vector.shape_cast %174 : vector<1x160x256xf32> to vector<160x256xf32>
    %cst_136 = arith.constant dense<0.000000e+00> : vector<16x256xf32>
    %176 = tpu.matmul %173, %175, %cst_136 {dimension_numbers = #tpu.dot_dimension_numbers<[1], [0], [0], [1], [0, 0, 1, 1], [], []>} : vector<16x160xf32>, vector<160x256xf32>, vector<16x256xf32> -> vector<16x256xf32>
    %177 = arith.addf %172, %176 : vector<16x256xf32>
    %178 = vector.extract_strided_slice %163 {offsets = [3, 0], sizes = [16, 160], strides = [1, 1]} : vector<20x160xf32> to vector<16x160xf32>
    %c3_137 = arith.constant 3 : index
    %c0_138 = arith.constant 0 : index
    %c0_139 = arith.constant 0 : index
    %179 = vector.load %arg4[%c3_137, %c0_138, %c0_139] : memref<5x160x256xf32, #tpu.memory_space<vmem>>, vector<1x160x256xf32>
    %180 = vector.shape_cast %179 : vector<1x160x256xf32> to vector<160x256xf32>
    %cst_140 = arith.constant dense<0.000000e+00> : vector<16x256xf32>
    %181 = tpu.matmul %178, %180, %cst_140 {dimension_numbers = #tpu.dot_dimension_numbers<[1], [0], [0], [1], [0, 0, 1, 1], [], []>} : vector<16x160xf32>, vector<160x256xf32>, vector<16x256xf32> -> vector<16x256xf32>
    %182 = arith.addf %177, %181 : vector<16x256xf32>
    %183 = vector.extract_strided_slice %163 {offsets = [4, 0], sizes = [16, 160], strides = [1, 1]} : vector<20x160xf32> to vector<16x160xf32>
    %c4_141 = arith.constant 4 : index
    %c0_142 = arith.constant 0 : index
    %c0_143 = arith.constant 0 : index
    %184 = vector.load %arg4[%c4_141, %c0_142, %c0_143] : memref<5x160x256xf32, #tpu.memory_space<vmem>>, vector<1x160x256xf32>
    %185 = vector.shape_cast %184 : vector<1x160x256xf32> to vector<160x256xf32>
    %cst_144 = arith.constant dense<0.000000e+00> : vector<16x256xf32>
    %186 = tpu.matmul %183, %185, %cst_144 {dimension_numbers = #tpu.dot_dimension_numbers<[1], [0], [0], [1], [0, 0, 1, 1], [], []>} : vector<16x160xf32>, vector<160x256xf32>, vector<16x256xf32> -> vector<16x256xf32>
    %187 = arith.addf %182, %186 : vector<16x256xf32>
    %c0_145 = arith.constant 0 : index
    %c0_146 = arith.constant 0 : index
    %188 = vector.load %arg5[%c0_145, %c0_146] : memref<1x256xf32, #tpu.memory_space<vmem>>, vector<1x256xf32>
    %189 = vector.broadcast %188 : vector<1x256xf32> to vector<16x256xf32>
    %190 = arith.addf %187, %189 : vector<16x256xf32>
    %191 = arith.negf %190 : vector<16x256xf32>
    %192 = math.exp %191 : vector<16x256xf32>
    %cst_147 = arith.constant 1.000000e+00 : f32
    %193 = vector.broadcast %cst_147 : f32 to vector<16x256xf32>
    %194 = arith.addf %193, %192 : vector<16x256xf32>
    %195 = arith.divf %193, %194 : vector<16x256xf32>
    %196 = arith.mulf %190, %195 : vector<16x256xf32>
    %c0_148 = arith.constant 0 : index
    %c0_149 = arith.constant 0 : index
    %197 = vector.load %arg12[%c0_148, %c0_149] : memref<9x16xf32, #tpu.memory_space<vmem>>, vector<9x16xf32>
    %cst_150 = arith.constant dense<0.000000e+00> : vector<9x256xf32>
    %198 = tpu.matmul %197, %196, %cst_150 {dimension_numbers = #tpu.dot_dimension_numbers<[1], [0], [0], [1], [0, 0, 1, 1], [], []>} : vector<9x16xf32>, vector<16x256xf32>, vector<9x256xf32> -> vector<9x256xf32>
    %c0_151 = arith.constant 0 : index
    %c0_152 = arith.constant 0 : index
    %199 = vector.load %arg13[%c0_151, %c0_152] : memref<9x16xf32, #tpu.memory_space<vmem>>, vector<9x16xf32>
    %cst_153 = arith.constant dense<0.000000e+00> : vector<9x256xf32>
    %200 = tpu.matmul %199, %196, %cst_153 {dimension_numbers = #tpu.dot_dimension_numbers<[1], [0], [0], [1], [0, 0, 1, 1], [], []>} : vector<9x16xf32>, vector<16x256xf32>, vector<9x256xf32> -> vector<9x256xf32>
    %201 = arith.maximumf %198, %200 : vector<9x256xf32>
    %c0_154 = arith.constant 0 : index
    %c0_155 = arith.constant 0 : index
    %202 = vector.load %arg14[%c0_154, %c0_155] : memref<256x144xf32, #tpu.memory_space<vmem>>, vector<256x144xf32>
    %cst_156 = arith.constant dense<0.000000e+00> : vector<9x144xf32>
    %203 = tpu.matmul %201, %202, %cst_156 {dimension_numbers = #tpu.dot_dimension_numbers<[1], [0], [0], [1], [0, 0, 1, 1], [], []>} : vector<9x256xf32>, vector<256x144xf32>, vector<9x144xf32> -> vector<9x144xf32>
    %c0_157 = arith.constant 0 : index
    %c0_158 = arith.constant 0 : index
    %204 = vector.load %arg15[%c0_157, %c0_158] : memref<256x144xf32, #tpu.memory_space<vmem>>, vector<256x144xf32>
    %cst_159 = arith.constant dense<0.000000e+00> : vector<9x144xf32>
    %205 = tpu.matmul %201, %204, %cst_159 {dimension_numbers = #tpu.dot_dimension_numbers<[1], [0], [0], [1], [0, 0, 1, 1], [], []>} : vector<9x256xf32>, vector<256x144xf32>, vector<9x144xf32> -> vector<9x144xf32>
    %206 = arith.maximumf %203, %205 : vector<9x144xf32>
    %207 = arith.negf %206 : vector<9x144xf32>
    %208 = math.exp %207 : vector<9x144xf32>
    %cst_160 = arith.constant 1.000000e+00 : f32
    %209 = vector.broadcast %cst_160 : f32 to vector<9x144xf32>
    %210 = arith.addf %209, %208 : vector<9x144xf32>
    %211 = arith.divf %209, %210 : vector<9x144xf32>
    %212 = arith.mulf %206, %211 : vector<9x144xf32>
    %213 = vector.extract_strided_slice %212 {offsets = [0, 0], sizes = [5, 144], strides = [1, 1]} : vector<9x144xf32> to vector<5x144xf32>
    %c0_161 = arith.constant 0 : index
    %c0_162 = arith.constant 0 : index
    %c0_163 = arith.constant 0 : index
    %214 = vector.load %arg6[%c0_161, %c0_162, %c0_163] : memref<5x144x160xf32, #tpu.memory_space<vmem>>, vector<1x144x160xf32>
    %215 = vector.shape_cast %214 : vector<1x144x160xf32> to vector<144x160xf32>
    %cst_164 = arith.constant dense<0.000000e+00> : vector<5x160xf32>
    %216 = tpu.matmul %213, %215, %cst_164 {dimension_numbers = #tpu.dot_dimension_numbers<[1], [0], [0], [1], [0, 0, 1, 1], [], []>} : vector<5x144xf32>, vector<144x160xf32>, vector<5x160xf32> -> vector<5x160xf32>
    %217 = vector.extract_strided_slice %212 {offsets = [1, 0], sizes = [5, 144], strides = [1, 1]} : vector<9x144xf32> to vector<5x144xf32>
    %c1_165 = arith.constant 1 : index
    %c0_166 = arith.constant 0 : index
    %c0_167 = arith.constant 0 : index
    %218 = vector.load %arg6[%c1_165, %c0_166, %c0_167] : memref<5x144x160xf32, #tpu.memory_space<vmem>>, vector<1x144x160xf32>
    %219 = vector.shape_cast %218 : vector<1x144x160xf32> to vector<144x160xf32>
    %cst_168 = arith.constant dense<0.000000e+00> : vector<5x160xf32>
    %220 = tpu.matmul %217, %219, %cst_168 {dimension_numbers = #tpu.dot_dimension_numbers<[1], [0], [0], [1], [0, 0, 1, 1], [], []>} : vector<5x144xf32>, vector<144x160xf32>, vector<5x160xf32> -> vector<5x160xf32>
    %221 = arith.addf %216, %220 : vector<5x160xf32>
    %222 = vector.extract_strided_slice %212 {offsets = [2, 0], sizes = [5, 144], strides = [1, 1]} : vector<9x144xf32> to vector<5x144xf32>
    %c2_169 = arith.constant 2 : index
    %c0_170 = arith.constant 0 : index
    %c0_171 = arith.constant 0 : index
    %223 = vector.load %arg6[%c2_169, %c0_170, %c0_171] : memref<5x144x160xf32, #tpu.memory_space<vmem>>, vector<1x144x160xf32>
    %224 = vector.shape_cast %223 : vector<1x144x160xf32> to vector<144x160xf32>
    %cst_172 = arith.constant dense<0.000000e+00> : vector<5x160xf32>
    %225 = tpu.matmul %222, %224, %cst_172 {dimension_numbers = #tpu.dot_dimension_numbers<[1], [0], [0], [1], [0, 0, 1, 1], [], []>} : vector<5x144xf32>, vector<144x160xf32>, vector<5x160xf32> -> vector<5x160xf32>
    %226 = arith.addf %221, %225 : vector<5x160xf32>
    %227 = vector.extract_strided_slice %212 {offsets = [3, 0], sizes = [5, 144], strides = [1, 1]} : vector<9x144xf32> to vector<5x144xf32>
    %c3_173 = arith.constant 3 : index
    %c0_174 = arith.constant 0 : index
    %c0_175 = arith.constant 0 : index
    %228 = vector.load %arg6[%c3_173, %c0_174, %c0_175] : memref<5x144x160xf32, #tpu.memory_space<vmem>>, vector<1x144x160xf32>
    %229 = vector.shape_cast %228 : vector<1x144x160xf32> to vector<144x160xf32>
    %cst_176 = arith.constant dense<0.000000e+00> : vector<5x160xf32>
    %230 = tpu.matmul %227, %229, %cst_176 {dimension_numbers = #tpu.dot_dimension_numbers<[1], [0], [0], [1], [0, 0, 1, 1], [], []>} : vector<5x144xf32>, vector<144x160xf32>, vector<5x160xf32> -> vector<5x160xf32>
    %231 = arith.addf %226, %230 : vector<5x160xf32>
    %232 = vector.extract_strided_slice %212 {offsets = [4, 0], sizes = [5, 144], strides = [1, 1]} : vector<9x144xf32> to vector<5x144xf32>
    %c4_177 = arith.constant 4 : index
    %c0_178 = arith.constant 0 : index
    %c0_179 = arith.constant 0 : index
    %233 = vector.load %arg6[%c4_177, %c0_178, %c0_179] : memref<5x144x160xf32, #tpu.memory_space<vmem>>, vector<1x144x160xf32>
    %234 = vector.shape_cast %233 : vector<1x144x160xf32> to vector<144x160xf32>
    %cst_180 = arith.constant dense<0.000000e+00> : vector<5x160xf32>
    %235 = tpu.matmul %232, %234, %cst_180 {dimension_numbers = #tpu.dot_dimension_numbers<[1], [0], [0], [1], [0, 0, 1, 1], [], []>} : vector<5x144xf32>, vector<144x160xf32>, vector<5x160xf32> -> vector<5x160xf32>
    %236 = arith.addf %231, %235 : vector<5x160xf32>
    %c0_181 = arith.constant 0 : index
    %c0_182 = arith.constant 0 : index
    %237 = vector.load %arg7[%c0_181, %c0_182] : memref<1x160xf32, #tpu.memory_space<vmem>>, vector<1x160xf32>
    %238 = vector.broadcast %237 : vector<1x160xf32> to vector<5x160xf32>
    %239 = arith.addf %236, %238 : vector<5x160xf32>
    %240 = arith.negf %239 : vector<5x160xf32>
    %241 = math.exp %240 : vector<5x160xf32>
    %cst_183 = arith.constant 1.000000e+00 : f32
    %242 = vector.broadcast %cst_183 : f32 to vector<5x160xf32>
    %243 = arith.addf %242, %241 : vector<5x160xf32>
    %244 = arith.divf %242, %243 : vector<5x160xf32>
    %245 = arith.mulf %239, %244 : vector<5x160xf32>
    %c0_184 = arith.constant 0 : index
    %c0_185 = arith.constant 0 : index
    %246 = vector.load %arg16[%c0_184, %c0_185] : memref<2x5xf32, #tpu.memory_space<vmem>>, vector<2x5xf32>
    %cst_186 = arith.constant dense<0.000000e+00> : vector<2x160xf32>
    %247 = tpu.matmul %246, %245, %cst_186 {dimension_numbers = #tpu.dot_dimension_numbers<[1], [0], [0], [1], [0, 0, 1, 1], [], []>} : vector<2x5xf32>, vector<5x160xf32>, vector<2x160xf32> -> vector<2x160xf32>
    %c0_187 = arith.constant 0 : index
    %c0_188 = arith.constant 0 : index
    %248 = vector.load %arg17[%c0_187, %c0_188] : memref<2x5xf32, #tpu.memory_space<vmem>>, vector<2x5xf32>
    %cst_189 = arith.constant dense<0.000000e+00> : vector<2x160xf32>
    %249 = tpu.matmul %248, %245, %cst_189 {dimension_numbers = #tpu.dot_dimension_numbers<[1], [0], [0], [1], [0, 0, 1, 1], [], []>} : vector<2x5xf32>, vector<5x160xf32>, vector<2x160xf32> -> vector<2x160xf32>
    %250 = arith.maximumf %247, %249 : vector<2x160xf32>
    %c0_190 = arith.constant 0 : index
    %c0_191 = arith.constant 0 : index
    %251 = vector.load %arg18[%c0_190, %c0_191] : memref<160x64xf32, #tpu.memory_space<vmem>>, vector<160x64xf32>
    %cst_192 = arith.constant dense<0.000000e+00> : vector<2x64xf32>
    %252 = tpu.matmul %250, %251, %cst_192 {dimension_numbers = #tpu.dot_dimension_numbers<[1], [0], [0], [1], [0, 0, 1, 1], [], []>} : vector<2x160xf32>, vector<160x64xf32>, vector<2x64xf32> -> vector<2x64xf32>
    %c0_193 = arith.constant 0 : index
    %c0_194 = arith.constant 0 : index
    %253 = vector.load %arg19[%c0_193, %c0_194] : memref<160x64xf32, #tpu.memory_space<vmem>>, vector<160x64xf32>
    %cst_195 = arith.constant dense<0.000000e+00> : vector<2x64xf32>
    %254 = tpu.matmul %250, %253, %cst_195 {dimension_numbers = #tpu.dot_dimension_numbers<[1], [0], [0], [1], [0, 0, 1, 1], [], []>} : vector<2x160xf32>, vector<160x64xf32>, vector<2x64xf32> -> vector<2x64xf32>
    %255 = arith.maximumf %252, %254 : vector<2x64xf32>
    %256 = vector.extract_strided_slice %255 {offsets = [0, 0], sizes = [1, 64], strides = [1, 1]} : vector<2x64xf32> to vector<1x64xf32>
    %257 = vector.extract_strided_slice %255 {offsets = [1, 0], sizes = [1, 64], strides = [1, 1]} : vector<2x64xf32> to vector<1x64xf32>
    %258 = tpu.concatenate %127, %256 in 0 : vector<1x64xf32>, vector<1x64xf32> -> vector<2x64xf32>
    %259 = tpu.concatenate %128, %257 in 0 : vector<1x64xf32>, vector<1x64xf32> -> vector<2x64xf32>
    %c0_196 = arith.constant 0 : index
    %c0_197 = arith.constant 0 : index
    %260 = vector.load %arg20[%c0_196, %c0_197] : memref<64x128xf32, #tpu.memory_space<vmem>>, vector<64x128xf32>
    %cst_198 = arith.constant dense<0.000000e+00> : vector<2x128xf32>
    %261 = tpu.matmul %258, %260, %cst_198 {dimension_numbers = #tpu.dot_dimension_numbers<[1], [0], [0], [1], [0, 0, 1, 1], [], []>} : vector<2x64xf32>, vector<64x128xf32>, vector<2x128xf32> -> vector<2x128xf32>
    %c0_199 = arith.constant 0 : index
    %c0_200 = arith.constant 0 : index
    %262 = vector.load %arg21[%c0_199, %c0_200] : memref<64x128xf32, #tpu.memory_space<vmem>>, vector<64x128xf32>
    %cst_201 = arith.constant dense<0.000000e+00> : vector<2x128xf32>
    %263 = tpu.matmul %259, %262, %cst_201 {dimension_numbers = #tpu.dot_dimension_numbers<[1], [0], [0], [1], [0, 0, 1, 1], [], []>} : vector<2x64xf32>, vector<64x128xf32>, vector<2x128xf32> -> vector<2x128xf32>
    %264 = arith.addf %261, %263 : vector<2x128xf32>
    %c0_202 = arith.constant 0 : index
    %c0_203 = arith.constant 0 : index
    %265 = vector.load %arg22[%c0_202, %c0_203] : memref<1x128xf32, #tpu.memory_space<vmem>>, vector<1x128xf32>
    %266 = vector.broadcast %265 : vector<1x128xf32> to vector<2x128xf32>
    %267 = arith.addf %264, %266 : vector<2x128xf32>
    %268 = arith.negf %267 : vector<2x128xf32>
    %269 = math.exp %268 : vector<2x128xf32>
    %cst_204 = arith.constant 1.000000e+00 : f32
    %270 = vector.broadcast %cst_204 : f32 to vector<2x128xf32>
    %271 = arith.addf %270, %269 : vector<2x128xf32>
    %272 = arith.divf %270, %271 : vector<2x128xf32>
    %273 = arith.mulf %267, %272 : vector<2x128xf32>
    %c0_205 = arith.constant 0 : index
    %c0_206 = arith.constant 0 : index
    %274 = vector.load %arg23[%c0_205, %c0_206] : memref<128x128xf32, #tpu.memory_space<vmem>>, vector<128x128xf32>
    %cst_207 = arith.constant dense<0.000000e+00> : vector<2x128xf32>
    %275 = tpu.matmul %273, %274, %cst_207 {dimension_numbers = #tpu.dot_dimension_numbers<[1], [0], [0], [1], [0, 0, 1, 1], [], []>} : vector<2x128xf32>, vector<128x128xf32>, vector<2x128xf32> -> vector<2x128xf32>
    %c0_208 = arith.constant 0 : index
    %c0_209 = arith.constant 0 : index
    %276 = vector.load %arg24[%c0_208, %c0_209] : memref<1x128xf32, #tpu.memory_space<vmem>>, vector<1x128xf32>
    %277 = vector.broadcast %276 : vector<1x128xf32> to vector<2x128xf32>
    %278 = arith.addf %275, %277 : vector<2x128xf32>
    %279 = arith.negf %278 : vector<2x128xf32>
    %280 = math.exp %279 : vector<2x128xf32>
    %cst_210 = arith.constant 1.000000e+00 : f32
    %281 = vector.broadcast %cst_210 : f32 to vector<2x128xf32>
    %282 = arith.addf %281, %280 : vector<2x128xf32>
    %283 = arith.divf %281, %282 : vector<2x128xf32>
    %284 = arith.mulf %278, %283 : vector<2x128xf32>
    %c0_211 = arith.constant 0 : index
    %c0_212 = arith.constant 0 : index
    %285 = vector.load %arg25[%c0_211, %c0_212] : memref<128x3xf32, #tpu.memory_space<vmem>>, vector<128x3xf32>
    %cst_213 = arith.constant dense<0.000000e+00> : vector<2x3xf32>
    %286 = tpu.matmul %284, %285, %cst_213 {dimension_numbers = #tpu.dot_dimension_numbers<[1], [0], [0], [1], [0, 0, 1, 1], [], []>} : vector<2x128xf32>, vector<128x3xf32>, vector<2x3xf32> -> vector<2x3xf32>
    %c0_214 = arith.constant 0 : index
    %c0_215 = arith.constant 0 : index
    %287 = vector.load %arg26[%c0_214, %c0_215] : memref<1x3xf32, #tpu.memory_space<vmem>>, vector<1x3xf32>
    %288 = vector.broadcast %287 : vector<1x3xf32> to vector<2x3xf32>
    %289 = arith.addf %286, %288 : vector<2x3xf32>
    %290 = vector.extract_strided_slice %289 {offsets = [0, 0], sizes = [1, 3], strides = [1, 1]} : vector<2x3xf32> to vector<1x3xf32>
    %c0_216 = arith.constant 0 : index
    %c0_217 = arith.constant 0 : index
    %c0_218 = arith.constant 0 : index
    %291 = vector.load %arg27[%c0_216, %c0_217, %c0_218] : memref<2x1x3xf32, #tpu.memory_space<vmem>>, vector<1x1x3xf32>
    %292 = vector.shape_cast %291 : vector<1x1x3xf32> to vector<1x3xf32>
    %293 = vector.shape_cast %290 : vector<1x3xf32> to vector<1x1x3xf32>
    tpu.vector_store %arg27[%c0_216, %c0_217, %c0_218], %293 {strides = array<i32>} : memref<2x1x3xf32, #tpu.memory_space<vmem>>, vector<1x1x3xf32>,
    %294 = vector.extract_strided_slice %289 {offsets = [1, 0], sizes = [1, 3], strides = [1, 1]} : vector<2x3xf32> to vector<1x3xf32>
    %c1_219 = arith.constant 1 : index
    %c0_220 = arith.constant 0 : index
    %c0_221 = arith.constant 0 : index
    %295 = vector.load %arg27[%c1_219, %c0_220, %c0_221] : memref<2x1x3xf32, #tpu.memory_space<vmem>>, vector<1x1x3xf32>
    %296 = vector.shape_cast %295 : vector<1x1x3xf32> to vector<1x3xf32>
    %297 = vector.shape_cast %294 : vector<1x3xf32> to vector<1x1x3xf32>
    tpu.vector_store %arg27[%c1_219, %c0_220, %c0_221], %297 {strides = array<i32>} : memref<2x1x3xf32, #tpu.memory_space<vmem>>, vector<1x1x3xf32>,
    return
  }
  func.func @transform_0(%arg0: i32) -> (i32, i32, i32) {
    %c0_i32 = arith.constant 0 : i32
    %c0_i32_0 = arith.constant 0 : i32
    %c0_i32_1 = arith.constant 0 : i32
    return %arg0, %c0_i32, %c0_i32_0 : i32, i32, i32
  }
  func.func @transform_1(%arg0: i32) -> (i32, i32, i32) {
    %c0_i32 = arith.constant 0 : i32
    %c0_i32_0 = arith.constant 0 : i32
    %c0_i32_1 = arith.constant 0 : i32
    %c0_i32_2 = arith.constant 0 : i32
    return %c0_i32, %c0_i32_0, %c0_i32_1 : i32, i32, i32
  }
  func.func @transform_2(%arg0: i32) -> (i32, i32) {
    %c0_i32 = arith.constant 0 : i32
    %c0_i32_0 = arith.constant 0 : i32
    %c0_i32_1 = arith.constant 0 : i32
    return %c0_i32, %c0_i32_0 : i32, i32
  }
  func.func @transform_3(%arg0: i32) -> (i32, i32, i32) {
    %c0_i32 = arith.constant 0 : i32
    %c0_i32_0 = arith.constant 0 : i32
    %c0_i32_1 = arith.constant 0 : i32
    %c0_i32_2 = arith.constant 0 : i32
    return %c0_i32, %c0_i32_0, %c0_i32_1 : i32, i32, i32
  }
  func.func @transform_4(%arg0: i32) -> (i32, i32) {
    %c0_i32 = arith.constant 0 : i32
    %c0_i32_0 = arith.constant 0 : i32
    %c0_i32_1 = arith.constant 0 : i32
    return %c0_i32, %c0_i32_0 : i32, i32
  }
  func.func @transform_5(%arg0: i32) -> (i32, i32, i32) {
    %c0_i32 = arith.constant 0 : i32
    %c0_i32_0 = arith.constant 0 : i32
    %c0_i32_1 = arith.constant 0 : i32
    %c0_i32_2 = arith.constant 0 : i32
    return %c0_i32, %c0_i32_0, %c0_i32_1 : i32, i32, i32
  }
  func.func @transform_6(%arg0: i32) -> (i32, i32) {
    %c0_i32 = arith.constant 0 : i32
    %c0_i32_0 = arith.constant 0 : i32
    %c0_i32_1 = arith.constant 0 : i32
    return %c0_i32, %c0_i32_0 : i32, i32
  }
  func.func @transform_7(%arg0: i32) -> (i32, i32) {
    %c0_i32 = arith.constant 0 : i32
    %c0_i32_0 = arith.constant 0 : i32
    %c0_i32_1 = arith.constant 0 : i32
    return %c0_i32, %c0_i32_0 : i32, i32
  }
  func.func @transform_8(%arg0: i32) -> (i32, i32) {
    %c0_i32 = arith.constant 0 : i32
    %c0_i32_0 = arith.constant 0 : i32
    %c0_i32_1 = arith.constant 0 : i32
    return %c0_i32, %c0_i32_0 : i32, i32
  }
  func.func @transform_9(%arg0: i32) -> (i32, i32) {
    %c0_i32 = arith.constant 0 : i32
    %c0_i32_0 = arith.constant 0 : i32
    %c0_i32_1 = arith.constant 0 : i32
    return %c0_i32, %c0_i32_0 : i32, i32
  }
  func.func @transform_10(%arg0: i32) -> (i32, i32) {
    %c0_i32 = arith.constant 0 : i32
    %c0_i32_0 = arith.constant 0 : i32
    %c0_i32_1 = arith.constant 0 : i32
    return %c0_i32, %c0_i32_0 : i32, i32
  }
  func.func @transform_11(%arg0: i32) -> (i32, i32) {
    %c0_i32 = arith.constant 0 : i32
    %c0_i32_0 = arith.constant 0 : i32
    %c0_i32_1 = arith.constant 0 : i32
    return %c0_i32, %c0_i32_0 : i32, i32
  }
  func.func @transform_12(%arg0: i32) -> (i32, i32) {
    %c0_i32 = arith.constant 0 : i32
    %c0_i32_0 = arith.constant 0 : i32
    %c0_i32_1 = arith.constant 0 : i32
    return %c0_i32, %c0_i32_0 : i32, i32
  }
  func.func @transform_13(%arg0: i32) -> (i32, i32) {
    %c0_i32 = arith.constant 0 : i32
    %c0_i32_0 = arith.constant 0 : i32
    %c0_i32_1 = arith.constant 0 : i32
    return %c0_i32, %c0_i32_0 : i32, i32
  }
  func.func @transform_14(%arg0: i32) -> (i32, i32) {
    %c0_i32 = arith.constant 0 : i32
    %c0_i32_0 = arith.constant 0 : i32
    %c0_i32_1 = arith.constant 0 : i32
    return %c0_i32, %c0_i32_0 : i32, i32
  }
  func.func @transform_15(%arg0: i32) -> (i32, i32) {
    %c0_i32 = arith.constant 0 : i32
    %c0_i32_0 = arith.constant 0 : i32
    %c0_i32_1 = arith.constant 0 : i32
    return %c0_i32, %c0_i32_0 : i32, i32
  }
  func.func @transform_16(%arg0: i32) -> (i32, i32) {
    %c0_i32 = arith.constant 0 : i32
    %c0_i32_0 = arith.constant 0 : i32
    %c0_i32_1 = arith.constant 0 : i32
    return %c0_i32, %c0_i32_0 : i32, i32
  }
  func.func @transform_17(%arg0: i32) -> (i32, i32) {
    %c0_i32 = arith.constant 0 : i32
    %c0_i32_0 = arith.constant 0 : i32
    %c0_i32_1 = arith.constant 0 : i32
    return %c0_i32, %c0_i32_0 : i32, i32
  }
  func.func @transform_18(%arg0: i32) -> (i32, i32) {
    %c0_i32 = arith.constant 0 : i32
    %c0_i32_0 = arith.constant 0 : i32
    %c0_i32_1 = arith.constant 0 : i32
    return %c0_i32, %c0_i32_0 : i32, i32
  }
  func.func @transform_19(%arg0: i32) -> (i32, i32) {
    %c0_i32 = arith.constant 0 : i32
    %c0_i32_0 = arith.constant 0 : i32
    %c0_i32_1 = arith.constant 0 : i32
    return %c0_i32, %c0_i32_0 : i32, i32
  }
  func.func @transform_20(%arg0: i32) -> (i32, i32) {
    %c0_i32 = arith.constant 0 : i32
    %c0_i32_0 = arith.constant 0 : i32
    %c0_i32_1 = arith.constant 0 : i32
    return %c0_i32, %c0_i32_0 : i32, i32
  }
  func.func @transform_21(%arg0: i32) -> (i32, i32) {
    %c0_i32 = arith.constant 0 : i32
    %c0_i32_0 = arith.constant 0 : i32
    %c0_i32_1 = arith.constant 0 : i32
    return %c0_i32, %c0_i32_0 : i32, i32
  }
  func.func @transform_22(%arg0: i32) -> (i32, i32) {
    %c0_i32 = arith.constant 0 : i32
    %c0_i32_0 = arith.constant 0 : i32
    %c0_i32_1 = arith.constant 0 : i32
    return %c0_i32, %c0_i32_0 : i32, i32
  }
  func.func @transform_23(%arg0: i32) -> (i32, i32) {
    %c0_i32 = arith.constant 0 : i32
    %c0_i32_0 = arith.constant 0 : i32
    %c0_i32_1 = arith.constant 0 : i32
    return %c0_i32, %c0_i32_0 : i32, i32
  }
  func.func @transform_24(%arg0: i32) -> (i32, i32) {
    %c0_i32 = arith.constant 0 : i32
    %c0_i32_0 = arith.constant 0 : i32
    %c0_i32_1 = arith.constant 0 : i32
    return %c0_i32, %c0_i32_0 : i32, i32
  }
  func.func @transform_25(%arg0: i32) -> (i32, i32) {
    %c0_i32 = arith.constant 0 : i32
    %c0_i32_0 = arith.constant 0 : i32
    %c0_i32_1 = arith.constant 0 : i32
    return %c0_i32, %c0_i32_0 : i32, i32
  }
  func.func @transform_26(%arg0: i32) -> (i32, i32, i32) {
    %c0_i32 = arith.constant 0 : i32
    %c0_i32_0 = arith.constant 0 : i32
    %c0_i32_1 = arith.constant 0 : i32
    return %arg0, %c0_i32, %c0_i32_0 : i32, i32, i32
  }
}

</mosaic_0001>

<bundles_post_ra>
// kernel: nn_forward_pallas.1
= control target key start
LH: loop header
LB: loop body
LE: loop exit
PB: predicated region body
PF: predicated region fallthrough
CT: control target
= control target key end

     0   :  { %s14330_s0 = inlined_call_operand.vmem [shape: f32[2,40,40], index: 0, kind: input, shape index: {}]   ;;  %s14331_s1 = inlined_call_operand.vmem [shape: f32[3,40,304], index: 1, kind: input, shape index: {}]   ;;  %s14332_s2 = inlined_call_operand.vmem [shape: f32[1,304], index: 2, kind: input, shape index: {}]   ;;  %s14333_s3 = inlined_call_operand.vmem [shape: f32[5,160,256], index: 3, kind: input, shape index: {}]   ;;  %s14334_s4 = inlined_call_operand.vmem [shape: f32[1,256], index: 4, kind: input, shape index: {}]   ;;  %s14335_s5 = inlined_call_operand.hbm [shape: f32[5,144,160], index: 5, kind: input, shape index: {}]   ;;  %s14336_s6 = inlined_call_operand.vmem [shape: f32[1,160], index: 6, kind: input, shape index: {}]   ;;  %s14337_s7 = inlined_call_operand.vmem [shape: f32[20,38], index: 7, kind: input, shape index: {}]   ;;  %s14338_s8 = inlined_call_operand.vmem [shape: f32[20,38], index: 8, kind: input, shape index: {}]   ;;  %s14339_s9 = inlined_call_operand.vmem [shape: f32[304,160], index: 9, kind: input, shape index: {}]   ;;  %s14340_s10 = inlined_call_operand.vmem [shape: f32[304,160], index: 10, kind: input, shape index: {}]   ;;  %s14341_s11 = inlined_call_operand.vmem [shape: f32[9,16], index: 11, kind: input, shape index: {}]   ;;  %s14342_s12 = inlined_call_operand.vmem [shape: f32[9,16], index: 12, kind: input, shape index: {}]   ;;  %s14343_s13 = inlined_call_operand.vmem [shape: f32[256,144], index: 13, kind: input, shape index: {}]   ;;  %s14344_s14 = inlined_call_operand.vmem [shape: f32[256,144], index: 14, kind: input, shape index: {}]   ;;  %s14345_s15 = inlined_call_operand.vmem [shape: f32[2,5], index: 15, kind: input, shape index: {}]   ;;  %s14346_s16 = inlined_call_operand.vmem [shape: f32[2,5], index: 16, kind: input, shape index: {}]   ;;  %s14347_s17 = inlined_call_operand.vmem [shape: f32[160,64], index: 17, kind: input, shape index: {}]   ;;  %s14348_s18 = inlined_call_operand.vmem [shape: f32[160,64], index: 18, kind: input, shape index: {}]   ;;  %s14349_s19 = inlined_call_operand.vmem [shape: f32[64,128], index: 19, kind: input, shape index: {}]   ;;  %s14350_s20 = inlined_call_operand.vmem [shape: f32[64,128], index: 20, kind: input, shape index: {}]   ;;  %s14351_s21 = inlined_call_operand.vmem [shape: f32[1,128], index: 21, kind: input, shape index: {}]   ;;  %s14352_s22 = inlined_call_operand.vmem [shape: f32[128,128], index: 22, kind: input, shape index: {}]   ;;  %s14353_s23 = inlined_call_operand.vmem [shape: f32[1,128], index: 23, kind: input, shape index: {}]   ;;  %s14354_s24 = inlined_call_operand.vmem [shape: f32[128,3], index: 24, kind: input, shape index: {}]   ;;  %s14355_s25 = inlined_call_operand.vmem [shape: f32[1,3], index: 25, kind: input, shape index: {}]   ;;  %s14356_s26 = inlined_call_operand.hbm [shape: f32[2,1,3], index: 26, kind: output, shape index: {}]  }
   0x1   :  { %14390 = sst [smem:[#allocation20_spill]] %s14330_s0 }
   0x2   :  { %14391 = sst [smem:[#allocation21_spill]] %s14331_s1 }
   0x3   :  { %14392 = sst [smem:[#allocation22_spill]] %s14332_s2 }
   0x4   :  { %14393 = sst [smem:[#allocation23_spill]] %s14333_s3 }
   0x5   :  { %14394 = sst [smem:[#allocation24_spill]] %s14334_s4 }
   0x6   :  { %14395 = sst [smem:[#allocation25_spill]] %s14335_s5 }
   0x7   :  { %14396 = sst [smem:[#allocation26_spill]] %s14336_s6 }
   0x8   :  { %14397 = sst [smem:[#allocation27_spill]] %s14337_s7 }
   0x9   :  { %14398 = sst [smem:[#allocation28_spill]] %s14338_s8 }
   0xa   :  { %14399 = sst [smem:[#allocation29_spill]] %s14339_s9 }
   0xb   :  { %14400 = sst [smem:[#allocation30_spill]] %s14340_s10 }
   0xc   :  { %14401 = sst [smem:[#allocation31_spill]] %s14355_s25 }
   0xd   :  { %14402 = sst [smem:[#allocation32_spill]] %s14356_s26 }
   0xe   :  { %31 = vsyncpa [#allocation3], 0 }
   0xf   :  { %32 = vsyncpa [#allocation4], 0  ;;  %s14403_s7 = sld [smem:[#allocation25_spill]]  ;;  %s8339_s8 = smov [#allocation2]  }
  0x10   :  { %s49_s4 = sshll.u32 %s8339_s8, 4  ;;  %s8340_s29 = smov 256   ;;  %s50_s4 = int_to_ptr.vmem [resolvable:$true] %s49_s4 }
  0x11   :  { %s14369_s0 = smov 16  }
  0x15   :  { %s47_s28 = sshll.u32 %s14403_s7, 4  ;;  %s48_s28 = int_to_ptr.hbm [resolvable:$true] %s47_s28 }
  0x16   :  { %55 = dma.hbm_to_vmem [thread:$0]  %s48_s28, 23040, %s50_s4, [#allocation3], %s8340_s29, %s8340_s29, %s14369_s0  }
  0x17   :  { %8335 = dma.done.wait [#allocation3], 23040  }
  0x18   :  { %8336 = vsyncadd [#allocation3], 4294944256  ;;  %s14404_s2 = sld [smem:[#allocation21_spill]]  ;;  %vm14365_vm0 = vcmask 1046528   ;;  %vm14364_vm1 = vcmask 326656   ;;  %vm14366_vm2 = vcmask 1045504  }
  0x19   :  { %s14405_s4 = sld [smem:[#allocation20_spill]]  ;;  %s8342_s9 = smov [#allocation5]  }
  0x1a   :  { %s14406_s1 = sld [smem:[#allocation22_spill]]  ;;  %s6782_s25 = sshll.u32 %s8342_s9, 4  ;;  %s6783_s25 = int_to_ptr.vmem [resolvable:$true] %s6782_s25 }
  0x1b   :  { %s14451_s7 = sld [smem:[#allocation27_spill]]  ;;  %s14727_s30 = smov 16  }
  0x1c   :  { %s14454_s10 = sld [smem:[#allocation28_spill]] }
  0x1d   :  { %s14463_s29 = sld [smem:[#allocation29_spill]] }
  0x1e   :  { %v6809_v0 = vld [vmem:[%s14404_s2 + $0xd8] sm:$0xff]  ;;  %v6811_v1 = vld [vmem:[%s14404_s2 + $0xe8] sm:$0xff]  ;;  %v6806_v2 = vld [vmem:[%s14404_s2 + $0xc0] sm:$0xff]  ;;  %s14464_s26 = sld [smem:[#allocation30_spill]] }
  0x1f   :  { %173 = vmatpush.msra.mxu0 %v6809_v0  ;;  %237 = vmatpush.msra.mxu2 %v6811_v1  ;;  %v6808_v3 = vld [vmem:[%s14404_s2 + $0xd0] sm:$0xff]  ;;  %v117_v4 = vld [vmem:[%s14404_s2 + $0x60] sm:$0xff]  ;;  %v6803_v5 = vld [vmem:[%s14404_s2 + $0xa8] sm:$0xff]  ;;  %s14465_s27 = sld [smem:[#allocation23_spill]] }
  0x20   :  { %7309 = vmatpush.msra.mxu3 %v117_v4  ;;  %v6805_v6 = vld [vmem:[%s14404_s2 + $0xb8] sm:$0xff]  ;;  %v114_v7 = vld [vmem:[%s14404_s2 + $0x48] sm:$0xff]  ;;  %v111_v8 = vld [vmem:[%s14404_s2 + $0x30] sm:$0xff]  ;;  %s14474_s0 = sld [smem:[#allocation24_spill]] }
  0x21   :  { %174 = vmatpush.msra.mxu0 %v6806_v2  ;;  %238 = vmatpush.msra.mxu2 %v6808_v3  ;;  %v6800_v9 = vld [vmem:[%s14404_s2 + $0x90] sm:$0xff]  ;;  %v6802_v10 = vld [vmem:[%s14404_s2 + $0xa0] sm:$0xff]  ;;  %v108_v12 = vld [vmem:[%s14404_s2 + $0x18] sm:$0xff]  ;;  %s14485_s5 = sld [smem:[#allocation26_spill]] }
  0x22   :  { %7310 = vmatpush.msra.mxu3 %v114_v7  ;;  %v8519_v11 = vld [vmem:[%s14405_s4] sm:$0xff]  ;;  %v8527_v13 = vld [vmem:[%s14405_s4 + $0x8] sm:$0xff]  ;;  %v6797_v16 = vld [vmem:[%s14404_s2 + $0x78] sm:$0xff]  ;;  %s14726_s28 = sld [smem:[#allocation32_spill]] }
  0x23   :  { %175 = vmatpush.msra.mxu0 %v6803_v5  ;;  %239 = vmatpush.msra.mxu2 %v6805_v6  ;;  %v142_v14 = vrot.slane %v8519_v11, 1  ;;  %v6810_v15 = vld [vmem:[%s14404_s2 + $0xe0] sm:$0xff]  ;;  %v6799_v17 = vld [vmem:[%s14404_s2 + $0x88] sm:$0xff]  ;;  %v143_v18 = vrot.slane %v8527_v13, 1  ;;  %v8549_v21 = vld [vmem:[%s14405_s4 + $0x10] sm:$0xff]  ;;  %v381_v54 = vrot.slane %v8519_v11, 2 }
  0x24   :  { %7311 = vmatpush.msra.mxu3 %v111_v8  ;;  %7304 = vmatpush.msra.mxu1 %v6810_v15  ;;  %v6807_v19 = vld [vmem:[%s14404_s2 + $0xc8] sm:$0xff]  ;;  %v105_v20 = vld [vmem:[%s14404_s2] sm:$0xff]  ;;  %v6804_v23 = vld [vmem:[%s14404_s2 + $0xb0] sm:$0xff]  ;;  %v145_v25 = vrot.slane %v8549_v21, 1  ;;  %v382_v55 = vrot.slane %v8527_v13, 2  ;;  %v384_v57 = vrot.slane %v8549_v21, 2 }
  0x25   :  { %176 = vmatpush.msra.mxu0 %v6800_v9  ;;  %240 = vmatpush.msra.mxu2 %v6802_v10  ;;  %v8552_v22 = vsel %vm14365_vm0, %v142_v14, %v143_v18  ;;  %v6801_v24 = vld [vmem:[%s14404_s2 + $0x98] sm:$0xff]  ;;  %v6798_v27 = vld [vmem:[%s14404_s2 + $0x80] sm:$0xff]  ;;  %v119_v31 = vld [vmem:[%s14404_s2 + $0x70] sm:$0xff] }
  0x26   :  { %7312 = vmatpush.msra.mxu3 %v108_v12  ;;  %7305 = vmatpush.msra.mxu1 %v6807_v19  ;;  %v6855_v26 = vld [vmem:[%s14404_s2 + $0x158] sm:$0xff]  ;;  %v6852_v28 = vld [vmem:[%s14404_s2 + $0x140] sm:$0xff]  ;;  %v146_v29 = vsel %vm14365_vm0, %v143_v18, %v145_v25  ;;  %v118_v33 = vld [vmem:[%s14404_s2 + $0x68] sm:$0xff]  ;;  %v383_v56 = vsel %vm14366_vm2, %v381_v54, %v382_v55  ;;  %v385_v58 = vsel %vm14366_vm2, %v382_v55, %v384_v57 }
  0x27   :  { %177 = vmatpush.msra.mxu0 %v6797_v16  ;;  %241 = vmatpush.msra.mxu2 %v6799_v17  ;;  %v8580_v30 = vld [vmem:[%s14405_s4 + $0x18] sm:$0xff]  ;;  %v6854_v34 = vld [vmem:[%s14404_s2 + $0x150] sm:$0xff]  ;;  %v6849_v35 = vld [vmem:[%s14404_s2 + $0x128] sm:$0xff] }
  0x28   :  { %6812 = vmatmul.msk.f32.vlgmr.msra.gmra.mxu0 %vm14364_vm1, %v8552_v22  ;;  %6822 = vmatmul.msk.f32.vlgmr.msra.gmra.mxu2 %vm14364_vm1, %v8552_v22  ;;  %v147_v32 = vrot.slane %v8580_v30, 1  ;;  %v116_v36 = vld [vmem:[%s14404_s2 + $0x58] sm:$0xff]  ;;  %v115_v37 = vld [vmem:[%s14404_s2 + $0x50] sm:$0xff]  ;;  %v8616_v41 = vld [vmem:[%s14405_s4 + $0x20] sm:$0xff]  ;;  %v386_v60 = vrot.slane %v8580_v30, 2  ;;  %s6784_s8 = sshll.u32 %s14726_s28, 4  ;;  %s6785_s8 = int_to_ptr.hbm [resolvable:$true] %s6784_s8 }
  0x29   :  { %7313 = vmatpush.msra.mxu3 %v105_v20  ;;  %7306 = vmatpush.msra.mxu1 %v6804_v23  ;;  %v6851_v38 = vld [vmem:[%s14404_s2 + $0x138] sm:$0xff]  ;;  %v6846_v39 = vld [vmem:[%s14404_s2 + $0x110] sm:$0xff]  ;;  %v113_v43 = vld [vmem:[%s14404_s2 + $0x40] sm:$0xff]  ;;  %v149_v47 = vrot.slane %v8616_v41, 1  ;;  %v388_v1 = vrot.slane %v8616_v41, 2 }
  0x2a   :  { %6828 = vmatmul.msk.f32.vlgmr.msra.gmra.mxu3 %vm14364_vm1, %v8527_v13  ;;  %205 = vmatpush.msrb.mxu0 %v6810_v15  ;;  %v148_v40 = vsel %vm14365_vm0, %v145_v25, %v147_v32  ;;  %v112_v42 = vld [vmem:[%s14404_s2 + $0x38] sm:$0xff]  ;;  %v6848_v44 = vld [vmem:[%s14404_s2 + $0x120] sm:$0xff]  ;;  %v110_v48 = vld [vmem:[%s14404_s2 + $0x28] sm:$0xff]  ;;  %v387_v61 = vsel %vm14366_vm2, %v384_v57, %v386_v60 }
  0x2b   :  { %7307 = vmatpush.msra.mxu1 %v6801_v24  ;;  %279 = vmatpush.msrb.mxu2 %v117_v4  ;;  %v6843_v45 = vld [vmem:[%s14404_s2 + $0xf8] sm:$0xff]  ;;  %v109_v46 = vld [vmem:[%s14404_s2 + $0x20] sm:$0xff]  ;;  %v6845_v49 = vld [vmem:[%s14404_s2 + $0x108] sm:$0xff]  ;;  %v150_v53 = vsel %vm14365_vm0, %v147_v32, %v149_v47  ;;  %v389_v3 = vsel %vm14366_vm2, %v386_v60, %v388_v1 }
  0x2c   :  { %206 = vmatpush.msrb.mxu0 %v6807_v19  ;;  %443 = vmatpush.msrb.mxu3 %v6855_v26  ;;  %v106_v50 = vld [vmem:[%s14404_s2 + $0x8] sm:$0xff]  ;;  %v6842_v51 = vld [vmem:[%s14404_s2 + $0xf0] sm:$0xff]  ;;  %v6856_v59 = vld [vmem:[%s14404_s2 + $0x160] sm:$0xff] }
  0x2d   :  { %7308 = vmatpush.msra.mxu1 %v6798_v27  ;;  %280 = vmatpush.msrb.mxu2 %v114_v7  ;;  %v107_v52 = vld [vmem:[%s14404_s2 + $0x10] sm:$0xff]  ;;  %v6853_v62 = vld [vmem:[%s14404_s2 + $0x148] sm:$0xff]  ;;  %v6847_v0 = vld [vmem:[%s14404_s2 + $0x118] sm:$0xff] }
  0x2e   :  { %6818 = vmatmul.msk.f32.vlgmr.msra.gmra.mxu1 %vm14364_vm1, %v146_v29  ;;  %207 = vmatpush.msrb.mxu0 %v6804_v23  ;;  %v6850_v63 = vld [vmem:[%s14404_s2 + $0x130] sm:$0xff]  ;;  %v6844_v2 = vld [vmem:[%s14404_s2 + $0x100] sm:$0xff] }
  0x2f   :  { %281 = vmatpush.msrb.mxu2 %v111_v8  ;;  %444 = vmatpush.msrb.mxu3 %v6852_v28  ;;  %v8751_v26 = vld [vmem:[%s14406_s1] sm:$0x7] }
  0x30   :  { %6813 = vmatmul.msk.f32.gmra.mxu0 %vm14364_vm1, %v146_v29  ;;  %6823 = vmatmul.msk.f32.gmra.mxu2 %vm14364_vm1, %v146_v29  ;;  %v8754_v29 = vperm.slane %v8751_v26, 1 }
  0x31   :  { %208 = vmatpush.msrb.mxu0 %v6801_v24  ;;  %282 = vmatpush.msrb.mxu2 %v108_v12 }
  0x32   :  { %6829 = vmatmul.msk.f32.gmra.mxu3 %vm14364_vm1, %v8549_v21  ;;  %343 = vmatpush.msrb.mxu1 %v119_v31  ;;  %14407 = vst [vmem:[#allocation8_spill] sm:$0xff] %v8754_v29 }
  0x33   :  { %209 = vmatpush.msrb.mxu0 %v6798_v27  ;;  %283 = vmatpush.msrb.mxu2 %v105_v20 }
  0x34   :  { %445 = vmatpush.msrb.mxu3 %v6849_v35  ;;  %344 = vmatpush.msrb.mxu1 %v116_v36 }
  0x35   :  { %311 = vmatpush.msra.mxu0 %v118_v33  ;;  %411 = vmatpush.msra.mxu2 %v6854_v34 }
  0x36   :  { %6819 = vmatmul.msk.f32.gmra.mxu1 %vm14364_vm1, %v148_v40  ;;  %446 = vmatpush.msrb.mxu3 %v6846_v39 }
  0x37   :  { %312 = vmatpush.msra.mxu0 %v115_v37  ;;  %412 = vmatpush.msra.mxu2 %v6851_v38  ;;  %v8763_v38 = vperm.slane %v8751_v26, 0 }
  0x38   :  { %6814 = vmatmul.msk.f32.gmra.mxu0 %vm14364_vm1, %v148_v40  ;;  %6824 = vmatmul.msk.f32.gmra.mxu2 %vm14364_vm1, %v148_v40 }
  0x39   :  { %313 = vmatpush.msra.mxu0 %v112_v42  ;;  %345 = vmatpush.msrb.mxu1 %v113_v43 }
  0x3a   :  { %6830 = vmatmul.msk.f32.gmra.mxu3 %vm14364_vm1, %v8580_v30  ;;  %413 = vmatpush.msra.mxu2 %v6848_v44 }
  0x3b   :  { %447 = vmatpush.msrb.mxu3 %v6843_v45  ;;  %314 = vmatpush.msra.mxu0 %v109_v46 }
  0x3c   :  { %346 = vmatpush.msrb.mxu1 %v110_v48  ;;  %414 = vmatpush.msra.mxu2 %v6845_v49 }
  0x3d   :  { %315 = vmatpush.msra.mxu0 %v106_v50 }
  0x3e   :  { %6820 = vmatmul.msk.f32.gmra.mxu1 %vm14364_vm1, %v150_v53  ;;  %415 = vmatpush.msra.mxu2 %v6842_v51 }
  0x3f   :  { %347 = vmatpush.msrb.mxu1 %v107_v52 }
  0x40   :  { %6815 = vmatmul.msk.f32.gmra.mxu0 %vm14364_vm1, %v150_v53  ;;  %6825 = vmatmul.msk.f32.gmra.mxu2 %vm14364_vm1, %v150_v53 }
  0x42   :  { %6831 = vmatmul.msk.f32.gmra.mxu3 %vm14364_vm1, %v8616_v41 }
  0x46   :  { %6821 = vmatmul.msk.f32.gmra.mxu1 %vm14364_vm1, %v149_v47 }
  0x48   :  { %6816 = vmatmul.msk.f32.gmra.mxu0 %vm14364_vm1, %v149_v47  ;;  %6826 = vmatmul.msk.f32.gmra.mxu2 %vm14364_vm1, %v149_v47 }
  0x4a   :  { %6862 = vmatmul.msk.f32.vlgmr.msrb.gmra.mxu3 %vm14364_vm1, %v383_v56 }
  0x4e   :  { %6837 = vmatmul.msk.f32.vlgmr.msrb.gmra.mxu1 %vm14364_vm1, %v8519_v11 }
  0x50   :  { %6817 = vmatmul.msk.f32.vlgmr.msrb.gmra.mxu0 %vm14364_vm1, %v8552_v22  ;;  %6827 = vmatmul.msk.f32.vlgmr.msrb.gmra.mxu2 %vm14364_vm1, %v8519_v11 }
  0x51   :  { %475 = vmatpush.msrb.mxu0 %v6856_v59 }
  0x52   :  { %6863 = vmatmul.msk.f32.gmra.mxu3 %vm14364_vm1, %v385_v58 }
  0x53   :  { %476 = vmatpush.msrb.mxu0 %v6853_v62 }
  0x55   :  { %477 = vmatpush.msrb.mxu0 %v6850_v63 }
  0x56   :  { %6838 = vmatmul.msk.f32.gmra.mxu1 %vm14364_vm1, %v8527_v13 }
  0x57   :  { %478 = vmatpush.msrb.mxu0 %v6847_v0 }
  0x58   :  { %6832 = vmatmul.msk.f32.vlgmr.msra.gmra.mxu0 %vm14364_vm1, %v8519_v11  ;;  %6857 = vmatmul.msk.f32.vlgmr.msra.gmra.mxu2 %vm14364_vm1, %v383_v56 }
  0x59   :  { %479 = vmatpush.msrb.mxu0 %v6844_v2 }
  0x5a   :  { %6864 = vmatmul.msk.f32.gmra.mxu3 %vm14364_vm1, %v387_v61 }
  0x5e   :  { %6839 = vmatmul.msk.f32.gmra.mxu1 %vm14364_vm1, %v8549_v21 }
  0x60   :  { %6833 = vmatmul.msk.f32.gmra.mxu0 %vm14364_vm1, %v8527_v13  ;;  %6858 = vmatmul.msk.f32.gmra.mxu2 %vm14364_vm1, %v385_v58 }
  0x62   :  { %6865 = vmatmul.msk.f32.gmra.mxu3 %vm14364_vm1, %v389_v3 }
  0x66   :  { %6840 = vmatmul.msk.f32.gmra.mxu1 %vm14364_vm1, %v8580_v30 }
  0x68   :  { %6834 = vmatmul.msk.f32.gmra.mxu0 %vm14364_vm1, %v8549_v21  ;;  %6859 = vmatmul.msk.f32.gmra.mxu2 %vm14364_vm1, %v387_v61 }
  0x6a   :  { %6866 = vmatmul.msk.f32.gmra.mxu3 %vm14364_vm1, %v388_v1 }
  0x6e   :  { %6841 = vmatmul.msk.f32.gmra.mxu1 %vm14364_vm1, %v8616_v41 }
  0x70   :  { %6835 = vmatmul.msk.f32.gmra.mxu0 %vm14364_vm1, %v8580_v30  ;;  %6860 = vmatmul.msk.f32.gmra.mxu2 %vm14364_vm1, %v389_v3 }
  0x78   :  { %6836 = vmatmul.msk.f32.gmra.mxu0 %vm14364_vm1, %v8616_v41  ;;  %6861 = vmatmul.msk.f32.gmra.mxu2 %vm14364_vm1, %v388_v1 }
  0x80   :  { %6867 = vmatmul.msk.f32.vlgmr.msrb.gmra.mxu0 %vm14364_vm1, %v383_v56 }
  0x88   :  { %6868 = vmatmul.msk.f32.gmra.mxu0 %vm14364_vm1, %v385_v58 }
  0x90   :  { %6869 = vmatmul.msk.f32.gmra.mxu0 %vm14364_vm1, %v387_v61 }
  0x98   :  { %6870 = vmatmul.msk.f32.gmra.mxu0 %vm14364_vm1, %v389_v3 }
  0xa0   :  { %6871 = vmatmul.msk.f32.gmra.mxu0 %vm14364_vm1, %v388_v1 }
  0xa5   :  { %v179_v4 = vpop.f32.mrf.mxu0 }
  0xab   :  { %v8726_v5 = vpop.f32.mrf.mxu2  ;;  %v214_v6 = vpop.f32.mrf.mxu1 }
  0xad   :  { %v182_v7 = vpop.f32.mrf.mxu0  ;;  %v288_v8 = vpop.f32.mrf.mxu3 }
  0xae   :  { %v289_v44 = vadd.f32 %v288_v8, %v182_v7 }
  0xb3   :  { %v8728_v9 = vpop.f32.mrf.mxu2  ;;  %v217_v10 = vpop.f32.mrf.mxu1 }
  0xb5   :  { %v185_v11 = vpop.f32.mrf.mxu0  ;;  %v291_v12 = vpop.f32.mrf.mxu3 }
  0xb6   :  { %v292_v57 = vadd.f32 %v291_v12, %v185_v11 }
  0xbb   :  { %v8730_v13 = vpop.f32.mrf.mxu2  ;;  %v220_v14 = vpop.f32.mrf.mxu1 }
  0xbd   :  { %v8732_v15 = vpop.f32.mrf.mxu0  ;;  %v8734_v16 = vpop.f32.mrf.mxu3 }
  0xbe   :  { %v295_v12 = vadd.f32 %v8734_v16, %v8732_v15 }
  0xc3   :  { %v8736_v17 = vpop.f32.mrf.mxu2  ;;  %v8742_v20 = vpop.f32.mrf.mxu1 }
  0xc5   :  { %v8738_v18 = vpop.f32.mrf.mxu0  ;;  %v8740_v19 = vpop.f32.mrf.mxu3 }
  0xcb   :  { %v8744_v21 = vpop.f32.mrf.mxu2  ;;  %v8746_v24 = vpop.f32.mrf.mxu1 }
  0xcd   :  { %v211_v22 = vpop.f32.mrf.mxu0  ;;  %v449_v23 = vpop.f32.mrf.mxu3 }
  0xd3   :  { %v285_v25 = vpop.f32.mrf.mxu2  ;;  %v8759_v34 = vpop.f32.mrf.mxu1 }
  0xd4   :  { %v286_v32 = vadd.f32 %v285_v25, %v179_v4 }
  0xd5   :  { %v317_v27 = vpop.f32.mrf.mxu0  ;;  %v452_v30 = vpop.f32.mrf.mxu3 }
  0xd6   :  { %v318_v28 = vadd.f32 %v317_v27, %v211_v22 }
  0xd8   :  { %v497_v31 = vadd.f32 %v449_v23, %v318_v28 }
  0xda   :  { %v8757_v33 = vadd.f32 %v8754_v29, %v497_v31 }
  0xdb   :  { %v417_v35 = vpop.f32.mrf.mxu2  ;;  %v355_v50 = vpop.f32.mrf.mxu1 }
  0xdc   :  { %v6873_v36 = vmul.f32 -1.442695, %v8757_v33  ;;  %v496_v37 = vadd.f32 %v417_v35, %v286_v32 }
  0xdd   :  { %v320_v39 = vpop.f32.mrf.mxu0  ;;  %v455_v43 = vpop.f32.mrf.mxu3 }
  0xde   :  { %v321_v40 = vadd.f32 %v320_v39, %v214_v6  ;;  %7322 = vpow2.f32 %v6873_v36  ;;  %v8766_v41 = vadd.f32 %v8763_v38, %v496_v37  ;;  %v298_v39 = vadd.f32 %v8740_v19, %v8738_v18 }
  0xdf   :  { %v8828_v19 = vadd.f32 %v355_v50, %v8730_v13 }
  0xe0   :  { %v500_v42 = vadd.f32 %v452_v30, %v321_v40  ;;  %v6872_v47 = vmul.f32 -1.442695, %v8766_v41 }
  0xe2   :  { %v8769_v45 = vadd.f32 %v8754_v29, %v500_v42  ;;  %v350_v42 = vadd.f32 %v8746_v24, %v8726_v5 }
  0xe3   :  { %v420_v46 = vpop.f32.mrf.mxu2  ;;  %v358_v7 = vpop.f32.mrf.mxu1 }
  0xe4   :  { %v6876_v48 = vmul.f32 -1.442695, %v8769_v45  ;;  %v499_v49 = vadd.f32 %v420_v46, %v289_v44  ;;  %v7323_v52 = vpop.eup %7322  ;;  %v8834_v5 = vadd.f32 %v358_v7, %v8736_v17 }
  0xe5   :  { %v323_v51 = vpop.f32.mrf.mxu0  ;;  %v8776_v56 = vadd.f32 1.0, %v7323_v52  ;;  %v458_v60 = vpop.f32.mrf.mxu3 }
  0xe6   :  { %7324 = vpow2.f32 %v6876_v48  ;;  %v324_v53 = vadd.f32 %v323_v51, %v217_v10  ;;  %v8774_v54 = vadd.f32 %v8763_v38, %v499_v49  ;;  %v8823_v48 = vadd.f32 %v8759_v34, %v8728_v9 }
  0xe7   :  { %7326 = vpow2.f32 %v6872_v47  ;;  %v620_v40 = vand.u32 2147483648, %v8776_v56  ;;  %v8831_v49 = vperm.slane %v8751_v26, 2  ;;  %vm614_vm3 = vweird.f32 %v8776_v56 }
  0xe8   :  { %v503_v55 = vadd.f32 %v455_v43, %v324_v53  ;;  %v6875_v62 = vmul.f32 -1.442695, %v8774_v54  ;;  %7328 = vrcp.f32 %v8776_v56 }
  0xe9   :  { %v8845_v50 = vor.u32 1.1754944e-38, %v620_v40 }
  0xea   :  { %v8779_v58 = vadd.f32 %v8754_v29, %v503_v55 }
  0xeb   :  { %v423_v59 = vpop.f32.mrf.mxu2  ;;  %v361_v44 = vpop.f32.mrf.mxu1 }
  0xec   :  { %v7325_v61 = vpop.eup %7324  ;;  %v6879_v63 = vmul.f32 -1.442695, %v8779_v58  ;;  %v502_v0 = vadd.f32 %v423_v59, %v292_v57  ;;  %v8842_v9 = vadd.f32 %v361_v44, %v8744_v21 }
  0xed   :  { %v8784_v1 = vadd.f32 1.0, %v7325_v61  ;;  %v326_v2 = vpop.f32.mrf.mxu0  ;;  %v7327_v3 = vpop.eup %7326 }
  0xee   :  { %7330 = vpow2.f32 %v6879_v63  ;;  %v8787_v4 = vadd.f32 %v8763_v38, %v502_v0  ;;  %v327_v6 = vadd.f32 %v326_v2, %v220_v14  ;;  %v8791_v11 = vadd.f32 1.0, %v7327_v3  ;;  %v8798_v23 = vpop.eup %7328  ;;  %v461_v35 = vpop.f32.mrf.mxu3 }
  0xef   :  { %7332 = vrcp.f32 %v8784_v1  ;;  %v610_v37 = vmul.f32 %v8798_v23, %v8776_v56  ;;  %v665_v2 = vand.u32 2147483648, %v8784_v1  ;;  %vm659_vm4 = vweird.f32 %v8784_v1 }
  0xf0   :  { %7334 = vpow2.f32 %v6875_v62  ;;  %v6878_v8 = vmul.f32 -1.442695, %v8787_v4  ;;  %v506_v10 = vadd.f32 %v458_v60, %v327_v6  ;;  %v663_v62 = vand.u32 2147483647, %v8784_v1 }
  0xf1   :  { %v611_v51 = vsub.f32 1.0, %v610_v37  ;;  %vm615_vm5 = vweird.f32 %v8798_v23 }
  0xf2   :  { %v8796_v22 = vadd.f32 %v8754_v29, %v506_v10  ;;  %7336 = vpow2.f32 %v6878_v8  ;;  %vm8880_vm6 = vcmp.eq.f32.partialorder %v663_v62, 8.507059e+37  ;;  %vm8911_vm9 = vmor %vm614_vm3, %vm615_vm5 }
  0xf3   :  { %v426_v25 = vpop.f32.mrf.mxu2  ;;  %7338 = vrcp.f32 %v8791_v11  ;;  %v612_v3 = vmul.f32 %v8798_v23, %v611_v51 }
  0xf4   :  { %v7331_v14 = vpop.eup %7330  ;;  %v6882_v27 = vmul.f32 -1.442695, %v8796_v22  ;;  %v505_v28 = vadd.f32 %v426_v25, %v295_v12 }
  0xf5   :  { %v8801_v30 = vpop.eup %7332  ;;  %v8804_v31 = vadd.f32 1.0, %v7331_v14  ;;  %v329_v32 = vpop.f32.mrf.mxu0 }
  0xf6   :  { %v7335_v15 = vpop.eup %7334  ;;  %7340 = vpow2.f32 %v6882_v27  ;;  %v8807_v16 = vadd.f32 %v8763_v38, %v505_v28  ;;  %v330_v36 = vadd.f32 %v329_v32, %v8742_v20  ;;  %v655_v20 = vmul.f32 %v8801_v30, %v8784_v1 }
  0xf7   :  { %7342 = vrcp.f32 %v8804_v31  ;;  %v8825_v18 = vadd.f32 1.0, %v7335_v15  ;;  %v710_v28 = vand.u32 2147483648, %v8804_v31  ;;  %v8885_v15 = vadd.f32 %v8798_v23, %v612_v3 }
  0xf8   :  { %v6881_v43 = vmul.f32 -1.442695, %v8807_v16  ;;  %v509_v46 = vadd.f32 %v461_v35, %v330_v36  ;;  %v7337_v47 = vpop.eup %7336  ;;  %v656_v59 = vsub.f32 1.0, %v655_v20  ;;  %v666_v35 = vor.u32 1.1754944e-38, %v665_v2 }
  0xf9   :  { %v8839_v52 = vpop.eup %7338  ;;  %v8848_v17 = vadd.f32 1.0, %v7337_v47  ;;  %v650_v7 = vand.u32 2147483648, %v8825_v18  ;;  %vm660_vm7 = vweird.f32 %v8801_v30  ;;  %vm704_vm8 = vweird.f32 %v8804_v31 }
  0xfa   :  { %7344 = vpow2.f32 %v6881_v43  ;;  %v8837_v24 = vadd.f32 %v8754_v29, %v509_v46  ;;  %v8870_v8 = vmul.f32 %v8839_v52, %v8791_v11  ;;  %v657_v14 = vmul.f32 %v8801_v30, %v656_v59  ;;  %vm8932_vm10 = vmor %vm659_vm4, %vm660_vm7 }
  0xfb   :  { %v429_v34 = vpop.f32.mrf.mxu2  ;;  %7346 = vrcp.f32 %v8825_v18  ;;  %v8897_v46 = vor.u32 1.1754944e-38, %v650_v7  ;;  %vm689_vm5 = vweird.f32 %v8848_v17 }
  0xfc   :  { %v7341_v53 = vpop.eup %7340  ;;  %v6885_v55 = vmul.f32 -1.442695, %v8837_v24  ;;  %v508_v57 = vadd.f32 %v429_v34, %v298_v39  ;;  %v658_v44 = vadd.f32 %v8801_v30, %v657_v14  ;;  %v708_v34 = vand.u32 2147483647, %v8804_v31 }
  0xfd   :  { %v8852_v60 = vpop.eup %7342  ;;  %v8855_v21 = vadd.f32 1.0, %v7341_v53  ;;  %v481_v61 = vpop.f32.mrf.mxu0  ;;  %v8905_v53 = vor.u32 1.1754944e-38, %v710_v28 }
  0xfe   :  { %7348 = vpow2.f32 %v6885_v55  ;;  %v8860_v0 = vadd.f32 %v8763_v38, %v508_v57  ;;  %v700_v6 = vmul.f32 %v8852_v60, %v8804_v31  ;;  %v498_v25 = vadd.f32 %v481_v61, %v350_v42  ;;  %v9211_v31 = vld [vmem:[%s14451_s7 + $0x10] sm:$0xf] }
  0xff   :  { %7350 = vrcp.f32 %v8855_v21  ;;  %v755_v3 = vand.u32 2147483648, %v8855_v21  ;;  %v753_v28 = vand.u32 2147483647, %v8855_v21  ;;  %vm749_vm11 = vweird.f32 %v8855_v21 }
 0x100   :  { %v7345_v10 = vpop.eup %7344  ;;  %7352 = vrcp.f32 %v8848_v17  ;;  %v6884_v12 = vmul.f32 -1.442695, %v8860_v0  ;;  %v701_v37 = vsub.f32 1.0, %v700_v6  ;;  %v8893_v43 = vadd.f32 %v8831_v49, %v498_v25 }
 0x101   :  { %v8875_v27 = vadd.f32 1.0, %v7345_v10  ;;  %v8887_v36 = vpop.eup %7346  ;;  %vm705_vm12 = vweird.f32 %v8852_v60  ;;  %vm8967_vm13 = vcmp.eq.f32.partialorder %v753_v28, 8.507059e+37 }
 0x102   :  { %7354 = vpow2.f32 %v6884_v12  ;;  %v702_v6 = vmul.f32 %v8852_v60, %v701_v37  ;;  %v8938_v10 = vmul.f32 %v8887_v36, %v8825_v18  ;;  %v6874_v25 = vmul.f32 -1.442695, %v8893_v43  ;;  %vm8987_vm3 = vmor %vm704_vm8, %vm705_vm12 }
 0x103   :  { %7356 = vrcp.f32 %v8875_v27  ;;  %v662_v37 = vsel %vm8932_vm10, %v8801_v30, %v658_v44  ;;  %v740_v26 = vand.u32 2147483648, %v8875_v27  ;;  %v756_v44 = vor.u32 1.1754944e-38, %v755_v3 }
 0x104   :  { %v7349_v42 = vpop.eup %7348  ;;  %vm734_vm14 = vweird.f32 %v8875_v27  ;;  %vm9006_vm8 = vcmp.eq.f32.partialorder %v708_v34, 8.507059e+37 }
 0x105   :  { %v8899_v20 = vpop.eup %7350  ;;  %v8901_v47 = vadd.f32 1.0, %v7349_v42  ;;  %v484_v51 = vpop.f32.mrf.mxu0  ;;  %v8977_v32 = vor.u32 1.1754944e-38, %v740_v26 }
 0x106   :  { %v8915_v57 = vpop.eup %7352  ;;  %v745_v59 = vmul.f32 %v8899_v20, %v8855_v21  ;;  %v501_v63 = vadd.f32 %v484_v51, %v8823_v48  ;;  %v8964_v48 = vsel %vm8880_vm6, %v666_v35, %v662_v37  ;;  %vm750_vm15 = vweird.f32 %v8899_v20 }
 0x107   :  { %7358 = vrcp.f32 %v8901_v47  ;;  %v685_v2 = vmul.f32 %v8915_v57, %v8848_v17  ;;  %v798_v51 = vand.u32 2147483647, %v8901_v47  ;;  %v800_v3 = vand.u32 2147483648, %v8901_v47  ;;  %vm9016_vm12 = vmor %vm749_vm11, %vm750_vm15 }
 0x108   :  { %v7355_v12 = vpop.eup %7354  ;;  %v746_v14 = vsub.f32 1.0, %v745_v59  ;;  %v8960_v59 = vadd.f32 %v8852_v60, %v702_v6  ;;  %v8974_v6 = vadd.f32 %v8831_v49, %v501_v63  ;;  %vm794_vm4 = vweird.f32 %v8901_v47 }
 0x109   :  { %v8945_v42 = vpop.eup %7356  ;;  %v8947_v1 = vadd.f32 1.0, %v7355_v12  ;;  %v686_v35 = vsub.f32 1.0, %v685_v2  ;;  %vm690_vm6 = vweird.f32 %v8915_v57  ;;  %vm8999_vm7 = vcmp.eq.f32.partialorder %v798_v51, 8.507059e+37 }
 0x10a   :  { %v747_v62 = vmul.f32 %v8899_v20, %v746_v14  ;;  %v730_v30 = vmul.f32 %v8945_v42, %v8875_v27  ;;  %v738_v14 = vand.u32 2147483647, %v8875_v27  ;;  %v707_v26 = vsel %vm8987_vm3, %v8852_v60, %v8960_v59 }
 0x10b   :  { %7360 = vrcp.f32 %v8947_v1  ;;  %v641_v60 = vsub.f32 1.0, %v8938_v10  ;;  %v801_v59 = vor.u32 1.1754944e-38, %v800_v3  ;;  %v687_v34 = vmul.f32 %v8915_v57, %v686_v35 }
 0x10c   :  { %7362 = vpow2.f32 %v6874_v25  ;;  %v731_v12 = vsub.f32 1.0, %v730_v30  ;;  %v748_v37 = vadd.f32 %v8899_v20, %v747_v62  ;;  %vm9026_vm3 = vcmp.eq.f32.partialorder %v738_v14, 8.507059e+37 }
 0x10d   :  { %v7359_v61 = vpop.eup %7358  ;;  %v487_v40 = vpop.f32.mrf.mxu0  ;;  %vm779_vm1 = vweird.f32 %v8947_v1  ;;  %v783_v21 = vand.u32 2147483647, %v8947_v1  ;;  %vm735_vm0 = vweird.f32 %v8945_v42  ;;  %v14426_v14 = vand.u32 2147483647, %v8776_v56 }
 0x10e   :  { %v790_v25 = vmul.f32 %v7359_v61, %v8901_v47  ;;  %v504_v28 = vadd.f32 %v487_v40, %v8828_v19  ;;  %v732_v19 = vmul.f32 %v8945_v42, %v731_v12  ;;  %vm795_vm10 = vweird.f32 %v7359_v61  ;;  %vm9056_vm15 = vmor %vm734_vm14, %vm735_vm0  ;;  %v9190_v47 = vld [vmem:[%s14451_s7 + $0x8] sm:$0xff] }
 0x10f   :  { %v6877_v12 = vmul.f32 -1.442695, %v8974_v6  ;;  %v752_v3 = vsel %vm9016_vm12, %v8899_v20, %v748_v37  ;;  %v785_v20 = vand.u32 2147483648, %v8947_v1  ;;  %vm9039_vm12 = vcmp.eq.f32.partialorder %v14426_v14, 8.507059e+37  ;;  %vm796_vm11 = vmor %vm794_vm4, %vm795_vm10 }
 0x110   :  { %v791_v40 = vsub.f32 1.0, %v790_v25  ;;  %v9004_v62 = vadd.f32 %v8831_v49, %v504_v28  ;;  %v733_v35 = vadd.f32 %v8945_v42, %v732_v19  ;;  %v642_v51 = vmul.f32 %v8887_v36, %v641_v60  ;;  %vm9083_vm0 = vmor %vm689_vm5, %vm690_vm6 }
 0x111   :  { %v7361_v30 = vpop.eup %7360  ;;  %7364 = vpow2.f32 %v6877_v12  ;;  %v688_v56 = vadd.f32 %v8915_v57, %v687_v34  ;;  %v14431_v60 = vand.u32 2147483647, %v8825_v18  ;;  %v14434_v27 = vsub.f32 1.0, %v8870_v8 }
 0x112   :  { %v7363_v25 = vpop.eup %7362  ;;  %v792_v28 = vmul.f32 %v7359_v61, %v791_v40  ;;  %v775_v63 = vmul.f32 %v7361_v30, %v8947_v1  ;;  %v6880_v10 = vmul.f32 -1.442695, %v9004_v62  ;;  %vm780_vm2 = vweird.f32 %v7361_v30 }
 0x113   :  { %vm9062_vm4 = vcmp.eq.f32.partialorder %v14431_v60, 8.507059e+37  ;;  %vm781_vm14 = vmor %vm779_vm1, %vm780_vm2  ;;  %vm14437_vm5 = vcmask 1045504   ;;  %v14438_v2 = vand.u32 2147483647, %v8848_v17  ;;  %vm14440_vm2 = vweird.f32 %v8825_v18 }
 0x114   :  { %v793_v40 = vadd.f32 %v7359_v61, %v792_v28  ;;  %v776_v13 = vsub.f32 1.0, %v775_v63  ;;  %v757_v28 = vsel %vm8967_vm13, %v756_v44, %v752_v3  ;;  %7366 = vpow2.f32 %v6880_v10 }
 0x115   :  { %v490_v19 = vpop.f32.mrf.mxu0  ;;  %vm645_vm13 = vweird.f32 %v8887_v36  ;;  %v829_v8 = vmul.f32 %v757_v28, %v8796_v22  ;;  %v692_v3 = vsel %vm9083_vm0, %v8915_v57, %v688_v56  ;;  %vm694_vm1 = vcmp.eq.f32.partialorder %v14438_v2, 8.507059e+37  ;;  %v9166_v28 = vld [vmem:[%s14451_s7] sm:$0xff] }
 0x116   :  { %v797_v63 = vsel %vm796_vm11, %v7359_v61, %v793_v40  ;;  %v777_v14 = vmul.f32 %v7361_v30, %v776_v13  ;;  %v507_v29 = vadd.f32 %v490_v19, %v8834_v5  ;;  %v737_v5 = vsel %vm9056_vm15, %v8945_v42, %v733_v35  ;;  %vm9112_vm6 = vmor %vm14440_vm2, %vm645_vm13 }
 0x117   :  { %v802_v13 = vsel %vm8999_vm7, %v801_v59, %v797_v63  ;;  %v597_v61 = vmul.f32 %v8839_v52, %v14434_v27  ;;  %v643_v42 = vadd.f32 %v8887_v36, %v642_v51  ;;  %vm784_vm7 = vcmp.eq.f32.partialorder %v783_v21, 8.507059e+37  ;;  %v7365_v35 = vpop.eup %7364  ;;  %vm14448_vm11 = vmmov %vm14437_vm5 }
 0x118   :  { %v832_v44 = vmul.f32 %v802_v13, %v8837_v24  ;;  %v778_v12 = vadd.f32 %v7361_v30, %v777_v14  ;;  %v9077_v34 = vadd.f32 %v8831_v49, %v507_v29  ;;  %v786_v24 = vor.u32 1.1754944e-38, %v785_v20 }
 0x119   :  { %v712_v29 = vsel %vm9006_vm8, %v8905_v53, %v707_v26  ;;  %v598_v1 = vadd.f32 %v8839_v52, %v597_v61  ;;  %v742_v22 = vsel %vm9026_vm3, %v8977_v32, %v737_v5  ;;  %v14439_v53 = vand.u32 2147483648, %v8848_v17 }
 0x11a   :  { %v782_v59 = vsel %vm781_vm14, %v7361_v30, %v778_v12  ;;  %v6883_v10 = vmul.f32 -1.442695, %v9077_v34  ;;  %6891 = vmatpush.msk.msrb.mxu2 %vm14437_vm5, %v832_v44  ;;  %v7367_v30 = vpop.eup %7366  ;;  %v826_v39 = vmul.f32 %v712_v29, %v8779_v58  ;;  %v647_v17 = vsel %vm9112_vm6, %v8887_v36, %v643_v42  ;;  %v1044_v36 = vld [vmem:[%s14463_s29 + $0x58] sm:$0xff] }
 0x11b   :  { %v787_v21 = vsel %vm784_vm7, %v786_v24, %v782_v59  ;;  %v696_v26 = vor.u32 1.1754944e-38, %v14439_v53  ;;  %v9121_v32 = vadd.f32 1.0, %v7363_v25  ;;  %v823_v18 = vmul.f32 %v8964_v48, %v8769_v45 }
 0x11c   :  { %v831_v40 = vmul.f32 %v787_v21, %v8860_v0  ;;  %7368 = vpow2.f32 %v6883_v10  ;;  %894 = vmatpush.msrb.mxu2 %v829_v8  ;;  %v14443_v0 = vsel %vm8911_vm9, %v8798_v23, %v8885_v15  ;;  %vm14444_vm8 = vweird.f32 %v8839_v52 }
 0x11d   :  { %v493_v20 = vpop.f32.mrf.mxu0  ;;  %v697_v51 = vsel %vm694_vm1, %v696_v26, %v692_v3  ;;  %v622_v58 = vsel %vm9039_vm12, %v8845_v50, %v14443_v0  ;;  %vm14445_vm10 = vweird.f32 %v8791_v11  ;;  %v9141_v25 = vadd.f32 1.0, %v7365_v35  ;;  %vm14452_vm12 = vmmov %vm14437_vm5 }
 0x11e   :  { %vm9137_vm3 = vmor %vm14445_vm10, %vm14444_vm8  ;;  %v510_v45 = vadd.f32 %v493_v20, %v8842_v9  ;;  %6887 = vmatpush.msk.msra.mxu1 %vm14448_vm11, %v831_v40  ;;  %895 = vmatpush.msrb.mxu2 %v826_v39  ;;  %v828_v23 = vmul.f32 %v742_v22, %v8807_v16  ;;  %v9149_v15 = vadd.f32 1.0, %v7367_v30  ;;  %v652_v55 = vsel %vm9062_vm4, %v8897_v46, %v647_v17  ;;  %v1073_v20 = vld [vmem:[%s14463_s29 + $0x140] sm:$0xff] }
 0x11f   :  { %v602_v50 = vsel %vm9137_vm3, %v8839_v52, %v598_v1  ;;  %v14449_v48 = vand.u32 2147483647, %v8791_v11  ;;  %v14450_v9 = vand.u32 2147483648, %v8791_v11  ;;  %v825_v16 = vmul.f32 %v697_v51, %v8787_v4  ;;  %vm14453_vm4 = vmmov %vm14437_vm5 }
 0x120   :  { %v9159_v19 = vadd.f32 %v8831_v49, %v510_v45  ;;  %868 = vmatpush.msra.mxu1 %v828_v23  ;;  %896 = vmatpush.msrb.mxu2 %v823_v18  ;;  %v820_v52 = vmul.f32 %v622_v58, %v8757_v33  ;;  %vm14382_vm15 = vcmask 310272   ;;  %7370 = vrcp.f32 %v9121_v32 }
 0x121   :  { %vm604_vm9 = vcmp.eq.f32.partialorder %v14449_v48, 8.507059e+37  ;;  %v606_v37 = vor.u32 1.1754944e-38, %v14450_v9  ;;  %7372 = vrcp.f32 %v9141_v25  ;;  %v822_v4 = vmul.f32 %v652_v55, %v8774_v54 }
 0x122   :  { %v7369_v11 = vpop.eup %7368  ;;  %v6886_v56 = vmul.f32 -1.442695, %v9159_v19  ;;  %869 = vmatpush.msra.mxu1 %v825_v16  ;;  %897 = vmatpush.msrb.mxu2 %v820_v52  ;;  %7374 = vrcp.f32 %v9149_v15  ;;  %vm674_vm14 = vweird.f32 %v9141_v25  ;;  %v678_v1 = vand.u32 2147483647, %v9141_v25 }
 0x123   :  { %v607_v46 = vsel %vm604_vm9, %v606_v37, %v602_v50  ;;  %v9173_v33 = vadd.f32 1.0, %v7369_v11  ;;  %6892 = vmatmul.msk.f32.vlgmr.msrb.gmra.mxu2 %vm14382_vm15, %v9166_v28  ;;  %vm629_vm5 = vweird.f32 %v9121_v32  ;;  %vm719_vm8 = vweird.f32 %v9149_v15 }
 0x124   :  { %7376 = vpow2.f32 %v6886_v56  ;;  %6903 = vmatpush.msk.msra.mxu2 %vm14452_vm12, %v832_v44  ;;  %870 = vmatpush.msra.mxu1 %v822_v4  ;;  %v819_v63 = vmul.f32 %v607_v46, %v8766_v41  ;;  %v725_v51 = vand.u32 2147483648, %v9149_v15  ;;  %v635_v11 = vand.u32 2147483648, %v9121_v32  ;;  %v1035_v46 = vld [vmem:[%s14463_s29 + $0x10] sm:$0xff] }
 0x125   :  { %7378 = vrcp.f32 %v9173_v33  ;;  %vm764_vm1 = vweird.f32 %v9173_v33  ;;  %v768_v26 = vand.u32 2147483647, %v9173_v33  ;;  %v770_v57 = vand.u32 2147483648, %v9173_v33 }
 0x126   :  { %984 = vmatpush.msra.mxu2 %v829_v8  ;;  %871 = vmatpush.msra.mxu1 %v819_v63  ;;  %v9180_v14 = vpop.eup %7370 }
 0x127   :  { %6888 = vmatmul.msk.f32.vlgmr.msra.gmra.mxu1 %vm14382_vm15, %v9166_v28  ;;  %v9184_v54 = vpop.eup %7372  ;;  %v625_v61 = vmul.f32 %v9180_v14, %v9121_v32  ;;  %vm630_vm13 = vweird.f32 %v9180_v14  ;;  %vm769_vm12 = vcmp.eq.f32.partialorder %v768_v26, 8.507059e+37  ;;  %v771_v50 = vor.u32 1.1754944e-38, %v770_v57  ;;  %v1077_v26 = vld [vmem:[%s14463_s29 + $0x160] sm:$0xff] }
 0x128   :  { %6899 = vmatpush.msk.msrb.mxu1 %vm14453_vm4, %v831_v40  ;;  %985 = vmatpush.msra.mxu2 %v826_v39  ;;  %v9192_v41 = vpop.eup %7374  ;;  %v670_v12 = vmul.f32 %v9184_v54, %v9141_v25  ;;  %v9234_v39 = vld [vmem:[%s14454_s10] sm:$0xff]  ;;  %vm675_vm10 = vweird.f32 %v9184_v54 }
 0x129   :  { %v715_v27 = vmul.f32 %v9192_v41, %v9149_v15  ;;  %v626_v24 = vsub.f32 1.0, %v625_v61  ;;  %vm720_vm0 = vweird.f32 %v9192_v41  ;;  %v1062_v61 = vld [vmem:[%s14463_s29 + $0xe8] sm:$0xff]  ;;  %v1049_v57 = vld [vmem:[%s14463_s29 + $0x80] sm:$0xff] }
 0x12a   :  { %v7377_v60 = vpop.eup %7376  ;;  %958 = vmatpush.msrb.mxu1 %v828_v23  ;;  %986 = vmatpush.msra.mxu2 %v823_v18  ;;  %v671_v29 = vsub.f32 1.0, %v670_v12  ;;  %v723_v18 = vand.u32 2147483647, %v9149_v15  ;;  %vm9250_vm11 = vmor %vm719_vm8, %vm720_vm0  ;;  %v680_v15 = vand.u32 2147483648, %v9141_v25  ;;  %v1060_v12 = vld [vmem:[%s14463_s29 + $0xd8] sm:$0xff]  ;;  %vm14466_vm8 = vcmask 1046528  }
 0x12b   :  { %v9194_v7 = vpop.eup %7378  ;;  %v593_v13 = vadd.f32 1.0, %v7377_v60  ;;  %6893 = vmatmul.msk.f32.gmra.mxu2 %vm14382_vm15, %v9190_v47  ;;  %v716_v42 = vsub.f32 1.0, %v715_v27  ;;  %v627_v35 = vmul.f32 %v9180_v14, %v626_v24  ;;  %vm9266_vm0 = vmor %vm674_vm14, %vm675_vm10  ;;  %v1061_v27 = vld [vmem:[%s14463_s29 + $0xe0] sm:$0xff] }
 0x12c   :  { %959 = vmatpush.msrb.mxu1 %v825_v16  ;;  %987 = vmatpush.msra.mxu2 %v820_v52  ;;  %v760_v5 = vmul.f32 %v9194_v7, %v9173_v33  ;;  %vm765_vm7 = vweird.f32 %v9194_v7  ;;  %v672_v2 = vmul.f32 %v9184_v54, %v671_v29  ;;  %v726_v52 = vor.u32 1.1754944e-38, %v725_v51  ;;  %vm631_vm14 = vmor %vm629_vm5, %vm630_vm13  ;;  %v1057_v24 = vld [vmem:[%s14463_s29 + $0xc0] sm:$0xff]  ;;  %v1058_v29 = vld [vmem:[%s14463_s29 + $0xc8] sm:$0xff] }
 0x12d   :  { %7380 = vrcp.f32 %v593_v13  ;;  %v717_v3 = vmul.f32 %v9192_v41, %v716_v42  ;;  %v815_v53 = vand.u32 2147483648, %v593_v13  ;;  %v813_v40 = vand.u32 2147483647, %v593_v13  ;;  %vm9237_vm6 = vmor %vm764_vm1, %vm765_vm7  ;;  %v1089_v42 = vld [vmem:[%s14463_s29 + $0x1c0] sm:$0xff]  ;;  %v1046_v51 = vld [vmem:[%s14463_s29 + $0x68] sm:$0xff] }
 0x12e   :  { %960 = vmatpush.msrb.mxu1 %v822_v4  ;;  %v761_v44 = vsub.f32 1.0, %v760_v5  ;;  %vm809_vm3 = vweird.f32 %v593_v13  ;;  %v673_v45 = vadd.f32 %v9184_v54, %v672_v2  ;;  %v628_v9 = vadd.f32 %v9180_v14, %v627_v35  ;;  %v1083_v35 = vld [vmem:[%s14463_s29 + $0x190] sm:$0xff]  ;;  %vm14467_vm10 = vmmov %vm14466_vm8 }
 0x12f   :  { %6889 = vmatmul.msk.f32.gmra.mxu1 %vm14382_vm15, %v9190_v47  ;;  %v718_v17 = vadd.f32 %v9192_v41, %v717_v3  ;;  %v816_v23 = vor.u32 1.1754944e-38, %v815_v53  ;;  %vm814_vm4 = vcmp.eq.f32.partialorder %v813_v40, 8.507059e+37  ;;  %vm724_vm7 = vcmp.eq.f32.partialorder %v723_v18, 8.507059e+37  ;;  %v1056_v3 = vld [vmem:[%s14463_s29 + $0xb8] sm:$0xff]  ;;  %v1051_v2 = vld [vmem:[%s14463_s29 + $0x90] sm:$0xff]  ;;  %v1045_v18 = vld [vmem:[%s14463_s29 + $0x60] sm:$0xff] }
 0x130   :  { %961 = vmatpush.msrb.mxu1 %v819_v63  ;;  %v762_v8 = vmul.f32 %v9194_v7, %v761_v44  ;;  %v677_v4 = vsel %vm9266_vm0, %v9184_v54, %v673_v45  ;;  %v633_v33 = vand.u32 2147483647, %v9121_v32  ;;  %v681_v25 = vor.u32 1.1754944e-38, %v680_v15  ;;  %v9287_v54 = vld [vmem:[%s14454_s10 + $0x8] sm:$0xff]  ;;  %v1059_v44 = vld [vmem:[%s14463_s29 + $0xd0] sm:$0xff]  ;;  %v1052_v53 = vld [vmem:[%s14463_s29 + $0x98] sm:$0xff] }
 0x131   :  { %v722_v48 = vsel %vm9250_vm11, %v9192_v41, %v718_v17  ;;  %vm14461_vm1 = vcmask 1045504   ;;  %v632_v41 = vsel %vm631_vm14, %v9180_v14, %v628_v9  ;;  %v936_v14 = vld [vmem:[%s14454_s10 + $0x10] sm:$0xf]  ;;  %v1048_v17 = vld [vmem:[%s14463_s29 + $0x78] sm:$0xff]  ;;  %v1069_v45 = vld [vmem:[%s14463_s29 + $0x120] sm:$0xff]  ;;  %vm14381_vm5 = vcmask 392192  }
 0x132   :  { %v763_v22 = vadd.f32 %v9194_v7, %v762_v8  ;;  %v727_v63 = vsel %vm724_vm7, %v726_v52, %v722_v48  ;;  %vm14462_vm13 = vmmov %vm14461_vm1  ;;  %v1087_v8 = vld [vmem:[%s14463_s29 + $0x1b0] sm:$0xff]  ;;  %v1040_v48 = vld [vmem:[%s14463_s29 + $0x38] sm:$0xff] }
 0x133   :  { %v7381_v59 = vpop.eup %7380  ;;  %6894 = vmatmul.msk.f32.gmra.mxu2 %vm14382_vm15, %v9211_v31  ;;  %v1075_v40 = vld [vmem:[%s14463_s29 + $0x150] sm:$0xff]  ;;  %v1065_v9 = vld [vmem:[%s14463_s29 + $0x100] sm:$0xff]  ;;  %vm14469_vm11 = vmmov %vm14461_vm1 }
 0x134   :  { %v805_v10 = vmul.f32 %v7381_v59, %v593_v13  ;;  %vm810_vm2 = vweird.f32 %v7381_v59  ;;  %v767_v58 = vsel %vm9237_vm6, %v9194_v7, %v763_v22  ;;  %v636_v7 = vor.u32 1.1754944e-38, %v635_v11  ;;  %v1079_v22 = vld [vmem:[%s14463_s29 + $0x170] sm:$0xff]  ;;  %v1036_v11 = vld [vmem:[%s14463_s29 + $0x18] sm:$0xff]  ;;  %vm14471_vm0 = vmmov %vm14461_vm1 }
 0x135   :  { %vm811_vm9 = vmor %vm809_vm3, %vm810_vm2  ;;  %v772_v16 = vsel %vm769_vm12, %v771_v50, %v767_v58  ;;  %vm679_vm2 = vcmp.eq.f32.partialorder %v678_v1, 8.507059e+37  ;;  %v827_v13 = vmul.f32 %v727_v63, %v9004_v62  ;;  %vm634_vm6 = vcmp.eq.f32.partialorder %v633_v33, 8.507059e+37  ;;  %v1063_v62 = vld [vmem:[%s14463_s29 + $0xf0] sm:$0xff]  ;;  %v1053_v1 = vld [vmem:[%s14463_s29 + $0xa0] sm:$0xff] }
 0x136   :  { %v806_v21 = vsub.f32 1.0, %v805_v10  ;;  %v682_v60 = vsel %vm679_vm2, %v681_v25, %v677_v4  ;;  %v637_v32 = vsel %vm634_vm6, %v636_v7, %v632_v41  ;;  %1119 = vmatpush.msra.mxu0 %v1063_v62  ;;  %v1085_v10 = vld [vmem:[%s14463_s29 + $0x1a0] sm:$0xff]  ;;  %v1043_v58 = vld [vmem:[%s14463_s29 + $0x50] sm:$0xff]  ;;  %v1042_v50 = vld [vmem:[%s14463_s29 + $0x48] sm:$0xff]  ;;  %vm14374_vm12 = vcmask 1044480  }
 0x137   :  { %6890 = vmatmul.msk.f32.gmra.mxu1 %vm14382_vm15, %v9211_v31  ;;  %v821_v5 = vmul.f32 %v637_v32, %v8893_v43  ;;  %v1095_v43 = vld [vmem:[%s14463_s29 + $0x1f0] sm:$0xff]  ;;  %v1033_v4 = vld [vmem:[%s14463_s29] sm:$0xff]  ;;  %v1034_v33 = vld [vmem:[%s14463_s29 + $0x8] sm:$0xff] }
 0x138   :  { %v807_v30 = vmul.f32 %v7381_v59, %v806_v21  ;;  %1145 = vmatpush.msra.mxu1 %v1095_v43  ;;  %1120 = vmatpush.msra.mxu0 %v1061_v27  ;;  %v1081_v21 = vld [vmem:[%s14463_s29 + $0x180] sm:$0xff]  ;;  %v1067_v15 = vld [vmem:[%s14463_s29 + $0x110] sm:$0xff]  ;;  %v1096_v25 = vld [vmem:[%s14463_s29 + $0x1f8] sm:$0xff] }
 0x139   :  { %v1305_v52 = vld [vmem:[%s14464_s26 + $0xf0] sm:$0xff]  ;;  %v1094_v41 = vld [vmem:[%s14463_s29 + $0x1e8] sm:$0xff]  ;;  %v1327_v27 = vld [vmem:[%s14464_s26 + $0x1a0] sm:$0xff] }
 0x13a   :  { %v808_v0 = vadd.f32 %v7381_v59, %v807_v30  ;;  %1121 = vmatpush.msra.mxu0 %v1059_v44  ;;  %v1050_v30 = vld [vmem:[%s14463_s29 + $0x88] sm:$0xff]  ;;  %v1301_v63 = vld [vmem:[%s14464_s26 + $0xd0] sm:$0xff]  ;;  %vm14468_vm3 = vmmov %vm14461_vm1 }
 0x13b   :  { %6904 = vmatmul.msk.f32.vlgmr.msra.gmra.mxu2 %vm14382_vm15, %v9234_v39  ;;  %v1297_v7 = vld [vmem:[%s14464_s26 + $0xb0] sm:$0xff]  ;;  %vm14473_vm14 = vmmov %vm14471_vm0 }
 0x13c   :  { %v812_v55 = vsel %vm811_vm9, %v7381_v59, %v808_v0  ;;  %v1055_v59 = vld [vmem:[%s14463_s29 + $0xb0] sm:$0xff]  ;;  %1122 = vmatpush.msra.mxu0 %v1057_v24  ;;  %v1287_v24 = vld [vmem:[%s14464_s26 + $0x60] sm:$0xff]  ;;  %vm14379_vm9 = vcmask 261120  }
 0x13d   :  { %v817_v37 = vsel %vm814_vm4, %v816_v23, %v812_v55  ;;  %v1071_v0 = vld [vmem:[%s14463_s29 + $0x130] sm:$0xff]  ;;  %v1041_v23 = vld [vmem:[%s14463_s29 + $0x40] sm:$0xff]  ;;  %vm14470_vm4 = vmmov %vm14466_vm8 }
 0x13e   :  { %v833_v56 = vmul.f32 %v817_v37, %v9159_v19  ;;  %v830_v19 = vmul.f32 %v772_v16, %v9077_v34  ;;  %v824_v34 = vmul.f32 %v682_v60, %v8974_v6  ;;  %v1093_v6 = vld [vmem:[%s14463_s29 + $0x1e0] sm:$0xff]  ;;  %1123 = vmatpush.msra.mxu0 %v1055_v59  ;;  %v1039_v55 = vld [vmem:[%s14463_s29 + $0x30] sm:$0xff]  ;;  %v1038_v16 = vld [vmem:[%s14463_s29 + $0x28] sm:$0xff] }
 0x13f   :  { %6900 = vmatmul.msk.f32.vlgmr.msrb.gmra.mxu1 %vm14382_vm15, %v9234_v39  ;;  %v1037_v37 = vld [vmem:[%s14463_s29 + $0x20] sm:$0xff]  ;;  %v1333_v32 = vld [vmem:[%s14464_s26 + $0x1d0] sm:$0xff]  ;;  %vm14472_vm7 = vmmov %vm14470_vm4 }
 0x140   :  { %6895 = vmatpush.msk.msra.mxu3 %vm14461_vm1, %v833_v56  ;;  %1146 = vmatpush.msra.mxu1 %v1093_v6  ;;  %v1335_v60 = vld [vmem:[%s14464_s26 + $0x1e0] sm:$0xff]  ;;  %v1293_v43 = vld [vmem:[%s14464_s26 + $0x90] sm:$0xff]  ;;  %v1088_v6 = vld [vmem:[%s14463_s29 + $0x1b8] sm:$0xff]  ;;  %vm14380_vm1 = vcmask 1043456  }
 0x141   :  { %1124 = vmatpush.msra.mxu0 %v1053_v1  ;;  %v1329_v62 = vld [vmem:[%s14464_s26 + $0x1b0] sm:$0xff]  ;;  %v1323_v59 = vld [vmem:[%s14464_s26 + $0x180] sm:$0xff] }
 0x142   :  { %920 = vmatpush.msra.mxu3 %v830_v19  ;;  %v1321_v1 = vld [vmem:[%s14464_s26 + $0x170] sm:$0xff] }
 0x143   :  { %6905 = vmatmul.msk.f32.gmra.mxu2 %vm14382_vm15, %v9287_v54  ;;  %1125 = vmatpush.msra.mxu0 %v1051_v2 }
 0x144   :  { %921 = vmatpush.msra.mxu3 %v827_v13 }
 0x145   :  { %1126 = vmatpush.msra.mxu0 %v1049_v57  ;;  %v1279_v57 = vld [vmem:[%s14464_s26 + $0x20] sm:$0xff] }
 0x146   :  { %922 = vmatpush.msra.mxu3 %v824_v34 }
 0x147   :  { %6901 = vmatmul.msk.f32.gmra.mxu1 %vm14382_vm15, %v9287_v54 }
 0x148   :  { %923 = vmatpush.msra.mxu3 %v821_v5 }
 0x149   :  { %6896 = vmatmul.msk.f32.vlgmr.msra.gmra.mxu3 %vm14382_vm15, %v9166_v28  ;;  %v1064_v28 = vld [vmem:[%s14463_s29 + $0xf8] sm:$0xff] }
 0x14a   :  { %6907 = vmatpush.msk.msrb.mxu3 %vm14462_vm13, %v833_v56  ;;  %v1303_v56 = vld [vmem:[%s14464_s26 + $0xe0] sm:$0xff] }
 0x14b   :  { %6906 = vmatmul.msk.f32.gmra.mxu2 %vm14382_vm15, %v936_v14 }
 0x14c   :  { %1010 = vmatpush.msrb.mxu3 %v830_v19  ;;  %v1337_v19 = vld [vmem:[%s14464_s26 + $0x1f0] sm:$0xff] }
 0x14e   :  { %1011 = vmatpush.msrb.mxu3 %v827_v13  ;;  %v1092_v13 = vld [vmem:[%s14463_s29 + $0x1d8] sm:$0xff] }
 0x14f   :  { %6902 = vmatmul.msk.f32.gmra.mxu1 %vm14382_vm15, %v936_v14 }
 0x150   :  { %1012 = vmatpush.msrb.mxu3 %v824_v34  ;;  %v1295_v34 = vld [vmem:[%s14464_s26 + $0xa0] sm:$0xff] }
 0x151   :  { %6897 = vmatmul.msk.f32.gmra.mxu3 %vm14382_vm15, %v9190_v47  ;;  %v1091_v47 = vld [vmem:[%s14463_s29 + $0x1d0] sm:$0xff] }
 0x152   :  { %1013 = vmatpush.msrb.mxu3 %v821_v5  ;;  %1147 = vmatpush.msra.mxu1 %v1091_v47  ;;  %v1090_v5 = vld [vmem:[%s14463_s29 + $0x1c8] sm:$0xff] }
 0x153   :  { %v1086_v47 = vld [vmem:[%s14463_s29 + $0x1a8] sm:$0xff] }
 0x154   :  { %1197 = vmatpush.msra.mxu3 %v1064_v28  ;;  %1148 = vmatpush.msra.mxu1 %v1089_v42  ;;  %v1291_v28 = vld [vmem:[%s14464_s26 + $0x80] sm:$0xff]  ;;  %v1325_v42 = vld [vmem:[%s14464_s26 + $0x190] sm:$0xff] }
 0x156   :  { %1198 = vmatpush.msra.mxu3 %v1062_v61  ;;  %1149 = vmatpush.msra.mxu1 %v1087_v8  ;;  %v1289_v61 = vld [vmem:[%s14464_s26 + $0x70] sm:$0xff] }
 0x158   :  { %1199 = vmatpush.msra.mxu3 %v1060_v12  ;;  %1150 = vmatpush.msra.mxu1 %v1085_v10  ;;  %v1084_v12 = vld [vmem:[%s14463_s29 + $0x198] sm:$0xff]  ;;  %v1285_v10 = vld [vmem:[%s14464_s26 + $0x50] sm:$0xff] }
 0x159   :  { %6898 = vmatmul.msk.f32.gmra.mxu3 %vm14382_vm15, %v9211_v31  ;;  %v1054_v31 = vld [vmem:[%s14463_s29 + $0xa8] sm:$0xff] }
 0x15a   :  { %1200 = vmatpush.msra.mxu3 %v1058_v29  ;;  %1151 = vmatpush.msra.mxu1 %v1083_v35  ;;  %v1082_v29 = vld [vmem:[%s14463_s29 + $0x188] sm:$0xff]  ;;  %v1283_v35 = vld [vmem:[%s14464_s26 + $0x40] sm:$0xff] }
 0x15c   :  { %1201 = vmatpush.msra.mxu3 %v1056_v3  ;;  %1152 = vmatpush.msra.mxu1 %v1081_v21  ;;  %v1080_v3 = vld [vmem:[%s14463_s29 + $0x178] sm:$0xff]  ;;  %v1319_v21 = vld [vmem:[%s14464_s26 + $0x160] sm:$0xff] }
 0x15e   :  { %1202 = vmatpush.msra.mxu3 %v1054_v31  ;;  %1153 = vmatpush.msra.mxu1 %v1079_v22  ;;  %v1078_v31 = vld [vmem:[%s14463_s29 + $0x168] sm:$0xff]  ;;  %v1281_v22 = vld [vmem:[%s14464_s26 + $0x30] sm:$0xff] }
 0x160   :  { %1203 = vmatpush.msra.mxu3 %v1052_v53  ;;  %1154 = vmatpush.msra.mxu1 %v1077_v26  ;;  %v1076_v53 = vld [vmem:[%s14463_s29 + $0x158] sm:$0xff]  ;;  %v1317_v26 = vld [vmem:[%s14464_s26 + $0x150] sm:$0xff] }
 0x161   :  { %6908 = vmatmul.msk.f32.vlgmr.msrb.gmra.mxu3 %vm14382_vm15, %v9234_v39  ;;  %v1047_v39 = vld [vmem:[%s14463_s29 + $0x70] sm:$0xff] }
 0x162   :  { %1204 = vmatpush.msra.mxu3 %v1050_v30  ;;  %1155 = vmatpush.msra.mxu1 %v1075_v40  ;;  %v1074_v40 = vld [vmem:[%s14463_s29 + $0x148] sm:$0xff] }
 0x163   :  { %1127 = vmatpush.msra.mxu0 %v1047_v39  ;;  %v1315_v39 = vld [vmem:[%s14464_s26 + $0x140] sm:$0xff] }
 0x164   :  { %1205 = vmatpush.msra.mxu3 %v1048_v17  ;;  %1156 = vmatpush.msra.mxu1 %v1073_v20  ;;  %v1277_v17 = vld [vmem:[%s14464_s26 + $0x10] sm:$0xff]  ;;  %v1072_v20 = vld [vmem:[%s14463_s29 + $0x138] sm:$0xff] }
 0x165   :  { %1128 = vmatpush.msra.mxu0 %v1045_v18  ;;  %v1313_v18 = vld [vmem:[%s14464_s26 + $0x130] sm:$0xff] }
 0x166   :  { %1206 = vmatpush.msra.mxu3 %v1046_v51  ;;  %1157 = vmatpush.msra.mxu1 %v1071_v0  ;;  %v1275_v51 = vld [vmem:[%s14464_s26] sm:$0xff]  ;;  %v1070_v0 = vld [vmem:[%s14463_s29 + $0x128] sm:$0xff] }
 0x167   :  { %1129 = vmatpush.msra.mxu0 %v1043_v58  ;;  %v1311_v58 = vld [vmem:[%s14464_s26 + $0x120] sm:$0xff] }
 0x168   :  { %1207 = vmatpush.msra.mxu3 %v1044_v36  ;;  %1158 = vmatpush.msra.mxu1 %v1069_v45  ;;  %v1068_v45 = vld [vmem:[%s14463_s29 + $0x118] sm:$0xff] }
 0x169   :  { %6909 = vmatmul.msk.f32.gmra.mxu3 %vm14382_vm15, %v9287_v54  ;;  %1130 = vmatpush.msra.mxu0 %v1041_v23  ;;  %v1299_v54 = vld [vmem:[%s14464_s26 + $0xc0] sm:$0xff]  ;;  %v1309_v23 = vld [vmem:[%s14464_s26 + $0x110] sm:$0xff] }
 0x16a   :  { %1208 = vmatpush.msra.mxu3 %v1042_v50  ;;  %1159 = vmatpush.msra.mxu1 %v1067_v15  ;;  %v1066_v50 = vld [vmem:[%s14463_s29 + $0x108] sm:$0xff]  ;;  %v1307_v15 = vld [vmem:[%s14464_s26 + $0x100] sm:$0xff] }
 0x16b   :  { %1131 = vmatpush.msra.mxu0 %v1039_v55 }
 0x16c   :  { %1209 = vmatpush.msra.mxu3 %v1040_v48  ;;  %1160 = vmatpush.msra.mxu1 %v1065_v9  ;;  %v1107_v9 = vld [vmem:[%s14463_s29 + $0x250] sm:$0xff] }
 0x16d   :  { %1132 = vmatpush.msra.mxu0 %v1037_v37  ;;  %1181 = vmatpush.msrb.mxu2 %v1107_v9  ;;  %v1298_v9 = vld [vmem:[%s14464_s26 + $0xb8] sm:$0xff] }
 0x16e   :  { %1210 = vmatpush.msra.mxu3 %v1038_v16  ;;  %1351 = vmatpush.msrb.mxu1 %v1305_v52  ;;  %v1105_v16 = vld [vmem:[%s14463_s29 + $0x240] sm:$0xff] }
 0x16f   :  { %1133 = vmatpush.msra.mxu0 %v1035_v46  ;;  %1182 = vmatpush.msrb.mxu2 %v1105_v16  ;;  %v1296_v16 = vld [vmem:[%s14464_s26 + $0xa8] sm:$0xff] }
 0x170   :  { %1211 = vmatpush.msra.mxu3 %v1036_v11  ;;  %1352 = vmatpush.msrb.mxu1 %v1303_v56  ;;  %v1338_v11 = vld [vmem:[%s14464_s26 + $0x1f8] sm:$0xff]  ;;  %v1103_v56 = vld [vmem:[%s14463_s29 + $0x230] sm:$0xff] }
 0x171   :  { %6910 = vmatmul.msk.f32.gmra.mxu3 %vm14382_vm15, %v936_v14  ;;  %1134 = vmatpush.msra.mxu0 %v1033_v4  ;;  %v1331_v14 = vld [vmem:[%s14464_s26 + $0x1c0] sm:$0xff]  ;;  %v1336_v4 = vld [vmem:[%s14464_s26 + $0x1e8] sm:$0xff] }
 0x172   :  { %1212 = vmatpush.msra.mxu3 %v1034_v33  ;;  %1353 = vmatpush.msrb.mxu1 %v1301_v63  ;;  %v1101_v33 = vld [vmem:[%s14463_s29 + $0x220] sm:$0xff]  ;;  %v1334_v63 = vld [vmem:[%s14464_s26 + $0x1d8] sm:$0xff] }
 0x173   :  { %1223 = vmatpush.msrb.mxu0 %v1096_v25  ;;  %1183 = vmatpush.msrb.mxu2 %v1103_v56 }
 0x174   :  { %1377 = vmatpush.msrb.mxu3 %v1337_v19  ;;  %1354 = vmatpush.msrb.mxu1 %v1299_v54  ;;  %v1332_v54 = vld [vmem:[%s14464_s26 + $0x1c8] sm:$0xff] }
 0x175   :  { %1224 = vmatpush.msrb.mxu0 %v1094_v41  ;;  %1184 = vmatpush.msrb.mxu2 %v1101_v33  ;;  %v1099_v41 = vld [vmem:[%s14463_s29 + $0x210] sm:$0xff]  ;;  %v1290_v33 = vld [vmem:[%s14464_s26 + $0x78] sm:$0xff] }
 0x176   :  { %1378 = vmatpush.msrb.mxu3 %v1335_v60  ;;  %1355 = vmatpush.msrb.mxu1 %v1297_v7  ;;  %v1349_v60 = vld [vmem:[%s14464_s26 + $0x250] sm:$0xff] }
 0x177   :  { %1225 = vmatpush.msrb.mxu0 %v1092_v13  ;;  %1185 = vmatpush.msrb.mxu2 %v1099_v41  ;;  %v1350_v13 = vld [vmem:[%s14464_s26 + $0x258] sm:$0xff]  ;;  %v1280_v41 = vld [vmem:[%s14464_s26 + $0x28] sm:$0xff] }
 0x178   :  { %1379 = vmatpush.msrb.mxu3 %v1333_v32  ;;  %1356 = vmatpush.msrb.mxu1 %v1295_v34  ;;  %v1330_v34 = vld [vmem:[%s14464_s26 + $0x1b8] sm:$0xff] }
 0x179   :  { %1226 = vmatpush.msrb.mxu0 %v1090_v5  ;;  %v1097_v5 = vld [vmem:[%s14463_s29 + $0x200] sm:$0xff] }
 0x17a   :  { %1380 = vmatpush.msrb.mxu3 %v1331_v14  ;;  %1357 = vmatpush.msrb.mxu1 %v1293_v43  ;;  %v1347_v14 = vld [vmem:[%s14464_s26 + $0x240] sm:$0xff]  ;;  %v1348_v43 = vld [vmem:[%s14464_s26 + $0x248] sm:$0xff] }
 0x17b   :  { %1227 = vmatpush.msrb.mxu0 %v1088_v6  ;;  %v1328_v6 = vld [vmem:[%s14464_s26 + $0x1a8] sm:$0xff]  ;;  %1186 = vmatpush.msrb.mxu2 %v1097_v5  ;;  %v1541_v5 = vld [vmem:[%s14465_s27 + $0xe0] sm:$0xff] }
 0x17c   :  { %1381 = vmatpush.msrb.mxu3 %v1329_v62  ;;  %1358 = vmatpush.msrb.mxu1 %v1291_v28  ;;  %v1345_v62 = vld [vmem:[%s14464_s26 + $0x230] sm:$0xff]  ;;  %v1346_v28 = vld [vmem:[%s14464_s26 + $0x238] sm:$0xff] }
 0x17d   :  { %1228 = vmatpush.msrb.mxu0 %v1086_v47  ;;  %v1326_v47 = vld [vmem:[%s14464_s26 + $0x198] sm:$0xff] }
 0x17e   :  { %1382 = vmatpush.msrb.mxu3 %v1327_v27  ;;  %1359 = vmatpush.msrb.mxu1 %v1289_v61 }
 0x17f   :  { %1229 = vmatpush.msrb.mxu0 %v1084_v12  ;;  %v1324_v12 = vld [vmem:[%s14464_s26 + $0x188] sm:$0xff] }
 0x180   :  { %1383 = vmatpush.msrb.mxu3 %v1325_v42  ;;  %1360 = vmatpush.msrb.mxu1 %v1287_v24  ;;  %v1343_v42 = vld [vmem:[%s14464_s26 + $0x220] sm:$0xff] }
 0x181   :  { %1230 = vmatpush.msrb.mxu0 %v1082_v29 }
 0x182   :  { %1384 = vmatpush.msrb.mxu3 %v1323_v59  ;;  %1361 = vmatpush.msrb.mxu1 %v1285_v10  ;;  %v1322_v59 = vld [vmem:[%s14464_s26 + $0x178] sm:$0xff]  ;;  %v1341_v10 = vld [vmem:[%s14464_s26 + $0x210] sm:$0xff] }
 0x183   :  { %1231 = vmatpush.msrb.mxu0 %v1080_v3  ;;  %v1342_v3 = vld [vmem:[%s14464_s26 + $0x218] sm:$0xff] }
 0x184   :  { %1385 = vmatpush.msrb.mxu3 %v1321_v1  ;;  %1362 = vmatpush.msrb.mxu1 %v1283_v35  ;;  %v1108_v1 = vld [vmem:[%s14463_s29 + $0x258] sm:$0xff]  ;;  %v1320_v35 = vld [vmem:[%s14464_s26 + $0x168] sm:$0xff] }
 0x185   :  { %1232 = vmatpush.msrb.mxu0 %v1078_v31  ;;  %v1339_v31 = vld [vmem:[%s14464_s26 + $0x200] sm:$0xff]  ;;  %1259 = vmatpush.msra.mxu2 %v1108_v1  ;;  %v1527_v1 = vld [vmem:[%s14465_s27 + $0x70] sm:$0xff] }
 0x186   :  { %1386 = vmatpush.msrb.mxu3 %v1319_v21  ;;  %1363 = vmatpush.msrb.mxu1 %v1281_v22  ;;  %v1340_v21 = vld [vmem:[%s14464_s26 + $0x208] sm:$0xff] }
 0x187   :  { %1233 = vmatpush.msrb.mxu0 %v1076_v53  ;;  %v1106_v22 = vld [vmem:[%s14463_s29 + $0x248] sm:$0xff] }
 0x188   :  { %1387 = vmatpush.msrb.mxu3 %v1317_v26  ;;  %1364 = vmatpush.msrb.mxu1 %v1279_v57  ;;  %v1316_v26 = vld [vmem:[%s14464_s26 + $0x148] sm:$0xff]  ;;  %v1104_v57 = vld [vmem:[%s14463_s29 + $0x238] sm:$0xff] }
 0x189   :  { %1234 = vmatpush.msrb.mxu0 %v1074_v40  ;;  %1260 = vmatpush.msra.mxu2 %v1106_v22  ;;  %v1102_v40 = vld [vmem:[%s14463_s29 + $0x228] sm:$0xff]  ;;  %v1525_v22 = vld [vmem:[%s14465_s27 + $0x60] sm:$0xff] }
 0x18a   :  { %1388 = vmatpush.msrb.mxu3 %v1315_v39  ;;  %1365 = vmatpush.msrb.mxu1 %v1277_v17  ;;  %v1312_v39 = vld [vmem:[%s14464_s26 + $0x128] sm:$0xff]  ;;  %v1100_v17 = vld [vmem:[%s14463_s29 + $0x218] sm:$0xff] }
 0x18b   :  { %1235 = vmatpush.msrb.mxu0 %v1072_v20  ;;  %1261 = vmatpush.msra.mxu2 %v1104_v57  ;;  %v1310_v20 = vld [vmem:[%s14464_s26 + $0x118] sm:$0xff]  ;;  %v1523_v57 = vld [vmem:[%s14465_s27 + $0x50] sm:$0xff] }
 0x18c   :  { %1389 = vmatpush.msrb.mxu3 %v1313_v18  ;;  %1366 = vmatpush.msrb.mxu1 %v1275_v51  ;;  %v1098_v18 = vld [vmem:[%s14463_s29 + $0x208] sm:$0xff] }
 0x18d   :  { %1236 = vmatpush.msrb.mxu0 %v1070_v0  ;;  %1262 = vmatpush.msra.mxu2 %v1102_v40  ;;  %v1308_v0 = vld [vmem:[%s14464_s26 + $0x108] sm:$0xff] }
 0x18e   :  { %1390 = vmatpush.msrb.mxu3 %v1311_v58  ;;  %v6928_v40 = vld [vmem:[%s14465_s27 + $0x168] sm:$0xff] }
 0x18f   :  { %1237 = vmatpush.msrb.mxu0 %v1068_v45  ;;  %1263 = vmatpush.msra.mxu2 %v1100_v17  ;;  %v1306_v45 = vld [vmem:[%s14464_s26 + $0xf8] sm:$0xff] }
 0x190   :  { %1391 = vmatpush.msrb.mxu3 %v1309_v23  ;;  %v1304_v23 = vld [vmem:[%s14464_s26 + $0xe8] sm:$0xff] }
 0x191   :  { %1238 = vmatpush.msrb.mxu0 %v1066_v50  ;;  %1264 = vmatpush.msra.mxu2 %v1098_v18  ;;  %v1302_v50 = vld [vmem:[%s14464_s26 + $0xd8] sm:$0xff] }
 0x192   :  { %1392 = vmatpush.msrb.mxu3 %v1307_v15  ;;  %v1300_v15 = vld [vmem:[%s14464_s26 + $0xc8] sm:$0xff] }
 0x1a4   :  { %v9521_v44 = vpop.f32.mrf.mxu1 }
 0x1a6   :  { %v899_v8 = vpop.f32.mrf.mxu2 }
 0x1ac   :  { %v876_v2 = vpop.f32.mrf.mxu1 }
 0x1ae   :  { %v902_v30 = vpop.f32.mrf.mxu2 }
 0x1b4   :  { %v9592_v36 = vpop.f32.mrf.mxu1 }
 0x1b6   :  { %v9606_v55 = vpop.f32.mrf.mxu2 }
 0x1bc   :  { %v963_v48 = vpop.f32.mrf.mxu1 }
 0x1bd   :  { %v9612_v37 = vmax.f32 %v9521_v44, %v963_v48 }
 0x1be   :  { %v989_v52 = vpop.f32.mrf.mxu2 }
 0x1bf   :  { %v9617_v46 = vmax.f32 %v899_v8, %v989_v52  ;;  %1135 = vmatmul.f32.vlgmr.msra.gmra.mxu0 %v9612_v37  ;;  %1213 = vmatmul.f32.vlgmr.msra.gmra.mxu3 %v9612_v37  ;;  %v1344_v8 = vld [vmem:[%s14464_s26 + $0x228] sm:$0xff]  ;;  %v1294_v52 = vld [vmem:[%s14464_s26 + $0x98] sm:$0xff] }
 0x1c0   :  { %1413 = vmatpush.msra.mxu0 %v1349_v60  ;;  %1491 = vmatpush.msra.mxu3 %v1350_v13  ;;  %v1278_v60 = vld [vmem:[%s14464_s26 + $0x18] sm:$0xff] }
 0x1c1   :  { %1161 = vmatmul.f32.vlgmr.msra.gmra.mxu1 %v9617_v46  ;;  %v6954_v13 = vld [vmem:[%s14465_s27 + $0x238] sm:$0xff] }
 0x1c2   :  { %1455 = vmatpush.msra.mxu1 %v1338_v11  ;;  %1414 = vmatpush.msra.mxu0 %v1347_v14  ;;  %v1292_v11 = vld [vmem:[%s14464_s26 + $0x88] sm:$0xff]  ;;  %v6946_v14 = vld [vmem:[%s14465_s27 + $0x1f8] sm:$0xff] }
 0x1c3   :  { %1492 = vmatpush.msra.mxu3 %v1348_v43  ;;  %v1539_v43 = vld [vmem:[%s14465_s27 + $0xd0] sm:$0xff] }
 0x1c4   :  { %v966_v25 = vpop.f32.mrf.mxu1  ;;  %1456 = vmatpush.msra.mxu1 %v1336_v4  ;;  %1415 = vmatpush.msra.mxu0 %v1345_v62  ;;  %v1537_v62 = vld [vmem:[%s14465_s27 + $0xc0] sm:$0xff] }
 0x1c5   :  { %v9637_v19 = vmax.f32 %v876_v2, %v966_v25  ;;  %1493 = vmatpush.msra.mxu3 %v1346_v28  ;;  %v1318_v2 = vld [vmem:[%s14464_s26 + $0x158] sm:$0xff]  ;;  %v1284_v25 = vld [vmem:[%s14464_s26 + $0x48] sm:$0xff] }
 0x1c6   :  { %v992_v7 = vpop.f32.mrf.mxu2  ;;  %1457 = vmatpush.msra.mxu1 %v1334_v63  ;;  %1416 = vmatpush.msra.mxu0 %v1343_v42  ;;  %v1286_v63 = vld [vmem:[%s14464_s26 + $0x58] sm:$0xff] }
 0x1c7   :  { %v9651_v32 = vmax.f32 %v902_v30, %v992_v7  ;;  %1138 = vmatmul.f32.gmra.mxu0 %v9637_v19  ;;  %1216 = vmatmul.f32.gmra.mxu3 %v9637_v19  ;;  %v1314_v30 = vld [vmem:[%s14464_s26 + $0x138] sm:$0xff]  ;;  %v1276_v7 = vld [vmem:[%s14464_s26 + $0x8] sm:$0xff] }
 0x1c8   :  { %1458 = vmatpush.msra.mxu1 %v1332_v54  ;;  %1494 = vmatpush.msra.mxu3 %v1344_v8  ;;  %v1282_v54 = vld [vmem:[%s14464_s26 + $0x38] sm:$0xff]  ;;  %v6951_v8 = vld [vmem:[%s14465_s27 + $0x220] sm:$0xff] }
 0x1c9   :  { %1164 = vmatmul.f32.gmra.mxu1 %v9651_v32  ;;  %1417 = vmatpush.msra.mxu0 %v1341_v10  ;;  %v6942_v28 = vld [vmem:[%s14465_s27 + $0x1d8] sm:$0xff]  ;;  %v6949_v10 = vld [vmem:[%s14465_s27 + $0x210] sm:$0xff] }
 0x1ca   :  { %1459 = vmatpush.msra.mxu1 %v1330_v34  ;;  %1495 = vmatpush.msra.mxu3 %v1342_v3  ;;  %v6950_v34 = vld [vmem:[%s14465_s27 + $0x218] sm:$0xff] }
 0x1cb   :  { %1418 = vmatpush.msra.mxu0 %v1339_v31  ;;  %v6938_v42 = vld [vmem:[%s14465_s27 + $0x1b8] sm:$0xff] }
 0x1cc   :  { %v9680_v27 = vpop.f32.mrf.mxu3  ;;  %v969_v61 = vpop.f32.mrf.mxu1  ;;  %1460 = vmatpush.msra.mxu1 %v1328_v6  ;;  %1496 = vmatpush.msra.mxu3 %v1340_v21  ;;  %v6944_v6 = vld [vmem:[%s14465_s27 + $0x1e8] sm:$0xff]  ;;  %v6934_v3 = vld [vmem:[%s14465_s27 + $0x198] sm:$0xff] }
 0x1cd   :  { %v9683_v44 = vmax.f32 %v9592_v36, %v969_v61  ;;  %v6940_v61 = vld [vmem:[%s14465_s27 + $0x1c8] sm:$0xff] }
 0x1ce   :  { %v995_v24 = vpop.f32.mrf.mxu2  ;;  %1461 = vmatpush.msra.mxu1 %v1326_v47  ;;  %v1535_v47 = vld [vmem:[%s14465_s27 + $0xb0] sm:$0xff]  ;;  %v6932_v21 = vld [vmem:[%s14465_s27 + $0x188] sm:$0xff] }
 0x1cf   :  { %v9695_v29 = vmax.f32 %v9606_v55, %v995_v24  ;;  %1141 = vmatmul.f32.gmra.mxu0 %v9683_v44  ;;  %1219 = vmatmul.f32.gmra.mxu3 %v9683_v44  ;;  %v1531_v24 = vld [vmem:[%s14465_s27 + $0x90] sm:$0xff] }
 0x1d0   :  { %1462 = vmatpush.msra.mxu1 %v1324_v12  ;;  %v6953_v12 = vld [vmem:[%s14465_s27 + $0x230] sm:$0xff] }
 0x1d1   :  { %1167 = vmatmul.f32.gmra.mxu1 %v9695_v29 }
 0x1d2   :  { %1463 = vmatpush.msra.mxu1 %v1322_v59  ;;  %v1529_v59 = vld [vmem:[%s14465_s27 + $0x80] sm:$0xff] }
 0x1d4   :  { %v928_v53 = vpop.f32.mrf.mxu3  ;;  %1464 = vmatpush.msra.mxu1 %v1320_v35  ;;  %v6947_v35 = vld [vmem:[%s14465_s27 + $0x200] sm:$0xff] }
 0x1d6   :  { %1465 = vmatpush.msra.mxu1 %v1318_v2  ;;  %v6945_v2 = vld [vmem:[%s14465_s27 + $0x1f0] sm:$0xff] }
 0x1d7   :  { %1239 = vmatmul.f32.vlgmr.msrb.gmra.mxu0 %v9617_v46  ;;  %1393 = vmatmul.f32.vlgmr.msrb.gmra.mxu3 %v9617_v46 }
 0x1d8   :  { %1466 = vmatpush.msra.mxu1 %v1316_v26  ;;  %1663 = vmatpush.msrb.mxu3 %v6954_v13  ;;  %v6930_v26 = vld [vmem:[%s14465_s27 + $0x178] sm:$0xff]  ;;  %v6989_v13 = vld [vmem:[%s14465_s27 + $0x310] sm:$0xff] }
 0x1d9   :  { %1367 = vmatmul.f32.vlgmr.msrb.gmra.mxu1 %v9612_v37  ;;  %1617 = vmatpush.msrb.mxu0 %v6953_v12  ;;  %v6977_v12 = vld [vmem:[%s14465_s27 + $0x2b0] sm:$0xff] }
 0x1da   :  { %1467 = vmatpush.msra.mxu1 %v1314_v30  ;;  %v6943_v30 = vld [vmem:[%s14465_s27 + $0x1e0] sm:$0xff] }
 0x1db   :  { %1618 = vmatpush.msrb.mxu0 %v6951_v8  ;;  %v6973_v8 = vld [vmem:[%s14465_s27 + $0x290] sm:$0xff] }
 0x1dc   :  { %v931_v51 = vpop.f32.mrf.mxu3  ;;  %1468 = vmatpush.msra.mxu1 %v1312_v39  ;;  %v1521_v39 = vld [vmem:[%s14465_s27 + $0x40] sm:$0xff] }
 0x1dd   :  { %1619 = vmatpush.msrb.mxu0 %v6949_v10  ;;  %v6958_v10 = vld [vmem:[%s14465_s27 + $0x258] sm:$0xff] }
 0x1de   :  { %1469 = vmatpush.msra.mxu1 %v1310_v20  ;;  %v6941_v20 = vld [vmem:[%s14465_s27 + $0x1d0] sm:$0xff] }
 0x1df   :  { %1242 = vmatmul.f32.gmra.mxu0 %v9651_v32  ;;  %1396 = vmatmul.f32.gmra.mxu3 %v9651_v32 }
 0x1e0   :  { %1470 = vmatpush.msra.mxu1 %v1308_v0  ;;  %1620 = vmatpush.msrb.mxu0 %v6947_v35  ;;  %v1519_v0 = vld [vmem:[%s14465_s27 + $0x30] sm:$0xff]  ;;  %v6956_v35 = vld [vmem:[%s14465_s27 + $0x248] sm:$0xff] }
 0x1e1   :  { %1370 = vmatmul.f32.gmra.mxu1 %v9637_v19 }
 0x1e2   :  { %1621 = vmatpush.msrb.mxu0 %v6945_v2 }
 0x1e4   :  { %v1015_v58 = vpop.f32.mrf.mxu3  ;;  %1622 = vmatpush.msrb.mxu0 %v6943_v30 }
 0x1e5   :  { %v1026_v36 = vmax.f32 %v9680_v27, %v1015_v58  ;;  %v6939_v58 = vld [vmem:[%s14465_s27 + $0x1c0] sm:$0xff] }
 0x1e6   :  { %1623 = vmatpush.msrb.mxu0 %v6941_v20 }
 0x1e7   :  { %6911 = vmatmul.msk.f32.vlgmr.msrb.gmra.mxu2 %vm14381_vm5, %v1026_v36  ;;  %1245 = vmatmul.f32.gmra.mxu0 %v9695_v29 }
 0x1e8   :  { %1399 = vmatmul.f32.gmra.mxu3 %v9695_v29  ;;  %1429 = vmatpush.msrb.mxu2 %v1306_v45  ;;  %v1517_v45 = vld [vmem:[%s14465_s27 + $0x20] sm:$0xff] }
 0x1e9   :  { %1373 = vmatmul.f32.gmra.mxu1 %v9683_v44  ;;  %1624 = vmatpush.msrb.mxu0 %v6939_v58 }
 0x1ea   :  { %1430 = vmatpush.msrb.mxu2 %v1304_v23  ;;  %v6937_v23 = vld [vmem:[%s14465_s27 + $0x1b0] sm:$0xff] }
 0x1eb   :  { %1625 = vmatpush.msrb.mxu0 %v6937_v23 }
 0x1ec   :  { %v1018_v55 = vpop.f32.mrf.mxu3  ;;  %1431 = vmatpush.msrb.mxu2 %v1302_v50 }
 0x1ed   :  { %v1029_v48 = vmax.f32 %v928_v53, %v1018_v55  ;;  %v1515_v55 = vld [vmem:[%s14465_s27 + $0x10] sm:$0xff] }
 0x1ee   :  { %1432 = vmatpush.msrb.mxu2 %v1300_v15  ;;  %v7001_v15 = vld [vmem:[%s14465_s27 + $0x370] sm:$0xff] }
 0x1ef   :  { %6912 = vmatmul.msk.f32.gmra.mxu2 %vm14381_vm5, %v1029_v48  ;;  %6917 = vmatmul.msk.f32.vlgmr.msra.gmra.mxu0 %vm14381_vm5, %v1026_v36 }
 0x1f0   :  { %6920 = vmatmul.msk.f32.vlgmr.msra.gmra.mxu3 %vm14381_vm5, %v1026_v36  ;;  %1433 = vmatpush.msrb.mxu2 %v1298_v9  ;;  %v6999_v9 = vld [vmem:[%s14465_s27 + $0x360] sm:$0xff] }
 0x1f1   :  { %1471 = vmatmul.f32.vlgmr.msra.gmra.mxu1 %v9617_v46  ;;  %v1288_v46 = vld [vmem:[%s14464_s26 + $0x68] sm:$0xff] }
 0x1f2   :  { %1434 = vmatpush.msrb.mxu2 %v1296_v16  ;;  %v1513_v16 = vld [vmem:[%s14465_s27] sm:$0xff] }
 0x1f4   :  { %v1021_v56 = vpop.f32.mrf.mxu3  ;;  %1435 = vmatpush.msrb.mxu2 %v1294_v52 }
 0x1f5   :  { %v1032_v4 = vmax.f32 %v931_v51, %v1021_v56  ;;  %v6926_v51 = vld [vmem:[%s14465_s27 + $0x158] sm:$0xff]  ;;  %v6997_v56 = vld [vmem:[%s14465_s27 + $0x350] sm:$0xff] }
 0x1f6   :  { %1436 = vmatpush.msrb.mxu2 %v1292_v11  ;;  %v6933_v11 = vld [vmem:[%s14465_s27 + $0x190] sm:$0xff] }
 0x1f7   :  { %6913 = vmatmul.msk.f32.gmra.mxu2 %vm14381_vm5, %v1032_v4  ;;  %6918 = vmatmul.msk.f32.gmra.mxu0 %vm14381_vm5, %v1029_v48 }
 0x1f8   :  { %6921 = vmatmul.msk.f32.gmra.mxu3 %vm14381_vm5, %v1029_v48  ;;  %1437 = vmatpush.msrb.mxu2 %v1290_v33  ;;  %v6931_v33 = vld [vmem:[%s14465_s27 + $0x180] sm:$0xff] }
 0x1f9   :  { %1474 = vmatmul.f32.gmra.mxu1 %v9651_v32  ;;  %v6952_v32 = vld [vmem:[%s14465_s27 + $0x228] sm:$0xff] }
 0x1fa   :  { %1438 = vmatpush.msrb.mxu2 %v1288_v46  ;;  %1664 = vmatpush.msrb.mxu3 %v6952_v32  ;;  %v6995_v46 = vld [vmem:[%s14465_s27 + $0x340] sm:$0xff] }
 0x1fc   :  { %1439 = vmatpush.msrb.mxu2 %v1286_v63  ;;  %1665 = vmatpush.msrb.mxu3 %v6950_v34  ;;  %v6929_v63 = vld [vmem:[%s14465_s27 + $0x170] sm:$0xff] }
 0x1fe   :  { %1440 = vmatpush.msrb.mxu2 %v1284_v25  ;;  %v6993_v25 = vld [vmem:[%s14465_s27 + $0x330] sm:$0xff] }
 0x1ff   :  { %6914 = vmatmul.msk.f32.vlgmr.msra.gmra.mxu2 %vm14381_vm5, %v1026_v36  ;;  %6919 = vmatmul.msk.f32.gmra.mxu0 %vm14381_vm5, %v1032_v4  ;;  %v6924_v36 = vld [vmem:[%s14465_s27 + $0x148] sm:$0xff] }
 0x200   :  { %6922 = vmatmul.msk.f32.gmra.mxu3 %vm14381_vm5, %v1032_v4  ;;  %1441 = vmatpush.msrb.mxu2 %v1282_v54  ;;  %v6927_v54 = vld [vmem:[%s14465_s27 + $0x160] sm:$0xff] }
 0x201   :  { %1477 = vmatmul.f32.gmra.mxu1 %v9695_v29  ;;  %v6936_v29 = vld [vmem:[%s14465_s27 + $0x1a8] sm:$0xff] }
 0x202   :  { %1442 = vmatpush.msrb.mxu2 %v1280_v41  ;;  %v6991_v41 = vld [vmem:[%s14465_s27 + $0x320] sm:$0xff] }
 0x204   :  { %1443 = vmatpush.msrb.mxu2 %v1278_v60 }
 0x206   :  { %1444 = vmatpush.msrb.mxu2 %v1276_v7  ;;  %v6925_v7 = vld [vmem:[%s14465_s27 + $0x150] sm:$0xff] }
 0x207   :  { %6915 = vmatmul.msk.f32.gmra.mxu2 %vm14381_vm5, %v1029_v48  ;;  %v6935_v48 = vld [vmem:[%s14465_s27 + $0x1a0] sm:$0xff] }
 0x208   :  { %1626 = vmatpush.msrb.mxu0 %v6935_v48 }
 0x20a   :  { %1627 = vmatpush.msrb.mxu0 %v6933_v11  ;;  %v7051_v11 = vld [vmem:[%s14465_s27 + $0x4e0] sm:$0xff] }
 0x20c   :  { %1628 = vmatpush.msrb.mxu0 %v6931_v33 }
 0x20e   :  { %1629 = vmatpush.msrb.mxu0 %v6929_v63  ;;  %v7049_v63 = vld [vmem:[%s14465_s27 + $0x4d0] sm:$0xff] }
 0x20f   :  { %6916 = vmatmul.msk.f32.gmra.mxu2 %vm14381_vm5, %v1032_v4 }
 0x210   :  { %1630 = vmatpush.msrb.mxu0 %v6927_v54  ;;  %v7047_v54 = vld [vmem:[%s14465_s27 + $0x4c0] sm:$0xff] }
 0x212   :  { %1631 = vmatpush.msrb.mxu0 %v6925_v7  ;;  %v7009_v7 = vld [vmem:[%s14465_s27 + $0x3b0] sm:$0xff] }
 0x217   :  { %1445 = vmatmul.f32.vlgmr.msrb.gmra.mxu2 %v9612_v37  ;;  %v1543_v37 = vld [vmem:[%s14465_s27 + $0xf0] sm:$0xff] }
 0x218   :  { %1713 = vmatpush.msrb.mxu1 %v1543_v37  ;;  %v6923_v37 = vld [vmem:[%s14465_s27 + $0x140] sm:$0xff] }
 0x219   :  { %1632 = vmatpush.msrb.mxu0 %v6923_v37  ;;  %v7007_v37 = vld [vmem:[%s14465_s27 + $0x3a0] sm:$0xff] }
 0x21a   :  { %1714 = vmatpush.msrb.mxu1 %v1541_v5  ;;  %v6985_v5 = vld [vmem:[%s14465_s27 + $0x2f0] sm:$0xff] }
 0x21c   :  { %1715 = vmatpush.msrb.mxu1 %v1539_v43  ;;  %v6981_v43 = vld [vmem:[%s14465_s27 + $0x2d0] sm:$0xff] }
 0x21e   :  { %1716 = vmatpush.msrb.mxu1 %v1537_v62 }
 0x21f   :  { %1448 = vmatmul.f32.gmra.mxu2 %v9637_v19  ;;  %v6948_v19 = vld [vmem:[%s14465_s27 + $0x208] sm:$0xff] }
 0x220   :  { %1666 = vmatpush.msrb.mxu3 %v6948_v19  ;;  %1717 = vmatpush.msrb.mxu1 %v1535_v47  ;;  %v6987_v19 = vld [vmem:[%s14465_s27 + $0x300] sm:$0xff]  ;;  %v6962_v47 = vld [vmem:[%s14465_s27 + $0x278] sm:$0xff] }
 0x221   :  { %1698 = vmatpush.msra.mxu0 %v6962_v47  ;;  %v6961_v47 = vld [vmem:[%s14465_s27 + $0x270] sm:$0xff] }
 0x222   :  { %1667 = vmatpush.msrb.mxu3 %v6946_v14  ;;  %v6983_v14 = vld [vmem:[%s14465_s27 + $0x2e0] sm:$0xff]  ;;  %1652 = vmatpush.msra.mxu2 %v6961_v47 }
 0x224   :  { %1668 = vmatpush.msrb.mxu3 %v6944_v6 }
 0x226   :  { %1669 = vmatpush.msrb.mxu3 %v6942_v28  ;;  %v6979_v28 = vld [vmem:[%s14465_s27 + $0x2c0] sm:$0xff] }
 0x227   :  { %1451 = vmatmul.f32.gmra.mxu2 %v9683_v44  ;;  %v1533_v44 = vld [vmem:[%s14465_s27 + $0xa0] sm:$0xff] }
 0x228   :  { %1670 = vmatpush.msrb.mxu3 %v6940_v61  ;;  %1718 = vmatpush.msrb.mxu1 %v1533_v44  ;;  %v6960_v61 = vld [vmem:[%s14465_s27 + $0x268] sm:$0xff] }
 0x229   :  { %1699 = vmatpush.msra.mxu0 %v6960_v61  ;;  %v7003_v61 = vld [vmem:[%s14465_s27 + $0x380] sm:$0xff] }
 0x22a   :  { %1671 = vmatpush.msrb.mxu3 %v6938_v42  ;;  %1719 = vmatpush.msrb.mxu1 %v1531_v24  ;;  %v6975_v42 = vld [vmem:[%s14465_s27 + $0x2a0] sm:$0xff] }
 0x22b   :  { %1700 = vmatpush.msra.mxu0 %v6958_v10  ;;  %v7008_v10 = vld [vmem:[%s14465_s27 + $0x3a8] sm:$0xff] }
 0x22c   :  { %1672 = vmatpush.msrb.mxu3 %v6936_v29  ;;  %1720 = vmatpush.msrb.mxu1 %v1529_v59 }
 0x22d   :  { %1701 = vmatpush.msra.mxu0 %v6956_v35  ;;  %v1526_v35 = vld [vmem:[%s14465_s27 + $0x68] sm:$0xff] }
 0x22e   :  { %1673 = vmatpush.msrb.mxu3 %v6934_v3  ;;  %1721 = vmatpush.msrb.mxu1 %v1527_v1  ;;  %v6971_v1 = vld [vmem:[%s14465_s27 + $0x280] sm:$0xff] }
 0x230   :  { %1674 = vmatpush.msrb.mxu3 %v6932_v21  ;;  %1722 = vmatpush.msrb.mxu1 %v1525_v22 }
 0x232   :  { %1675 = vmatpush.msrb.mxu3 %v6930_v26  ;;  %1723 = vmatpush.msrb.mxu1 %v1523_v57 }
 0x234   :  { %1676 = vmatpush.msrb.mxu3 %v6928_v40  ;;  %1724 = vmatpush.msrb.mxu1 %v1521_v39 }
 0x236   :  { %1677 = vmatpush.msrb.mxu3 %v6926_v51  ;;  %1725 = vmatpush.msrb.mxu1 %v1519_v0 }
 0x238   :  { %1678 = vmatpush.msrb.mxu3 %v6924_v36  ;;  %1726 = vmatpush.msrb.mxu1 %v1517_v45 }
 0x23a   :  { %1862 = vmatpush.msra.mxu3 %v7001_v15  ;;  %1727 = vmatpush.msrb.mxu1 %v1515_v55  ;;  %v1544_v15 = vld [vmem:[%s14465_s27 + $0xf8] sm:$0xff] }
 0x23c   :  { %v9866_v27 = vpop.f32.mrf.mxu0  ;;  %1863 = vmatpush.msra.mxu3 %v6999_v9  ;;  %1728 = vmatpush.msrb.mxu1 %v1513_v16 }
 0x23e   :  { %v9932_v17 = vpop.f32.mrf.mxu1  ;;  %1864 = vmatpush.msra.mxu3 %v6997_v56  ;;  %1897 = vmatpush.msra.mxu1 %v7009_v7 }
 0x23f   :  { %v1163_v29 = vadd.f32 %v9932_v17, %v9866_v27 }
 0x240   :  { %1865 = vmatpush.msra.mxu3 %v6995_v46  ;;  %1898 = vmatpush.msra.mxu1 %v7007_v37  ;;  %v7067_v37 = vld [vmem:[%s14465_s27 + $0x540] sm:$0xff] }
 0x242   :  { %v9915_v53 = vpop.f32.mrf.mxu3  ;;  %1866 = vmatpush.msra.mxu3 %v6993_v25  ;;  %v1538_v25 = vld [vmem:[%s14465_s27 + $0xc8] sm:$0xff] }
 0x244   :  { %v9904_v31 = vpop.f32.mrf.mxu0  ;;  %1867 = vmatpush.msra.mxu3 %v6991_v41 }
 0x246   :  { %v9974_v52 = vpop.f32.mrf.mxu1  ;;  %1868 = vmatpush.msra.mxu3 %v6989_v13 }
 0x247   :  { %v1166_v30 = vadd.f32 %v9974_v52, %v9904_v31  ;;  %v7053_v31 = vld [vmem:[%s14465_s27 + $0x4f0] sm:$0xff]  ;;  %v1542_v52 = vld [vmem:[%s14465_s27 + $0xe8] sm:$0xff] }
 0x248   :  { %1869 = vmatpush.msra.mxu3 %v6987_v19 }
 0x24a   :  { %v9957_v50 = vpop.f32.mrf.mxu3  ;;  %1870 = vmatpush.msra.mxu3 %v6985_v5  ;;  %v1534_v5 = vld [vmem:[%s14465_s27 + $0xa8] sm:$0xff] }
 0x24c   :  { %v9937_v18 = vpop.f32.mrf.mxu0  ;;  %1871 = vmatpush.msra.mxu3 %v6983_v14  ;;  %v1532_v14 = vld [vmem:[%s14465_s27 + $0x98] sm:$0xff] }
 0x24e   :  { %v1168_v32 = vpop.f32.mrf.mxu1  ;;  %1872 = vmatpush.msra.mxu3 %v6981_v43 }
 0x24f   :  { %v1169_v55 = vadd.f32 %v1168_v32, %v9937_v18  ;;  %v1540_v18 = vld [vmem:[%s14465_s27 + $0xd8] sm:$0xff] }
 0x250   :  { %1873 = vmatpush.msra.mxu3 %v6979_v28  ;;  %v1536_v32 = vld [vmem:[%s14465_s27 + $0xb8] sm:$0xff]  ;;  %v1530_v28 = vld [vmem:[%s14465_s27 + $0x88] sm:$0xff] }
 0x252   :  { %v10002_v60 = vpop.f32.mrf.mxu3  ;;  %1874 = vmatpush.msra.mxu3 %v6977_v12  ;;  %v7010_v12 = vld [vmem:[%s14465_s27 + $0x3b8] sm:$0xff] }
 0x254   :  { %v9982_v4 = vpop.f32.mrf.mxu0  ;;  %1875 = vmatpush.msra.mxu3 %v6975_v42 }
 0x256   :  { %v1368_v44 = vpop.f32.mrf.mxu1  ;;  %1876 = vmatpush.msra.mxu3 %v6973_v8  ;;  %v1528_v8 = vld [vmem:[%s14465_s27 + $0x78] sm:$0xff] }
 0x258   :  { %1877 = vmatpush.msra.mxu3 %v6971_v1  ;;  %v7087_v1 = vld [vmem:[%s14465_s27 + $0x5e0] sm:$0xff] }
 0x25a   :  { %v1394_v6 = vpop.f32.mrf.mxu3 }
 0x25b   :  { %v1395_v59 = vadd.f32 %v1394_v6, %v1368_v44  ;;  %v7005_v6 = vld [vmem:[%s14465_s27 + $0x390] sm:$0xff] }
 0x25c   :  { %v10010_v34 = vpop.f32.mrf.mxu0  ;;  %1899 = vmatpush.msra.mxu1 %v7005_v6 }
 0x25d   :  { %v1244_v6 = vadd.f32 %v10010_v34, %v9957_v50 }
 0x25e   :  { %v1371_v26 = vpop.f32.mrf.mxu1  ;;  %1900 = vmatpush.msra.mxu1 %v7003_v61 }
 0x262   :  { %v1397_v27 = vpop.f32.mrf.mxu3 }
 0x263   :  { %v1398_v40 = vadd.f32 %v1397_v27, %v1371_v26  ;;  %v7006_v26 = vld [vmem:[%s14465_s27 + $0x398] sm:$0xff] }
 0x264   :  { %v10027_v62 = vpop.f32.mrf.mxu0 }
 0x266   :  { %v1374_v45 = vpop.f32.mrf.mxu1 }
 0x26a   :  { %v1188_v24 = vpop.f32.mrf.mxu2 }
 0x26b   :  { %v1189_v21 = vadd.f32 %v1188_v24, %v1163_v29  ;;  %v1400_v0 = vpop.f32.mrf.mxu3  ;;  %v7089_v24 = vld [vmem:[%s14465_s27 + $0x5f0] sm:$0xff]  ;;  %v6959_v29 = vld [vmem:[%s14465_s27 + $0x260] sm:$0xff] }
 0x26c   :  { %v1420_v3 = vpop.f32.mrf.mxu0  ;;  %v1401_v48 = vadd.f32 %v1400_v0, %v1374_v45  ;;  %1653 = vmatpush.msra.mxu2 %v6959_v29  ;;  %v1520_v0 = vld [vmem:[%s14465_s27 + $0x38] sm:$0xff]  ;;  %v1549_v45 = vld [vmem:[%s14465_s27 + $0x120] sm:$0xff] }
 0x26d   :  { %v1421_v22 = vadd.f32 %v1420_v3, %v1395_v59  ;;  %v6957_v3 = vld [vmem:[%s14465_s27 + $0x250] sm:$0xff] }
 0x26e   :  { %1654 = vmatpush.msra.mxu2 %v6957_v3 }
 0x26f   :  { %v10058_v2 = vmax.f32 %v1189_v21, %v1421_v22  ;;  %v7085_v21 = vld [vmem:[%s14465_s27 + $0x5d0] sm:$0xff]  ;;  %v1524_v22 = vld [vmem:[%s14465_s27 + $0x58] sm:$0xff] }
 0x271   :  { %1729 = vmatmul.f32.vlgmr.msrb.gmra.mxu1 %v10058_v2  ;;  %v1600_v58 = vrot.slane %v10058_v2, 1  ;;  %v1846_v44 = vrot.slane %v10058_v2, 2 }
 0x272   :  { %v1191_v57 = vpop.f32.mrf.mxu2  ;;  %1943 = vmatpush.msrb.mxu1 %v7010_v12  ;;  %v7059_v12 = vld [vmem:[%s14465_s27 + $0x500] sm:$0xff] }
 0x273   :  { %v1192_v17 = vadd.f32 %v1191_v57, %v1166_v30  ;;  %v6955_v57 = vld [vmem:[%s14465_s27 + $0x240] sm:$0xff] }
 0x274   :  { %v1423_v39 = vpop.f32.mrf.mxu0  ;;  %1944 = vmatpush.msrb.mxu1 %v7008_v10  ;;  %v7083_v30 = vld [vmem:[%s14465_s27 + $0x5c0] sm:$0xff]  ;;  %1655 = vmatpush.msra.mxu2 %v6955_v57  ;;  %v1247_v10 = vadd.f32 %v10027_v62, %v10002_v60  ;;  %v7046_v60 = vld [vmem:[%s14465_s27 + $0x4b8] sm:$0xff] }
 0x275   :  { %v1424_v20 = vadd.f32 %v1423_v39, %v1398_v40  ;;  %v1522_v40 = vld [vmem:[%s14465_s27 + $0x48] sm:$0xff]  ;;  %v1552_v57 = vld [vmem:[%s14465_s27 + $0x138] sm:$0xff] }
 0x276   :  { %1945 = vmatpush.msrb.mxu1 %v7006_v26  ;;  %v7004_v39 = vld [vmem:[%s14465_s27 + $0x388] sm:$0xff]  ;;  %v7045_v26 = vld [vmem:[%s14465_s27 + $0x4b0] sm:$0xff] }
 0x277   :  { %v10063_v51 = vmax.f32 %v1192_v17, %v1424_v20  ;;  %v7081_v20 = vld [vmem:[%s14465_s27 + $0x5b0] sm:$0xff] }
 0x278   :  { %1946 = vmatpush.msrb.mxu1 %v7004_v39  ;;  %v7043_v39 = vld [vmem:[%s14465_s27 + $0x4a0] sm:$0xff] }
 0x279   :  { %1732 = vmatmul.f32.gmra.mxu1 %v10063_v51  ;;  %v1601_v36 = vrot.slane %v10063_v51, 1  ;;  %v1847_v43 = vrot.slane %v10063_v51, 2 }
 0x27a   :  { %v1194_v23 = vpop.f32.mrf.mxu2 }
 0x27b   :  { %v1602_v9 = vsel %vm14466_vm8, %v1600_v58, %v1601_v36  ;;  %v1195_v56 = vadd.f32 %v1194_v23, %v1169_v55  ;;  %v10144_v59 = vsel %vm14468_vm3, %v1846_v44, %v1847_v43  ;;  %v1551_v58 = vld [vmem:[%s14465_s27 + $0x130] sm:$0xff]  ;;  %v7079_v23 = vld [vmem:[%s14465_s27 + $0x5a0] sm:$0xff]  ;;  %v1472_v55 = vpop.f32.mrf.mxu1 }
 0x27c   :  { %v1426_v16 = vpop.f32.mrf.mxu0  ;;  %1633 = vmatmul.f32.vlgmr.msrb.gmra.mxu0 %v1602_v9  ;;  %1679 = vmatmul.f32.vlgmr.msrb.gmra.mxu3 %v1602_v9  ;;  %v1516_v9 = vld [vmem:[%s14465_s27 + $0x18] sm:$0xff] }
 0x27d   :  { %v1427_v33 = vadd.f32 %v1426_v16, %v1401_v48  ;;  %1759 = vmatpush.msrb.mxu0 %v1544_v15  ;;  %2051 = vmatpush.msrb.mxu3 %v7053_v31  ;;  %v1518_v15 = vld [vmem:[%s14465_s27 + $0x28] sm:$0xff]  ;;  %v1547_v31 = vld [vmem:[%s14465_s27 + $0x110] sm:$0xff]  ;;  %v1545_v16 = vld [vmem:[%s14465_s27 + $0x100] sm:$0xff] }
 0x27e   :  { %1748 = vmatpush.msrb.mxu2 %v1551_v58  ;;  %v7077_v48 = vld [vmem:[%s14465_s27 + $0x590] sm:$0xff] }
 0x27f   :  { %v10085_v46 = vmax.f32 %v1195_v56, %v1427_v33  ;;  %1760 = vmatpush.msrb.mxu0 %v1542_v52  ;;  %2052 = vmatpush.msrb.mxu3 %v7051_v11  ;;  %v1498_v52 = vpop.f32.mrf.mxu3  ;;  %v7075_v11 = vld [vmem:[%s14465_s27 + $0x580] sm:$0xff]  ;;  %v1514_v56 = vld [vmem:[%s14465_s27 + $0x8] sm:$0xff]  ;;  %v7041_v58 = vld [vmem:[%s14465_s27 + $0x490] sm:$0xff] }
 0x280   :  { %1749 = vmatpush.msrb.mxu2 %v1549_v45  ;;  %v7042_v45 = vld [vmem:[%s14465_s27 + $0x498] sm:$0xff] }
 0x281   :  { %v1606_v41 = vrot.slane %v10085_v46, 1  ;;  %1761 = vmatpush.msrb.mxu0 %v1540_v18  ;;  %2053 = vmatpush.msrb.mxu3 %v7049_v63  ;;  %v1852_v27 = vrot.slane %v10085_v46, 2  ;;  %v7073_v18 = vld [vmem:[%s14465_s27 + $0x570] sm:$0xff] }
 0x282   :  { %v10100_v13 = vpop.f32.mrf.mxu2  ;;  %1750 = vmatpush.msrb.mxu2 %v1547_v31  ;;  %v7040_v31 = vld [vmem:[%s14465_s27 + $0x488] sm:$0xff] }
 0x283   :  { %v1607_v19 = vsel %vm14467_vm10, %v1601_v36, %v1606_v41  ;;  %1762 = vmatpush.msrb.mxu0 %v1538_v25  ;;  %2054 = vmatpush.msrb.mxu3 %v7047_v54  ;;  %v10193_v36 = vsel %vm14469_vm11, %v1847_v43, %v1852_v27  ;;  %v7071_v25 = vld [vmem:[%s14465_s27 + $0x560] sm:$0xff]  ;;  %v7069_v54 = vld [vmem:[%s14465_s27 + $0x550] sm:$0xff]  ;;  %v1241_v41 = vadd.f32 %v9982_v4, %v9915_v53  ;;  %v1475_v7 = vpop.f32.mrf.mxu1 }
 0x284   :  { %1636 = vmatmul.f32.gmra.mxu0 %v1607_v19  ;;  %1682 = vmatmul.f32.gmra.mxu3 %v1607_v19  ;;  %v7065_v43 = vld [vmem:[%s14465_s27 + $0x530] sm:$0xff]  ;;  %v7063_v4 = vld [vmem:[%s14465_s27 + $0x520] sm:$0xff] }
 0x285   :  { %1763 = vmatpush.msrb.mxu0 %v1536_v32  ;;  %1751 = vmatpush.msrb.mxu2 %v1545_v16 }
 0x287   :  { %1764 = vmatpush.msrb.mxu0 %v1534_v5  ;;  %v1501_v19 = vpop.f32.mrf.mxu3  ;;  %v1267_v5 = vadd.f32 %v10100_v13, %v1241_v41  ;;  %v7061_v13 = vld [vmem:[%s14465_s27 + $0x510] sm:$0xff]  ;;  %v7034_v41 = vld [vmem:[%s14465_s27 + $0x458] sm:$0xff] }
 0x289   :  { %1765 = vmatpush.msrb.mxu0 %v1532_v14 }
 0x28a   :  { %v10132_v42 = vpop.f32.mrf.mxu2 }
 0x28b   :  { %1766 = vmatpush.msrb.mxu0 %v1530_v28  ;;  %v1270_v47 = vadd.f32 %v10132_v42, %v1244_v6  ;;  %v1478_v3 = vpop.f32.mrf.mxu1  ;;  %v7000_v6 = vld [vmem:[%s14465_s27 + $0x368] sm:$0xff] }
 0x28c   :  { %1878 = vmatmul.f32.vlgmr.msra.gmra.mxu3 %v10144_v59 }
 0x28d   :  { %2170 = vmatpush.msra.mxu3 %v7089_v24  ;;  %1767 = vmatpush.msrb.mxu0 %v1528_v8 }
 0x28f   :  { %2171 = vmatpush.msra.mxu3 %v7087_v1  ;;  %1768 = vmatpush.msrb.mxu0 %v1526_v35  ;;  %v1504_v62 = vpop.f32.mrf.mxu3 }
 0x291   :  { %2172 = vmatpush.msra.mxu3 %v7085_v21  ;;  %1769 = vmatpush.msrb.mxu0 %v1524_v22 }
 0x292   :  { %v10181_v17 = vpop.f32.mrf.mxu2 }
 0x293   :  { %2173 = vmatpush.msra.mxu3 %v7083_v30  ;;  %1770 = vmatpush.msrb.mxu0 %v1522_v40  ;;  %v1273_v30 = vadd.f32 %v10181_v17, %v1247_v10  ;;  %v1550_v17 = vld [vmem:[%s14465_s27 + $0x128] sm:$0xff]  ;;  %v7022_v10 = vld [vmem:[%s14465_s27 + $0x3f8] sm:$0xff] }
 0x294   :  { %1881 = vmatmul.f32.gmra.mxu3 %v10193_v36 }
 0x295   :  { %2174 = vmatpush.msra.mxu3 %v7081_v20  ;;  %1771 = vmatpush.msrb.mxu0 %v1520_v0  ;;  %v7044_v20 = vld [vmem:[%s14465_s27 + $0x4a8] sm:$0xff] }
 0x297   :  { %2175 = vmatpush.msra.mxu3 %v7079_v23  ;;  %1772 = vmatpush.msrb.mxu0 %v1518_v15  ;;  %v1548_v23 = vld [vmem:[%s14465_s27 + $0x118] sm:$0xff]  ;;  %v7039_v15 = vld [vmem:[%s14465_s27 + $0x480] sm:$0xff] }
 0x299   :  { %2176 = vmatpush.msra.mxu3 %v7077_v48  ;;  %1773 = vmatpush.msrb.mxu0 %v1516_v9 }
 0x29a   :  { %v1446_v33 = vpop.f32.mrf.mxu2 }
 0x29b   :  { %2177 = vmatpush.msra.mxu3 %v7075_v11  ;;  %1774 = vmatpush.msrb.mxu0 %v1514_v56  ;;  %v1473_v63 = vadd.f32 %v1472_v55, %v1446_v33  ;;  %v7037_v56 = vld [vmem:[%s14465_s27 + $0x470] sm:$0xff]  ;;  %v7038_v33 = vld [vmem:[%s14465_s27 + $0x478] sm:$0xff] }
 0x29d   :  { %2178 = vmatpush.msra.mxu3 %v7073_v18  ;;  %v1499_v32 = vadd.f32 %v1498_v52, %v1473_v63  ;;  %v1546_v18 = vld [vmem:[%s14465_s27 + $0x108] sm:$0xff]  ;;  %v7035_v63 = vld [vmem:[%s14465_s27 + $0x460] sm:$0xff] }
 0x29f   :  { %2179 = vmatpush.msra.mxu3 %v7071_v25  ;;  %v10243_v53 = vmax.f32 %v1267_v5, %v1499_v32  ;;  %v7036_v25 = vld [vmem:[%s14465_s27 + $0x468] sm:$0xff]  ;;  %v2154_v5 = vrot.slane %v10058_v2, 4 }
 0x2a0   :  { %v7032_v32 = vld [vmem:[%s14465_s27 + $0x448] sm:$0xff] }
 0x2a1   :  { %2180 = vmatpush.msra.mxu3 %v7069_v54  ;;  %v1603_v50 = vrot.slane %v10243_v53, 1  ;;  %v1849_v34 = vrot.slane %v10243_v53, 2  ;;  %v2003_v8 = vrot.slane %v10243_v53, 3  ;;  %v7033_v54 = vld [vmem:[%s14465_s27 + $0x450] sm:$0xff] }
 0x2a2   :  { %v1449_v14 = vpop.f32.mrf.mxu2 }
 0x2a3   :  { %v1476_v28 = vadd.f32 %v1475_v7, %v1449_v14  ;;  %2181 = vmatpush.msra.mxu3 %v7067_v37  ;;  %v7031_v7 = vld [vmem:[%s14465_s27 + $0x440] sm:$0xff]  ;;  %v2155_v37 = vrot.slane %v10063_v51, 4  ;;  %v7029_v14 = vld [vmem:[%s14465_s27 + $0x430] sm:$0xff] }
 0x2a5   :  { %v1502_v61 = vadd.f32 %v1501_v19, %v1476_v28  ;;  %2182 = vmatpush.msra.mxu3 %v7065_v43  ;;  %v7002_v19 = vld [vmem:[%s14465_s27 + $0x378] sm:$0xff]  ;;  %v10377_v28 = vsel %vm14380_vm1, %v2154_v5, %v2155_v37 }
 0x2a6   :  { %v7030_v43 = vld [vmem:[%s14465_s27 + $0x438] sm:$0xff] }
 0x2a7   :  { %v10252_v44 = vmax.f32 %v1270_v47, %v1502_v61  ;;  %2183 = vmatpush.msra.mxu3 %v7063_v4  ;;  %v7027_v4 = vld [vmem:[%s14465_s27 + $0x420] sm:$0xff]  ;;  %v7028_v47 = vld [vmem:[%s14465_s27 + $0x428] sm:$0xff]  ;;  %v6998_v61 = vld [vmem:[%s14465_s27 + $0x358] sm:$0xff] }
 0x2a9   :  { %v1604_v42 = vrot.slane %v10252_v44, 1  ;;  %v1850_v24 = vrot.slane %v10252_v44, 2  ;;  %v2004_v29 = vrot.slane %v10252_v44, 3  ;;  %2184 = vmatpush.msra.mxu3 %v7061_v13  ;;  %v7025_v13 = vld [vmem:[%s14465_s27 + $0x410] sm:$0xff] }
 0x2aa   :  { %v1452_v1 = vpop.f32.mrf.mxu2 }
 0x2ab   :  { %v1479_v35 = vadd.f32 %v1478_v3, %v1452_v1  ;;  %v1605_v21 = vsel %vm14470_vm4, %v1603_v50, %v1604_v42  ;;  %v10267_v22 = vsel %vm14471_vm0, %v1849_v34, %v1850_v24  ;;  %v10270_v27 = vsel %vm14374_vm12, %v2003_v8, %v2004_v29  ;;  %2185 = vmatpush.msra.mxu3 %v7059_v12  ;;  %v7026_v50 = vld [vmem:[%s14465_s27 + $0x418] sm:$0xff]  ;;  %v6996_v34 = vld [vmem:[%s14465_s27 + $0x348] sm:$0xff]  ;;  %v7023_v12 = vld [vmem:[%s14465_s27 + $0x400] sm:$0xff] }
 0x2ac   :  { %6963 = vmatmul.msk.f32.vlgmr.msra.gmra.mxu2 %vm14379_vm9, %v1605_v21  ;;  %6965 = vmatmul.msk.f32.vlgmr.msra.gmra.mxu0 %vm14379_vm9, %v1605_v21  ;;  %v6994_v8 = vld [vmem:[%s14465_s27 + $0x338] sm:$0xff]  ;;  %v6992_v3 = vld [vmem:[%s14465_s27 + $0x328] sm:$0xff]  ;;  %vm14371_vm0 = vcmask 130048  }
 0x2ad   :  { %v1505_v40 = vadd.f32 %v1504_v62, %v1479_v35  ;;  %7011 = vmatmul.msk.f32.vlgmr.msra.gmra.mxu1 %vm14379_vm9, %v10267_v22  ;;  %7055 = vmatmul.msk.f32.vlgmr.msrb.gmra.mxu3 %vm14379_vm9, %v10270_v27  ;;  %v7019_v35 = vld [vmem:[%s14465_s27 + $0x3e0] sm:$0xff]  ;;  %v7020_v21 = vld [vmem:[%s14465_s27 + $0x3e8] sm:$0xff] }
 0x2ae   :  { %2016 = vmatpush.msra.mxu0 %v7045_v26  ;;  %2062 = vmatpush.msra.mxu1 %v7046_v60  ;;  %v7017_v26 = vld [vmem:[%s14465_s27 + $0x3d0] sm:$0xff]  ;;  %v7018_v60 = vld [vmem:[%s14465_s27 + $0x3d8] sm:$0xff]  ;;  %v6988_v62 = vld [vmem:[%s14465_s27 + $0x308] sm:$0xff] }
 0x2af   :  { %v10297_v0 = vmax.f32 %v1273_v30, %v1505_v40  ;;  %1794 = vmatpush.msra.mxu2 %v1552_v57  ;;  %v7015_v57 = vld [vmem:[%s14465_s27 + $0x3c0] sm:$0xff]  ;;  %v2001_v30 = vrot.slane %v10063_v51, 3  ;;  %v7016_v40 = vld [vmem:[%s14465_s27 + $0x3c8] sm:$0xff] }
 0x2b0   :  { %2017 = vmatpush.msra.mxu0 %v7043_v39  ;;  %2063 = vmatpush.msra.mxu1 %v7044_v20  ;;  %v6986_v39 = vld [vmem:[%s14465_s27 + $0x2f8] sm:$0xff]  ;;  %v2000_v20 = vrot.slane %v10058_v2, 3 }
 0x2b1   :  { %v1608_v55 = vrot.slane %v10297_v0, 1  ;;  %v1854_v48 = vrot.slane %v10297_v0, 2  ;;  %v2008_v9 = vrot.slane %v10297_v0, 3  ;;  %1795 = vmatpush.msra.mxu2 %v1550_v17  ;;  %v7097_v17 = vld [vmem:[%s14465_s27 + $0x630] sm:$0xff] }
 0x2b2   :  { %2018 = vmatpush.msra.mxu0 %v7041_v58  ;;  %2064 = vmatpush.msra.mxu1 %v7042_v45  ;;  %v2002_v58 = vsel %vm14374_vm12, %v2000_v20, %v2001_v30  ;;  %v6982_v45 = vld [vmem:[%s14465_s27 + $0x2d8] sm:$0xff] }
 0x2b3   :  { %v1609_v16 = vsel %vm14472_vm7, %v1604_v42, %v1608_v55  ;;  %v10319_v52 = vsel %vm14473_vm14, %v1850_v24, %v1854_v48  ;;  %v10322_v11 = vsel %vm14374_vm12, %v2004_v29, %v2008_v9  ;;  %1796 = vmatpush.msra.mxu2 %v1548_v23  ;;  %v7024_v42 = vld [vmem:[%s14465_s27 + $0x408] sm:$0xff]  ;;  %v2160_v24 = vrot.slane %v10085_v46, 4  ;;  %v7021_v29 = vld [vmem:[%s14465_s27 + $0x3f0] sm:$0xff]  ;;  %v7095_v23 = vld [vmem:[%s14465_s27 + $0x620] sm:$0xff] }
 0x2b4   :  { %2019 = vmatpush.msra.mxu0 %v7039_v15  ;;  %2065 = vmatpush.msra.mxu1 %v7040_v31  ;;  %v7096_v15 = vld [vmem:[%s14465_s27 + $0x628] sm:$0xff]  ;;  %v7093_v55 = vld [vmem:[%s14465_s27 + $0x610] sm:$0xff]  ;;  %v2006_v48 = vrot.slane %v10085_v46, 3  ;;  %v7094_v9 = vld [vmem:[%s14465_s27 + $0x618] sm:$0xff] }
 0x2b5   :  { %6964 = vmatmul.msk.f32.gmra.mxu2 %vm14379_vm9, %v1609_v16  ;;  %6966 = vmatmul.msk.f32.gmra.mxu0 %vm14379_vm9, %v1609_v16  ;;  %v10423_v1 = vsel %vm14380_vm1, %v2155_v37, %v2160_v24  ;;  %v6980_v31 = vld [vmem:[%s14465_s27 + $0x2c8] sm:$0xff]  ;;  %v6978_v16 = vld [vmem:[%s14465_s27 + $0x2b8] sm:$0xff]  ;;  %v2162_v37 = vrot.slane %v10297_v0, 4 }
 0x2b6   :  { %7012 = vmatmul.msk.f32.gmra.mxu1 %vm14379_vm9, %v10319_v52  ;;  %7056 = vmatmul.msk.f32.gmra.mxu3 %vm14379_vm9, %v10322_v11  ;;  %v6976_v46 = vld [vmem:[%s14465_s27 + $0x2a8] sm:$0xff] }
 0x2b7   :  { %2020 = vmatpush.msra.mxu0 %v7037_v56  ;;  %2066 = vmatpush.msra.mxu1 %v7038_v33  ;;  %v7092_v56 = vld [vmem:[%s14465_s27 + $0x608] sm:$0xff]  ;;  %v2007_v33 = vsel %vm14374_vm12, %v2001_v30, %v2006_v48 }
 0x2b8   :  { %1797 = vmatpush.msra.mxu2 %v1546_v18  ;;  %v6974_v18 = vld [vmem:[%s14465_s27 + $0x298] sm:$0xff]  ;;  %v7084_v0 = vld [vmem:[%s14465_s27 + $0x5c8] sm:$0xff] }
 0x2b9   :  { %2021 = vmatpush.msra.mxu0 %v7035_v63  ;;  %2067 = vmatpush.msra.mxu1 %v7036_v25  ;;  %v6972_v63 = vld [vmem:[%s14465_s27 + $0x288] sm:$0xff]  ;;  %v7054_v25 = vld [vmem:[%s14465_s27 + $0x4f8] sm:$0xff] }
 0x2bb   :  { %2022 = vmatpush.msra.mxu0 %v7033_v54  ;;  %2068 = vmatpush.msra.mxu1 %v7034_v41  ;;  %v2158_v54 = vrot.slane %v10252_v44, 4  ;;  %v2157_v41 = vrot.slane %v10243_v53, 4 }
 0x2bd   :  { %2023 = vmatpush.msra.mxu0 %v7031_v7  ;;  %2069 = vmatpush.msra.mxu1 %v7032_v32  ;;  %v7052_v7 = vld [vmem:[%s14465_s27 + $0x4e8] sm:$0xff]  ;;  %v2159_v32 = vsel %vm14380_vm1, %v2157_v41, %v2158_v54  ;;  %v2163_v5 = vsel %vm14380_vm1, %v2158_v54, %v2162_v37 }
 0x2be   :  { %6967 = vmatmul.msk.f32.vlgmr.msrb.gmra.mxu2 %vm14379_vm9, %v10243_v53  ;;  %1775 = vmatmul.f32.vlgmr.msrb.gmra.mxu0 %v10058_v2  ;;  %v7098_v2 = vld [vmem:[%s14465_s27 + $0x638] sm:$0xff] }
 0x2bf   :  { %1908 = vmatpush.msrb.mxu2 %v7002_v19  ;;  %7013 = vmatmul.msk.f32.vlgmr.msrb.gmra.mxu1 %vm14379_vm9, %v10267_v22  ;;  %v6990_v22 = vld [vmem:[%s14465_s27 + $0x318] sm:$0xff]  ;;  %v7088_v19 = vld [vmem:[%s14465_s27 + $0x5e8] sm:$0xff] }
 0x2c0   :  { %2186 = vmatmul.f32.vlgmr.msra.gmra.mxu3 %v10377_v28  ;;  %2024 = vmatpush.msra.mxu0 %v7029_v14  ;;  %v7086_v14 = vld [vmem:[%s14465_s27 + $0x5d8] sm:$0xff] }
 0x2c1   :  { %2070 = vmatpush.msra.mxu1 %v7030_v43  ;;  %1909 = vmatpush.msrb.mxu2 %v7000_v6  ;;  %v7080_v43 = vld [vmem:[%s14465_s27 + $0x5a8] sm:$0xff]  ;;  %v7078_v6 = vld [vmem:[%s14465_s27 + $0x598] sm:$0xff] }
 0x2c2   :  { %2025 = vmatpush.msra.mxu0 %v7027_v4  ;;  %v7076_v4 = vld [vmem:[%s14465_s27 + $0x588] sm:$0xff] }
 0x2c3   :  { %2071 = vmatpush.msra.mxu1 %v7028_v47  ;;  %1910 = vmatpush.msrb.mxu2 %v6998_v61  ;;  %v7074_v47 = vld [vmem:[%s14465_s27 + $0x578] sm:$0xff]  ;;  %v7072_v61 = vld [vmem:[%s14465_s27 + $0x568] sm:$0xff] }
 0x2c4   :  { %2026 = vmatpush.msra.mxu0 %v7025_v13  ;;  %v7068_v13 = vld [vmem:[%s14465_s27 + $0x548] sm:$0xff] }
 0x2c5   :  { %2072 = vmatpush.msra.mxu1 %v7026_v50  ;;  %1911 = vmatpush.msrb.mxu2 %v6996_v34  ;;  %v7066_v50 = vld [vmem:[%s14465_s27 + $0x538] sm:$0xff]  ;;  %v7064_v34 = vld [vmem:[%s14465_s27 + $0x528] sm:$0xff] }
 0x2c6   :  { %2027 = vmatpush.msra.mxu0 %v7023_v12  ;;  %6968 = vmatmul.msk.f32.gmra.mxu2 %vm14379_vm9, %v10252_v44  ;;  %v7060_v12 = vld [vmem:[%s14465_s27 + $0x508] sm:$0xff] }
 0x2c7   :  { %2073 = vmatpush.msra.mxu1 %v7024_v42  ;;  %1778 = vmatmul.f32.gmra.mxu0 %v10063_v51  ;;  %v6984_v51 = vld [vmem:[%s14465_s27 + $0x2e8] sm:$0xff] }
 0x2c8   :  { %1912 = vmatpush.msrb.mxu2 %v6994_v8  ;;  %7014 = vmatmul.msk.f32.gmra.mxu1 %vm14379_vm9, %v10319_v52  ;;  %v7091_v52 = vld [vmem:[%s14465_s27 + $0x600] sm:$0xff] }
 0x2c9   :  { %2189 = vmatmul.f32.gmra.mxu3 %v10423_v1  ;;  %2028 = vmatpush.msra.mxu0 %v7021_v29 }
 0x2ca   :  { %2074 = vmatpush.msra.mxu1 %v7022_v10  ;;  %1913 = vmatpush.msrb.mxu2 %v6992_v3 }
 0x2cb   :  { %2029 = vmatpush.msra.mxu0 %v7019_v35 }
 0x2cc   :  { %2075 = vmatpush.msra.mxu1 %v7020_v21  ;;  %1914 = vmatpush.msrb.mxu2 %v6990_v22 }
 0x2cd   :  { %2030 = vmatpush.msra.mxu0 %v7017_v26 }
 0x2ce   :  { %2076 = vmatpush.msra.mxu1 %v7018_v60  ;;  %1915 = vmatpush.msrb.mxu2 %v6988_v62 }
 0x2cf   :  { %2031 = vmatpush.msra.mxu0 %v7015_v57  ;;  %6969 = vmatmul.msk.f32.vlgmr.msra.gmra.mxu2 %vm14379_vm9, %v10243_v53  ;;  %v7048_v53 = vld [vmem:[%s14465_s27 + $0x4c8] sm:$0xff] }
 0x2d0   :  { %2077 = vmatpush.msra.mxu1 %v7016_v40  ;;  %1916 = vmatpush.msrb.mxu2 %v6986_v39 }
 0x2d1   :  { %2032 = vmatmul.f32.vlgmr.msra.gmra.mxu0 %v2002_v58  ;;  %2078 = vmatmul.f32.vlgmr.msra.gmra.mxu1 %v2002_v58 }
 0x2d2   :  { %1917 = vmatpush.msrb.mxu2 %v6984_v51  ;;  %2205 = vmatpush.msrb.mxu0 %v7097_v17 }
 0x2d3   :  { %2251 = vmatpush.msrb.mxu1 %v7098_v2 }
 0x2d4   :  { %1918 = vmatpush.msrb.mxu2 %v6982_v45  ;;  %2206 = vmatpush.msrb.mxu0 %v7095_v23 }
 0x2d5   :  { %2252 = vmatpush.msrb.mxu1 %v7096_v15 }
 0x2d6   :  { %1919 = vmatpush.msrb.mxu2 %v6980_v31  ;;  %2207 = vmatpush.msrb.mxu0 %v7093_v55 }
 0x2d7   :  { %6970 = vmatmul.msk.f32.gmra.mxu2 %vm14379_vm9, %v10252_v44  ;;  %2253 = vmatpush.msrb.mxu1 %v7094_v9  ;;  %v7050_v44 = vld [vmem:[%s14465_s27 + $0x4d8] sm:$0xff] }
 0x2d8   :  { %1920 = vmatpush.msrb.mxu2 %v6978_v16  ;;  %2208 = vmatpush.msrb.mxu0 %v7091_v52  ;;  %v10603_v52 = vld [vmem:[%s14474_s0] sm:$0x3] }
 0x2d9   :  { %2035 = vmatmul.f32.gmra.mxu0 %v2007_v33  ;;  %2081 = vmatmul.f32.gmra.mxu1 %v2007_v33  ;;  %v10606_v54 = vperm.slane %v10603_v52, 0 }
 0x2da   :  { %1921 = vmatpush.msrb.mxu2 %v6976_v46  ;;  %2254 = vmatpush.msrb.mxu1 %v7092_v56 }
 0x2db   :  { %14475 = vst [vmem:[#allocation9_spill] sm:$0xff] %v10606_v54 }
 0x2dc   :  { %1922 = vmatpush.msrb.mxu2 %v6974_v18 }
 0x2de   :  { %1923 = vmatpush.msrb.mxu2 %v6972_v63 }
 0x2df   :  { %1924 = vmatmul.f32.vlgmr.msrb.gmra.mxu2 %v10144_v59  ;;  %v7090_v59 = vld [vmem:[%s14465_s27 + $0x5f8] sm:$0xff] }
 0x2e0   :  { %2097 = vmatpush.msra.mxu2 %v7054_v25 }
 0x2e1   :  { %7099 = vmatmul.msk.f32.vlgmr.msrb.gmra.mxu0 %vm14379_vm9, %v2159_v32  ;;  %7101 = vmatmul.msk.f32.vlgmr.msrb.gmra.mxu1 %vm14379_vm9, %v2159_v32 }
 0x2e2   :  { %2098 = vmatpush.msra.mxu2 %v7052_v7 }
 0x2e4   :  { %2099 = vmatpush.msra.mxu2 %v7050_v44 }
 0x2e6   :  { %2100 = vmatpush.msra.mxu2 %v7048_v53 }
 0x2e7   :  { %1927 = vmatmul.f32.gmra.mxu2 %v10193_v36  ;;  %v7082_v36 = vld [vmem:[%s14465_s27 + $0x5b8] sm:$0xff] }
 0x2e8   :  { %2216 = vmatpush.msrb.mxu2 %v7090_v59 }
 0x2e9   :  { %7100 = vmatmul.msk.f32.gmra.mxu0 %vm14379_vm9, %v2163_v5  ;;  %7102 = vmatmul.msk.f32.gmra.mxu1 %vm14379_vm9, %v2163_v5 }
 0x2ea   :  { %2217 = vmatpush.msrb.mxu2 %v7088_v19 }
 0x2ec   :  { %2218 = vmatpush.msrb.mxu2 %v7086_v14 }
 0x2ee   :  { %2219 = vmatpush.msrb.mxu2 %v7084_v0  ;;  %v1730_v26 = vpop.f32.mrf.mxu1 }
 0x2ef   :  { %7057 = vmatmul.msk.f32.vlgmr.msra.gmra.mxu2 %vm14379_vm9, %v10270_v27  ;;  %v7070_v27 = vld [vmem:[%s14465_s27 + $0x558] sm:$0xff] }
 0x2f0   :  { %2220 = vmatpush.msrb.mxu2 %v7082_v36 }
 0x2f2   :  { %2221 = vmatpush.msrb.mxu2 %v7080_v43 }
 0x2f4   :  { %2222 = vmatpush.msrb.mxu2 %v7078_v6 }
 0x2f6   :  { %2223 = vmatpush.msrb.mxu2 %v7076_v4  ;;  %v1733_v57 = vpop.f32.mrf.mxu1 }
 0x2f7   :  { %7058 = vmatmul.msk.f32.gmra.mxu2 %vm14379_vm9, %v10322_v11  ;;  %v7062_v11 = vld [vmem:[%s14465_s27 + $0x518] sm:$0xff] }
 0x2f8   :  { %2224 = vmatpush.msrb.mxu2 %v7074_v47 }
 0x2f9   :  { %v1634_v42 = vpop.f32.mrf.mxu0 }
 0x2fa   :  { %2225 = vmatpush.msrb.mxu2 %v7072_v61 }
 0x2fc   :  { %2226 = vmatpush.msrb.mxu2 %v7070_v27 }
 0x2fe   :  { %2227 = vmatpush.msrb.mxu2 %v7068_v13 }
 0x2ff   :  { %v10584_v8 = vpop.f32.mrf.mxu3 }
 0x300   :  { %2228 = vmatpush.msrb.mxu2 %v7066_v50 }
 0x301   :  { %v1637_v24 = vpop.f32.mrf.mxu0 }
 0x302   :  { %2229 = vmatpush.msrb.mxu2 %v7064_v34 }
 0x304   :  { %2230 = vmatpush.msrb.mxu2 %v7062_v11 }
 0x306   :  { %2231 = vmatpush.msrb.mxu2 %v7060_v12 }
 0x307   :  { %2232 = vmatmul.f32.vlgmr.msrb.gmra.mxu2 %v10377_v28  ;;  %v10588_v10 = vpop.f32.mrf.mxu3 }
 0x30f   :  { %2235 = vmatmul.f32.gmra.mxu2 %v10423_v1  ;;  %v1879_v21 = vpop.f32.mrf.mxu3 }
 0x317   :  { %v1882_v62 = vpop.f32.mrf.mxu3 }
 0x329   :  { %v10586_v29 = vpop.f32.mrf.mxu0 }
 0x32a   :  { %v1902_v39 = vpop.f32.mrf.mxu1 }
 0x32b   :  { %v1903_v55 = vadd.f32 %v1902_v39, %v1879_v21 }
 0x32f   :  { %v1657_v3 = vpop.f32.mrf.mxu2 }
 0x330   :  { %v2056_v30 = vpop.f32.mrf.mxu3  ;;  %v1658_v58 = vadd.f32 %v1657_v3, %v1634_v42 }
 0x332   :  { %v10590_v35 = vpop.f32.mrf.mxu0  ;;  %v1731_v23 = vadd.f32 %v1730_v26, %v1658_v58 }
 0x333   :  { %v1905_v2 = vpop.f32.mrf.mxu1 }
 0x334   :  { %v1906_v32 = vadd.f32 %v1905_v2, %v1882_v62 }
 0x338   :  { %v1660_v22 = vpop.f32.mrf.mxu2 }
 0x339   :  { %v2059_v51 = vpop.f32.mrf.mxu3  ;;  %v1661_v48 = vadd.f32 %v1660_v22, %v1637_v24 }
 0x33b   :  { %v10592_v60 = vpop.f32.mrf.mxu0  ;;  %v1734_v18 = vadd.f32 %v1733_v57, %v1661_v48 }
 0x33c   :  { %v1948_v33 = vpop.f32.mrf.mxu1 }
 0x341   :  { %v1753_v28 = vpop.f32.mrf.mxu2 }
 0x342   :  { %v1754_v15 = vadd.f32 %v1753_v28, %v1731_v23 }
 0x343   :  { %v2187_v16 = vpop.f32.mrf.mxu3 }
 0x344   :  { %v10594_v1 = vpop.f32.mrf.mxu0  ;;  %v1954_v46 = vadd.f32 %v1903_v55, %v1754_v15  ;;  %v2488_v15 = vld [vmem:[%s14343_s13 + $0x98] sm:$0xff] }
 0x345   :  { %v10612_v43 = vpop.f32.mrf.mxu1 }
 0x349   :  { %v1756_v40 = vpop.f32.mrf.mxu2 }
 0x34a   :  { %v1757_v41 = vadd.f32 %v1756_v40, %v1734_v18  ;;  %v1704_v40 = vadd.f32 %v10586_v29, %v10584_v8 }
 0x34c   :  { %v1956_v37 = vadd.f32 %v1906_v32, %v1757_v41  ;;  %v2190_v5 = vpop.f32.mrf.mxu3  ;;  %v1707_v41 = vadd.f32 %v10590_v35, %v10588_v10 }
 0x34e   :  { %v2033_v20 = vpop.f32.mrf.mxu0  ;;  %v2079_v50 = vpop.f32.mrf.mxu1  ;;  %v1780_v10 = vadd.f32 %v10594_v1, %v1707_v41 }
 0x34f   :  { %v2057_v9 = vadd.f32 %v2056_v30, %v2033_v20 }
 0x351   :  { %v2108_v63 = vadd.f32 %v2057_v9, %v1954_v46 }
 0x352   :  { %v10596_v17 = vpop.f32.mrf.mxu2 }
 0x356   :  { %v2036_v45 = vpop.f32.mrf.mxu0  ;;  %v2082_v3 = vpop.f32.mrf.mxu1 }
 0x357   :  { %v2060_v44 = vadd.f32 %v2059_v51, %v2036_v45  ;;  %v1777_v45 = vadd.f32 %v10592_v60, %v1704_v40  ;;  %v2491_v40 = vld [vmem:[%s14343_s13 + $0xb0] sm:$0xff] }
 0x359   :  { %v2110_v0 = vadd.f32 %v2060_v44, %v1956_v37  ;;  %v1800_v8 = vadd.f32 %v10596_v17, %v1777_v45  ;;  %v10628_v17 = vperm.slane %v10603_v52, 1  ;;  %v10639_v37 = vld [vmem:[%s14342_s12] sm:$0xff] }
 0x35a   :  { %v10598_v31 = vpop.f32.mrf.mxu2 }
 0x35b   :  { %14478 = vst [vmem:[#allocation10_spill] sm:$0xff] %v10628_v17 }
 0x35e   :  { %v2210_v56 = vpop.f32.mrf.mxu0  ;;  %v2256_v46 = vpop.f32.mrf.mxu1 }
 0x35f   :  { %v2211_v25 = vadd.f32 %v2210_v56, %v2187_v16 }
 0x361   :  { %v2262_v7 = vadd.f32 %v2211_v25, %v2108_v63 }
 0x362   :  { %v1925_v59 = vpop.f32.mrf.mxu2 }
 0x363   :  { %v10609_v53 = vadd.f32 %v10606_v54, %v2262_v7  ;;  %v1949_v23 = vadd.f32 %v1948_v33, %v1925_v59  ;;  %v10634_v59 = vld [vmem:[%s14341_s11] sm:$0xff] }
 0x365   :  { %v7103_v19 = vmul.f32 -1.442695, %v10609_v53  ;;  %v1955_v60 = vadd.f32 %v1949_v23, %v1800_v8  ;;  %v2487_v23 = vld [vmem:[%s14343_s13 + $0x90] sm:$0xff] }
 0x366   :  { %v2213_v14 = vpop.f32.mrf.mxu0 }
 0x367   :  { %7382 = vpow2.f32 %v7103_v19  ;;  %v2214_v36 = vadd.f32 %v2213_v14, %v2190_v5 }
 0x369   :  { %v2264_v6 = vadd.f32 %v2214_v36, %v2110_v0  ;;  %v2259_v0 = vpop.f32.mrf.mxu1 }
 0x36a   :  { %v1928_v27 = vpop.f32.mrf.mxu2 }
 0x36b   :  { %v2274_v4 = vadd.f32 %v10606_v54, %v2264_v6  ;;  %v1952_v35 = vadd.f32 %v10612_v43, %v1928_v27 }
 0x36d   :  { %v7383_v47 = vpop.eup %7382  ;;  %v7105_v61 = vmul.f32 -1.442695, %v2274_v4 }
 0x36e   :  { %v2288_v13 = vadd.f32 1.0, %v7383_v47 }
 0x36f   :  { %7384 = vpow2.f32 %v7105_v61 }
 0x370   :  { %7386 = vrcp.f32 %v2288_v13  ;;  %vm2297_vm6 = vweird.f32 %v2288_v13  ;;  %v2303_v20 = vand.u32 2147483648, %v2288_v13  ;;  %v2301_v2 = vand.u32 2147483647, %v2288_v13 }
 0x372   :  { %v2102_v12 = vpop.f32.mrf.mxu2  ;;  %v2304_v16 = vor.u32 1.1754944e-38, %v2303_v20  ;;  %vm2302_vm4 = vcmp.eq.f32.partialorder %v2301_v2, 8.507059e+37  ;;  %v2490_v2 = vld [vmem:[%s14343_s13 + $0xa8] sm:$0xff] }
 0x373   :  { %v2103_v29 = vadd.f32 %v2102_v12, %v2079_v50 }
 0x375   :  { %v7385_v34 = vpop.eup %7384  ;;  %v2109_v7 = vadd.f32 %v2103_v29, %v1955_v60 }
 0x376   :  { %v2290_v11 = vadd.f32 1.0, %v7385_v34  ;;  %v7387_v42 = vpop.eup %7386 }
 0x377   :  { %v2293_v24 = vmul.f32 %v7387_v42, %v2288_v13  ;;  %vm2298_vm2 = vweird.f32 %v7387_v42 }
 0x378   :  { %7388 = vrcp.f32 %v2290_v11  ;;  %v2333_v39 = vand.u32 2147483648, %v2290_v11  ;;  %v2331_v58 = vand.u32 2147483647, %v2290_v11  ;;  %vm10618_vm8 = vmor %vm2297_vm6, %vm2298_vm2  ;;  %vm2327_vm10 = vweird.f32 %v2290_v11 }
 0x379   :  { %v2294_v21 = vsub.f32 1.0, %v2293_v24  ;;  %v2500_v24 = vld [vmem:[%s14343_s13 + $0xf8] sm:$0xff] }
 0x37a   :  { %v2105_v28 = vpop.f32.mrf.mxu2  ;;  %v2334_v9 = vor.u32 1.1754944e-38, %v2333_v39  ;;  %vm2332_vm11 = vcmp.eq.f32.partialorder %v2331_v58, 8.507059e+37  ;;  %v2492_v39 = vld [vmem:[%s14343_s13 + $0xb8] sm:$0xff]  ;;  %v2489_v58 = vld [vmem:[%s14343_s13 + $0xa0] sm:$0xff] }
 0x37b   :  { %v2295_v62 = vmul.f32 %v7387_v42, %v2294_v21  ;;  %v2106_v19 = vadd.f32 %v2105_v28, %v2082_v3  ;;  %v2497_v3 = vld [vmem:[%s14343_s13 + $0xe0] sm:$0xff] }
 0x37d   :  { %v2296_v30 = vadd.f32 %v7387_v42, %v2295_v62  ;;  %v2496_v62 = vld [vmem:[%s14343_s13 + $0xd8] sm:$0xff] }
 0x37e   :  { %v7389_v22 = vpop.eup %7388 }
 0x37f   :  { %v2323_v26 = vmul.f32 %v7389_v22, %v2290_v11  ;;  %vm2328_vm13 = vweird.f32 %v7389_v22  ;;  %v2300_v48 = vsel %vm10618_vm8, %v7387_v42, %v2296_v30  ;;  %v2499_v42 = vld [vmem:[%s14343_s13 + $0xf0] sm:$0xff]  ;;  %v2494_v30 = vld [vmem:[%s14343_s13 + $0xc8] sm:$0xff] }
 0x380   :  { %vm2329_vm3 = vmor %vm2327_vm10, %vm2328_vm13  ;;  %v2305_v18 = vsel %vm2302_vm4, %v2304_v16, %v2300_v48  ;;  %2533 = vmatpush.msra.mxu2 %v2499_v42  ;;  %v2486_v16 = vld [vmem:[%s14343_s13 + $0x88] sm:$0xff]  ;;  %v2469_v42 = vld [vmem:[%s14343_s13] sm:$0xff] }
 0x381   :  { %v2324_v57 = vsub.f32 1.0, %v2323_v26  ;;  %v2352_v44 = vmul.f32 %v2305_v18, %v10609_v53  ;;  %v1803_v53 = vadd.f32 %v10598_v31, %v1780_v10  ;;  %v10655_v31 = vld [vmem:[%s14341_s11 + $0x8] sm:$0x1]  ;;  %v2495_v26 = vld [vmem:[%s14343_s13 + $0xd0] sm:$0xff] }
 0x382   :  { %2534 = vmatpush.msra.mxu2 %v2497_v3  ;;  %v2483_v18 = vld [vmem:[%s14343_s13 + $0x70] sm:$0xff]  ;;  %v2482_v10 = vld [vmem:[%s14343_s13 + $0x68] sm:$0xff] }
 0x383   :  { %v2325_v51 = vmul.f32 %v7389_v22, %v2324_v57  ;;  %v1957_v14 = vadd.f32 %v1952_v35, %v1803_v53  ;;  %v2493_v57 = vld [vmem:[%s14343_s13 + $0xc0] sm:$0xff]  ;;  %v2655_v3 = vld [vmem:[%s14344_s14 + $0xf0] sm:$0xff] }
 0x384   :  { %2535 = vmatpush.msra.mxu2 %v2495_v26  ;;  %v2526_v26 = vld [vmem:[%s14343_s13 + $0x1c8] sm:$0xff] }
 0x385   :  { %v2326_v55 = vadd.f32 %v7389_v22, %v2325_v51  ;;  %v2111_v43 = vadd.f32 %v2106_v19, %v1957_v14  ;;  %v2479_v14 = vld [vmem:[%s14343_s13 + $0x50] sm:$0xff] }
 0x386   :  { %2536 = vmatpush.msra.mxu2 %v2493_v57  ;;  %v2651_v57 = vld [vmem:[%s14344_s14 + $0xd0] sm:$0xff] }
 0x387   :  { %v2330_v56 = vsel %vm2329_vm3, %v7389_v22, %v2326_v55  ;;  %v2498_v22 = vld [vmem:[%s14343_s13 + $0xe8] sm:$0xff] }
 0x388   :  { %v2335_v33 = vsel %vm2332_vm11, %v2334_v9, %v2330_v56  ;;  %2537 = vmatpush.msra.mxu2 %v2491_v40  ;;  %v2485_v9 = vld [vmem:[%s14343_s13 + $0x80] sm:$0xff] }
 0x389   :  { %v2354_v25 = vmul.f32 %v2335_v33, %v2274_v4  ;;  %v10660_v4 = vld [vmem:[%s14342_s12 + $0x8] sm:$0x1]  ;;  %v2521_v40 = vld [vmem:[%s14343_s13 + $0x1a0] sm:$0xff]  ;;  %v2515_v33 = vld [vmem:[%s14343_s13 + $0x170] sm:$0xff] }
 0x38a   :  { %v2233_v63 = vpop.f32.mrf.mxu2  ;;  %2538 = vmatpush.msra.mxu2 %v2489_v58  ;;  %v2647_v58 = vld [vmem:[%s14344_s14 + $0xb0] sm:$0xff] }
 0x38b   :  { %v2257_v32 = vadd.f32 %v2256_v46, %v2233_v63  ;;  %2379 = vmatpush.msra.mxu0 %v2354_v25  ;;  %2433 = vmatpush.msra.mxu1 %v2354_v25  ;;  %v2484_v63 = vld [vmem:[%s14343_s13 + $0x78] sm:$0xff] }
 0x38c   :  { %2539 = vmatpush.msra.mxu2 %v2487_v23  ;;  %v2646_v23 = vld [vmem:[%s14344_s14 + $0xa8] sm:$0xff] }
 0x38d   :  { %v2263_v52 = vadd.f32 %v2257_v32, %v2109_v7  ;;  %2380 = vmatpush.msra.mxu0 %v2352_v44  ;;  %2434 = vmatpush.msra.mxu1 %v2352_v44  ;;  %v2481_v44 = vld [vmem:[%s14343_s13 + $0x60] sm:$0xff] }
 0x38e   :  { %7107 = vmatmul.msk.f32.vlgmr.msra.gmra.mxu0 %vm14371_vm0, %v10634_v59  ;;  %7111 = vmatmul.msk.f32.vlgmr.msra.gmra.mxu1 %vm14371_vm0, %v10639_v37 }
 0x38f   :  { %v10645_v5 = vadd.f32 %v10628_v17, %v2263_v52  ;;  %2579 = vmatpush.msrb.mxu1 %v2500_v24  ;;  %2540 = vmatpush.msra.mxu2 %v2485_v9  ;;  %v2470_v24 = vld [vmem:[%s14343_s13 + $0x8] sm:$0xff] }
 0x390   :  { %v2642_v9 = vld [vmem:[%s14344_s14 + $0x88] sm:$0xff] }
 0x391   :  { %v7104_v1 = vmul.f32 -1.442695, %v10645_v5  ;;  %2580 = vmatpush.msrb.mxu1 %v2498_v22  ;;  %2541 = vmatpush.msra.mxu2 %v2483_v18  ;;  %v2525_v22 = vld [vmem:[%s14343_s13 + $0x1c0] sm:$0xff]  ;;  %v2516_v18 = vld [vmem:[%s14343_s13 + $0x178] sm:$0xff] }
 0x392   :  { %v2236_v36 = vpop.f32.mrf.mxu2 }
 0x393   :  { %7390 = vpow2.f32 %v7104_v1  ;;  %v2260_v6 = vadd.f32 %v2259_v0, %v2236_v36  ;;  %2581 = vmatpush.msrb.mxu1 %v2496_v62  ;;  %2542 = vmatpush.msra.mxu2 %v2481_v44  ;;  %v2480_v1 = vld [vmem:[%s14343_s13 + $0x58] sm:$0xff]  ;;  %v2477_v36 = vld [vmem:[%s14343_s13 + $0x40] sm:$0xff] }
 0x394   :  { %v2653_v62 = vld [vmem:[%s14344_s14 + $0xe0] sm:$0xff]  ;;  %v2636_v44 = vld [vmem:[%s14344_s14 + $0x58] sm:$0xff] }
 0x395   :  { %v2265_v47 = vadd.f32 %v2260_v6, %v2111_v43  ;;  %2582 = vmatpush.msrb.mxu1 %v2494_v30  ;;  %2543 = vmatpush.msra.mxu2 %v2479_v14  ;;  %v2478_v43 = vld [vmem:[%s14343_s13 + $0x48] sm:$0xff]  ;;  %v2531_v6 = vld [vmem:[%s14343_s13 + $0x1f0] sm:$0xff]  ;;  %v2652_v30 = vld [vmem:[%s14344_s14 + $0xd8] sm:$0xff] }
 0x396   :  { %7108 = vmatmul.msk.f32.gmra.mxu0 %vm14371_vm0, %v10655_v31  ;;  %7112 = vmatmul.msk.f32.gmra.mxu1 %vm14371_vm0, %v10660_v4  ;;  %v2510_v14 = vld [vmem:[%s14343_s13 + $0x148] sm:$0xff] }
 0x397   :  { %v10663_v61 = vadd.f32 %v10628_v17, %v2265_v47  ;;  %2583 = vmatpush.msrb.mxu1 %v2492_v39  ;;  %v2475_v47 = vld [vmem:[%s14343_s13 + $0x30] sm:$0xff]  ;;  %2544 = vmatpush.msra.mxu2 %v2477_v36  ;;  %v2522_v39 = vld [vmem:[%s14343_s13 + $0x1a8] sm:$0xff] }
 0x398   :  { %v2507_v36 = vld [vmem:[%s14343_s13 + $0x130] sm:$0xff] }
 0x399   :  { %v7391_v27 = vpop.eup %7390  ;;  %v7106_v13 = vmul.f32 -1.442695, %v10663_v61  ;;  %2584 = vmatpush.msrb.mxu1 %v2490_v2  ;;  %2545 = vmatpush.msra.mxu2 %v2475_v47  ;;  %v2648_v2 = vld [vmem:[%s14344_s14 + $0xb8] sm:$0xff]  ;;  %v2505_v47 = vld [vmem:[%s14343_s13 + $0x120] sm:$0xff] }
 0x39a   :  { %v10670_v50 = vadd.f32 1.0, %v7391_v27  ;;  %v2529_v27 = vld [vmem:[%s14343_s13 + $0x1e0] sm:$0xff] }
 0x39b   :  { %7392 = vpow2.f32 %v7106_v13  ;;  %2585 = vmatpush.msrb.mxu1 %v2488_v15  ;;  %v2474_v13 = vld [vmem:[%s14343_s13 + $0x28] sm:$0xff]  ;;  %v2643_v15 = vld [vmem:[%s14344_s14 + $0x90] sm:$0xff] }
 0x39c   :  { %7394 = vrcp.f32 %v10670_v50  ;;  %vm2312_vm14 = vweird.f32 %v10670_v50  ;;  %v2318_v29 = vand.u32 2147483648, %v10670_v50  ;;  %v2316_v60 = vand.u32 2147483647, %v10670_v50 }
 0x39d   :  { %2586 = vmatpush.msrb.mxu1 %v2486_v16  ;;  %v2517_v16 = vld [vmem:[%s14343_s13 + $0x180] sm:$0xff] }
 0x39e   :  { %v2319_v32 = vor.u32 1.1754944e-38, %v2318_v29  ;;  %vm2317_vm3 = vcmp.eq.f32.partialorder %v2316_v60, 8.507059e+37  ;;  %v2641_v29 = vld [vmem:[%s14344_s14 + $0x80] sm:$0xff]  ;;  %v2640_v60 = vld [vmem:[%s14344_s14 + $0x78] sm:$0xff] }
 0x39f   :  { %2587 = vmatpush.msrb.mxu1 %v2484_v63  ;;  %v2637_v63 = vld [vmem:[%s14344_s14 + $0x60] sm:$0xff] }
 0x3a1   :  { %v7393_v34 = vpop.eup %7392  ;;  %2588 = vmatpush.msrb.mxu1 %v2482_v10  ;;  %v2511_v10 = vld [vmem:[%s14343_s13 + $0x150] sm:$0xff] }
 0x3a2   :  { %v10673_v11 = vpop.eup %7394  ;;  %v2291_v12 = vadd.f32 1.0, %v7393_v34  ;;  %v2528_v34 = vld [vmem:[%s14343_s13 + $0x1d8] sm:$0xff] }
 0x3a3   :  { %v2308_v21 = vmul.f32 %v10673_v11, %v10670_v50  ;;  %vm2313_vm7 = vweird.f32 %v10673_v11  ;;  %2589 = vmatpush.msrb.mxu1 %v2480_v1  ;;  %v2527_v50 = vld [vmem:[%s14343_s13 + $0x1d0] sm:$0xff] }
 0x3a4   :  { %7396 = vrcp.f32 %v2291_v12  ;;  %v2348_v8 = vand.u32 2147483648, %v2291_v12  ;;  %v2346_v56 = vand.u32 2147483647, %v2291_v12  ;;  %vm10731_vm6 = vmor %vm2312_vm14, %vm2313_vm7  ;;  %vm2342_vm13 = vweird.f32 %v2291_v12  ;;  %v2631_v1 = vld [vmem:[%s14344_s14 + $0x30] sm:$0xff] }
 0x3a5   :  { %v2309_v28 = vsub.f32 1.0, %v2308_v21  ;;  %2590 = vmatpush.msrb.mxu1 %v2478_v43  ;;  %v2656_v21 = vld [vmem:[%s14344_s14 + $0xf8] sm:$0xff] }
 0x3a6   :  { %v2349_v7 = vor.u32 1.1754944e-38, %v2348_v8  ;;  %vm2347_vm10 = vcmp.eq.f32.partialorder %v2346_v56, 8.507059e+37  ;;  %v2520_v8 = vld [vmem:[%s14343_s13 + $0x198] sm:$0xff]  ;;  %v2639_v56 = vld [vmem:[%s14344_s14 + $0x70] sm:$0xff] }
 0x3a7   :  { %v2310_v20 = vmul.f32 %v10673_v11, %v2309_v28  ;;  %v2524_v28 = vld [vmem:[%s14343_s13 + $0x1b8] sm:$0xff] }
 0x3a8   :  { %v2508_v43 = vld [vmem:[%s14343_s13 + $0x138] sm:$0xff] }
 0x3a9   :  { %v2311_v48 = vadd.f32 %v10673_v11, %v2310_v20  ;;  %v2649_v20 = vld [vmem:[%s14344_s14 + $0xc0] sm:$0xff] }
 0x3aa   :  { %v7397_v51 = vpop.eup %7396 }
 0x3ab   :  { %v2338_v45 = vmul.f32 %v7397_v51, %v2291_v12  ;;  %vm2343_vm2 = vweird.f32 %v7397_v51  ;;  %v2315_v41 = vsel %vm10731_vm6, %v10673_v11, %v2311_v48  ;;  %v2471_v11 = vld [vmem:[%s14343_s13 + $0x10] sm:$0xff]  ;;  %v2472_v12 = vld [vmem:[%s14343_s13 + $0x18] sm:$0xff] }
 0x3ac   :  { %vm2344_vm8 = vmor %vm2342_vm13, %vm2343_vm2  ;;  %v2320_v53 = vsel %vm2317_vm3, %v2319_v32, %v2315_v41  ;;  %v2519_v48 = vld [vmem:[%s14343_s13 + $0x190] sm:$0xff]  ;;  %v2513_v41 = vld [vmem:[%s14343_s13 + $0x160] sm:$0xff] }
 0x3ad   :  { %v2339_v55 = vsub.f32 1.0, %v2338_v45  ;;  %v2353_v0 = vmul.f32 %v2320_v53, %v10645_v5  ;;  %v2532_v5 = vld [vmem:[%s14343_s13 + $0x1f8] sm:$0xff]  ;;  %v2645_v45 = vld [vmem:[%s14344_s14 + $0xa0] sm:$0xff]  ;;  %v2635_v32 = vld [vmem:[%s14344_s14 + $0x50] sm:$0xff] }
 0x3ae   :  { %v2634_v53 = vld [vmem:[%s14344_s14 + $0x48] sm:$0xff] }
 0x3af   :  { %v2340_v46 = vmul.f32 %v7397_v51, %v2339_v55  ;;  %v2644_v55 = vld [vmem:[%s14344_s14 + $0x98] sm:$0xff] }
 0x3b1   :  { %v2341_v25 = vadd.f32 %v7397_v51, %v2340_v46  ;;  %v2518_v46 = vld [vmem:[%s14343_s13 + $0x188] sm:$0xff] }
 0x3b3   :  { %v2345_v35 = vsel %vm2344_vm8, %v7397_v51, %v2341_v25  ;;  %v2650_v51 = vld [vmem:[%s14344_s14 + $0xc8] sm:$0xff] }
 0x3b4   :  { %v2350_v52 = vsel %vm2347_vm10, %v2349_v7, %v2345_v35  ;;  %v2638_v25 = vld [vmem:[%s14344_s14 + $0x68] sm:$0xff]  ;;  %v2512_v35 = vld [vmem:[%s14343_s13 + $0x158] sm:$0xff] }
 0x3b5   :  { %v2355_v19 = vmul.f32 %v2350_v52, %v10663_v61  ;;  %v2476_v61 = vld [vmem:[%s14343_s13 + $0x38] sm:$0xff]  ;;  %v2514_v7 = vld [vmem:[%s14343_s13 + $0x168] sm:$0xff]  ;;  %v2633_v52 = vld [vmem:[%s14344_s14 + $0x40] sm:$0xff] }
 0x3b6   :  { %2591 = vmatpush.msrb.mxu1 %v2476_v61  ;;  %v2506_v61 = vld [vmem:[%s14343_s13 + $0x128] sm:$0xff] }
 0x3b7   :  { %2402 = vmatpush.msrb.mxu3 %v2355_v19  ;;  %2456 = vmatpush.msrb.mxu0 %v2355_v19  ;;  %v2509_v19 = vld [vmem:[%s14343_s13 + $0x140] sm:$0xff] }
 0x3b8   :  { %2592 = vmatpush.msrb.mxu1 %v2474_v13  ;;  %v2504_v13 = vld [vmem:[%s14343_s13 + $0x118] sm:$0xff] }
 0x3b9   :  { %2403 = vmatpush.msrb.mxu3 %v2353_v0  ;;  %2457 = vmatpush.msrb.mxu0 %v2353_v0  ;;  %v2632_v0 = vld [vmem:[%s14344_s14 + $0x38] sm:$0xff] }
 0x3ba   :  { %7109 = vmatmul.msk.f32.vlgmr.msrb.gmra.mxu3 %vm14371_vm0, %v10634_v59  ;;  %7113 = vmatmul.msk.f32.vlgmr.msrb.gmra.mxu0 %vm14371_vm0, %v10639_v37  ;;  %v2530_v59 = vld [vmem:[%s14343_s13 + $0x1e8] sm:$0xff]  ;;  %v2473_v37 = vld [vmem:[%s14343_s13 + $0x20] sm:$0xff] }
 0x3bb   :  { %2556 = vmatpush.msra.mxu3 %v2531_v6  ;;  %2602 = vmatpush.msra.mxu0 %v2532_v5  ;;  %v2629_v6 = vld [vmem:[%s14344_s14 + $0x20] sm:$0xff]  ;;  %v2630_v5 = vld [vmem:[%s14344_s14 + $0x28] sm:$0xff] }
 0x3bc   :  { %2546 = vmatpush.msra.mxu2 %v2473_v37  ;;  %2593 = vmatpush.msrb.mxu1 %v2472_v12  ;;  %v2503_v37 = vld [vmem:[%s14343_s13 + $0x110] sm:$0xff]  ;;  %v2502_v12 = vld [vmem:[%s14343_s13 + $0x108] sm:$0xff] }
 0x3bd   :  { %2557 = vmatpush.msra.mxu3 %v2529_v27  ;;  %2603 = vmatpush.msra.mxu0 %v2530_v59  ;;  %v2627_v27 = vld [vmem:[%s14344_s14 + $0x10] sm:$0xff]  ;;  %v2628_v59 = vld [vmem:[%s14344_s14 + $0x18] sm:$0xff] }
 0x3be   :  { %2547 = vmatpush.msra.mxu2 %v2471_v11  ;;  %2594 = vmatpush.msrb.mxu1 %v2470_v24  ;;  %v2501_v11 = vld [vmem:[%s14343_s13 + $0x100] sm:$0xff]  ;;  %v2688_v24 = vld [vmem:[%s14344_s14 + $0x1f8] sm:$0xff] }
 0x3bf   :  { %2558 = vmatpush.msra.mxu3 %v2527_v50  ;;  %2604 = vmatpush.msra.mxu0 %v2528_v34  ;;  %v2625_v50 = vld [vmem:[%s14344_s14] sm:$0xff]  ;;  %v2626_v34 = vld [vmem:[%s14344_s14 + $0x8] sm:$0xff] }
 0x3c0   :  { %2548 = vmatpush.msra.mxu2 %v2469_v42  ;;  %2735 = vmatpush.msra.mxu1 %v2656_v21  ;;  %v2687_v42 = vld [vmem:[%s14344_s14 + $0x1f0] sm:$0xff]  ;;  %v2686_v21 = vld [vmem:[%s14344_s14 + $0x1e8] sm:$0xff] }
 0x3c1   :  { %2559 = vmatpush.msra.mxu3 %v2525_v22  ;;  %2605 = vmatpush.msra.mxu0 %v2526_v26  ;;  %v2683_v22 = vld [vmem:[%s14344_s14 + $0x1d0] sm:$0xff]  ;;  %v2684_v26 = vld [vmem:[%s14344_s14 + $0x1d8] sm:$0xff] }
 0x3c2   :  { %7110 = vmatmul.msk.f32.gmra.mxu3 %vm14371_vm0, %v10655_v31  ;;  %7114 = vmatmul.msk.f32.gmra.mxu0 %vm14371_vm0, %v10660_v4  ;;  %v2654_v31 = vld [vmem:[%s14344_s14 + $0xe8] sm:$0xff]  ;;  %v2523_v4 = vld [vmem:[%s14343_s13 + $0x1b0] sm:$0xff] }
 0x3c3   :  { %2689 = vmatpush.msrb.mxu2 %v2655_v3  ;;  %2736 = vmatpush.msra.mxu1 %v2654_v31  ;;  %v2685_v3 = vld [vmem:[%s14344_s14 + $0x1e0] sm:$0xff]  ;;  %v2682_v31 = vld [vmem:[%s14344_s14 + $0x1c8] sm:$0xff] }
 0x3c4   :  { %2560 = vmatpush.msra.mxu3 %v2523_v4  ;;  %2606 = vmatpush.msra.mxu0 %v2524_v28  ;;  %v2679_v4 = vld [vmem:[%s14344_s14 + $0x1b0] sm:$0xff]  ;;  %v2680_v28 = vld [vmem:[%s14344_s14 + $0x1b8] sm:$0xff] }
 0x3c5   :  { %2690 = vmatpush.msrb.mxu2 %v2653_v62  ;;  %2737 = vmatpush.msra.mxu1 %v2652_v30  ;;  %v2681_v62 = vld [vmem:[%s14344_s14 + $0x1c0] sm:$0xff]  ;;  %v2678_v30 = vld [vmem:[%s14344_s14 + $0x1a8] sm:$0xff] }
 0x3c6   :  { %2561 = vmatpush.msra.mxu3 %v2521_v40  ;;  %2607 = vmatpush.msra.mxu0 %v2522_v39 }
 0x3c7   :  { %2691 = vmatpush.msrb.mxu2 %v2651_v57  ;;  %2738 = vmatpush.msra.mxu1 %v2650_v51  ;;  %v2677_v57 = vld [vmem:[%s14344_s14 + $0x1a0] sm:$0xff] }
 0x3c8   :  { %2562 = vmatpush.msra.mxu3 %v2519_v48  ;;  %2608 = vmatpush.msra.mxu0 %v2520_v8  ;;  %v2671_v48 = vld [vmem:[%s14344_s14 + $0x170] sm:$0xff]  ;;  %v2672_v8 = vld [vmem:[%s14344_s14 + $0x178] sm:$0xff] }
 0x3c9   :  { %2692 = vmatpush.msrb.mxu2 %v2649_v20  ;;  %2739 = vmatpush.msra.mxu1 %v2648_v2 }
 0x3ca   :  { %2563 = vmatpush.msra.mxu3 %v2517_v16  ;;  %2609 = vmatpush.msra.mxu0 %v2518_v46  ;;  %v2667_v16 = vld [vmem:[%s14344_s14 + $0x150] sm:$0xff]  ;;  %v2668_v46 = vld [vmem:[%s14344_s14 + $0x158] sm:$0xff] }
 0x3cb   :  { %2693 = vmatpush.msrb.mxu2 %v2647_v58  ;;  %2740 = vmatpush.msra.mxu1 %v2646_v23  ;;  %v2676_v23 = vld [vmem:[%s14344_s14 + $0x198] sm:$0xff] }
 0x3cc   :  { %2564 = vmatpush.msra.mxu3 %v2515_v33  ;;  %2610 = vmatpush.msra.mxu0 %v2516_v18  ;;  %v2663_v33 = vld [vmem:[%s14344_s14 + $0x130] sm:$0xff]  ;;  %v2664_v18 = vld [vmem:[%s14344_s14 + $0x138] sm:$0xff] }
 0x3cd   :  { %2694 = vmatpush.msrb.mxu2 %v2645_v45  ;;  %2741 = vmatpush.msra.mxu1 %v2644_v55  ;;  %v2675_v45 = vld [vmem:[%s14344_s14 + $0x190] sm:$0xff]  ;;  %v2674_v55 = vld [vmem:[%s14344_s14 + $0x188] sm:$0xff] }
 0x3ce   :  { %2565 = vmatpush.msra.mxu3 %v2513_v41  ;;  %2611 = vmatpush.msra.mxu0 %v2514_v7  ;;  %v2659_v41 = vld [vmem:[%s14344_s14 + $0x110] sm:$0xff]  ;;  %v2660_v7 = vld [vmem:[%s14344_s14 + $0x118] sm:$0xff] }
 0x3cf   :  { %2695 = vmatpush.msrb.mxu2 %v2643_v15  ;;  %2742 = vmatpush.msra.mxu1 %v2642_v9  ;;  %v2673_v15 = vld [vmem:[%s14344_s14 + $0x180] sm:$0xff]  ;;  %v2670_v9 = vld [vmem:[%s14344_s14 + $0x168] sm:$0xff] }
 0x3d0   :  { %2566 = vmatpush.msra.mxu3 %v2511_v10  ;;  %2612 = vmatpush.msra.mxu0 %v2512_v35 }
 0x3d1   :  { %2696 = vmatpush.msrb.mxu2 %v2641_v29  ;;  %2743 = vmatpush.msra.mxu1 %v2640_v60  ;;  %v2669_v29 = vld [vmem:[%s14344_s14 + $0x160] sm:$0xff]  ;;  %v2666_v60 = vld [vmem:[%s14344_s14 + $0x148] sm:$0xff] }
 0x3d2   :  { %2567 = vmatpush.msra.mxu3 %v2509_v19  ;;  %2613 = vmatpush.msra.mxu0 %v2510_v14 }
 0x3d3   :  { %2697 = vmatpush.msrb.mxu2 %v2639_v56  ;;  %2744 = vmatpush.msra.mxu1 %v2638_v25  ;;  %v2665_v56 = vld [vmem:[%s14344_s14 + $0x140] sm:$0xff]  ;;  %v2662_v25 = vld [vmem:[%s14344_s14 + $0x128] sm:$0xff] }
 0x3d4   :  { %2568 = vmatpush.msra.mxu3 %v2507_v36  ;;  %2614 = vmatpush.msra.mxu0 %v2508_v43  ;;  %v2893_v36 = vld [vmem:[#allocation2 + $0xe0] sm:$0xff]  ;;  %v2931_v43 = vld [vmem:[#allocation2 + $0x208] sm:$0xff] }
 0x3d5   :  { %2698 = vmatpush.msrb.mxu2 %v2637_v63  ;;  %2745 = vmatpush.msra.mxu1 %v2636_v44  ;;  %v2661_v63 = vld [vmem:[%s14344_s14 + $0x120] sm:$0xff]  ;;  %v2658_v44 = vld [vmem:[%s14344_s14 + $0x108] sm:$0xff] }
 0x3d6   :  { %2569 = vmatpush.msra.mxu3 %v2505_v47  ;;  %2615 = vmatpush.msra.mxu0 %v2506_v61  ;;  %v2889_v47 = vld [vmem:[#allocation2 + $0xc0] sm:$0xff]  ;;  %v2927_v61 = vld [vmem:[#allocation2 + $0x1e8] sm:$0xff] }
 0x3d7   :  { %2699 = vmatpush.msrb.mxu2 %v2635_v32  ;;  %2746 = vmatpush.msra.mxu1 %v2634_v53  ;;  %v2657_v32 = vld [vmem:[%s14344_s14 + $0x100] sm:$0xff] }
 0x3d8   :  { %2570 = vmatpush.msra.mxu3 %v2503_v37  ;;  %2616 = vmatpush.msra.mxu0 %v2504_v13  ;;  %v2925_v37 = vld [vmem:[#allocation2 + $0x1d8] sm:$0xff]  ;;  %v2885_v13 = vld [vmem:[#allocation2 + $0xa0] sm:$0xff] }
 0x3d9   :  { %2700 = vmatpush.msrb.mxu2 %v2633_v52  ;;  %2747 = vmatpush.msra.mxu1 %v2632_v0  ;;  %v2933_v0 = vld [vmem:[#allocation2 + $0x218] sm:$0xff] }
 0x3da   :  { %2571 = vmatpush.msra.mxu3 %v2501_v11  ;;  %2617 = vmatpush.msra.mxu0 %v2502_v12  ;;  %v2883_v11 = vld [vmem:[#allocation2 + $0x90] sm:$0xff] }
 0x3db   :  { %2701 = vmatpush.msrb.mxu2 %v2631_v1  ;;  %2748 = vmatpush.msra.mxu1 %v2630_v5  ;;  %v2895_v1 = vld [vmem:[#allocation2 + $0xf0] sm:$0xff]  ;;  %v2929_v5 = vld [vmem:[#allocation2 + $0x1f8] sm:$0xff] }
 0x3dc   :  { %2712 = vmatpush.msrb.mxu3 %v2687_v42  ;;  %2758 = vmatpush.msrb.mxu0 %v2688_v24  ;;  %v2928_v12 = vld [vmem:[#allocation2 + $0x1f0] sm:$0xff]  ;;  %v2921_v42 = vld [vmem:[#allocation2 + $0x1b8] sm:$0xff]  ;;  %v2881_v24 = vld [vmem:[#allocation2 + $0x80] sm:$0xff] }
 0x3dd   :  { %2702 = vmatpush.msrb.mxu2 %v2629_v6  ;;  %2749 = vmatpush.msra.mxu1 %v2628_v59  ;;  %v2891_v6 = vld [vmem:[#allocation2 + $0xd0] sm:$0xff] }
 0x3de   :  { %2713 = vmatpush.msrb.mxu3 %v2685_v3  ;;  %2759 = vmatpush.msrb.mxu0 %v2686_v21  ;;  %v2932_v59 = vld [vmem:[#allocation2 + $0x210] sm:$0xff]  ;;  %v2926_v3 = vld [vmem:[#allocation2 + $0x1e0] sm:$0xff]  ;;  %v2919_v21 = vld [vmem:[#allocation2 + $0x1a8] sm:$0xff] }
 0x3df   :  { %2703 = vmatpush.msrb.mxu2 %v2627_v27  ;;  %2750 = vmatpush.msra.mxu1 %v2626_v34  ;;  %v2887_v27 = vld [vmem:[#allocation2 + $0xb0] sm:$0xff]  ;;  %v2923_v34 = vld [vmem:[#allocation2 + $0x1c8] sm:$0xff] }
 0x3e0   :  { %2714 = vmatpush.msrb.mxu3 %v2683_v22  ;;  %2760 = vmatpush.msrb.mxu0 %v2684_v26  ;;  %v2879_v22 = vld [vmem:[#allocation2 + $0x70] sm:$0xff] }
 0x3e1   :  { %2704 = vmatpush.msrb.mxu2 %v2625_v50  ;;  %v2930_v50 = vld [vmem:[#allocation2 + $0x200] sm:$0xff]  ;;  %v2924_v26 = vld [vmem:[#allocation2 + $0x1d0] sm:$0xff] }
 0x3e2   :  { %2715 = vmatpush.msrb.mxu3 %v2681_v62  ;;  %2761 = vmatpush.msrb.mxu0 %v2682_v31  ;;  %v2917_v62 = vld [vmem:[#allocation2 + $0x198] sm:$0xff]  ;;  %v2877_v31 = vld [vmem:[#allocation2 + $0x60] sm:$0xff] }
 0x3e4   :  { %2716 = vmatpush.msrb.mxu3 %v2679_v4  ;;  %2762 = vmatpush.msrb.mxu0 %v2680_v28  ;;  %v2922_v4 = vld [vmem:[#allocation2 + $0x1c0] sm:$0xff]  ;;  %v2915_v28 = vld [vmem:[#allocation2 + $0x188] sm:$0xff] }
 0x3e6   :  { %2717 = vmatpush.msrb.mxu3 %v2677_v57  ;;  %2763 = vmatpush.msrb.mxu0 %v2678_v30  ;;  %v2875_v57 = vld [vmem:[#allocation2 + $0x50] sm:$0xff] }
 0x3e8   :  { %2718 = vmatpush.msrb.mxu3 %v2675_v45  ;;  %2764 = vmatpush.msrb.mxu0 %v2676_v23 }
 0x3ea   :  { %2719 = vmatpush.msrb.mxu3 %v2673_v15  ;;  %2765 = vmatpush.msrb.mxu0 %v2674_v55 }
 0x3ec   :  { %2720 = vmatpush.msrb.mxu3 %v2671_v48  ;;  %2766 = vmatpush.msrb.mxu0 %v2672_v8  ;;  %v2920_v8 = vld [vmem:[#allocation2 + $0x1b0] sm:$0xff] }
 0x3ee   :  { %2721 = vmatpush.msrb.mxu3 %v2669_v29  ;;  %2767 = vmatpush.msrb.mxu0 %v2670_v9  ;;  %v2913_v29 = vld [vmem:[#allocation2 + $0x178] sm:$0xff]  ;;  %v2873_v9 = vld [vmem:[#allocation2 + $0x40] sm:$0xff] }
 0x3f0   :  { %2722 = vmatpush.msrb.mxu3 %v2667_v16  ;;  %2768 = vmatpush.msrb.mxu0 %v2668_v46  ;;  %v2918_v16 = vld [vmem:[#allocation2 + $0x1a0] sm:$0xff]  ;;  %v2911_v46 = vld [vmem:[#allocation2 + $0x168] sm:$0xff] }
 0x3f2   :  { %2723 = vmatpush.msrb.mxu3 %v2665_v56  ;;  %2769 = vmatpush.msrb.mxu0 %v2666_v60  ;;  %v2871_v56 = vld [vmem:[#allocation2 + $0x30] sm:$0xff] }
 0x3f4   :  { %2724 = vmatpush.msrb.mxu3 %v2663_v33  ;;  %2770 = vmatpush.msrb.mxu0 %v2664_v18  ;;  %v2916_v18 = vld [vmem:[#allocation2 + $0x190] sm:$0xff] }
 0x3f6   :  { %2725 = vmatpush.msrb.mxu3 %v2661_v63  ;;  %2771 = vmatpush.msrb.mxu0 %v2662_v25  ;;  %v2909_v63 = vld [vmem:[#allocation2 + $0x158] sm:$0xff]  ;;  %v2869_v25 = vld [vmem:[#allocation2 + $0x20] sm:$0xff] }
 0x3f8   :  { %2726 = vmatpush.msrb.mxu3 %v2659_v41  ;;  %2772 = vmatpush.msrb.mxu0 %v2660_v7 }
 0x3fa   :  { %2727 = vmatpush.msrb.mxu3 %v2657_v32  ;;  %2773 = vmatpush.msrb.mxu0 %v2658_v44 }
 0x40b   :  { %v2382_v40 = vpop.f32.mrf.mxu0  ;;  %v2436_v39 = vpop.f32.mrf.mxu1 }
 0x40c   :  { %v2465_v20 = vmax.f32 %v2382_v40, %v2436_v39 }
 0x40e   :  { %2549 = vmatmul.f32.vlgmr.msra.gmra.mxu2 %v2465_v20  ;;  %2595 = vmatmul.f32.vlgmr.msrb.gmra.mxu1 %v2465_v20 }
 0x40f   :  { %2985 = vmatpush.msrb.mxu1 %v2933_v0  ;;  %2945 = vmatpush.msra.mxu2 %v2932_v59  ;;  %v2865_v0 = vld [vmem:[#allocation2] sm:$0xff]  ;;  %v3138_v59 = vld [vmem:[#allocation2 + $0x330] sm:$0xff] }
 0x411   :  { %2986 = vmatpush.msrb.mxu1 %v2931_v43  ;;  %2946 = vmatpush.msra.mxu2 %v2930_v50  ;;  %v2908_v50 = vld [vmem:[#allocation2 + $0x150] sm:$0xff] }
 0x413   :  { %v2385_v51 = vpop.f32.mrf.mxu0  ;;  %v2439_v58 = vpop.f32.mrf.mxu1  ;;  %2987 = vmatpush.msrb.mxu1 %v2929_v5  ;;  %2947 = vmatpush.msra.mxu2 %v2928_v12  ;;  %v2910_v5 = vld [vmem:[#allocation2 + $0x160] sm:$0xff] }
 0x414   :  { %v2467_v2 = vmax.f32 %v2385_v51, %v2439_v58 }
 0x415   :  { %2988 = vmatpush.msrb.mxu1 %v2927_v61  ;;  %2948 = vmatpush.msra.mxu2 %v2926_v3  ;;  %v3135_v3 = vld [vmem:[#allocation2 + $0x318] sm:$0xff] }
 0x416   :  { %2552 = vmatmul.f32.gmra.mxu2 %v2467_v2  ;;  %2598 = vmatmul.f32.gmra.mxu1 %v2467_v2 }
 0x417   :  { %2989 = vmatpush.msrb.mxu1 %v2925_v37  ;;  %2949 = vmatpush.msra.mxu2 %v2924_v26  ;;  %v3137_v37 = vld [vmem:[#allocation2 + $0x328] sm:$0xff]  ;;  %v3134_v26 = vld [vmem:[#allocation2 + $0x310] sm:$0xff] }
 0x419   :  { %2990 = vmatpush.msrb.mxu1 %v2923_v34  ;;  %2950 = vmatpush.msra.mxu2 %v2922_v4 }
 0x41b   :  { %2991 = vmatpush.msrb.mxu1 %v2921_v42  ;;  %2951 = vmatpush.msra.mxu2 %v2920_v8 }
 0x41d   :  { %2992 = vmatpush.msrb.mxu1 %v2919_v21  ;;  %2952 = vmatpush.msra.mxu2 %v2918_v16  ;;  %v2906_v21 = vld [vmem:[#allocation2 + $0x140] sm:$0xff] }
 0x41e   :  { %2705 = vmatmul.f32.vlgmr.msrb.gmra.mxu2 %v2465_v20  ;;  %2751 = vmatmul.f32.vlgmr.msra.gmra.mxu1 %v2465_v20 }
 0x41f   :  { %2993 = vmatpush.msrb.mxu1 %v2917_v62  ;;  %2953 = vmatpush.msra.mxu2 %v2916_v18  ;;  %v3133_v62 = vld [vmem:[#allocation2 + $0x308] sm:$0xff] }
 0x421   :  { %2994 = vmatpush.msrb.mxu1 %v2915_v28  ;;  %v2904_v28 = vld [vmem:[#allocation2 + $0x130] sm:$0xff] }
 0x423   :  { %2995 = vmatpush.msrb.mxu1 %v2913_v29 }
 0x425   :  { %2996 = vmatpush.msrb.mxu1 %v2911_v46  ;;  %v2892_v46 = vld [vmem:[#allocation2 + $0xd8] sm:$0xff] }
 0x426   :  { %2708 = vmatmul.f32.gmra.mxu2 %v2467_v2  ;;  %2754 = vmatmul.f32.gmra.mxu1 %v2467_v2 }
 0x427   :  { %2997 = vmatpush.msrb.mxu1 %v2909_v63  ;;  %v3125_v63 = vld [vmem:[#allocation2 + $0x2c8] sm:$0xff] }
 0x437   :  { %v2459_v10 = vpop.f32.mrf.mxu0 }
 0x43d   :  { %v2405_v35 = vpop.f32.mrf.mxu3 }
 0x43e   :  { %v2466_v52 = vmax.f32 %v2405_v35, %v2459_v10  ;;  %v2914_v10 = vld [vmem:[#allocation2 + $0x180] sm:$0xff]  ;;  %v2907_v35 = vld [vmem:[#allocation2 + $0x148] sm:$0xff] }
 0x43f   :  { %v2462_v53 = vpop.f32.mrf.mxu0  ;;  %2954 = vmatpush.msra.mxu2 %v2914_v10  ;;  %2998 = vmatpush.msrb.mxu1 %v2907_v35 }
 0x440   :  { %2572 = vmatmul.f32.vlgmr.msra.gmra.mxu3 %v2466_v52  ;;  %2618 = vmatmul.f32.vlgmr.msra.gmra.mxu0 %v2466_v52 }
 0x441   :  { %3027 = vmatpush.msra.mxu0 %v2895_v1  ;;  %v2905_v1 = vld [vmem:[#allocation2 + $0x138] sm:$0xff] }
 0x442   :  { %2999 = vmatpush.msrb.mxu1 %v2905_v1  ;;  %v3122_v1 = vld [vmem:[#allocation2 + $0x2b0] sm:$0xff] }
 0x443   :  { %3028 = vmatpush.msra.mxu0 %v2893_v36 }
 0x445   :  { %v2408_v19 = vpop.f32.mrf.mxu3  ;;  %3029 = vmatpush.msra.mxu0 %v2891_v6  ;;  %v3139_v6 = vld [vmem:[#allocation2 + $0x338] sm:$0xff] }
 0x446   :  { %v2468_v14 = vmax.f32 %v2408_v19, %v2462_v53 }
 0x447   :  { %3030 = vmatpush.msra.mxu0 %v2889_v47  ;;  %v2903_v47 = vld [vmem:[#allocation2 + $0x128] sm:$0xff] }
 0x448   :  { %2575 = vmatmul.f32.gmra.mxu3 %v2468_v14  ;;  %2621 = vmatmul.f32.gmra.mxu0 %v2468_v14 }
 0x449   :  { %3031 = vmatpush.msra.mxu0 %v2887_v27  ;;  %3000 = vmatpush.msrb.mxu1 %v2903_v47 }
 0x44b   :  { %3032 = vmatpush.msra.mxu0 %v2885_v13  ;;  %3149 = vmatpush.msra.mxu1 %v3138_v59  ;;  %v2937_v59 = vld [vmem:[#allocation2 + $0x238] sm:$0xff] }
 0x44d   :  { %3033 = vmatpush.msra.mxu0 %v2883_v11 }
 0x44f   :  { %3034 = vmatpush.msra.mxu0 %v2881_v24  ;;  %v3136_v24 = vld [vmem:[#allocation2 + $0x320] sm:$0xff] }
 0x450   :  { %2728 = vmatmul.f32.vlgmr.msrb.gmra.mxu3 %v2466_v52  ;;  %2774 = vmatmul.f32.vlgmr.msrb.gmra.mxu0 %v2466_v52  ;;  %v2867_v52 = vld [vmem:[#allocation2 + $0x10] sm:$0xff] }
 0x451   :  { %3035 = vmatpush.msra.mxu0 %v2879_v22  ;;  %3150 = vmatpush.msra.mxu1 %v3136_v24 }
 0x453   :  { %3036 = vmatpush.msra.mxu0 %v2877_v31  ;;  %3151 = vmatpush.msra.mxu1 %v3134_v26 }
 0x455   :  { %3037 = vmatpush.msra.mxu0 %v2875_v57 }
 0x457   :  { %3038 = vmatpush.msra.mxu0 %v2873_v9  ;;  %v3127_v9 = vld [vmem:[#allocation2 + $0x2d8] sm:$0xff] }
 0x458   :  { %2731 = vmatmul.f32.gmra.mxu3 %v2468_v14  ;;  %2777 = vmatmul.f32.gmra.mxu0 %v2468_v14  ;;  %v2912_v14 = vld [vmem:[#allocation2 + $0x170] sm:$0xff] }
 0x459   :  { %3039 = vmatpush.msra.mxu0 %v2871_v56  ;;  %2955 = vmatpush.msra.mxu2 %v2912_v14  ;;  %v3126_v56 = vld [vmem:[#allocation2 + $0x2d0] sm:$0xff]  ;;  %v2888_v14 = vld [vmem:[#allocation2 + $0xb8] sm:$0xff] }
 0x45b   :  { %3040 = vmatpush.msra.mxu0 %v2869_v25  ;;  %2956 = vmatpush.msra.mxu2 %v2910_v5  ;;  %v2936_v25 = vld [vmem:[#allocation2 + $0x230] sm:$0xff] }
 0x45c   :  { %2979 = vmatpush.msra.mxu3 %v2936_v25  ;;  %v3384_v25 = vld [vmem:[#allocation2 + $0x560] sm:$0xff] }
 0x45d   :  { %3041 = vmatpush.msra.mxu0 %v2867_v52  ;;  %2957 = vmatpush.msra.mxu2 %v2908_v50  ;;  %v3123_v52 = vld [vmem:[#allocation2 + $0x2b8] sm:$0xff] }
 0x45f   :  { %3042 = vmatpush.msra.mxu0 %v2865_v0  ;;  %2958 = vmatpush.msra.mxu2 %v2906_v21  ;;  %v3117_v21 = vld [vmem:[#allocation2 + $0x288] sm:$0xff] }
 0x461   :  { %3189 = vmatpush.msrb.mxu0 %v3139_v6  ;;  %2959 = vmatpush.msra.mxu2 %v2904_v28 }
 0x463   :  { %3190 = vmatpush.msrb.mxu0 %v3137_v37 }
 0x465   :  { %3191 = vmatpush.msrb.mxu0 %v3135_v3 }
 0x467   :  { %3192 = vmatpush.msrb.mxu0 %v3133_v62 }
 0x48b   :  { %v2596_v30 = vpop.f32.mrf.mxu1 }
 0x491   :  { %v2550_v40 = vpop.f32.mrf.mxu2 }
 0x493   :  { %v11084_v20 = vpop.f32.mrf.mxu1 }
 0x499   :  { %v2553_v2 = vpop.f32.mrf.mxu2 }
 0x49b   :  { %v2752_v23 = vpop.f32.mrf.mxu1 }
 0x4a1   :  { %v2706_v60 = vpop.f32.mrf.mxu2 }
 0x4a3   :  { %v2755_v11 = vpop.f32.mrf.mxu1 }
 0x4a9   :  { %v2709_v43 = vpop.f32.mrf.mxu2 }
 0x4bd   :  { %v2619_v39 = vpop.f32.mrf.mxu0 }
 0x4be   :  { %v2620_v55 = vadd.f32 %v2619_v39, %v2596_v30  ;;  %v3132_v30 = vld [vmem:[#allocation2 + $0x300] sm:$0xff] }
 0x4bf   :  { %3152 = vmatpush.msra.mxu1 %v3132_v30 }
 0x4c3   :  { %v2573_v51 = vpop.f32.mrf.mxu3 }
 0x4c4   :  { %v2574_v32 = vadd.f32 %v2573_v51, %v2550_v40  ;;  %v3131_v40 = vld [vmem:[#allocation2 + $0x2f8] sm:$0xff]  ;;  %v2902_v51 = vld [vmem:[#allocation2 + $0x120] sm:$0xff] }
 0x4c5   :  { %v11086_v58 = vpop.f32.mrf.mxu0  ;;  %3193 = vmatpush.msrb.mxu0 %v3131_v40  ;;  %2960 = vmatpush.msra.mxu2 %v2902_v51  ;;  %v2880_v51 = vld [vmem:[#allocation2 + $0x78] sm:$0xff] }
 0x4c6   :  { %v2623_v4 = vadd.f32 %v11086_v58, %v11084_v20  ;;  %v2896_v20 = vld [vmem:[#allocation2 + $0xf8] sm:$0xff]  ;;  %v3130_v58 = vld [vmem:[#allocation2 + $0x2f0] sm:$0xff] }
 0x4c7   :  { %3067 = vmatpush.msrb.mxu2 %v2896_v20  ;;  %3153 = vmatpush.msra.mxu1 %v3130_v58  ;;  %v3113_v58 = vld [vmem:[#allocation2 + $0x268] sm:$0xff] }
 0x4cb   :  { %v2576_v45 = vpop.f32.mrf.mxu3 }
 0x4cc   :  { %v2577_v12 = vadd.f32 %v2576_v45, %v2553_v2 }
 0x4cd   :  { %v2775_v15 = vpop.f32.mrf.mxu0 }
 0x4ce   :  { %v2776_v48 = vadd.f32 %v2775_v15, %v2752_v23  ;;  %v3129_v15 = vld [vmem:[#allocation2 + $0x2e8] sm:$0xff] }
 0x4cf   :  { %3194 = vmatpush.msrb.mxu0 %v3129_v15  ;;  %v2878_v15 = vld [vmem:[#allocation2 + $0x68] sm:$0xff] }
 0x4d0   :  { %v11088_v33 = vmax.f32 %v2620_v55, %v2776_v48  ;;  %v2894_v55 = vld [vmem:[#allocation2 + $0xe8] sm:$0xff]  ;;  %v3128_v48 = vld [vmem:[#allocation2 + $0x2e0] sm:$0xff] }
 0x4d1   :  { %3068 = vmatpush.msrb.mxu2 %v2894_v55  ;;  %3154 = vmatpush.msra.mxu1 %v3128_v48  ;;  %v3112_v55 = vld [vmem:[#allocation2 + $0x260] sm:$0xff]  ;;  %v3111_v48 = vld [vmem:[#allocation2 + $0x258] sm:$0xff] }
 0x4d2   :  { %v7116_v41 = vmul.f32 -1.442695, %v11088_v33  ;;  %3195 = vmatpush.msrb.mxu0 %v3127_v9  ;;  %v3109_v9 = vld [vmem:[#allocation2 + $0x248] sm:$0xff] }
 0x4d3   :  { %v2729_v7 = vpop.f32.mrf.mxu3  ;;  %3069 = vmatpush.msrb.mxu2 %v2892_v46  ;;  %3155 = vmatpush.msra.mxu1 %v3126_v56  ;;  %v3386_v56 = vld [vmem:[#allocation2 + $0x570] sm:$0xff] }
 0x4d4   :  { %7398 = vpow2.f32 %v7116_v41  ;;  %v2730_v44 = vadd.f32 %v2729_v7, %v2706_v60  ;;  %v2890_v7 = vld [vmem:[#allocation2 + $0xc8] sm:$0xff]  ;;  %3196 = vmatpush.msrb.mxu0 %v3125_v63  ;;  %v2872_v63 = vld [vmem:[#allocation2 + $0x38] sm:$0xff] }
 0x4d5   :  { %v2778_v27 = vpop.f32.mrf.mxu0  ;;  %3070 = vmatpush.msrb.mxu2 %v2890_v7 }
 0x4d6   :  { %v11091_v53 = vmax.f32 %v2574_v32, %v2730_v44  ;;  %v2779_v42 = vadd.f32 %v2778_v27, %v2755_v11  ;;  %v3124_v32 = vld [vmem:[#allocation2 + $0x2c0] sm:$0xff]  ;;  %3197 = vmatpush.msrb.mxu0 %v3123_v52  ;;  %v2884_v11 = vld [vmem:[#allocation2 + $0x98] sm:$0xff] }
 0x4d7   :  { %v2934_v44 = vld [vmem:[#allocation2 + $0x220] sm:$0xff]  ;;  %3156 = vmatpush.msra.mxu1 %v3124_v32  ;;  %3071 = vmatpush.msrb.mxu2 %v2888_v14  ;;  %v3261_v32 = vld [vmem:[#allocation2 + $0x448] sm:$0xff]  ;;  %v3259_v52 = vld [vmem:[#allocation2 + $0x438] sm:$0xff] }
 0x4d8   :  { %v7115_v19 = vmul.f32 -1.442695, %v11091_v53  ;;  %v11103_v39 = vmax.f32 %v2623_v4, %v2779_v42  ;;  %2980 = vmatpush.msra.mxu3 %v2934_v44  ;;  %v3120_v27 = vld [vmem:[#allocation2 + $0x2a0] sm:$0xff]  ;;  %v2935_v42 = vld [vmem:[#allocation2 + $0x228] sm:$0xff] }
 0x4d9   :  { %3157 = vmatpush.msra.mxu1 %v3122_v1  ;;  %v3116_v4 = vld [vmem:[#allocation2 + $0x280] sm:$0xff]  ;;  %v2870_v44 = vld [vmem:[#allocation2 + $0x28] sm:$0xff] }
 0x4da   :  { %v7399_v36 = vpop.eup %7398  ;;  %7400 = vpow2.f32 %v7115_v19  ;;  %v7118_v29 = vmul.f32 -1.442695, %v11103_v39  ;;  %3019 = vmatpush.msrb.mxu3 %v2937_v59  ;;  %v3380_v1 = vld [vmem:[#allocation2 + $0x540] sm:$0xff] }
 0x4db   :  { %v11094_v61 = vadd.f32 1.0, %v7399_v36  ;;  %v2732_v13 = vpop.f32.mrf.mxu3  ;;  %3158 = vmatpush.msra.mxu1 %v3120_v27  ;;  %v3376_v27 = vld [vmem:[#allocation2 + $0x520] sm:$0xff] }
 0x4dc   :  { %v2733_v34 = vadd.f32 %v2732_v13, %v2709_v43  ;;  %v3121_v43 = vld [vmem:[#allocation2 + $0x2a8] sm:$0xff]  ;;  %3020 = vmatpush.msrb.mxu3 %v2935_v42  ;;  %v3264_v42 = vld [vmem:[#allocation2 + $0x460] sm:$0xff] }
 0x4dd   :  { %7402 = vrcp.f32 %v11094_v61  ;;  %v2827_v16 = vand.u32 2147483648, %v11094_v61  ;;  %v2825_v18 = vand.u32 2147483647, %v11094_v61  ;;  %vm2821_vm4 = vweird.f32 %v11094_v61  ;;  %3198 = vmatpush.msrb.mxu0 %v3121_v43  ;;  %v3257_v43 = vld [vmem:[#allocation2 + $0x428] sm:$0xff] }
 0x4de   :  { %v11097_v22 = vmax.f32 %v2577_v12, %v2733_v34  ;;  %v3119_v34 = vld [vmem:[#allocation2 + $0x298] sm:$0xff]  ;;  %v3118_v12 = vld [vmem:[#allocation2 + $0x290] sm:$0xff] }
 0x4df   :  { %v2828_v19 = vor.u32 1.1754944e-38, %v2827_v16  ;;  %vm2826_vm14 = vcmp.eq.f32.partialorder %v2825_v18, 8.507059e+37  ;;  %3199 = vmatpush.msrb.mxu0 %v3119_v34  ;;  %3159 = vmatpush.msra.mxu1 %v3118_v12  ;;  %v2874_v16 = vld [vmem:[#allocation2 + $0x48] sm:$0xff]  ;;  %v3263_v18 = vld [vmem:[#allocation2 + $0x458] sm:$0xff]  ;;  %v3374_v34 = vld [vmem:[#allocation2 + $0x510] sm:$0xff] }
 0x4e0   :  { %v7401_v31 = vpop.eup %7400  ;;  %v7117_v45 = vmul.f32 -1.442695, %v11097_v22  ;;  %v3251_v12 = vld [vmem:[#allocation2 + $0x3f8] sm:$0xff] }
 0x4e1   :  { %v11101_v57 = vadd.f32 1.0, %v7401_v31  ;;  %v2882_v31 = vld [vmem:[#allocation2 + $0x88] sm:$0xff]  ;;  %3200 = vmatpush.msrb.mxu0 %v3117_v21  ;;  %3160 = vmatpush.msra.mxu1 %v3116_v4  ;;  %v3267_v21 = vld [vmem:[#allocation2 + $0x478] sm:$0xff] }
 0x4e3   :  { %v7403_v2 = vpop.eup %7402  ;;  %7404 = vrcp.f32 %v11101_v57  ;;  %v2812_v47 = vand.u32 2147483648, %v11101_v57  ;;  %v2810_v50 = vand.u32 2147483647, %v11101_v57  ;;  %vm2806_vm6 = vweird.f32 %v11101_v57 }
 0x4e4   :  { %v2817_v23 = vmul.f32 %v7403_v2, %v11094_v61  ;;  %7406 = vpow2.f32 %v7117_v45  ;;  %vm2822_vm11 = vweird.f32 %v7403_v2  ;;  %v2886_v61 = vld [vmem:[#allocation2 + $0xa8] sm:$0xff]  ;;  %v2899_v45 = vld [vmem:[#allocation2 + $0x110] sm:$0xff] }
 0x4e5   :  { %7408 = vpow2.f32 %v7118_v29  ;;  %vm2823_vm7 = vmor %vm2821_vm4, %vm2822_vm11  ;;  %3072 = vmatpush.msrb.mxu2 %v2886_v61  ;;  %v2813_v62 = vor.u32 1.1754944e-38, %v2812_v47  ;;  %vm2811_vm8 = vcmp.eq.f32.partialorder %v2810_v50, 8.507059e+37  ;;  %v3110_v29 = vld [vmem:[#allocation2 + $0x250] sm:$0xff]  ;;  %v3255_v47 = vld [vmem:[#allocation2 + $0x418] sm:$0xff] }
 0x4e6   :  { %v2818_v8 = vsub.f32 1.0, %v2817_v23  ;;  %v2897_v23 = vld [vmem:[#allocation2 + $0x100] sm:$0xff]  ;;  %v3266_v50 = vld [vmem:[#allocation2 + $0x470] sm:$0xff] }
 0x4e7   :  { %3073 = vmatpush.msrb.mxu2 %v2884_v11  ;;  %v2898_v11 = vld [vmem:[#allocation2 + $0x108] sm:$0xff] }
 0x4e8   :  { %v2819_v60 = vmul.f32 %v7403_v2, %v2818_v8 }
 0x4e9   :  { %v11111_v41 = vpop.eup %7404  ;;  %3074 = vmatpush.msrb.mxu2 %v2882_v31  ;;  %v3142_v31 = vld [vmem:[#allocation2 + $0x350] sm:$0xff] }
 0x4ea   :  { %v2820_v10 = vadd.f32 %v7403_v2, %v2819_v60  ;;  %v2802_v35 = vmul.f32 %v11111_v41, %v11101_v57  ;;  %v7407_v6 = vpop.eup %7406  ;;  %vm2807_vm2 = vweird.f32 %v11111_v41  ;;  %v3115_v57 = vld [vmem:[#allocation2 + $0x278] sm:$0xff]  ;;  %v3108_v60 = vld [vmem:[#allocation2 + $0x240] sm:$0xff] }
 0x4eb   :  { %v7409_v24 = vpop.eup %7408  ;;  %vm2808_vm13 = vmor %vm2806_vm6, %vm2807_vm2  ;;  %3201 = vmatpush.msrb.mxu0 %v3115_v57  ;;  %3075 = vmatpush.msrb.mxu2 %v2880_v51  ;;  %v3265_v57 = vld [vmem:[#allocation2 + $0x468] sm:$0xff]  ;;  %v3247_v51 = vld [vmem:[#allocation2 + $0x3d8] sm:$0xff] }
 0x4ec   :  { %v2824_v0 = vsel %vm2823_vm7, %v7403_v2, %v2820_v10  ;;  %v2803_v36 = vsub.f32 1.0, %v2802_v35  ;;  %v11132_v40 = vadd.f32 1.0, %v7409_v24  ;;  %v3114_v2 = vld [vmem:[#allocation2 + $0x270] sm:$0xff]  ;;  %v2900_v35 = vld [vmem:[#allocation2 + $0x118] sm:$0xff] }
 0x4ed   :  { %v2829_v5 = vsel %vm2826_vm14, %v2828_v19, %v2824_v0  ;;  %3161 = vmatpush.msra.mxu1 %v3114_v2  ;;  %3202 = vmatpush.msrb.mxu0 %v3113_v58  ;;  %v3382_v10 = vld [vmem:[#allocation2 + $0x550] sm:$0xff]  ;;  %v2868_v19 = vld [vmem:[#allocation2 + $0x18] sm:$0xff] }
 0x4ee   :  { %v11119_v37 = vmul.f32 %v2829_v5, %v11088_v33  ;;  %v2804_v13 = vmul.f32 %v11111_v41, %v2803_v36  ;;  %v11126_v33 = vadd.f32 1.0, %v7407_v6  ;;  %3076 = vmatpush.msrb.mxu2 %v2878_v15  ;;  %v3378_v6 = vld [vmem:[#allocation2 + $0x530] sm:$0xff]  ;;  %v2866_v5 = vld [vmem:[#allocation2 + $0x8] sm:$0xff]  ;;  %vm2851_vm7 = vweird.f32 %v11132_v40 }
 0x4ef   :  { %3162 = vmatpush.msra.mxu1 %v3112_v55  ;;  %3203 = vmatpush.msrb.mxu0 %v3111_v48  ;;  %v3245_v55 = vld [vmem:[#allocation2 + $0x3c8] sm:$0xff]  ;;  %v3390_v48 = vld [vmem:[#allocation2 + $0x590] sm:$0xff] }
 0x4f0   :  { %v2805_v3 = vadd.f32 %v11111_v41, %v2804_v13  ;;  %v2941_v26 = vrot.slane %v11119_v37, 1  ;;  %7410 = vrcp.f32 %v11126_v33  ;;  %v3253_v13 = vld [vmem:[#allocation2 + $0x408] sm:$0xff]  ;;  %v2842_v4 = vand.u32 2147483648, %v11126_v33 }
 0x4f1   :  { %7412 = vrcp.f32 %v11132_v40  ;;  %3163 = vmatpush.msra.mxu1 %v3110_v29  ;;  %3204 = vmatpush.msrb.mxu0 %v3109_v9  ;;  %vm2836_vm3 = vweird.f32 %v11126_v33  ;;  %v3269_v58 = vrot.slane %v11119_v37, 3  ;;  %v3366_v29 = vld [vmem:[#allocation2 + $0x4d0] sm:$0xff]  ;;  %v3140_v9 = vld [vmem:[#allocation2 + $0x340] sm:$0xff] }
 0x4f2   :  { %v2809_v28 = vsel %vm2808_vm13, %v11111_v41, %v2805_v3  ;;  %7119 = vmatmul.msk.f32.vlgmr.msra.gmra.mxu3 %vm14371_vm0, %v2941_v26  ;;  %v3372_v3 = vld [vmem:[#allocation2 + $0x500] sm:$0xff] }
 0x4f3   :  { %v2814_v30 = vsel %vm2811_vm8, %v2813_v62, %v2809_v28  ;;  %3061 = vmatpush.msra.mxu3 %v2899_v45  ;;  %3164 = vmatpush.msra.mxu1 %v3108_v60  ;;  %v3249_v62 = vld [vmem:[#allocation2 + $0x3e8] sm:$0xff]  ;;  %v3370_v28 = vld [vmem:[#allocation2 + $0x4f0] sm:$0xff]  ;;  %v3367_v45 = vld [vmem:[#allocation2 + $0x4d8] sm:$0xff] }
 0x4f4   :  { %v11138_v20 = vmul.f32 %v2814_v30, %v11091_v53  ;;  %v2876_v53 = vld [vmem:[#allocation2 + $0x58] sm:$0xff]  ;;  %v2840_v30 = vand.u32 2147483647, %v11126_v33 }
 0x4f5   :  { %3062 = vmatpush.msra.mxu3 %v2897_v23  ;;  %3077 = vmatpush.msrb.mxu2 %v2876_v53  ;;  %v3368_v23 = vld [vmem:[#allocation2 + $0x4e0] sm:$0xff]  ;;  %v2843_v53 = vor.u32 1.1754944e-38, %v2842_v4  ;;  %v3373_v4 = vld [vmem:[#allocation2 + $0x508] sm:$0xff] }
 0x4f6   :  { %v2940_v8 = vrot.slane %v11138_v20, 1  ;;  %v11143_v46 = vpop.eup %7410  ;;  %3043 = vmatmul.f32.vlgmr.msra.gmra.mxu0 %v11138_v20  ;;  %v3144_v36 = vrot.slane %v11138_v20, 2  ;;  %vm2841_vm2 = vcmp.eq.f32.partialorder %v2840_v30, 8.507059e+37  ;;  %v3246_v30 = vld [vmem:[#allocation2 + $0x3d0] sm:$0xff] }
 0x4f7   :  { %3078 = vmatpush.msrb.mxu2 %v2874_v16  ;;  %v11146_v41 = vpop.eup %7412  ;;  %v2832_v7 = vmul.f32 %v11143_v46, %v11126_v33  ;;  %3403 = vmatpush.msra.mxu0 %v3386_v56  ;;  %vm2837_vm10 = vweird.f32 %v11143_v46  ;;  %v2857_v33 = vand.u32 2147483648, %v11132_v40  ;;  %v3143_v56 = vld [vmem:[#allocation2 + $0x358] sm:$0xff]  ;;  %v3232_v16 = vld [vmem:[#allocation2 + $0x360] sm:$0xff] }
 0x4f8   :  { %2961 = vmatmul.f32.vlgmr.msra.gmra.mxu2 %v2940_v8  ;;  %3001 = vmatmul.f32.vlgmr.msrb.gmra.mxu1 %v2940_v8  ;;  %v2847_v14 = vmul.f32 %v11146_v41, %v11132_v40  ;;  %vm2852_vm11 = vweird.f32 %v11146_v41  ;;  %vm11170_vm4 = vmor %vm2836_vm3, %vm2837_vm10  ;;  %v2855_v8 = vand.u32 2147483647, %v11132_v40 }
 0x4f9   :  { %3313 = vmatpush.msrb.mxu1 %v3263_v18  ;;  %3079 = vmatpush.msrb.mxu2 %v2872_v63  ;;  %v2833_v0 = vsub.f32 1.0, %v2832_v7  ;;  %vm11184_vm14 = vmor %vm2851_vm7, %vm2852_vm11  ;;  %v3364_v18 = vld [vmem:[#allocation2 + $0x4c0] sm:$0xff]  ;;  %v3241_v7 = vld [vmem:[#allocation2 + $0x3a8] sm:$0xff]  ;;  %vm14370_vm11 = vcmask 39936  }
 0x4fa   :  { %3404 = vmatpush.msra.mxu0 %v3384_v25  ;;  %7120 = vmatmul.msk.f32.vlgmr.msrb.gmra.mxu3 %vm14371_vm0, %v2941_v26  ;;  %v2848_v61 = vsub.f32 1.0, %v2847_v14  ;;  %v3388_v63 = vld [vmem:[#allocation2 + $0x580] sm:$0xff]  ;;  %v2858_v25 = vor.u32 1.1754944e-38, %v2857_v33  ;;  %vm2856_vm6 = vcmp.eq.f32.partialorder %v2855_v8, 8.507059e+37  ;;  %v3237_v14 = vld [vmem:[#allocation2 + $0x388] sm:$0xff] }
 0x4fb   :  { %3314 = vmatpush.msrb.mxu1 %v3261_v32  ;;  %3080 = vmatpush.msrb.mxu2 %v2870_v44  ;;  %v2834_v59 = vmul.f32 %v11143_v46, %v2833_v0  ;;  %v3141_v32 = vld [vmem:[#allocation2 + $0x348] sm:$0xff]  ;;  %v3362_v44 = vld [vmem:[#allocation2 + $0x4b0] sm:$0xff]  ;;  %v3145_v0 = vrot.slane %v11119_v37, 2  ;;  %v3240_v33 = vld [vmem:[#allocation2 + $0x3a0] sm:$0xff] }
 0x4fc   :  { %3405 = vmatpush.msra.mxu0 %v3382_v10  ;;  %3101 = vmatpush.msrb.mxu3 %v2900_v35  ;;  %v2849_v24 = vmul.f32 %v11146_v41, %v2848_v61  ;;  %v3356_v61 = vld [vmem:[#allocation2 + $0x480] sm:$0xff] }
 0x4fd   :  { %3315 = vmatpush.msrb.mxu1 %v3259_v52  ;;  %3081 = vmatpush.msrb.mxu2 %v2868_v19  ;;  %v2835_v26 = vadd.f32 %v11143_v46, %v2834_v59  ;;  %v3360_v52 = vld [vmem:[#allocation2 + $0x4a0] sm:$0xff]  ;;  %v3387_v19 = vld [vmem:[#allocation2 + $0x578] sm:$0xff] }
 0x4fe   :  { %3406 = vmatpush.msra.mxu0 %v3380_v1  ;;  %3102 = vmatpush.msrb.mxu3 %v2898_v11  ;;  %v2850_v2 = vadd.f32 %v11146_v41, %v2849_v24  ;;  %v3381_v11 = vld [vmem:[#allocation2 + $0x548] sm:$0xff]  ;;  %v3397_v24 = vrot.slane %v11119_v37, 4  ;;  %v3236_v8 = vld [vmem:[#allocation2 + $0x380] sm:$0xff] }
 0x4ff   :  { %3205 = vmatmul.f32.vlgmr.msrb.gmra.mxu0 %v3144_v36  ;;  %3316 = vmatpush.msrb.mxu1 %v3257_v43  ;;  %v2839_v15 = vsel %vm11170_vm4, %v11143_v46, %v2835_v26  ;;  %v3243_v46 = vld [vmem:[#allocation2 + $0x3b8] sm:$0xff]  ;;  %v3358_v43 = vld [vmem:[#allocation2 + $0x490] sm:$0xff] }
 0x500   :  { %3165 = vmatmul.f32.vlgmr.msra.gmra.mxu1 %v3144_v36  ;;  %3407 = vmatpush.msra.mxu0 %v3378_v6  ;;  %v2854_v40 = vsel %vm11184_vm14, %v11146_v41, %v2850_v2  ;;  %v2844_v60 = vsel %vm2841_vm2, %v2843_v53, %v2839_v15  ;;  %v3239_v41 = vld [vmem:[#allocation2 + $0x398] sm:$0xff]  ;;  %v3262_v36 = vld [vmem:[#allocation2 + $0x450] sm:$0xff]  ;;  %v3244_v2 = vld [vmem:[#allocation2 + $0x3c0] sm:$0xff] }
 0x501   :  { %3082 = vmatpush.msrb.mxu2 %v2866_v5  ;;  %3317 = vmatpush.msrb.mxu1 %v3255_v47  ;;  %v2859_v10 = vsel %vm2856_vm6, %v2858_v25, %v2854_v40  ;;  %v2863_v35 = vmul.f32 %v2844_v60, %v11097_v22  ;;  %v3385_v22 = vld [vmem:[#allocation2 + $0x568] sm:$0xff]  ;;  %v3235_v5 = vld [vmem:[#allocation2 + $0x378] sm:$0xff]  ;;  %v3260_v47 = vld [vmem:[#allocation2 + $0x440] sm:$0xff]  ;;  %vm14487_vm6 = vcmask 1046528  }
 0x502   :  { %3083 = vmatmul.f32.vlgmr.msrb.gmra.mxu2 %v11138_v20  ;;  %3408 = vmatpush.msra.mxu0 %v3376_v27  ;;  %v2864_v1 = vmul.f32 %v2859_v10, %v11103_v39  ;;  %v3383_v39 = vld [vmem:[#allocation2 + $0x558] sm:$0xff]  ;;  %v3394_v27 = vrot.slane %v11138_v20, 4  ;;  %v3254_v26 = vld [vmem:[#allocation2 + $0x410] sm:$0xff] }
 0x503   :  { %7121 = vmatmul.msk.f32.vlgmr.msra.gmra.mxu3 %vm14371_vm0, %v11119_v37  ;;  %3318 = vmatpush.msrb.mxu1 %v3253_v13  ;;  %v3395_v6 = vrot.slane %v2863_v35, 4  ;;  %v3258_v13 = vld [vmem:[#allocation2 + $0x430] sm:$0xff]  ;;  %v3363_v15 = vld [vmem:[#allocation2 + $0x4b8] sm:$0xff] }
 0x504   :  { %3307 = vmatpush.msra.mxu2 %v3266_v50  ;;  %3409 = vmatpush.msra.mxu0 %v3374_v34  ;;  %v3398_v59 = vrot.slane %v2864_v1, 4  ;;  %v3233_v50 = vld [vmem:[#allocation2 + $0x368] sm:$0xff]  ;;  %v3359_v53 = vld [vmem:[#allocation2 + $0x498] sm:$0xff] }
 0x505   :  { %3319 = vmatpush.msrb.mxu1 %v3251_v12  ;;  %3183 = vmatpush.msra.mxu3 %v3142_v31  ;;  %v3396_v34 = vsel %vm14380_vm1, %v3394_v27, %v3395_v6  ;;  %v3268_v12 = vrot.slane %v11138_v20, 3  ;;  %v3252_v31 = vld [vmem:[#allocation2 + $0x400] sm:$0xff]  ;;  %v3375_v20 = vld [vmem:[#allocation2 + $0x518] sm:$0xff] }
 0x506   :  { %3308 = vmatpush.msra.mxu2 %v3264_v42  ;;  %3410 = vmatpush.msra.mxu0 %v3372_v3  ;;  %v3256_v42 = vld [vmem:[#allocation2 + $0x420] sm:$0xff]  ;;  %v3379_v3 = vld [vmem:[#allocation2 + $0x538] sm:$0xff] }
 0x507   :  { %3320 = vmatpush.msrb.mxu1 %v3249_v62  ;;  %3184 = vmatpush.msra.mxu3 %v3140_v9  ;;  %v3377_v62 = vld [vmem:[#allocation2 + $0x528] sm:$0xff] }
 0x508   :  { %3347 = vmatpush.msrb.mxu2 %v3267_v21  ;;  %3411 = vmatpush.msra.mxu0 %v3370_v28  ;;  %v3399_v21 = vsel %vm14380_vm1, %v3397_v24, %v3398_v59  ;;  %v3248_v28 = vld [vmem:[#allocation2 + $0x3e0] sm:$0xff]  ;;  %v3357_v9 = vld [vmem:[#allocation2 + $0x488] sm:$0xff] }
 0x509   :  { %3321 = vmatpush.msrb.mxu1 %v3247_v51  ;;  %v3369_v51 = vld [vmem:[#allocation2 + $0x4e8] sm:$0xff] }
 0x50a   :  { %3348 = vmatpush.msrb.mxu2 %v3265_v57  ;;  %3412 = vmatpush.msra.mxu0 %v3368_v23  ;;  %v3371_v57 = vld [vmem:[#allocation2 + $0x4f8] sm:$0xff]  ;;  %v3365_v23 = vld [vmem:[#allocation2 + $0x4c8] sm:$0xff] }
 0x50b   :  { %7125 = vmatmul.msk.f32.vlgmr.msra.gmra.mxu2 %vm14371_vm0, %v3269_v58  ;;  %7122 = vmatmul.msk.f32.vlgmr.msrb.gmra.mxu3 %vm14371_vm0, %v11119_v37  ;;  %v3250_v37 = vld [vmem:[#allocation2 + $0x3f0] sm:$0xff] }
 0x50c   :  { %3322 = vmatpush.msrb.mxu1 %v3245_v55  ;;  %3437 = vmatpush.msra.mxu2 %v3390_v48  ;;  %v3238_v55 = vld [vmem:[#allocation2 + $0x390] sm:$0xff]  ;;  %v3361_v48 = vld [vmem:[#allocation2 + $0x4a8] sm:$0xff] }
 0x50d   :  { %3413 = vmatpush.msra.mxu0 %v3366_v29  ;;  %3223 = vmatpush.msrb.mxu3 %v3143_v56  ;;  %v3234_v29 = vld [vmem:[#allocation2 + $0x370] sm:$0xff]  ;;  %v3389_v56 = vld [vmem:[#allocation2 + $0x588] sm:$0xff] }
 0x50e   :  { %3323 = vmatpush.msrb.mxu1 %v3243_v46  ;;  %3438 = vmatpush.msra.mxu2 %v3388_v63  ;;  %v3391_v46 = vld [vmem:[#allocation2 + $0x598] sm:$0xff] }
 0x50f   :  { %3414 = vmatpush.msra.mxu0 %v3364_v18  ;;  %3224 = vmatpush.msrb.mxu3 %v3141_v32 }
 0x510   :  { %3324 = vmatpush.msrb.mxu1 %v3241_v7 }
 0x511   :  { %3415 = vmatpush.msra.mxu0 %v3362_v44 }
 0x512   :  { %3325 = vmatpush.msrb.mxu1 %v3239_v41 }
 0x513   :  { %7126 = vmatmul.msk.f32.vlgmr.msrb.gmra.mxu2 %vm14371_vm0, %v3269_v58  ;;  %3416 = vmatpush.msra.mxu0 %v3360_v52  ;;  %v3242_v58 = vld [vmem:[#allocation2 + $0x3b0] sm:$0xff] }
 0x514   :  { %3443 = vmatpush.msrb.mxu2 %v3387_v19  ;;  %7123 = vmatmul.msk.f32.vlgmr.msra.gmra.mxu3 %vm14371_vm0, %v3145_v0 }
 0x515   :  { %3326 = vmatpush.msrb.mxu1 %v3237_v14  ;;  %3273 = vmatpush.msra.mxu3 %v3262_v36 }
 0x516   :  { %3417 = vmatpush.msra.mxu0 %v3358_v43  ;;  %3444 = vmatpush.msrb.mxu2 %v3385_v22 }
 0x517   :  { %3327 = vmatpush.msrb.mxu1 %v3235_v5  ;;  %3274 = vmatpush.msra.mxu3 %v3260_v47  ;;  %v11209_v47 = vld [vmem:[%s14485_s5] sm:$0x3] }
 0x518   :  { %3418 = vmatpush.msra.mxu0 %v3356_v61  ;;  %3445 = vmatpush.msrb.mxu2 %v3383_v39  ;;  %14486 = vst [vmem:[#allocation11_spill] sm:$0xff] %v11209_v47 }
 0x519   :  { %3419 = vmatmul.f32.vlgmr.msra.gmra.mxu0 %v3396_v34  ;;  %3275 = vmatpush.msra.mxu3 %v3258_v13 }
 0x51a   :  { %3328 = vmatpush.msrb.mxu1 %v3233_v50  ;;  %3446 = vmatpush.msrb.mxu2 %v3381_v11 }
 0x51b   :  { %3329 = vmatmul.f32.vlgmr.msrb.gmra.mxu1 %v3268_v12  ;;  %3276 = vmatpush.msra.mxu3 %v3256_v42 }
 0x51c   :  { %7127 = vmatmul.msk.f32.vlgmr.msra.gmra.mxu2 %vm14371_vm0, %v3399_v21  ;;  %7124 = vmatmul.msk.f32.vlgmr.msrb.gmra.mxu3 %vm14371_vm0, %v3145_v0 }
 0x51d   :  { %3447 = vmatpush.msrb.mxu2 %v3379_v3  ;;  %3277 = vmatpush.msra.mxu3 %v3254_v26 }
 0x51f   :  { %3448 = vmatpush.msrb.mxu2 %v3377_v62  ;;  %3278 = vmatpush.msra.mxu3 %v3252_v31 }
 0x521   :  { %3449 = vmatpush.msrb.mxu2 %v3375_v20  ;;  %3279 = vmatpush.msra.mxu3 %v3250_v37 }
 0x523   :  { %3450 = vmatpush.msrb.mxu2 %v3373_v4  ;;  %3280 = vmatpush.msra.mxu3 %v3248_v28  ;;  %v14372_v28 = vperm.slane %v11209_v47, 1 }
 0x525   :  { %3451 = vmatpush.msrb.mxu2 %v3371_v57  ;;  %3281 = vmatpush.msra.mxu3 %v3246_v30 }
 0x527   :  { %3452 = vmatpush.msrb.mxu2 %v3369_v51  ;;  %3282 = vmatpush.msra.mxu3 %v3244_v2 }
 0x529   :  { %3453 = vmatpush.msrb.mxu2 %v3367_v45  ;;  %3283 = vmatpush.msra.mxu3 %v3242_v58 }
 0x52b   :  { %3454 = vmatpush.msrb.mxu2 %v3365_v23  ;;  %3284 = vmatpush.msra.mxu3 %v3240_v33 }
 0x52d   :  { %3455 = vmatpush.msrb.mxu2 %v3363_v15  ;;  %3285 = vmatpush.msra.mxu3 %v3238_v55 }
 0x52f   :  { %3456 = vmatpush.msrb.mxu2 %v3361_v48  ;;  %3286 = vmatpush.msra.mxu3 %v3236_v8 }
 0x531   :  { %3457 = vmatpush.msrb.mxu2 %v3359_v53  ;;  %3287 = vmatpush.msra.mxu3 %v3234_v29  ;;  %v3712_v29 = vld [vmem:[%s14348_s18 + $0x98] sm:$0xff] }
 0x533   :  { %3458 = vmatpush.msrb.mxu2 %v3357_v9  ;;  %3288 = vmatpush.msra.mxu3 %v3232_v16 }
 0x534   :  { %3459 = vmatmul.f32.vlgmr.msrb.gmra.mxu2 %v3396_v34  ;;  %3289 = vmatmul.f32.vlgmr.msra.gmra.mxu3 %v3268_v12  ;;  %v14373_v12 = vperm.slane %v11209_v47, 0 }
 0x535   :  { %3477 = vmatpush.msrb.mxu3 %v3391_v46  ;;  %3745 = vmatpush.msra.mxu2 %v3712_v29  ;;  %v7533_v29 = vld [vmem:[%s14404_s2 + $0xc8] sm:$0xff] }
 0x537   :  { %3478 = vmatpush.msrb.mxu3 %v3389_v56  ;;  %v3711_v56 = vld [vmem:[%s14348_s18 + $0x90] sm:$0xff] }
 0x538   :  { %3746 = vmatpush.msra.mxu2 %v3711_v56  ;;  %v7535_v56 = vld [vmem:[%s14404_s2 + $0xb0] sm:$0xff] }
 0x53c   :  { %7128 = vmatmul.msk.f32.vlgmr.msrb.gmra.mxu3 %vm14371_vm0, %v3399_v21 }
 0x573   :  { %v3044_v10 = vpop.f32.mrf.mxu0 }
 0x575   :  { %v2982_v40 = vpop.f32.mrf.mxu3  ;;  %v3002_v35 = vpop.f32.mrf.mxu1 }
 0x57b   :  { %v2962_v18 = vpop.f32.mrf.mxu2 }
 0x57c   :  { %v2983_v19 = vadd.f32 %v2982_v40, %v2962_v18  ;;  %v3206_v14 = vpop.f32.mrf.mxu0 }
 0x57d   :  { %v3022_v60 = vpop.f32.mrf.mxu3  ;;  %v3166_v1 = vpop.f32.mrf.mxu1 }
 0x57e   :  { %v3045_v0 = vadd.f32 %v3044_v10, %v2983_v19  ;;  %v3023_v43 = vadd.f32 %v3022_v60, %v3002_v35  ;;  %v3533_v35 = vld [vmem:[%s14345_s15] sm:$0x3] }
 0x585   :  { %v3084_v25 = vpop.f32.mrf.mxu2 }
 0x586   :  { %v3064_v63 = vpop.f32.mrf.mxu3  ;;  %v3085_v61 = vadd.f32 %v3084_v25, %v3023_v43  ;;  %v3584_v43 = vld [vmem:[%s14346_s16] sm:$0x3] }
 0x587   :  { %v3065_v6 = vadd.f32 %v3064_v63, %v3045_v0  ;;  %v3710_v63 = vld [vmem:[%s14348_s18 + $0x88] sm:$0xff] }
 0x588   :  { %3747 = vmatpush.msra.mxu2 %v3710_v63  ;;  %v7537_v63 = vld [vmem:[%s14404_s2 + $0x98] sm:$0xff] }
 0x58e   :  { %v3104_v7 = vpop.f32.mrf.mxu3  ;;  %v3310_v32 = vpop.f32.mrf.mxu2 }
 0x58f   :  { %v3105_v50 = vadd.f32 %v3104_v7, %v3085_v61  ;;  %v3707_v61 = vld [vmem:[%s14348_s18 + $0x70] sm:$0xff] }
 0x596   :  { %v3350_v41 = vpop.f32.mrf.mxu2  ;;  %v3420_v13 = vpop.f32.mrf.mxu0 }
 0x597   :  { %v3186_v44 = vpop.f32.mrf.mxu3 }
 0x598   :  { %v3187_v36 = vadd.f32 %v3186_v44, %v3166_v1  ;;  %v3330_v42 = vpop.f32.mrf.mxu1  ;;  %v3648_v1 = vld [vmem:[%s14347_s17 + $0x90] sm:$0xff] }
 0x599   :  { %v3351_v21 = vadd.f32 %v3350_v41, %v3330_v42  ;;  %v3640_v42 = vld [vmem:[%s14347_s17 + $0x50] sm:$0xff] }
 0x59a   :  { %v3229_v39 = vadd.f32 %v3187_v36, %v3065_v6  ;;  %v3645_v6 = vld [vmem:[%s14347_s17 + $0x78] sm:$0xff] }
 0x59f   :  { %v3226_v52 = vpop.f32.mrf.mxu3  ;;  %v3440_v22 = vpop.f32.mrf.mxu2 }
 0x5a0   :  { %v3227_v27 = vadd.f32 %v3226_v52, %v3206_v14  ;;  %v3441_v34 = vadd.f32 %v3440_v22, %v3420_v13  ;;  %v3649_v52 = vld [vmem:[%s14347_s17 + $0x98] sm:$0xff]  ;;  %v3642_v13 = vld [vmem:[%s14347_s17 + $0x60] sm:$0xff] }
 0x5a1   :  { %v3708_v22 = vld [vmem:[%s14348_s18 + $0x78] sm:$0xff] }
 0x5a2   :  { %v3230_v24 = vadd.f32 %v3227_v27, %v3105_v50  ;;  %v3643_v27 = vld [vmem:[%s14347_s17 + $0x68] sm:$0xff]  ;;  %v3705_v50 = vld [vmem:[%s14348_s18 + $0x60] sm:$0xff] }
 0x5a4   :  { %v3354_v37 = vadd.f32 %v3351_v21, %v3230_v24  ;;  %v3703_v24 = vld [vmem:[%s14348_s18 + $0x50] sm:$0xff]  ;;  %v3702_v21 = vld [vmem:[%s14348_s18 + $0x48] sm:$0xff] }
 0x5b7   :  { %v3290_v5 = vpop.f32.mrf.mxu3  ;;  %v3460_v62 = vpop.f32.mrf.mxu2 }
 0x5b8   :  { %v3311_v59 = vadd.f32 %v3310_v32, %v3290_v5  ;;  %v3644_v5 = vld [vmem:[%s14347_s17 + $0x70] sm:$0xff] }
 0x5ba   :  { %v3353_v11 = vadd.f32 %v3311_v59, %v3229_v39  ;;  %v3647_v39 = vld [vmem:[%s14347_s17 + $0x88] sm:$0xff] }
 0x5bb   :  { %v3706_v59 = vld [vmem:[%s14348_s18 + $0x68] sm:$0xff] }
 0x5bc   :  { %v3483_v3 = vadd.f32 %v3441_v34, %v3353_v11  ;;  %v3641_v34 = vld [vmem:[%s14347_s17 + $0x58] sm:$0xff] }
 0x5bd   :  { %v3704_v11 = vld [vmem:[%s14348_s18 + $0x58] sm:$0xff] }
 0x5be   :  { %v3491_v26 = vadd.f32 %v14373_v12, %v3483_v3  ;;  %v3639_v3 = vld [vmem:[%s14347_s17 + $0x48] sm:$0xff] }
 0x5bf   :  { %v3480_v31 = vpop.f32.mrf.mxu3 }
 0x5c0   :  { %v7129_v20 = vmul.f32 -1.442695, %v3491_v26  ;;  %v3481_v4 = vadd.f32 %v3480_v31, %v3460_v62  ;;  %v3701_v62 = vld [vmem:[%s14348_s18 + $0x40] sm:$0xff]  ;;  %v3637_v31 = vld [vmem:[%s14347_s17 + $0x38] sm:$0xff] }
 0x5c2   :  { %7414 = vpow2.f32 %v7129_v20  ;;  %v3484_v57 = vadd.f32 %v3481_v4, %v3354_v37  ;;  %v3700_v20 = vld [vmem:[%s14348_s18 + $0x38] sm:$0xff]  ;;  %v3636_v37 = vld [vmem:[%s14347_s17 + $0x30] sm:$0xff] }
 0x5c3   :  { %v3699_v4 = vld [vmem:[%s14348_s18 + $0x30] sm:$0xff] }
 0x5c4   :  { %v3492_v30 = vadd.f32 %v14372_v28, %v3484_v57  ;;  %v3635_v57 = vld [vmem:[%s14347_s17 + $0x28] sm:$0xff] }
 0x5c6   :  { %v7130_v51 = vmul.f32 -1.442695, %v3492_v30 }
 0x5c8   :  { %v7415_v2 = vpop.eup %7414  ;;  %7416 = vpow2.f32 %v7130_v51  ;;  %v3634_v51 = vld [vmem:[%s14347_s17 + $0x20] sm:$0xff] }
 0x5c9   :  { %v3499_v45 = vadd.f32 1.0, %v7415_v2  ;;  %v3646_v2 = vld [vmem:[%s14347_s17 + $0x80] sm:$0xff] }
 0x5cb   :  { %7418 = vrcp.f32 %v3499_v45  ;;  %v3512_v48 = vand.u32 2147483648, %v3499_v45  ;;  %v3510_v53 = vand.u32 2147483647, %v3499_v45  ;;  %vm3506_vm8 = vweird.f32 %v3499_v45 }
 0x5cd   :  { %v3513_v40 = vor.u32 1.1754944e-38, %v3512_v48  ;;  %vm3511_vm3 = vcmp.eq.f32.partialorder %v3510_v53, 8.507059e+37  ;;  %v3632_v48 = vld [vmem:[%s14347_s17 + $0x10] sm:$0xff]  ;;  %v7532_v53 = vld [vmem:[%s14404_s2 + $0xc0] sm:$0xff] }
 0x5ce   :  { %v7417_v58 = vpop.eup %7416 }
 0x5cf   :  { %v3500_v23 = vadd.f32 1.0, %v7417_v58  ;;  %v3709_v58 = vld [vmem:[%s14348_s18 + $0x80] sm:$0xff] }
 0x5d0   :  { %3748 = vmatpush.msra.mxu2 %v3709_v58  ;;  %v7564_v58 = vld [vmem:[%s14404_s2 + $0x160] sm:$0xff] }
 0x5d1   :  { %v7419_v33 = vpop.eup %7418  ;;  %7420 = vrcp.f32 %v3500_v23  ;;  %v3527_v7 = vand.u32 2147483648, %v3500_v23  ;;  %v3525_v10 = vand.u32 2147483647, %v3500_v23  ;;  %vm3521_vm7 = vweird.f32 %v3500_v23 }
 0x5d2   :  { %v3502_v15 = vmul.f32 %v7419_v33, %v3499_v45  ;;  %vm3507_vm13 = vweird.f32 %v7419_v33  ;;  %v3697_v45 = vld [vmem:[%s14348_s18 + $0x20] sm:$0xff] }
 0x5d3   :  { %vm3508_vm10 = vmor %vm3506_vm8, %vm3507_vm13  ;;  %v3528_v19 = vor.u32 1.1754944e-38, %v3527_v7  ;;  %vm3526_vm2 = vcmp.eq.f32.partialorder %v3525_v10, 8.507059e+37  ;;  %v7539_v7 = vld [vmem:[%s14404_s2 + $0x80] sm:$0xff]  ;;  %v7542_v10 = vld [vmem:[%s14404_s2 + $0xd0] sm:$0xff]  ;;  %vm14488_vm13 = vcmask 326656  }
 0x5d4   :  { %v3503_v55 = vsub.f32 1.0, %v3502_v15  ;;  %v7530_v15 = vld [vmem:[%s14404_s2 + $0xd8] sm:$0xff]  ;;  %vm14489_vm8 = vmmov %vm14488_vm13 }
 0x5d6   :  { %v3504_v8 = vmul.f32 %v7419_v33, %v3503_v55  ;;  %v7531_v55 = vld [vmem:[%s14404_s2 + $0xe0] sm:$0xff] }
 0x5d7   :  { %v7421_v9 = vpop.eup %7420  ;;  %3827 = vmatpush.msrb.mxu2 %v7531_v55 }
 0x5d8   :  { %v3505_v16 = vadd.f32 %v7419_v33, %v3504_v8  ;;  %v3517_v46 = vmul.f32 %v7421_v9, %v3500_v23  ;;  %vm3522_vm4 = vweird.f32 %v7421_v9  ;;  %v3633_v23 = vld [vmem:[%s14347_s17 + $0x18] sm:$0xff]  ;;  %v3695_v8 = vld [vmem:[%s14348_s18 + $0x10] sm:$0xff] }
 0x5d9   :  { %vm3523_vm14 = vmor %vm3521_vm7, %vm3522_vm4  ;;  %3828 = vmatpush.msrb.mxu2 %v7533_v29  ;;  %v7570_v29 = vld [vmem:[%s14404_s2 + $0xf0] sm:$0xff] }
 0x5da   :  { %v3509_v60 = vsel %vm3508_vm10, %v7419_v33, %v3505_v16  ;;  %v3518_v18 = vsub.f32 1.0, %v3517_v46  ;;  %v3696_v33 = vld [vmem:[%s14348_s18 + $0x18] sm:$0xff]  ;;  %v3694_v16 = vld [vmem:[%s14348_s18 + $0x8] sm:$0xff]  ;;  %vm14490_vm10 = vmmov %vm14487_vm6 }
 0x5db   :  { %v3514_v25 = vsel %vm3511_vm3, %v3513_v40, %v3509_v60  ;;  %v7534_v46 = vld [vmem:[%s14404_s2 + $0xa8] sm:$0xff]  ;;  %3829 = vmatpush.msrb.mxu2 %v7535_v56  ;;  %v3630_v40 = vld [vmem:[%s14347_s17] sm:$0xff]  ;;  %vm14491_vm3 = vmmov %vm14489_vm8 }
 0x5dc   :  { %v3531_v32 = vmul.f32 %v3514_v25, %v3491_v26  ;;  %v3519_v44 = vmul.f32 %v7421_v9, %v3518_v18  ;;  %v3638_v26 = vld [vmem:[%s14347_s17 + $0x40] sm:$0xff]  ;;  %v7536_v18 = vld [vmem:[%s14404_s2 + $0x90] sm:$0xff]  ;;  %v7538_v25 = vld [vmem:[%s14404_s2 + $0x78] sm:$0xff] }
 0x5dd   :  { %v3693_v60 = vld [vmem:[%s14348_s18] sm:$0xff]  ;;  %3830 = vmatpush.msrb.mxu2 %v7537_v63  ;;  %vm14492_vm4 = vmmov %vm14491_vm3  ;;  %v7145_v56 = vld [vmem:[%s14405_s4 + $0x48] sm:$0xff] }
 0x5de   :  { %v3520_v41 = vadd.f32 %v7421_v9, %v3519_v44  ;;  %7131 = vmatpush.msk.msra.mxu3 %vm14374_vm12, %v3531_v32  ;;  %v7541_v44 = vld [vmem:[%s14404_s2 + $0x60] sm:$0xff]  ;;  %vm14493_vm7 = vmmov %vm14491_vm3 }
 0x5df   :  { %7132 = vmatmul.msk.f32.vlgmr.msra.gmra.mxu3 %vm14370_vm11, %v3533_v35  ;;  %3831 = vmatpush.msrb.mxu2 %v7539_v7 }
 0x5e0   :  { %v3524_v14 = vsel %vm3523_vm14, %v7421_v9, %v3520_v41  ;;  %7135 = vmatpush.msk.msrb.mxu3 %vm14374_vm12, %v3531_v32  ;;  %v3631_v9 = vld [vmem:[%s14347_s17 + $0x8] sm:$0xff]  ;;  %v7544_v41 = vld [vmem:[%s14404_s2 + $0xb8] sm:$0xff]  ;;  %vm14494_vm14 = vmmov %vm14491_vm3 }
 0x5e1   :  { %v3529_v0 = vsel %vm3526_vm2, %v3528_v19, %v3524_v14  ;;  %v7540_v32 = vld [vmem:[%s14404_s2 + $0xe8] sm:$0xff]  ;;  %v7546_v19 = vld [vmem:[%s14404_s2 + $0xa0] sm:$0xff]  ;;  %v7547_v14 = vld [vmem:[%s14404_s2 + $0x18] sm:$0xff] }
 0x5e2   :  { %3685 = vmatpush.msra.mxu3 %v3649_v52  ;;  %v3532_v36 = vmul.f32 %v3529_v0, %v3492_v30  ;;  %v3698_v30 = vld [vmem:[%s14348_s18 + $0x28] sm:$0xff]  ;;  %v7545_v52 = vld [vmem:[%s14404_s2 + $0x30] sm:$0xff]  ;;  %v7549_v0 = vld [vmem:[%s14404_s2] sm:$0xff] }
 0x5e3   :  { %vm14495_vm2 = vmmov %vm14487_vm6 }
 0x5e4   :  { %3686 = vmatpush.msra.mxu3 %v3648_v1  ;;  %7133 = vmatpush.msk.msra.mxu1 %vm14374_vm12, %v3532_v36  ;;  %v7548_v1 = vld [vmem:[%s14404_s2 + $0x88] sm:$0xff] }
 0x5e5   :  { %7137 = vmatpush.msk.msrb.mxu0 %vm14374_vm12, %v3532_v36  ;;  %7134 = vmatmul.msk.f32.vlgmr.msra.gmra.mxu1 %vm14370_vm11, %v3533_v35  ;;  %v7543_v35 = vld [vmem:[%s14404_s2 + $0x48] sm:$0xff] }
 0x5e6   :  { %7138 = vmatmul.msk.f32.vlgmr.msrb.gmra.mxu0 %vm14370_vm11, %v3584_v43  ;;  %3653 = vmatpush.msrb.mxu1 %v3645_v6 }
 0x5e7   :  { %3713 = vmatpush.msra.mxu0 %v3708_v22  ;;  %7136 = vmatmul.msk.f32.vlgmr.msrb.gmra.mxu3 %vm14370_vm11, %v3584_v43 }
 0x5e8   :  { %3654 = vmatpush.msrb.mxu1 %v3644_v5  ;;  %3687 = vmatpush.msra.mxu3 %v3647_v39  ;;  %v11414_v5 = vld [vmem:[%s14405_s4 + $0x28] sm:$0xff] }
 0x5e9   :  { %3714 = vmatpush.msra.mxu0 %v3707_v61  ;;  %v11419_v61 = vld [vmem:[%s14405_s4 + $0x30] sm:$0xff]  ;;  %v3765_v39 = vrot.slane %v11414_v5, 1 }
 0x5ea   :  { %3655 = vmatpush.msrb.mxu1 %v3643_v27  ;;  %3688 = vmatpush.msra.mxu3 %v3646_v2  ;;  %v3766_v27 = vrot.slane %v11419_v61, 1  ;;  %v7563_v2 = vld [vmem:[%s14404_s2 + $0x140] sm:$0xff]  ;;  %v3987_v7 = vrot.slane %v11419_v61, 2 }
 0x5eb   :  { %3715 = vmatpush.msra.mxu0 %v3706_v59  ;;  %v7550_v59 = vld [vmem:[%s14404_s2 + $0x68] sm:$0xff] }
 0x5ec   :  { %3656 = vmatpush.msrb.mxu1 %v3642_v13  ;;  %3795 = vmatpush.msrb.mxu3 %v7530_v15  ;;  %v7551_v13 = vld [vmem:[%s14404_s2 + $0x70] sm:$0xff]  ;;  %v7566_v15 = vld [vmem:[%s14404_s2 + $0x128] sm:$0xff] }
 0x5ed   :  { %3716 = vmatpush.msra.mxu0 %v3705_v50  ;;  %v7552_v50 = vld [vmem:[%s14404_s2 + $0x50] sm:$0xff] }
 0x5ee   :  { %3657 = vmatpush.msrb.mxu1 %v3641_v34  ;;  %3796 = vmatpush.msrb.mxu3 %v7532_v53  ;;  %v7553_v34 = vld [vmem:[%s14404_s2 + $0x58] sm:$0xff]  ;;  %v7569_v53 = vld [vmem:[%s14404_s2 + $0x148] sm:$0xff] }
 0x5ef   :  { %3717 = vmatpush.msra.mxu0 %v3704_v11 }
 0x5f0   :  { %3658 = vmatpush.msrb.mxu1 %v3640_v42  ;;  %3797 = vmatpush.msrb.mxu3 %v7534_v46 }
 0x5f1   :  { %3718 = vmatpush.msra.mxu0 %v3703_v24  ;;  %v3767_v24 = vsel %vm14487_vm6, %v3765_v39, %v3766_v27  ;;  %vm14496_vm6 = vmmov %vm14491_vm3 }
 0x5f2   :  { %3659 = vmatpush.msrb.mxu1 %v3639_v3  ;;  %3798 = vmatpush.msrb.mxu3 %v7536_v18  ;;  %v7554_v3 = vld [vmem:[%s14404_s2 + $0x38] sm:$0xff]  ;;  %v7574_v18 = vld [vmem:[%s14404_s2 + $0x100] sm:$0xff] }
 0x5f3   :  { %3719 = vmatpush.msra.mxu0 %v3702_v21  ;;  %v7555_v21 = vld [vmem:[%s14404_s2 + $0x40] sm:$0xff] }
 0x5f4   :  { %3660 = vmatpush.msrb.mxu1 %v3638_v26  ;;  %3799 = vmatpush.msrb.mxu3 %v7538_v25  ;;  %v11447_v26 = vld [vmem:[%s14405_s4 + $0x38] sm:$0xff]  ;;  %v3986_v25 = vrot.slane %v11414_v5, 2 }
 0x5f5   :  { %3720 = vmatpush.msra.mxu0 %v3701_v62  ;;  %v3768_v62 = vrot.slane %v11447_v26, 1 }
 0x5f6   :  { %3661 = vmatpush.msrb.mxu1 %v3637_v31  ;;  %v7556_v31 = vld [vmem:[%s14404_s2 + $0x20] sm:$0xff] }
 0x5f7   :  { %3721 = vmatpush.msra.mxu0 %v3700_v20  ;;  %v7557_v20 = vld [vmem:[%s14404_s2 + $0x28] sm:$0xff] }
 0x5f8   :  { %3662 = vmatpush.msrb.mxu1 %v3636_v37  ;;  %v7558_v37 = vld [vmem:[%s14404_s2 + $0x150] sm:$0xff] }
 0x5f9   :  { %3722 = vmatpush.msra.mxu0 %v3699_v4  ;;  %v7559_v4 = vld [vmem:[%s14404_s2 + $0x158] sm:$0xff] }
 0x5fa   :  { %3663 = vmatpush.msrb.mxu1 %v3635_v57  ;;  %v7560_v57 = vld [vmem:[%s14404_s2 + $0x8] sm:$0xff] }
 0x5fb   :  { %3723 = vmatpush.msra.mxu0 %v3698_v30  ;;  %v7561_v30 = vld [vmem:[%s14404_s2 + $0x10] sm:$0xff] }
 0x5fc   :  { %3664 = vmatpush.msrb.mxu1 %v3634_v51  ;;  %v7562_v51 = vld [vmem:[%s14404_s2 + $0x138] sm:$0xff] }
 0x5fd   :  { %3724 = vmatpush.msra.mxu0 %v3697_v45  ;;  %v3769_v45 = vsel %vm14490_vm10, %v3766_v27, %v3768_v62  ;;  %vm14499_vm10 = vmmov %vm14491_vm3 }
 0x5fe   :  { %3665 = vmatpush.msrb.mxu1 %v3633_v23  ;;  %v11483_v23 = vld [vmem:[%s14405_s4 + $0x40] sm:$0xff] }
 0x5ff   :  { %3725 = vmatpush.msra.mxu0 %v3696_v33  ;;  %v7565_v33 = vld [vmem:[%s14404_s2 + $0x120] sm:$0xff]  ;;  %v3770_v55 = vrot.slane %v11483_v23, 1 }
 0x600   :  { %3666 = vmatpush.msrb.mxu1 %v3632_v48  ;;  %v7567_v48 = vld [vmem:[%s14404_s2 + $0x108] sm:$0xff] }
 0x601   :  { %3726 = vmatpush.msra.mxu0 %v3695_v8  ;;  %v7568_v8 = vld [vmem:[%s14404_s2 + $0x110] sm:$0xff]  ;;  %v3771_v46 = vsel %vm14495_vm2, %v3768_v62, %v3770_v55 }
 0x602   :  { %3667 = vmatpush.msrb.mxu1 %v3631_v9  ;;  %v7571_v9 = vld [vmem:[%s14404_s2 + $0xf8] sm:$0xff] }
 0x603   :  { %3727 = vmatpush.msra.mxu0 %v3694_v16  ;;  %v7572_v16 = vld [vmem:[%s14404_s2 + $0x130] sm:$0xff] }
 0x604   :  { %3668 = vmatpush.msrb.mxu1 %v3630_v40  ;;  %v7573_v40 = vld [vmem:[%s14404_s2 + $0x118] sm:$0xff] }
 0x605   :  { %3728 = vmatpush.msra.mxu0 %v3693_v60  ;;  %v3772_v60 = vrot.slane %v7145_v56, 1 }
 0x606   :  { %3859 = vmatpush.msra.mxu1 %v7540_v32 }
 0x607   :  { %3901 = vmatpush.msrb.mxu0 %v7541_v44  ;;  %v3989_v44 = vrot.slane %v11447_v26, 2 }
 0x608   :  { %3860 = vmatpush.msra.mxu1 %v7542_v10 }
 0x609   :  { %3902 = vmatpush.msrb.mxu0 %v7543_v35  ;;  %v3991_v35 = vrot.slane %v11483_v23, 2 }
 0x60a   :  { %3861 = vmatpush.msra.mxu1 %v7544_v41 }
 0x60b   :  { %3903 = vmatpush.msrb.mxu0 %v7545_v52  ;;  %v3993_v52 = vrot.slane %v7145_v56, 2 }
 0x60c   :  { %3862 = vmatpush.msra.mxu1 %v7546_v19 }
 0x60d   :  { %3904 = vmatpush.msrb.mxu0 %v7547_v14 }
 0x60e   :  { %3863 = vmatpush.msra.mxu1 %v7548_v1 }
 0x60f   :  { %3905 = vmatpush.msrb.mxu0 %v7549_v0 }
 0x662   :  { %v3561_v36 = vpop.f32.mrf.mxu3  ;;  %v3581_v43 = vpop.f32.mrf.mxu1 }
 0x663   :  { %v3625_v6 = vpop.f32.mrf.mxu0 }
 0x664   :  { %v3629_v22 = vmax.f32 %v3581_v43, %v3625_v6 }
 0x666   :  { %7139 = vmatmul.msk.f32.vlgmr.msra.gmra.mxu3 %vm14379_vm9, %v3629_v22  ;;  %7140 = vmatmul.msk.f32.vlgmr.msra.gmra.mxu2 %vm14379_vm9, %v3629_v22 }
 0x667   :  { %3933 = vmatpush.msra.mxu3 %v7550_v59  ;;  %3965 = vmatpush.msra.mxu2 %v7551_v13 }
 0x669   :  { %3934 = vmatpush.msra.mxu3 %v7552_v50  ;;  %3966 = vmatpush.msra.mxu2 %v7553_v34 }
 0x66a   :  { %v3605_v11 = vpop.f32.mrf.mxu3 }
 0x66b   :  { %v3628_v42 = vmax.f32 %v3561_v36, %v3605_v11  ;;  %3935 = vmatpush.msra.mxu3 %v7554_v3  ;;  %3967 = vmatpush.msra.mxu2 %v7555_v21 }
 0x66d   :  { %3669 = vmatmul.f32.vlgmr.msrb.gmra.mxu1 %v3628_v42  ;;  %3729 = vmatmul.f32.vlgmr.msra.gmra.mxu0 %v3628_v42 }
 0x66e   :  { %7146 = vmatmul.msk.f32.vlgmr.msrb.gmra.mxu3 %vm14488_vm13, %v3767_v24  ;;  %7151 = vmatmul.msk.f32.vlgmr.msrb.gmra.mxu2 %vm14489_vm8, %v3767_v24  ;;  %vm14497_vm13 = vmmov %vm14491_vm3 }
 0x66f   :  { %3936 = vmatpush.msra.mxu3 %v7556_v31  ;;  %3968 = vmatpush.msra.mxu2 %v7557_v20  ;;  %vm14498_vm8 = vmmov %vm14491_vm3 }
 0x670   :  { %4016 = vmatpush.msrb.mxu1 %v7558_v37  ;;  %4048 = vmatpush.msra.mxu0 %v7559_v4 }
 0x671   :  { %3937 = vmatpush.msra.mxu3 %v7560_v57  ;;  %3969 = vmatpush.msra.mxu2 %v7561_v30 }
 0x672   :  { %4017 = vmatpush.msrb.mxu1 %v7562_v51  ;;  %4049 = vmatpush.msra.mxu0 %v7563_v2 }
 0x673   :  { %4080 = vmatpush.msrb.mxu3 %v7564_v58 }
 0x674   :  { %4018 = vmatpush.msrb.mxu1 %v7565_v33  ;;  %4050 = vmatpush.msra.mxu0 %v7566_v15 }
 0x675   :  { %7156 = vmatmul.msk.f32.vlgmr.msra.gmra.mxu1 %vm14491_vm3, %v3767_v24  ;;  %7161 = vmatmul.msk.f32.vlgmr.msrb.gmra.mxu0 %vm14492_vm4, %v11414_v5  ;;  %vm14500_vm3 = vmmov %vm14495_vm2 }
 0x676   :  { %7147 = vmatmul.msk.f32.gmra.mxu3 %vm14493_vm7, %v3769_v45  ;;  %7152 = vmatmul.msk.f32.gmra.mxu2 %vm14494_vm14, %v3769_v45  ;;  %v3773_v63 = vsel %vm14500_vm3, %v3770_v55, %v3772_v60  ;;  %vm14501_vm7 = vmmov %vm14492_vm4  ;;  %v14539_v55 = vld [vmem:[#allocation8_spill] sm:$0xff] }
 0x677   :  { %4019 = vmatpush.msrb.mxu1 %v7567_v48  ;;  %4051 = vmatpush.msra.mxu0 %v7568_v8  ;;  %vm14502_vm14 = vmmov %vm14492_vm4 }
 0x678   :  { %4081 = vmatpush.msrb.mxu3 %v7569_v53  ;;  %vm14503_vm2 = vmmov %vm14492_vm4 }
 0x679   :  { %4020 = vmatpush.msrb.mxu1 %v7570_v29  ;;  %4052 = vmatpush.msra.mxu0 %v7571_v9  ;;  %vm14508_vm11 = vmmov %vm14503_vm2 }
 0x67a   :  { %4082 = vmatpush.msrb.mxu3 %v7572_v16  ;;  %vm14509_vm3 = vmmov %vm14503_vm2 }
 0x67b   :  { %vm14533_vm0 = vmmov %vm14503_vm2 }
 0x67c   :  { %4083 = vmatpush.msrb.mxu3 %v7573_v40 }
 0x67d   :  { %7157 = vmatmul.msk.f32.gmra.mxu1 %vm14496_vm6, %v3769_v45  ;;  %7162 = vmatmul.msk.f32.gmra.mxu0 %vm14497_vm13, %v11419_v61  ;;  %vm14504_vm6 = vmmov %vm14503_vm2 }
 0x67e   :  { %7148 = vmatmul.msk.f32.gmra.mxu3 %vm14498_vm8, %v3771_v46  ;;  %7153 = vmatmul.msk.f32.gmra.mxu2 %vm14499_vm10, %v3771_v46  ;;  %vm14505_vm13 = vmmov %vm14503_vm2 }
 0x67f   :  { %4084 = vmatpush.msrb.mxu3 %v7574_v18  ;;  %vm14506_vm8 = vmmov %vm14503_vm2 }
 0x680   :  { %vm14507_vm10 = vmmov %vm14503_vm2 }
 0x685   :  { %7158 = vmatmul.msk.f32.gmra.mxu1 %vm14492_vm4, %v3771_v46  ;;  %7163 = vmatmul.msk.f32.gmra.mxu0 %vm14501_vm7, %v11447_v26  ;;  %vm14510_vm4 = vmmov %vm14503_vm2 }
 0x686   :  { %7149 = vmatmul.msk.f32.gmra.mxu3 %vm14502_vm14, %v3773_v63  ;;  %7154 = vmatmul.msk.f32.gmra.mxu2 %vm14503_vm2, %v3773_v63  ;;  %vm14511_vm7 = vmmov %vm14503_vm2  ;;  %vm14512_vm14 = vcmask 1045504  }
 0x687   :  { %v3988_v32 = vsel %vm14512_vm14, %v3986_v25, %v3987_v7 }
 0x68d   :  { %7159 = vmatmul.msk.f32.gmra.mxu1 %vm14504_vm6, %v3773_v63  ;;  %7164 = vmatmul.msk.f32.gmra.mxu0 %vm14505_vm13, %v11483_v23  ;;  %vm14513_vm6 = vmmov %vm14503_vm2 }
 0x68e   :  { %7150 = vmatmul.msk.f32.gmra.mxu3 %vm14506_vm8, %v3772_v60  ;;  %7155 = vmatmul.msk.f32.gmra.mxu2 %vm14507_vm10, %v3772_v60  ;;  %vm14515_vm13 = vmmov %vm14503_vm2 }
 0x68f   :  { %vm14516_vm8 = vmmov %vm14512_vm14 }
 0x690   :  { %v3990_v10 = vsel %vm14516_vm8, %v3987_v7, %v3989_v44  ;;  %vm14517_vm10 = vmmov %vm14503_vm2  ;;  %v3994_v19 = vsel %vm14516_vm8, %v3991_v35, %v3993_v52 }
 0x691   :  { %vm14521_vm14 = vmmov %vm14516_vm8 }
 0x692   :  { %v3992_v41 = vsel %vm14521_vm14, %v3989_v44, %v3991_v35  ;;  %vm14529_vm14 = vmmov %vm14503_vm2 }
 0x693   :  { %vm14534_vm8 = vmmov %vm14533_vm0 }
 0x695   :  { %7160 = vmatmul.msk.f32.gmra.mxu1 %vm14508_vm11, %v3772_v60  ;;  %7165 = vmatmul.msk.f32.gmra.mxu0 %vm14509_vm3, %v7145_v56  ;;  %vm14514_vm11 = vmmov %vm14503_vm2 }
 0x696   :  { %7166 = vmatmul.msk.f32.vlgmr.msra.gmra.mxu3 %vm14510_vm4, %v11414_v5  ;;  %7171 = vmatmul.msk.f32.vlgmr.msra.gmra.mxu2 %vm14511_vm7, %v11414_v5  ;;  %vm14518_vm3 = vmmov %vm14503_vm2 }
 0x697   :  { %vm14519_vm4 = vmmov %vm14503_vm2 }
 0x698   :  { %vm14520_vm7 = vmmov %vm14503_vm2 }
 0x69d   :  { %7176 = vmatmul.msk.f32.vlgmr.msrb.gmra.mxu1 %vm14503_vm2, %v3988_v32  ;;  %7181 = vmatmul.msk.f32.vlgmr.msra.gmra.mxu0 %vm14513_vm6, %v3988_v32  ;;  %vm14522_vm6 = vmmov %vm14503_vm2 }
 0x69e   :  { %7167 = vmatmul.msk.f32.gmra.mxu3 %vm14514_vm11, %v11419_v61  ;;  %7172 = vmatmul.msk.f32.gmra.mxu2 %vm14515_vm13, %v11419_v61  ;;  %vm14523_vm11 = vmmov %vm14503_vm2 }
 0x69f   :  { %vm14524_vm13 = vmmov %vm14503_vm2 }
 0x6a5   :  { %7177 = vmatmul.msk.f32.gmra.mxu1 %vm14517_vm10, %v3990_v10  ;;  %7182 = vmatmul.msk.f32.gmra.mxu0 %vm14518_vm3, %v3990_v10  ;;  %vm14525_vm10 = vmmov %vm14503_vm2 }
 0x6a6   :  { %7168 = vmatmul.msk.f32.gmra.mxu3 %vm14519_vm4, %v11447_v26  ;;  %7173 = vmatmul.msk.f32.gmra.mxu2 %vm14520_vm7, %v11447_v26  ;;  %vm14526_vm3 = vmmov %vm14503_vm2 }
 0x6a7   :  { %vm14527_vm4 = vmmov %vm14503_vm2 }
 0x6a8   :  { %vm14528_vm7 = vmmov %vm14503_vm2 }
 0x6ad   :  { %7178 = vmatmul.msk.f32.gmra.mxu1 %vm14503_vm2, %v3992_v41  ;;  %7183 = vmatmul.msk.f32.gmra.mxu0 %vm14522_vm6, %v3992_v41  ;;  %vm14530_vm6 = vmmov %vm14503_vm2 }
 0x6ae   :  { %7169 = vmatmul.msk.f32.gmra.mxu3 %vm14523_vm11, %v11483_v23  ;;  %7174 = vmatmul.msk.f32.gmra.mxu2 %vm14524_vm13, %v11483_v23  ;;  %vm14531_vm11 = vmmov %vm14503_vm2 }
 0x6af   :  { %vm14532_vm13 = vmmov %vm14503_vm2 }
 0x6b5   :  { %7179 = vmatmul.msk.f32.gmra.mxu1 %vm14525_vm10, %v3994_v19  ;;  %7184 = vmatmul.msk.f32.gmra.mxu0 %vm14526_vm3, %v3994_v19 }
 0x6b6   :  { %7170 = vmatmul.msk.f32.gmra.mxu3 %vm14527_vm4, %v7145_v56  ;;  %7175 = vmatmul.msk.f32.gmra.mxu2 %vm14528_vm7, %v7145_v56 }
 0x6bd   :  { %7180 = vmatmul.msk.f32.gmra.mxu1 %vm14529_vm14, %v3993_v52  ;;  %7185 = vmatmul.msk.f32.gmra.mxu0 %vm14503_vm2, %v3993_v52 }
 0x6be   :  { %7186 = vmatmul.msk.f32.vlgmr.msrb.gmra.mxu3 %vm14530_vm6, %v3988_v32 }
 0x6c6   :  { %7187 = vmatmul.msk.f32.gmra.mxu3 %vm14531_vm11, %v3990_v10 }
 0x6ce   :  { %7188 = vmatmul.msk.f32.gmra.mxu3 %vm14532_vm13, %v3992_v41 }
 0x6d6   :  { %7189 = vmatmul.msk.f32.gmra.mxu3 %vm14533_vm0, %v3994_v19 }
 0x6de   :  { %7190 = vmatmul.msk.f32.gmra.mxu3 %vm14534_vm8, %v3993_v52 }
 0x6e9   :  { %v11584_v14 = vpop.f32.mrf.mxu3  ;;  %v11586_v1 = vpop.f32.mrf.mxu2 }
 0x6ea   :  { %14535 = vst [vmem:[#allocation12_spill] sm:$0xff] %v11584_v14  ;;  %v11588_v0 = vpop.f32.mrf.mxu1  ;;  %v11590_v36 = vpop.f32.mrf.mxu0 }
 0x6eb   :  { %14536 = vst [vmem:[#allocation13_spill] sm:$0xff] %v11586_v1 }
 0x6ec   :  { %14537 = vst [vmem:[#allocation14_spill] sm:$0xff] %v11588_v0 }
 0x6ed   :  { %14538 = vst [vmem:[#allocation15_spill] sm:$0xff] %v11590_v36 }
 0x6f1   :  { %v3801_v43 = vpop.f32.mrf.mxu3  ;;  %v3833_v6 = vpop.f32.mrf.mxu2 }
 0x6f2   :  { %v11592_v22 = vpop.f32.mrf.mxu1  ;;  %v3907_v5 = vpop.f32.mrf.mxu0 }
 0x6f3   :  { %v3908_v20 = vadd.f32 %v3907_v5, %v3801_v43 }
 0x6f9   :  { %v3804_v61 = vpop.f32.mrf.mxu3  ;;  %v3836_v59 = vpop.f32.mrf.mxu2 }
 0x6fa   :  { %v11594_v39 = vpop.f32.mrf.mxu1  ;;  %v3910_v27 = vpop.f32.mrf.mxu0 }
 0x6fb   :  { %v3911_v23 = vadd.f32 %v3910_v27, %v3804_v61 }
 0x701   :  { %v3807_v13 = vpop.f32.mrf.mxu3  ;;  %v3839_v11 = vpop.f32.mrf.mxu2 }
 0x702   :  { %v11596_v50 = vpop.f32.mrf.mxu1  ;;  %v3913_v34 = vpop.f32.mrf.mxu0 }
 0x703   :  { %v3914_v63 = vadd.f32 %v3913_v34, %v3807_v13 }
 0x709   :  { %v3810_v42 = vpop.f32.mrf.mxu3  ;;  %v3842_v21 = vpop.f32.mrf.mxu2 }
 0x70a   :  { %v11598_v24 = vpop.f32.mrf.mxu1  ;;  %v3916_v3 = vpop.f32.mrf.mxu0 }
 0x70b   :  { %v3917_v34 = vadd.f32 %v3916_v3, %v3810_v42 }
 0x711   :  { %v11600_v26 = vpop.f32.mrf.mxu3  ;;  %v11606_v37 = vpop.f32.mrf.mxu2 }
 0x712   :  { %v11602_v62 = vpop.f32.mrf.mxu1  ;;  %v11604_v31 = vpop.f32.mrf.mxu0 }
 0x719   :  { %v3939_v4 = vpop.f32.mrf.mxu3  ;;  %v11615_v9 = vpop.f32.mrf.mxu2 }
 0x71a   :  { %v3940_v57 = vadd.f32 %v3939_v4, %v3833_v6  ;;  %v4022_v30 = vpop.f32.mrf.mxu1  ;;  %v4054_v51 = vpop.f32.mrf.mxu0 }
 0x71b   :  { %v4101_v2 = vadd.f32 %v4022_v30, %v3908_v20 }
 0x71c   :  { %v4102_v58 = vadd.f32 %v4054_v51, %v3940_v57 }
 0x71d   :  { %v11609_v45 = vadd.f32 %v4101_v2, %v8763_v38 }
 0x71e   :  { %v11613_v48 = vadd.f32 %v4102_v58, %v14539_v55 }
 0x71f   :  { %v7191_v33 = vmul.f32 -1.442695, %v11609_v45 }
 0x720   :  { %14540 = vst [vmem:[#allocation8_spill] sm:$0xff] %v11613_v48  ;;  %v7192_v40 = vmul.f32 -1.442695, %v11613_v48 }
 0x721   :  { %v3942_v15 = vpop.f32.mrf.mxu3  ;;  %7422 = vpow2.f32 %v7191_v33  ;;  %v3974_v19 = vpop.f32.mrf.mxu2 }
 0x722   :  { %v3943_v8 = vadd.f32 %v3942_v15, %v3836_v59  ;;  %v4025_v53 = vpop.f32.mrf.mxu1  ;;  %v4057_v29 = vpop.f32.mrf.mxu0  ;;  %7424 = vpow2.f32 %v7192_v40 }
 0x723   :  { %v4104_v16 = vadd.f32 %v4025_v53, %v3911_v23 }
 0x724   :  { %v4105_v46 = vadd.f32 %v4057_v29, %v3943_v8 }
 0x725   :  { %v11618_v56 = vadd.f32 %v4104_v16, %v8763_v38 }
 0x726   :  { %v11623_v18 = vadd.f32 %v4105_v46, %v14539_v55  ;;  %v3920_v46 = vadd.f32 %v11604_v31, %v11600_v26 }
 0x727   :  { %v7194_v60 = vmul.f32 -1.442695, %v11618_v56  ;;  %v7423_v10 = vpop.eup %7422 }
 0x728   :  { %14541 = vst [vmem:[#allocation16_spill] sm:$0xff] %v11623_v18  ;;  %v7195_v41 = vmul.f32 -1.442695, %v11623_v18  ;;  %v11629_v6 = vadd.f32 1.0, %v7423_v10  ;;  %v7425_v27 = vpop.eup %7424 }
 0x729   :  { %v3945_v25 = vpop.f32.mrf.mxu3  ;;  %7426 = vpow2.f32 %v7194_v60  ;;  %v11637_v30 = vadd.f32 1.0, %v7425_v27  ;;  %v3972_v27 = vadd.f32 %v11615_v9, %v11592_v22 }
 0x72a   :  { %v3946_v7 = vadd.f32 %v3945_v25, %v3839_v11  ;;  %v4028_v32 = vpop.f32.mrf.mxu1  ;;  %v4060_v44 = vpop.f32.mrf.mxu0  ;;  %7428 = vpow2.f32 %v7195_v41  ;;  %v4202_v31 = vand.u32 2147483648, %v11629_v6 }
 0x72b   :  { %v4107_v35 = vadd.f32 %v4028_v32, %v3914_v63 }
 0x72c   :  { %v4108_v52 = vadd.f32 %v4060_v44, %v3946_v7 }
 0x72d   :  { %v11627_v43 = vadd.f32 %v4107_v35, %v8763_v38 }
 0x72e   :  { %v11632_v5 = vadd.f32 %v4108_v52, %v14539_v55 }
 0x72f   :  { %v7197_v61 = vmul.f32 -1.442695, %v11627_v43  ;;  %v7427_v13 = vpop.eup %7426 }
 0x730   :  { %v7198_v59 = vmul.f32 -1.442695, %v11632_v5  ;;  %v11639_v2 = vadd.f32 1.0, %v7427_v13  ;;  %v7429_v33 = vpop.eup %7428 }
 0x731   :  { %7430 = vpow2.f32 %v7197_v61  ;;  %v3948_v11 = vpop.f32.mrf.mxu3  ;;  %v11657_v40 = vadd.f32 1.0, %v7429_v33 }
 0x732   :  { %7432 = vrcp.f32 %v11629_v6  ;;  %v3949_v20 = vadd.f32 %v3948_v11, %v3842_v21  ;;  %v4031_v4 = vpop.f32.mrf.mxu1  ;;  %v4063_v57 = vpop.f32.mrf.mxu0  ;;  %vm4241_vm0 = vweird.f32 %v11639_v2 }
 0x733   :  { %7434 = vpow2.f32 %v7198_v59  ;;  %v4110_v51 = vadd.f32 %v4031_v4, %v3917_v34  ;;  %v3977_v21 = vpop.f32.mrf.mxu2  ;;  %v11680_v59 = vadd.f32 %v3974_v19, %v11594_v39  ;;  %v11695_v19 = vor.u32 1.1754944e-38, %v4202_v31 }
 0x734   :  { %v4111_v58 = vadd.f32 %v4063_v57, %v3949_v20  ;;  %7436 = vrcp.f32 %v11637_v30 }
 0x735   :  { %v11642_v23 = vadd.f32 %v4110_v51, %v8763_v38  ;;  %7438 = vrcp.f32 %v11639_v2 }
 0x736   :  { %v11645_v42 = vadd.f32 %v4111_v58, %v14539_v55  ;;  %v4247_v58 = vand.u32 2147483648, %v11639_v2 }
 0x737   :  { %v7431_v3 = vpop.eup %7430  ;;  %v7200_v15 = vmul.f32 -1.442695, %v11642_v23 }
 0x738   :  { %v11649_v8 = vpop.eup %7432  ;;  %v11652_v53 = vadd.f32 1.0, %v7431_v3  ;;  %v7201_v29 = vmul.f32 -1.442695, %v11645_v42 }
 0x739   :  { %v7435_v16 = vpop.eup %7434  ;;  %7440 = vpow2.f32 %v7200_v15  ;;  %v3951_v60 = vpop.f32.mrf.mxu3  ;;  %v4192_v44 = vmul.f32 %v11649_v8, %v11629_v6 }
 0x73a   :  { %7442 = vrcp.f32 %v11652_v53  ;;  %v3952_v63 = vadd.f32 %v3951_v60, %v11606_v37  ;;  %v4034_v25 = vpop.f32.mrf.mxu1  ;;  %v4066_v7 = vpop.f32.mrf.mxu0  ;;  %v11663_v10 = vadd.f32 1.0, %v7435_v16  ;;  %v4292_v60 = vand.u32 2147483648, %v11652_v53 }
 0x73b   :  { %7444 = vpow2.f32 %v7201_v29  ;;  %v4113_v32 = vadd.f32 %v4034_v25, %v3920_v46  ;;  %v11665_v41 = vpop.eup %7436  ;;  %v4193_v34 = vsub.f32 1.0, %v4192_v44  ;;  %v3980_v57 = vpop.f32.mrf.mxu2  ;;  %vm4286_vm3 = vweird.f32 %v11652_v53 }
 0x73c   :  { %v4114_v35 = vadd.f32 %v4066_v7, %v3952_v63  ;;  %7446 = vrcp.f32 %v11657_v40  ;;  %v11672_v37 = vpop.eup %7438  ;;  %v11712_v29 = vadd.f32 %v3980_v57, %v11598_v24  ;;  %v4307_v63 = vand.u32 2147483648, %v11663_v10 }
 0x73d   :  { %v11669_v26 = vadd.f32 %v4113_v32, %v8763_v38  ;;  %v11686_v38 = vadd.f32 %v3977_v21, %v11596_v50  ;;  %7448 = vrcp.f32 %v11663_v10  ;;  %v4237_v39 = vmul.f32 %v11672_v37, %v11639_v2 }
 0x73e   :  { %v11675_v52 = vadd.f32 %v4114_v35, %v14539_v55  ;;  %v4194_v3 = vmul.f32 %v11649_v8, %v4193_v34  ;;  %v11708_v21 = vmul.f32 %v11665_v41, %v11637_v30  ;;  %v11721_v35 = vor.u32 1.1754944e-38, %v4247_v58 }
 0x73f   :  { %v7441_v61 = vpop.eup %7440  ;;  %v7203_v13 = vmul.f32 -1.442695, %v11669_v26  ;;  %v4238_v25 = vsub.f32 1.0, %v4237_v39  ;;  %vm4242_vm10 = vweird.f32 %v11672_v37  ;;  %v11745_v28 = vor.u32 1.1754944e-38, %v4292_v60 }
 0x740   :  { %v11683_v11 = vpop.eup %7442  ;;  %v11689_v20 = vadd.f32 1.0, %v7441_v61  ;;  %v7204_v55 = vmul.f32 -1.442695, %v11675_v52  ;;  %v11747_v12 = vor.u32 1.1754944e-38, %v4307_v63  ;;  %vm11796_vm11 = vmor %vm4241_vm0, %vm4242_vm10 }
 0x741   :  { %v7445_v4 = vpop.eup %7444  ;;  %7450 = vpow2.f32 %v7203_v13  ;;  %v4086_v22 = vpop.f32.mrf.mxu3  ;;  %v4282_v51 = vmul.f32 %v11683_v11, %v11652_v53  ;;  %v11730_v13 = vadd.f32 %v11649_v8, %v4194_v3  ;;  %vm4287_vm7 = vweird.f32 %v11683_v11 }
 0x742   :  { %7452 = vrcp.f32 %v11689_v20  ;;  %v11698_v50 = vadd.f32 1.0, %v7445_v4  ;;  %v11703_v33 = vpop.eup %7446  ;;  %v4103_v16 = vadd.f32 %v4086_v22, %v3972_v27  ;;  %v4290_v22 = vand.u32 2147483647, %v11652_v53  ;;  %vm11810_vm8 = vmor %vm4286_vm3, %vm4287_vm7 }
 0x743   :  { %7454 = vpow2.f32 %v7204_v55  ;;  %v11719_v32 = vpop.eup %7448  ;;  %v4283_v44 = vsub.f32 1.0, %v4282_v51  ;;  %v4252_v24 = vmul.f32 %v11703_v33, %v11657_v40  ;;  %v4335_v39 = vand.u32 2147483647, %v11689_v20 }
 0x744   :  { %7456 = vrcp.f32 %v11698_v50  ;;  %v11738_v57 = vadd.f32 %v4103_v16, %v8831_v49  ;;  %v4337_v16 = vand.u32 2147483648, %v11689_v20  ;;  %v4297_v63 = vmul.f32 %v11719_v32, %v11663_v10 }
 0x745   :  { %v4284_v46 = vmul.f32 %v11683_v11, %v4283_v44  ;;  %v4253_v27 = vsub.f32 1.0, %v4252_v24  ;;  %v4352_v7 = vand.u32 2147483648, %v11698_v50  ;;  %vm4331_vm4 = vweird.f32 %v11689_v20 }
 0x746   :  { %14542 = vst [vmem:[#allocation17_spill] sm:$0xff] %v11738_v57  ;;  %v4350_v44 = vand.u32 2147483647, %v11698_v50  ;;  %vm4346_vm14 = vweird.f32 %v11698_v50  ;;  %v11778_v1 = vor.u32 1.1754944e-38, %v4337_v16  ;;  %v4298_v36 = vsub.f32 1.0, %v4297_v63 }
 0x747   :  { %v7451_v61 = vpop.eup %7450  ;;  %vm4302_vm2 = vweird.f32 %v11719_v32  ;;  %vm11786_vm6 = vcmp.eq.f32.partialorder %v4335_v39, 8.507059e+37  ;;  %v4254_v16 = vmul.f32 %v11703_v33, %v4253_v27  ;;  %vm11822_vm12 = vcmp.eq.f32.partialorder %v4290_v22, 8.507059e+37 }
 0x748   :  { %v11733_v55 = vpop.eup %7452  ;;  %v11735_v4 = vadd.f32 1.0, %v7451_v61  ;;  %v4239_v61 = vmul.f32 %v11672_v37, %v4238_v25  ;;  %v7193_v25 = vmul.f32 -1.442695, %v11738_v57  ;;  %vm11844_vm5 = vcmp.eq.f32.partialorder %v4350_v44, 8.507059e+37 }
 0x749   :  { %v7455_v51 = vpop.eup %7454  ;;  %v4089_v58 = vpop.f32.mrf.mxu3  ;;  %v4327_v3 = vmul.f32 %v11733_v55, %v11689_v20  ;;  %vm4332_vm13 = vweird.f32 %v11733_v55  ;;  %v14562_v57 = vand.u32 2147483647, %v11663_v10 }
 0x74a   :  { %v11750_v15 = vpop.eup %7456  ;;  %7458 = vrcp.f32 %v11735_v4  ;;  %v11755_v34 = vadd.f32 1.0, %v7455_v51  ;;  %v4106_v9 = vadd.f32 %v4089_v58, %v11680_v59  ;;  %v11775_v59 = vadd.f32 %v11672_v37, %v4239_v61  ;;  %vm11856_vm10 = vmor %vm4331_vm4, %vm4332_vm13 }
 0x74b   :  { %v4328_v31 = vsub.f32 1.0, %v4327_v3  ;;  %v4342_v60 = vmul.f32 %v11750_v15, %v11698_v50  ;;  %v11772_v3 = vadd.f32 %v11683_v11, %v4284_v46  ;;  %v4380_v58 = vand.u32 2147483647, %v11735_v4 }
 0x74c   :  { %7460 = vrcp.f32 %v11755_v34  ;;  %v11790_v46 = vor.u32 1.1754944e-38, %v4352_v7  ;;  %v4382_v39 = vand.u32 2147483648, %v11735_v4  ;;  %vm4376_vm7 = vweird.f32 %v11735_v4 }
 0x74d   :  { %v4329_v24 = vmul.f32 %v11733_v55, %v4328_v31  ;;  %v4343_v51 = vsub.f32 1.0, %v4342_v60  ;;  %7462 = vpow2.f32 %v7193_v25  ;;  %v11784_v31 = vadd.f32 %v4106_v9, %v8831_v49 }
 0x74e   :  { %vm11832_vm9 = vcmp.eq.f32.partialorder %v4380_v58, 8.507059e+37  ;;  %vm4347_vm1 = vweird.f32 %v11750_v15  ;;  %v4383_v58 = vor.u32 1.1754944e-38, %v4382_v39  ;;  %vm11876_vm4 = vcmp.eq.f32.partialorder %v14562_v57, 8.507059e+37 }
 0x74f   :  { %14543 = vst [vmem:[#allocation18_spill] sm:$0xff] %v11784_v31  ;;  %v4344_v7 = vmul.f32 %v11750_v15, %v4343_v51  ;;  %v4330_v0 = vadd.f32 %v11733_v55, %v4329_v24  ;;  %v4289_v51 = vsel %vm11810_vm8, %v11683_v11, %v11772_v3  ;;  %v4299_v11 = vmul.f32 %v11719_v32, %v4298_v36  ;;  %vm11888_vm3 = vmor %vm4346_vm14, %vm4347_vm1 }
 0x750   :  { %v11781_v14 = vpop.eup %7458  ;;  %v7196_v3 = vmul.f32 -1.442695, %v11784_v31  ;;  %v14567_v57 = vand.u32 2147483647, %v11629_v6  ;;  %v14570_v50 = vand.u32 2147483647, %v11657_v40  ;;  %vm14574_vm14 = vweird.f32 %v11663_v10 }
 0x751   :  { %v4372_v9 = vmul.f32 %v11781_v14, %v11735_v4  ;;  %v4092_v63 = vpop.f32.mrf.mxu3  ;;  %vm4377_vm8 = vweird.f32 %v11781_v14  ;;  %v4345_v44 = vadd.f32 %v11750_v15, %v4344_v7  ;;  %v4334_v20 = vsel %vm11856_vm10, %v11733_v55, %v4330_v0  ;;  %v14597_v7 = vld [vmem:[#allocation16_spill] sm:$0xff] }
 0x752   :  { %v4109_v27 = vadd.f32 %v4092_v63, %v11686_v38  ;;  %v7461_v54 = vpop.eup %7460  ;;  %v4300_v55 = vadd.f32 %v11719_v32, %v4299_v11  ;;  %vm11895_vm10 = vcmp.eq.f32.partialorder %v14567_v57, 8.507059e+37  ;;  %vm4378_vm13 = vmor %vm4376_vm7, %vm4377_vm8  ;;  %7464 = vpow2.f32 %v7196_v3  ;;  %v12053_v0 = vld [vmem:[%s14454_s10] sm:$0xff] }
 0x753   :  { %v4373_v38 = vsub.f32 1.0, %v4372_v9  ;;  %v4387_v22 = vmul.f32 %v7461_v54, %v11755_v34  ;;  %vm4392_vm0 = vweird.f32 %v7461_v54  ;;  %vm11905_vm1 = vcmp.eq.f32.partialorder %v14570_v50, 8.507059e+37  ;;  %vm11927_vm7 = vmor %vm14574_vm14, %vm4302_vm2 }
 0x754   :  { %v11841_v63 = vadd.f32 %v4109_v27, %v8831_v49  ;;  %v14559_v27 = vand.u32 2147483647, %v11639_v2  ;;  %v14573_v11 = vsub.f32 1.0, %v11708_v21  ;;  %v4339_v4 = vsel %vm11786_vm6, %v11778_v1, %v4334_v20 }
 0x755   :  { %v4374_v36 = vmul.f32 %v11781_v14, %v4373_v38  ;;  %v11867_v38 = vpop.eup %7462  ;;  %v4388_v17 = vsub.f32 1.0, %v4387_v22  ;;  %v4395_v22 = vand.u32 2147483647, %v11755_v34  ;;  %v4255_v3 = vadd.f32 %v11703_v33, %v4254_v16 }
 0x756   :  { %14554 = vst [vmem:[#allocation19_spill] sm:$0xff] %v11841_v63  ;;  %vm11863_vm15 = vcmp.eq.f32.partialorder %v14559_v27, 8.507059e+37  ;;  %v7199_v39 = vmul.f32 -1.442695, %v11841_v63  ;;  %v4397_v27 = vand.u32 2147483648, %v11755_v34  ;;  %v4209_v57 = vmul.f32 %v11665_v41, %v14573_v11  ;;  %v7578_v11 = vld [vmem:[%s14463_s29 + $0x240] sm:$0xff] }
 0x757   :  { %v4375_v2 = vadd.f32 %v11781_v14, %v4374_v36  ;;  %v4389_v36 = vmul.f32 %v7461_v54, %v4388_v17  ;;  %v4349_v17 = vsel %vm11888_vm3, %v11750_v15, %v4345_v44  ;;  %vm14577_vm6 = vweird.f32 %v11755_v34  ;;  %v7583_v34 = vld [vmem:[%s14463_s29 + $0x1f0] sm:$0xff] }
 0x758   :  { %7466 = vpow2.f32 %v7199_v39  ;;  %vm4393_vm3 = vmor %vm14577_vm6, %vm4392_vm0  ;;  %v4398_v15 = vor.u32 1.1754944e-38, %v4397_v27  ;;  %vm14578_vm2 = vweird.f32 %v11649_v8  ;;  %vm14579_vm8 = vweird.f32 %v11629_v6  ;;  %v7465_v16 = vpop.eup %7464  ;;  %v12043_v27 = vld [vmem:[%s14451_s7] sm:$0xff] }
 0x759   :  { %v4379_v63 = vsel %vm4378_vm13, %v11781_v14, %v4375_v2  ;;  %v4095_v48 = vpop.f32.mrf.mxu3  ;;  %v4390_v18 = vadd.f32 %v7461_v54, %v4389_v36  ;;  %vm11950_vm0 = vmor %vm14579_vm8, %vm14578_vm2  ;;  %v4210_v47 = vadd.f32 %v11665_v41, %v4209_v57  ;;  %vm14583_vm13 = vweird.f32 %v11703_v33 }
 0x75a   :  { %v4384_v50 = vsel %vm11832_vm9, %v4383_v58, %v4379_v63  ;;  %v4112_v21 = vadd.f32 %v4095_v48, %v11712_v29  ;;  %vm4396_vm9 = vcmp.eq.f32.partialorder %v4395_v22, 8.507059e+37  ;;  %v4294_v48 = vsel %vm11822_vm12, %v11745_v28, %v4289_v51  ;;  %v3983_v29 = vpop.f32.mrf.mxu2  ;;  %v14598_v22 = vld [vmem:[#allocation8_spill] sm:$0xff] }
 0x75b   :  { %v11932_v1 = vmul.f32 %v4384_v50, %v11669_v26  ;;  %v4394_v60 = vsel %vm4393_vm3, %v7461_v54, %v4390_v18  ;;  %v4304_v26 = vsel %vm11927_vm7, %v11719_v32, %v4300_v55  ;;  %vm14582_vm12 = vcmask 1045504   ;;  %v7577_v55 = vld [vmem:[%s14463_s29 + $0x250] sm:$0xff] }
 0x75c   :  { %v11941_v10 = vadd.f32 %v4112_v21, %v8831_v49  ;;  %v4399_v28 = vsel %vm4396_vm9, %v4398_v15, %v4394_v60  ;;  %v11958_v54 = vmul.f32 %v4339_v4, %v11642_v23  ;;  %v4354_v18 = vsel %vm11844_vm5, %v11790_v46, %v4349_v17  ;;  %vm14593_vm6 = vmmov %vm14582_vm12  ;;  %v7579_v17 = vld [vmem:[%s14463_s29 + $0x230] sm:$0xff]  ;;  %v12082_v21 = vld [vmem:[%s14451_s7 + $0x8] sm:$0xff] }
 0x75d   :  { %7206 = vmatpush.msk.msrb.mxu2 %vm14582_vm12, %v11932_v1  ;;  %vm14584_vm14 = vweird.f32 %v11657_v40  ;;  %v4199_v32 = vsel %vm11950_vm0, %v11649_v8, %v11730_v13  ;;  %v4429_v23 = vmul.f32 %v4399_v28, %v11675_v52  ;;  %v14587_v46 = vsel %vm11796_vm11, %v11672_v37, %v11775_v59  ;;  %vm14594_vm3 = vmmov %vm14593_vm6  ;;  %v7581_v15 = vld [vmem:[%s14463_s29 + $0x220] sm:$0xff] }
 0x75e   :  { %vm11967_vm7 = vmor %vm14584_vm14, %vm14583_vm13  ;;  %v7202_v51 = vmul.f32 -1.442695, %v11941_v10  ;;  %v4249_v24 = vsel %vm11863_vm15, %v11721_v35, %v14587_v46  ;;  %v3984_v8 = vadd.f32 %v3983_v29, %v11602_v62  ;;  %v4422_v52 = vmul.f32 %v4294_v48, %v11627_v43  ;;  %v7467_v62 = vpop.eup %7466  ;;  %v12097_v48 = vld [vmem:[%s14454_s10 + $0x8] sm:$0xff] }
 0x75f   :  { %v4259_v63 = vsel %vm11967_vm7, %v11703_v33, %v4255_v3  ;;  %4452 = vmatpush.msrb.mxu2 %v11958_v54  ;;  %v4309_v13 = vsel %vm11876_vm4, %v11747_v12, %v4304_v26  ;;  %v14588_v37 = vand.u32 2147483648, %v11657_v40  ;;  %vm14589_vm5 = vweird.f32 %v11665_v41  ;;  %7210 = vmatpush.msk.msra.mxu1 %vm14593_vm6, %v4429_v23 }
 0x760   :  { %vm14590_vm15 = vweird.f32 %v11637_v30  ;;  %7468 = vpow2.f32 %v7202_v51  ;;  %7222 = vmatpush.msk.msra.mxu3 %vm14594_vm3, %v4429_v23  ;;  %v4426_v43 = vmul.f32 %v4354_v18, %v11645_v42  ;;  %v4204_v12 = vsel %vm11895_vm10, %v11695_v19, %v4199_v32  ;;  %v7586_v32 = vld [vmem:[%s14463_s29 + $0x200] sm:$0xff]  ;;  %v7587_v23 = vld [vmem:[%s14463_s29 + $0x1d0] sm:$0xff] }
 0x761   :  { %v4263_v59 = vor.u32 1.1754944e-38, %v14588_v37  ;;  %vm12000_vm11 = vmor %vm14590_vm15, %vm14589_vm5  ;;  %v12014_v33 = vadd.f32 1.0, %v11867_v38  ;;  %v4098_v61 = vpop.f32.mrf.mxu3  ;;  %4453 = vmatpush.msrb.mxu2 %v4422_v52  ;;  %v4419_v53 = vmul.f32 %v4249_v24, %v11618_v56  ;;  %v14595_v42 = vand.u32 2147483648, %v11637_v30  ;;  %v7588_v51 = vld [vmem:[%s14464_s26 + $0xf0] sm:$0xff] }
 0x762   :  { %v4214_v40 = vsel %vm12000_vm11, %v11665_v41, %v4210_v47  ;;  %v12021_v44 = vadd.f32 1.0, %v7465_v16  ;;  %4478 = vmatpush.msra.mxu1 %v4426_v43  ;;  %4556 = vmatpush.msra.mxu3 %v4426_v43  ;;  %v4115_v19 = vadd.f32 %v4098_v61, %v3984_v8  ;;  %v4423_v41 = vmul.f32 %v4309_v13, %v11632_v5  ;;  %v7584_v47 = vld [vmem:[%s14463_s29 + $0x210] sm:$0xff]  ;;  %v7592_v43 = vld [vmem:[%s14463_s29 + $0x1c0] sm:$0xff] }
 0x763   :  { %v4264_v9 = vsel %vm11905_vm1, %v4263_v59, %v4259_v63  ;;  %v4218_v58 = vor.u32 1.1754944e-38, %v14595_v42  ;;  %v14596_v38 = vand.u32 2147483647, %v11637_v30  ;;  %v12026_v39 = vadd.f32 1.0, %v7467_v62  ;;  %4454 = vmatpush.msrb.mxu2 %v4419_v53  ;;  %vm14600_vm1 = vmmov %vm14594_vm3  ;;  %v12133_v63 = vld [vmem:[%s14451_s7 + $0x10] sm:$0xf] }
 0x764   :  { %v4416_v56 = vmul.f32 %v4204_v12, %v11609_v45  ;;  %v12030_v20 = vadd.f32 %v4115_v19, %v8831_v49  ;;  %4479 = vmatpush.msra.mxu1 %v4423_v41  ;;  %4557 = vmatpush.msra.mxu3 %v4423_v41  ;;  %v4420_v2 = vmul.f32 %v4264_v9, %v14597_v7  ;;  %7470 = vrcp.f32 %v12014_v33  ;;  %v12145_v13 = vld [vmem:[%s14454_s10 + $0x10] sm:$0xf] }
 0x765   :  { %vm4216_vm4 = vcmp.eq.f32.partialorder %v14596_v38, 8.507059e+37  ;;  %7472 = vrcp.f32 %v12021_v44  ;;  %vm14599_vm10 = vcmask 310272   ;;  %vm4271_vm14 = vweird.f32 %v12021_v44  ;;  %v7593_v61 = vld [vmem:[%s14464_s26 + $0xd0] sm:$0xff] }
 0x766   :  { %v4219_v31 = vsel %vm4216_vm4, %v4218_v58, %v4214_v40  ;;  %4455 = vmatpush.msrb.mxu2 %v4416_v56  ;;  %v7469_v5 = vpop.eup %7468  ;;  %v7205_v30 = vmul.f32 -1.442695, %v12030_v20  ;;  %4480 = vmatpush.msra.mxu1 %v4420_v2  ;;  %7474 = vrcp.f32 %v12026_v39  ;;  %vm14601_vm9 = vmmov %vm14599_vm10  ;;  %v4275_v59 = vand.u32 2147483647, %v12021_v44  ;;  %v7594_v58 = vld [vmem:[%s14463_s29 + $0x1b0] sm:$0xff] }
 0x767   :  { %4558 = vmatpush.msra.mxu3 %v4420_v2  ;;  %v4417_v45 = vmul.f32 %v4219_v31, %v14598_v22  ;;  %v12038_v49 = vadd.f32 1.0, %v7469_v5  ;;  %7207 = vmatmul.msk.f32.vlgmr.msrb.gmra.mxu2 %vm14599_vm10, %v12043_v27  ;;  %vm14602_vm2 = vmmov %vm14601_vm9  ;;  %v4277_v35 = vand.u32 2147483648, %v12021_v44  ;;  %vm4226_vm6 = vweird.f32 %v12014_v33  ;;  %v7596_v5 = vld [vmem:[%s14463_s29 + $0x1a0] sm:$0xff]  ;;  %v7622_v31 = vld [vmem:[%s14463_s29 + $0x258] sm:$0xff] }
 0x768   :  { %7476 = vpow2.f32 %v7205_v30  ;;  %7218 = vmatpush.msk.msra.mxu2 %vm14600_vm1, %v11932_v1  ;;  %vm14603_vm8 = vmmov %vm14602_vm2  ;;  %vm4316_vm1 = vweird.f32 %v12026_v39  ;;  %v4320_v7 = vand.u32 2147483647, %v12026_v39  ;;  %v4322_v2 = vand.u32 2147483648, %v12026_v39 }
 0x769   :  { %4481 = vmatpush.msra.mxu1 %v4417_v45  ;;  %4559 = vmatpush.msra.mxu3 %v4417_v45  ;;  %7478 = vrcp.f32 %v12038_v49  ;;  %vm14604_vm0 = vmmov %vm14602_vm2  ;;  %vm4361_vm3 = vweird.f32 %v12038_v49  ;;  %v4365_v9 = vand.u32 2147483647, %v12038_v49  ;;  %v4367_v42 = vand.u32 2147483648, %v12038_v49  ;;  %v7630_v45 = vld [vmem:[%s14463_s29 + $0x238] sm:$0xff] }
 0x76a   :  { %7223 = vmatmul.msk.f32.vlgmr.msra.gmra.mxu3 %vm14601_vm9, %v12053_v0  ;;  %7211 = vmatmul.msk.f32.vlgmr.msra.gmra.mxu1 %vm14602_vm2, %v12043_v27  ;;  %v12062_v25 = vpop.eup %7470  ;;  %vm14605_vm12 = vmmov %vm14604_vm0 }
 0x76b   :  { %4676 = vmatpush.msrb.mxu3 %v7577_v55  ;;  %4530 = vmatpush.msra.mxu2 %v11958_v54  ;;  %v12065_v36 = vpop.eup %7472  ;;  %v4222_v60 = vmul.f32 %v12062_v25, %v12014_v33  ;;  %v7585_v54 = vld [vmem:[%s14463_s29 + $0x1e0] sm:$0xff]  ;;  %vm14606_vm13 = vmmov %vm14604_vm0 }
 0x76c   :  { %v12070_v57 = vpop.eup %7474  ;;  %v4267_v29 = vmul.f32 %v12065_v36, %v12021_v44  ;;  %vm14607_vm7 = vmmov %vm14604_vm0  ;;  %vm4272_vm9 = vweird.f32 %v12065_v36 }
 0x76d   :  { %4677 = vmatpush.msrb.mxu3 %v7578_v11  ;;  %4531 = vmatpush.msra.mxu2 %v4422_v52  ;;  %v4312_v1 = vmul.f32 %v12070_v57, %v12026_v39  ;;  %v4223_v6 = vsub.f32 1.0, %v4222_v60  ;;  %v7590_v52 = vld [vmem:[%s14464_s26 + $0xe0] sm:$0xff]  ;;  %vm14608_vm5 = vmmov %vm14604_vm0  ;;  %vm4317_vm11 = vweird.f32 %v12070_v57  ;;  %v4368_v11 = vor.u32 1.1754944e-38, %v4367_v42  ;;  %v7616_v42 = vld [vmem:[%s14463_s29 + $0x110] sm:$0xff] }
 0x76e   :  { %v7477_v4 = vpop.eup %7476  ;;  %v4268_v18 = vsub.f32 1.0, %v4267_v29  ;;  %v4323_v29 = vor.u32 1.1754944e-38, %v4322_v2  ;;  %v7624_v2 = vld [vmem:[%s14463_s29 + $0xb0] sm:$0xff] }
 0x76f   :  { %4678 = vmatpush.msrb.mxu3 %v7579_v17  ;;  %v12075_v3 = vpop.eup %7478  ;;  %v12077_v50 = vadd.f32 1.0, %v7477_v4  ;;  %4532 = vmatpush.msra.mxu2 %v4419_v53  ;;  %v4313_v28 = vsub.f32 1.0, %v4312_v1  ;;  %v4224_v62 = vmul.f32 %v12062_v25, %v4223_v6  ;;  %v7598_v17 = vld [vmem:[%s14463_s29 + $0x190] sm:$0xff]  ;;  %v4278_v6 = vor.u32 1.1754944e-38, %v4277_v35 }
 0x770   :  { %7208 = vmatmul.msk.f32.gmra.mxu2 %vm14603_vm8, %v12082_v21  ;;  %v4357_v14 = vmul.f32 %v12075_v3, %v12038_v49  ;;  %v4269_v37 = vmul.f32 %v12065_v36, %v4268_v18  ;;  %vm4362_vm15 = vweird.f32 %v12075_v3  ;;  %vm12199_vm8 = vmor %vm4316_vm1, %vm4317_vm11  ;;  %v7597_v49 = vld [vmem:[%s14464_s26 + $0xb0] sm:$0xff]  ;;  %vm4321_vm11 = vcmp.eq.f32.partialorder %v4320_v7, 8.507059e+37  ;;  %v7623_v7 = vld [vmem:[%s14463_s29 + $0xc8] sm:$0xff] }
 0x771   :  { %4679 = vmatpush.msrb.mxu3 %v7581_v15  ;;  %7480 = vrcp.f32 %v12077_v50  ;;  %4533 = vmatpush.msra.mxu2 %v4416_v56  ;;  %v4314_v8 = vmul.f32 %v12070_v57, %v4313_v28  ;;  %v4412_v53 = vand.u32 2147483648, %v12077_v50  ;;  %v4410_v41 = vand.u32 2147483647, %v12077_v50  ;;  %v7595_v56 = vld [vmem:[%s14464_s26 + $0xc0] sm:$0xff]  ;;  %vm12181_vm10 = vmor %vm4361_vm3, %vm4362_vm15  ;;  %v14623_v35 = vld [vmem:[#allocation17_spill] sm:$0xff] }
 0x772   :  { %7224 = vmatmul.msk.f32.gmra.mxu3 %vm14604_vm0, %v12097_v48  ;;  %7212 = vmatmul.msk.f32.gmra.mxu1 %vm14605_vm12, %v12082_v21  ;;  %v4358_v26 = vsub.f32 1.0, %v4357_v14  ;;  %vm4406_vm2 = vweird.f32 %v12077_v50  ;;  %v4270_v39 = vadd.f32 %v12065_v36, %v4269_v37  ;;  %v4225_v4 = vadd.f32 %v12062_v25, %v4224_v62  ;;  %v7599_v14 = vld [vmem:[%s14464_s26 + $0xa0] sm:$0xff]  ;;  %vm12227_vm15 = vmor %vm4271_vm14, %vm4272_vm9  ;;  %v7645_v60 = vld [vmem:[%s14463_s29 + $0x50] sm:$0xff] }
 0x773   :  { %4640 = vmatpush.msrb.mxu2 %v7583_v34  ;;  %4680 = vmatpush.msrb.mxu3 %v7584_v47  ;;  %v4315_v38 = vadd.f32 %v12070_v57, %v4314_v8  ;;  %v4413_v55 = vor.u32 1.1754944e-38, %v4412_v53  ;;  %vm4227_vm12 = vweird.f32 %v12062_v25  ;;  %v4230_v28 = vand.u32 2147483647, %v12014_v33  ;;  %v7606_v8 = vld [vmem:[%s14464_s26 + $0x70] sm:$0xff]  ;;  %v7612_v53 = vld [vmem:[%s14463_s29 + $0xf8] sm:$0xff] }
 0x774   :  { %v4359_v16 = vmul.f32 %v12075_v3, %v4358_v26  ;;  %v4232_v26 = vand.u32 2147483648, %v12014_v33  ;;  %v4274_v47 = vsel %vm12227_vm15, %v12065_v36, %v4270_v39  ;;  %vm12249_vm14 = vmor %vm4226_vm6, %vm4227_vm12  ;;  %v7602_v36 = vld [vmem:[%s14463_s29 + $0x170] sm:$0xff]  ;;  %vm14618_vm3 = vcmask 1045504  }
 0x775   :  { %4641 = vmatpush.msrb.mxu2 %v7585_v54  ;;  %4681 = vmatpush.msrb.mxu3 %v7586_v32  ;;  %v7601_v54 = vld [vmem:[%s14464_s26 + $0x90] sm:$0xff]  ;;  %v4229_v33 = vsel %vm12249_vm14, %v12062_v25, %v4225_v4  ;;  %vm4231_vm6 = vcmp.eq.f32.partialorder %v4230_v28, 8.507059e+37  ;;  %v7635_v4 = vld [vmem:[%s14463_s29 + $0x80] sm:$0xff]  ;;  %v7650_v28 = vld [vmem:[%s14463_s29 + $0x38] sm:$0xff] }
 0x776   :  { %v4360_v40 = vadd.f32 %v12075_v3, %v4359_v16  ;;  %v7605_v25 = vld [vmem:[%s14463_s29 + $0x150] sm:$0xff] }
 0x777   :  { %4642 = vmatpush.msrb.mxu2 %v7587_v23  ;;  %4770 = vmatpush.msra.mxu3 %v7588_v51  ;;  %v12126_v46 = vpop.eup %7480  ;;  %v4233_v23 = vor.u32 1.1754944e-38, %v4232_v26  ;;  %v7603_v51 = vld [vmem:[%s14463_s29 + $0x160] sm:$0xff]  ;;  %v7631_v39 = vld [vmem:[%s14463_s29 + $0x90] sm:$0xff]  ;;  %v7646_v26 = vld [vmem:[%s14463_s29 + $0x58] sm:$0xff] }
 0x778   :  { %v4402_v24 = vmul.f32 %v12126_v46, %v12077_v50  ;;  %7209 = vmatmul.msk.f32.gmra.mxu2 %vm14606_vm13, %v12133_v63  ;;  %vm4407_vm4 = vweird.f32 %v12126_v46  ;;  %v4364_v22 = vsel %vm12181_vm10, %v12075_v3, %v4360_v40  ;;  %vm4411_vm13 = vcmp.eq.f32.partialorder %v4410_v41, 8.507059e+37  ;;  %v7610_v40 = vld [vmem:[%s14464_s26 + $0x50] sm:$0xff]  ;;  %v7619_v41 = vld [vmem:[%s14463_s29 + $0xd8] sm:$0xff] }
 0x779   :  { %4771 = vmatpush.msra.mxu3 %v7590_v52  ;;  %4643 = vmatpush.msrb.mxu2 %v7592_v43  ;;  %vm4408_vm0 = vmor %vm4406_vm2, %vm4407_vm4  ;;  %v4319_v50 = vsel %vm12199_vm8, %v12070_v57, %v4315_v38  ;;  %v7600_v57 = vld [vmem:[%s14463_s29 + $0x180] sm:$0xff]  ;;  %vm4276_vm10 = vcmp.eq.f32.partialorder %v4275_v59, 8.507059e+37  ;;  %v14622_v52 = vld [vmem:[#allocation18_spill] sm:$0xff] }
 0x77a   :  { %7225 = vmatmul.msk.f32.gmra.mxu3 %vm14607_vm7, %v12145_v13  ;;  %v4403_v12 = vsub.f32 1.0, %v4402_v24  ;;  %7213 = vmatmul.msk.f32.gmra.mxu1 %vm14608_vm5, %v12133_v63  ;;  %vm14613_vm7 = vmmov %vm14608_vm5  ;;  %vm4366_vm5 = vcmp.eq.f32.partialorder %v4365_v9, 8.507059e+37  ;;  %v4324_v18 = vsel %vm4321_vm11, %v4323_v29, %v4319_v50  ;;  %v4279_v16 = vsel %vm4276_vm10, %v4278_v6, %v4274_v47  ;;  %v7607_v59 = vld [vmem:[%s14463_s29 + $0x140] sm:$0xff]  ;;  %v7638_v50 = vld [vmem:[%s14463_s29 + $0x70] sm:$0xff] }
 0x77b   :  { %4772 = vmatpush.msra.mxu3 %v7593_v61  ;;  %4644 = vmatpush.msrb.mxu2 %v7594_v58  ;;  %v4369_v15 = vsel %vm4366_vm5, %v4368_v11, %v4364_v22  ;;  %vm14619_vm4 = vmmov %vm14618_vm3  ;;  %v4234_v24 = vsel %vm4231_vm6, %v4233_v23, %v4229_v33  ;;  %v4421_v37 = vmul.f32 %v4279_v16, %v14622_v52  ;;  %v7608_v43 = vld [vmem:[%s14464_s26 + $0x60] sm:$0xff]  ;;  %v7611_v61 = vld [vmem:[%s14463_s29 + $0xf0] sm:$0xff]  ;;  %vm14631_vm5 = vcmask 392192  }
 0x77c   :  { %v4404_v19 = vmul.f32 %v12126_v46, %v4403_v12  ;;  %v4427_v32 = vmul.f32 %v4369_v15, %v11941_v10  ;;  %v14620_v10 = vld [vmem:[#allocation19_spill] sm:$0xff]  ;;  %vm14621_vm1 = vmmov %vm14613_vm7  ;;  %v4418_v62 = vmul.f32 %v4234_v24, %v14623_v35  ;;  %v7609_v12 = vld [vmem:[%s14463_s29 + $0x130] sm:$0xff] }
 0x77d   :  { %4773 = vmatpush.msra.mxu3 %v7595_v56  ;;  %4645 = vmatpush.msrb.mxu2 %v7596_v5  ;;  %v4424_v44 = vmul.f32 %v4324_v18, %v14620_v10  ;;  %vm14624_vm9 = vmmov %vm14621_vm1  ;;  %v7613_v9 = vld [vmem:[%s14463_s29 + $0x120] sm:$0xff]  ;;  %v7617_v58 = vld [vmem:[%s14463_s29 + $0xd0] sm:$0xff] }
 0x77e   :  { %v4405_v30 = vadd.f32 %v12126_v46, %v4404_v19  ;;  %vm14625_vm2 = vmmov %vm14621_vm1  ;;  %v7618_v19 = vld [vmem:[%s14464_s26 + $0x40] sm:$0xff]  ;;  %v7625_v5 = vld [vmem:[%s14463_s29 + $0xb8] sm:$0xff] }
 0x77f   :  { %4774 = vmatpush.msra.mxu3 %v7597_v49  ;;  %4646 = vmatpush.msrb.mxu2 %v7598_v17  ;;  %vm14626_vm8 = vmmov %vm14621_vm1  ;;  %v7620_v38 = vld [vmem:[%s14463_s29 + $0x100] sm:$0xff]  ;;  %v7629_v22 = vld [vmem:[%s14463_s29 + $0xa8] sm:$0xff] }
 0x780   :  { %v4409_v3 = vsel %vm4408_vm0, %v12126_v46, %v4405_v30  ;;  %7219 = vmatmul.msk.f32.vlgmr.msra.gmra.mxu2 %vm14613_vm7, %v12053_v0  ;;  %v7604_v46 = vld [vmem:[%s14464_s26 + $0x80] sm:$0xff]  ;;  %vm14627_vm0 = vmmov %vm14621_vm1  ;;  %v7634_v11 = vld [vmem:[%s14463_s29 + $0x228] sm:$0xff] }
 0x781   :  { %4775 = vmatpush.msra.mxu3 %v7599_v14  ;;  %v4414_v1 = vsel %vm4411_vm13, %v4413_v55, %v4409_v3  ;;  %4647 = vmatpush.msrb.mxu2 %v7600_v57  ;;  %v7621_v56 = vld [vmem:[%s14463_s29 + $0xc0] sm:$0xff]  ;;  %vm14628_vm12 = vmmov %vm14627_vm0  ;;  %v7633_v55 = vld [vmem:[%s14463_s29 + $0x98] sm:$0xff] }
 0x782   :  { %v4430_v34 = vmul.f32 %v4414_v1, %v12030_v20  ;;  %v7627_v30 = vld [vmem:[%s14463_s29 + $0xa0] sm:$0xff]  ;;  %v7636_v17 = vld [vmem:[%s14464_s26 + $0x10] sm:$0xff]  ;;  %vm14629_vm13 = vmmov %vm14627_vm0 }
 0x783   :  { %4776 = vmatpush.msra.mxu3 %v7601_v54  ;;  %4648 = vmatpush.msrb.mxu2 %v7602_v36  ;;  %v7632_v49 = vld [vmem:[%s14464_s26 + $0x20] sm:$0xff]  ;;  %v7637_v3 = vld [vmem:[%s14463_s29 + $0x88] sm:$0xff]  ;;  %vm14630_vm7 = vmmov %vm14627_vm0 }
 0x784   :  { %7214 = vmatpush.msk.msrb.mxu0 %vm14618_vm3, %v4430_v34  ;;  %7226 = vmatpush.msk.msrb.mxu1 %vm14619_vm4, %v4430_v34  ;;  %v7639_v14 = vld [vmem:[%s14463_s29 + $0x78] sm:$0xff]  ;;  %v7641_v1 = vld [vmem:[%s14463_s29 + $0x60] sm:$0xff]  ;;  %v7643_v15 = vld [vmem:[%s14463_s29 + $0x68] sm:$0xff] }
 0x785   :  { %4649 = vmatpush.msrb.mxu2 %v7603_v51  ;;  %4777 = vmatpush.msra.mxu3 %v7604_v46  ;;  %v7644_v29 = vld [vmem:[%s14463_s29 + $0x208] sm:$0xff]  ;;  %v7647_v57 = vld [vmem:[%s14463_s29 + $0x40] sm:$0xff]  ;;  %v7649_v47 = vld [vmem:[%s14463_s29 + $0x30] sm:$0xff] }
 0x786   :  { %4504 = vmatpush.msrb.mxu0 %v4427_v32  ;;  %4582 = vmatpush.msrb.mxu1 %v4427_v32  ;;  %v7648_v34 = vld [vmem:[%s14463_s29 + $0x48] sm:$0xff]  ;;  %v7651_v54 = vld [vmem:[%s14463_s29 + $0x20] sm:$0xff]  ;;  %v7653_v6 = vld [vmem:[%s14463_s29 + $0x10] sm:$0xff] }
 0x787   :  { %4650 = vmatpush.msrb.mxu2 %v7605_v25  ;;  %4778 = vmatpush.msra.mxu3 %v7606_v8  ;;  %v7652_v18 = vld [vmem:[%s14463_s29 + $0x28] sm:$0xff]  ;;  %v7654_v20 = vld [vmem:[%s14463_s29 + $0x18] sm:$0xff]  ;;  %v7655_v36 = vld [vmem:[%s14463_s29] sm:$0xff] }
 0x788   :  { %7220 = vmatmul.msk.f32.gmra.mxu2 %vm14621_vm1, %v12097_v48  ;;  %4505 = vmatpush.msrb.mxu0 %v4424_v44  ;;  %v7656_v32 = vld [vmem:[%s14463_s29 + $0x1f8] sm:$0xff]  ;;  %v7657_v33 = vld [vmem:[%s14463_s29 + $0x8] sm:$0xff]  ;;  %v7658_v16 = vld [vmem:[%s14464_s26 + $0x1f0] sm:$0xff] }
 0x789   :  { %4583 = vmatpush.msrb.mxu1 %v4424_v44  ;;  %4651 = vmatpush.msrb.mxu2 %v7607_v59  ;;  %v7659_v23 = vld [vmem:[%s14463_s29 + $0x1e8] sm:$0xff]  ;;  %v7660_v51 = vld [vmem:[%s14464_s26 + $0x1e0] sm:$0xff]  ;;  %v7661_v46 = vld [vmem:[%s14463_s29 + $0x1d8] sm:$0xff] }
 0x78a   :  { %4506 = vmatpush.msrb.mxu0 %v4421_v37  ;;  %4779 = vmatpush.msra.mxu3 %v7608_v43  ;;  %v7662_v10 = vld [vmem:[%s14464_s26 + $0x1d0] sm:$0xff]  ;;  %v7663_v44 = vld [vmem:[%s14463_s29 + $0x1c8] sm:$0xff]  ;;  %v7664_v24 = vld [vmem:[%s14464_s26 + $0x1c0] sm:$0xff] }
 0x78b   :  { %4584 = vmatpush.msrb.mxu1 %v4421_v37  ;;  %4652 = vmatpush.msrb.mxu2 %v7609_v12  ;;  %v7665_v25 = vld [vmem:[%s14463_s29 + $0x1b8] sm:$0xff]  ;;  %v7666_v8 = vld [vmem:[%s14464_s26 + $0x1b0] sm:$0xff]  ;;  %v7667_v52 = vld [vmem:[%s14463_s29 + $0x1a8] sm:$0xff] }
 0x78c   :  { %4507 = vmatpush.msrb.mxu0 %v4418_v62  ;;  %4780 = vmatpush.msra.mxu3 %v7610_v40  ;;  %v7668_v37 = vld [vmem:[%s14464_s26 + $0x1a0] sm:$0xff]  ;;  %v7669_v59 = vld [vmem:[%s14463_s29 + $0x198] sm:$0xff]  ;;  %v7670_v35 = vld [vmem:[%s14464_s26 + $0x190] sm:$0xff] }
 0x78d   :  { %4585 = vmatpush.msrb.mxu1 %v4418_v62  ;;  %7215 = vmatmul.msk.f32.vlgmr.msrb.gmra.mxu0 %vm14624_vm9, %v12043_v27  ;;  %v7614_v27 = vld [vmem:[%s14463_s29 + $0xe0] sm:$0xff]  ;;  %v7671_v62 = vld [vmem:[%s14463_s29 + $0x188] sm:$0xff]  ;;  %v7673_v12 = vld [vmem:[%s14463_s29 + $0x178] sm:$0xff] }
 0x78e   :  { %7227 = vmatmul.msk.f32.vlgmr.msrb.gmra.mxu1 %vm14625_vm2, %v12053_v0  ;;  %4614 = vmatpush.msra.mxu0 %v7611_v61  ;;  %v7615_v0 = vld [vmem:[%s14463_s29 + $0xe8] sm:$0xff]  ;;  %v7672_v43 = vld [vmem:[%s14464_s26 + $0x180] sm:$0xff]  ;;  %v7674_v40 = vld [vmem:[%s14464_s26 + $0x170] sm:$0xff] }
 0x78f   :  { %4692 = vmatpush.msra.mxu1 %v7612_v53  ;;  %4653 = vmatpush.msrb.mxu2 %v7613_v9  ;;  %v7675_v61 = vld [vmem:[%s14463_s29 + $0x168] sm:$0xff]  ;;  %v7676_v53 = vld [vmem:[%s14464_s26 + $0x160] sm:$0xff]  ;;  %v7677_v9 = vld [vmem:[%s14463_s29 + $0x158] sm:$0xff] }
 0x790   :  { %7221 = vmatmul.msk.f32.gmra.mxu2 %vm14626_vm8, %v12145_v13  ;;  %4615 = vmatpush.msra.mxu0 %v7614_v27  ;;  %v7678_v27 = vld [vmem:[%s14464_s26 + $0x150] sm:$0xff]  ;;  %vm14632_vm15 = vmmov %vm14631_vm5 }
 0x791   :  { %4693 = vmatpush.msra.mxu1 %v7615_v0  ;;  %4654 = vmatpush.msrb.mxu2 %v7616_v42  ;;  %v7679_v0 = vld [vmem:[%s14463_s29 + $0x148] sm:$0xff]  ;;  %v7680_v42 = vld [vmem:[%s14464_s26 + $0x140] sm:$0xff]  ;;  %vm14633_vm11 = vmmov %vm14631_vm5 }
 0x792   :  { %4616 = vmatpush.msra.mxu0 %v7617_v58  ;;  %4781 = vmatpush.msra.mxu3 %v7618_v19  ;;  %v7681_v58 = vld [vmem:[%s14463_s29 + $0x138] sm:$0xff]  ;;  %v7682_v19 = vld [vmem:[%s14464_s26 + $0x130] sm:$0xff]  ;;  %vm14634_vm14 = vmmov %vm14631_vm5 }
 0x793   :  { %4694 = vmatpush.msra.mxu1 %v7619_v41  ;;  %4655 = vmatpush.msrb.mxu2 %v7620_v38  ;;  %v7683_v41 = vld [vmem:[%s14463_s29 + $0x128] sm:$0xff]  ;;  %v7684_v38 = vld [vmem:[%s14464_s26 + $0x120] sm:$0xff]  ;;  %vm14635_vm3 = vmmov %vm14631_vm5 }
 0x794   :  { %4617 = vmatpush.msra.mxu0 %v7621_v56  ;;  %v7685_v56 = vld [vmem:[%s14463_s29 + $0x118] sm:$0xff]  ;;  %vm14636_vm4 = vmmov %vm14635_vm3 }
 0x795   :  { %4754 = vmatpush.msra.mxu2 %v7622_v31  ;;  %7216 = vmatmul.msk.f32.gmra.mxu0 %vm14627_vm0, %v12082_v21  ;;  %v7626_v21 = vld [vmem:[%s14463_s29 + $0x248] sm:$0xff]  ;;  %v7686_v31 = vld [vmem:[%s14464_s26 + $0x110] sm:$0xff]  ;;  %vm14637_vm10 = vmmov %vm14635_vm3  ;;  %vm14643_vm0 = vcmask 1046528  }
 0x796   :  { %4695 = vmatpush.msra.mxu1 %v7623_v7  ;;  %4618 = vmatpush.msra.mxu0 %v7624_v2  ;;  %v7687_v7 = vld [vmem:[%s14463_s29 + $0x108] sm:$0xff]  ;;  %v7688_v2 = vld [vmem:[%s14464_s26 + $0x100] sm:$0xff]  ;;  %vm14638_vm6 = vmmov %vm14635_vm3 }
 0x797   :  { %7228 = vmatmul.msk.f32.gmra.mxu1 %vm14628_vm12, %v12097_v48  ;;  %4755 = vmatpush.msra.mxu2 %v7626_v21  ;;  %v7628_v48 = vld [vmem:[%s14464_s26 + $0x30] sm:$0xff]  ;;  %vm14639_vm1 = vmmov %vm14635_vm3  ;;  %vm14644_vm12 = vcmask 1043456  }
 0x798   :  { %4696 = vmatpush.msra.mxu1 %v7625_v5  ;;  %4619 = vmatpush.msra.mxu0 %v7627_v30  ;;  %vm14640_vm9 = vmmov %vm14639_vm1 }
 0x799   :  { %4782 = vmatpush.msra.mxu3 %v7628_v48  ;;  %4756 = vmatpush.msra.mxu2 %v7630_v45  ;;  %v7689_v45 = vld [vmem:[%s14464_s26 + $0x250] sm:$0xff]  ;;  %vm14641_vm2 = vmmov %vm14639_vm1 }
 0x79a   :  { %4697 = vmatpush.msra.mxu1 %v7629_v22  ;;  %4620 = vmatpush.msra.mxu0 %v7631_v39  ;;  %v7690_v39 = vld [vmem:[%s14464_s26 + $0x240] sm:$0xff]  ;;  %vm14642_vm8 = vmmov %vm14639_vm1 }
 0x79b   :  { %4783 = vmatpush.msra.mxu3 %v7632_v49  ;;  %4757 = vmatpush.msra.mxu2 %v7634_v11  ;;  %v7691_v11 = vld [vmem:[%s14464_s26 + $0x230] sm:$0xff] }
 0x79c   :  { %4698 = vmatpush.msra.mxu1 %v7633_v55  ;;  %4621 = vmatpush.msra.mxu0 %v7635_v4 }
 0x79d   :  { %4784 = vmatpush.msra.mxu3 %v7636_v17  ;;  %7217 = vmatmul.msk.f32.gmra.mxu0 %vm14629_vm13, %v12133_v63  ;;  %v7640_v63 = vld [vmem:[%s14463_s29 + $0x218] sm:$0xff]  ;;  %v7692_v17 = vld [vmem:[%s14464_s26 + $0x220] sm:$0xff]  ;;  %vm14645_vm13 = vmmov %vm14643_vm0 }
 0x79e   :  { %4699 = vmatpush.msra.mxu1 %v7637_v3  ;;  %4622 = vmatpush.msra.mxu0 %v7638_v50  ;;  %v7693_v3 = vld [vmem:[%s14464_s26 + $0x210] sm:$0xff] }
 0x79f   :  { %7229 = vmatmul.msk.f32.gmra.mxu1 %vm14630_vm7, %v12145_v13  ;;  %4758 = vmatpush.msra.mxu2 %v7640_v63  ;;  %v7642_v13 = vld [vmem:[%s14464_s26] sm:$0xff]  ;;  %vm14646_vm7 = vmmov %vm14644_vm12 }
 0x7a0   :  { %4700 = vmatpush.msra.mxu1 %v7639_v14  ;;  %4623 = vmatpush.msra.mxu0 %v7641_v1  ;;  %v7694_v14 = vld [vmem:[%s14464_s26 + $0x200] sm:$0xff] }
 0x7a1   :  { %4785 = vmatpush.msra.mxu3 %v7642_v13  ;;  %4759 = vmatpush.msra.mxu2 %v7644_v29 }
 0x7a2   :  { %4701 = vmatpush.msra.mxu1 %v7643_v15  ;;  %4624 = vmatpush.msra.mxu0 %v7645_v60  ;;  %v7695_v60 = vld [vmem:[%s14464_s26 + $0xf8] sm:$0xff] }
 0x7a4   :  { %4702 = vmatpush.msra.mxu1 %v7646_v26  ;;  %4625 = vmatpush.msra.mxu0 %v7647_v57  ;;  %v7696_v26 = vld [vmem:[%s14464_s26 + $0x258] sm:$0xff]  ;;  %v7697_v57 = vld [vmem:[%s14464_s26 + $0xe8] sm:$0xff] }
 0x7a6   :  { %4703 = vmatpush.msra.mxu1 %v7648_v34  ;;  %4626 = vmatpush.msra.mxu0 %v7649_v47  ;;  %v7698_v34 = vld [vmem:[%s14464_s26 + $0x248] sm:$0xff] }
 0x7a8   :  { %4704 = vmatpush.msra.mxu1 %v7650_v28  ;;  %4627 = vmatpush.msra.mxu0 %v7651_v54 }
 0x7aa   :  { %4705 = vmatpush.msra.mxu1 %v7652_v18  ;;  %4628 = vmatpush.msra.mxu0 %v7653_v6  ;;  %v7699_v18 = vld [vmem:[%s14464_s26 + $0xd8] sm:$0xff] }
 0x7ab   :  { %v7700_v6 = vld [vmem:[%s14464_s26 + $0x238] sm:$0xff] }
 0x7ac   :  { %4706 = vmatpush.msra.mxu1 %v7654_v20  ;;  %4629 = vmatpush.msra.mxu0 %v7655_v36 }
 0x7ae   :  { %4718 = vmatpush.msrb.mxu0 %v7656_v32  ;;  %4707 = vmatpush.msra.mxu1 %v7657_v33  ;;  %v7701_v32 = vld [vmem:[%s14464_s26 + $0xc8] sm:$0xff] }
 0x7af   :  { %v7702_v33 = vld [vmem:[%s14464_s26 + $0x228] sm:$0xff] }
 0x7b0   :  { %4796 = vmatpush.msrb.mxu1 %v7658_v16  ;;  %4719 = vmatpush.msrb.mxu0 %v7659_v23  ;;  %v7703_v16 = vld [vmem:[%s14464_s26 + $0xb8] sm:$0xff] }
 0x7b1   :  { %v7704_v23 = vld [vmem:[%s14464_s26 + $0x1f8] sm:$0xff] }
 0x7b2   :  { %4797 = vmatpush.msrb.mxu1 %v7660_v51  ;;  %4720 = vmatpush.msrb.mxu0 %v7661_v46  ;;  %v7705_v51 = vld [vmem:[%s14464_s26 + $0x218] sm:$0xff]  ;;  %v7706_v46 = vld [vmem:[%s14465_s27 + $0x230] sm:$0xff] }
 0x7b4   :  { %4798 = vmatpush.msrb.mxu1 %v7662_v10  ;;  %4721 = vmatpush.msrb.mxu0 %v7663_v44  ;;  %v7707_v44 = vld [vmem:[%s14464_s26 + $0xa8] sm:$0xff] }
 0x7b6   :  { %4799 = vmatpush.msrb.mxu1 %v7664_v24  ;;  %4722 = vmatpush.msrb.mxu0 %v7665_v25  ;;  %v7708_v24 = vld [vmem:[%s14464_s26 + $0x1e8] sm:$0xff] }
 0x7b8   :  { %4800 = vmatpush.msrb.mxu1 %v7666_v8  ;;  %4723 = vmatpush.msrb.mxu0 %v7667_v52  ;;  %v7709_v52 = vld [vmem:[%s14464_s26 + $0x208] sm:$0xff] }
 0x7ba   :  { %4801 = vmatpush.msrb.mxu1 %v7668_v37  ;;  %4724 = vmatpush.msrb.mxu0 %v7669_v59  ;;  %v7710_v37 = vld [vmem:[%s14465_s27 + $0x220] sm:$0xff] }
 0x7bc   :  { %4802 = vmatpush.msrb.mxu1 %v7670_v35  ;;  %4725 = vmatpush.msrb.mxu0 %v7671_v62  ;;  %v7711_v62 = vld [vmem:[%s14464_s26 + $0x98] sm:$0xff] }
 0x7be   :  { %4803 = vmatpush.msrb.mxu1 %v7672_v43  ;;  %4726 = vmatpush.msrb.mxu0 %v7673_v12  ;;  %v7712_v43 = vld [vmem:[%s14464_s26 + $0x1d8] sm:$0xff]  ;;  %v7713_v12 = vld [vmem:[%s14465_s27 + $0x210] sm:$0xff] }
 0x7c0   :  { %4804 = vmatpush.msrb.mxu1 %v7674_v40  ;;  %4727 = vmatpush.msrb.mxu0 %v7675_v61  ;;  %v7714_v40 = vld [vmem:[%s14464_s26 + $0x88] sm:$0xff] }
 0x7c1   :  { %v7715_v61 = vld [vmem:[%s14464_s26 + $0x1c8] sm:$0xff] }
 0x7c2   :  { %4805 = vmatpush.msrb.mxu1 %v7676_v53  ;;  %4728 = vmatpush.msrb.mxu0 %v7677_v9  ;;  %v7716_v53 = vld [vmem:[%s14465_s27 + $0x200] sm:$0xff] }
 0x7c4   :  { %4806 = vmatpush.msrb.mxu1 %v7678_v27  ;;  %4729 = vmatpush.msrb.mxu0 %v7679_v0  ;;  %v7717_v27 = vld [vmem:[%s14464_s26 + $0x78] sm:$0xff] }
 0x7c5   :  { %v7718_v0 = vld [vmem:[%s14464_s26 + $0x1b8] sm:$0xff] }
 0x7c6   :  { %4807 = vmatpush.msrb.mxu1 %v7680_v42  ;;  %4730 = vmatpush.msrb.mxu0 %v7681_v58  ;;  %v7719_v58 = vld [vmem:[%s14465_s27 + $0x1f0] sm:$0xff] }
 0x7c8   :  { %4808 = vmatpush.msrb.mxu1 %v7682_v19  ;;  %4731 = vmatpush.msrb.mxu0 %v7683_v41  ;;  %v7720_v41 = vld [vmem:[%s14464_s26 + $0x68] sm:$0xff] }
 0x7ca   :  { %4809 = vmatpush.msrb.mxu1 %v7684_v38  ;;  %4732 = vmatpush.msrb.mxu0 %v7685_v56  ;;  %v7721_v38 = vld [vmem:[%s14464_s26 + $0x1a8] sm:$0xff]  ;;  %v7722_v56 = vld [vmem:[%s14465_s27 + $0x1e0] sm:$0xff] }
 0x7cc   :  { %4810 = vmatpush.msrb.mxu1 %v7686_v31  ;;  %4733 = vmatpush.msrb.mxu0 %v7687_v7  ;;  %v7723_v31 = vld [vmem:[%s14464_s26 + $0x58] sm:$0xff] }
 0x7cd   :  { %v7724_v7 = vld [vmem:[%s14464_s26 + $0x198] sm:$0xff] }
 0x7ce   :  { %4811 = vmatpush.msrb.mxu1 %v7688_v2  ;;  %v7725_v2 = vld [vmem:[%s14465_s27 + $0x1d0] sm:$0xff] }
 0x7e7   :  { %v4483_v5 = vpop.f32.mrf.mxu1 }
 0x7ea   :  { %v4457_v21 = vpop.f32.mrf.mxu2 }
 0x7ed   :  { %v4561_v30 = vpop.f32.mrf.mxu3 }
 0x7ee   :  { %v12541_v48 = vmax.f32 %v4483_v5, %v4561_v30  ;;  %v7726_v5 = vld [vmem:[%s14465_s27 + $0x278] sm:$0xff]  ;;  %v7728_v30 = vld [vmem:[%s14464_s26 + $0x188] sm:$0xff] }
 0x7ef   :  { %v4486_v22 = vpop.f32.mrf.mxu1 }
 0x7f0   :  { %4656 = vmatmul.f32.vlgmr.msrb.gmra.mxu2 %v12541_v48 }
 0x7f1   :  { %4832 = vmatpush.msrb.mxu2 %v7689_v45  ;;  %v7730_v45 = vld [vmem:[%s14465_s27 + $0x268] sm:$0xff] }
 0x7f3   :  { %4833 = vmatpush.msrb.mxu2 %v7690_v39  ;;  %v4460_v49 = vpop.f32.mrf.mxu2  ;;  %v7731_v39 = vld [vmem:[%s14464_s26 + $0x38] sm:$0xff] }
 0x7f5   :  { %v4564_v55 = vpop.f32.mrf.mxu3  ;;  %4834 = vmatpush.msrb.mxu2 %v7691_v11  ;;  %v7734_v11 = vld [vmem:[%s14465_s27 + $0x258] sm:$0xff] }
 0x7f6   :  { %v12553_v4 = vmax.f32 %v4486_v22, %v4564_v55  ;;  %v7729_v22 = vld [vmem:[%s14465_s27 + $0x1c0] sm:$0xff]  ;;  %v7733_v55 = vld [vmem:[%s14465_s27 + $0x1b0] sm:$0xff] }
 0x7f7   :  { %4835 = vmatpush.msrb.mxu2 %v7692_v17  ;;  %v4489_v50 = vpop.f32.mrf.mxu1  ;;  %v7735_v17 = vld [vmem:[%s14464_s26 + $0x28] sm:$0xff] }
 0x7f8   :  { %4659 = vmatmul.f32.gmra.mxu2 %v12553_v4 }
 0x7f9   :  { %4836 = vmatpush.msrb.mxu2 %v7693_v3  ;;  %v7736_v3 = vld [vmem:[%s14464_s26 + $0x168] sm:$0xff] }
 0x7fb   :  { %4837 = vmatpush.msrb.mxu2 %v7694_v14  ;;  %v4463_v63 = vpop.f32.mrf.mxu2  ;;  %v7738_v14 = vld [vmem:[%s14465_s27 + $0x248] sm:$0xff] }
 0x7fd   :  { %v4567_v1 = vpop.f32.mrf.mxu3 }
 0x7fe   :  { %v12565_v13 = vmax.f32 %v4489_v50, %v4567_v1  ;;  %v7737_v50 = vld [vmem:[%s14465_s27 + $0x1a0] sm:$0xff]  ;;  %v7740_v1 = vld [vmem:[%s14464_s26 + $0x158] sm:$0xff] }
 0x800   :  { %4662 = vmatmul.f32.gmra.mxu2 %v12565_v13 }
 0x803   :  { %v4535_v15 = vpop.f32.mrf.mxu2 }
 0x804   :  { %v12568_v29 = vmax.f32 %v4457_v21, %v4535_v15  ;;  %v7727_v21 = vld [vmem:[%s14464_s26 + $0x48] sm:$0xff]  ;;  %v7741_v15 = vld [vmem:[%s14465_s27 + $0x190] sm:$0xff] }
 0x806   :  { %4630 = vmatmul.f32.vlgmr.msra.gmra.mxu0 %v12568_v29  ;;  %4708 = vmatmul.f32.vlgmr.msra.gmra.mxu1 %v12568_v29 }
 0x807   :  { %4848 = vmatpush.msra.mxu0 %v7695_v60  ;;  %4910 = vmatpush.msra.mxu1 %v7696_v26  ;;  %v7742_v60 = vld [vmem:[%s14464_s26 + $0x8] sm:$0xff] }
 0x808   :  { %v7743_v26 = vld [vmem:[%s14464_s26 + $0x148] sm:$0xff] }
 0x809   :  { %4849 = vmatpush.msra.mxu0 %v7697_v57  ;;  %4911 = vmatpush.msra.mxu1 %v7698_v34  ;;  %v7744_v57 = vld [vmem:[%s14465_s27 + $0x180] sm:$0xff]  ;;  %v7745_v34 = vld [vmem:[%s14465_s27 + $0x270] sm:$0xff] }
 0x80a   :  { %v4509_v47 = vpop.f32.mrf.mxu0 }
 0x80b   :  { %v4538_v28 = vpop.f32.mrf.mxu2  ;;  %v4587_v54 = vpop.f32.mrf.mxu1  ;;  %4850 = vmatpush.msra.mxu0 %v7699_v18  ;;  %4912 = vmatpush.msra.mxu1 %v7700_v6  ;;  %v7749_v18 = vld [vmem:[%s14464_s26 + $0x128] sm:$0xff]  ;;  %v7750_v6 = vld [vmem:[%s14465_s27 + $0x160] sm:$0xff] }
 0x80c   :  { %v12590_v20 = vmax.f32 %v4460_v49, %v4538_v28  ;;  %v12592_v36 = vmax.f32 %v4509_v47, %v4587_v54  ;;  %v7732_v49 = vld [vmem:[%s14464_s26 + $0x178] sm:$0xff]  ;;  %v7747_v28 = vld [vmem:[%s14465_s27 + $0x170] sm:$0xff]  ;;  %v7748_v54 = vld [vmem:[%s14465_s27 + $0x260] sm:$0xff] }
 0x80d   :  { %4851 = vmatpush.msra.mxu0 %v7701_v32  ;;  %4913 = vmatpush.msra.mxu1 %v7702_v33  ;;  %v7746_v47 = vld [vmem:[%s14464_s26 + $0x138] sm:$0xff]  ;;  %v7751_v32 = vld [vmem:[%s14465_s27 + $0x250] sm:$0xff] }
 0x80e   :  { %4633 = vmatmul.f32.gmra.mxu0 %v12590_v20  ;;  %7230 = vmatmul.msk.f32.vlgmr.msrb.gmra.mxu3 %vm14631_vm5, %v12592_v36  ;;  %v7752_v33 = vld [vmem:[%s14464_s26 + $0x118] sm:$0xff]  ;;  %vm14647_vm5 = vcmask 261120  }
 0x80f   :  { %4711 = vmatmul.f32.gmra.mxu1 %v12590_v20  ;;  %7233 = vmatmul.msk.f32.vlgmr.msra.gmra.mxu2 %vm14632_vm15, %v12592_v36  ;;  %vm14648_vm15 = vmmov %vm14643_vm0 }
 0x810   :  { %4852 = vmatpush.msra.mxu0 %v7703_v16  ;;  %4874 = vmatpush.msrb.mxu3 %v7704_v23  ;;  %v7753_v16 = vld [vmem:[%s14465_s27 + $0x150] sm:$0xff]  ;;  %v7754_v23 = vld [vmem:[%s14465_s27 + $0x240] sm:$0xff] }
 0x811   :  { %4914 = vmatpush.msra.mxu1 %v7705_v51  ;;  %4954 = vmatpush.msra.mxu2 %v7706_v46  ;;  %v7755_v51 = vld [vmem:[%s14464_s26 + $0x108] sm:$0xff]  ;;  %v7756_v46 = vld [vmem:[%s14465_s27 + $0x140] sm:$0xff] }
 0x812   :  { %v4512_v10 = vpop.f32.mrf.mxu0  ;;  %4853 = vmatpush.msra.mxu0 %v7707_v44  ;;  %4875 = vmatpush.msrb.mxu3 %v7708_v24  ;;  %v7760_v44 = vld [vmem:[%s14465_s27 + $0x130] sm:$0xff]  ;;  %v7761_v24 = vld [vmem:[%s14465_s27 + $0x228] sm:$0xff] }
 0x813   :  { %v4541_v25 = vpop.f32.mrf.mxu2  ;;  %4915 = vmatpush.msra.mxu1 %v7709_v52  ;;  %4955 = vmatpush.msra.mxu2 %v7710_v37  ;;  %v7764_v52 = vld [vmem:[%s14465_s27 + $0x120] sm:$0xff]  ;;  %v7765_v37 = vld [vmem:[%s14465_s27 + $0x218] sm:$0xff] }
 0x814   :  { %v4590_v8 = vpop.f32.mrf.mxu1  ;;  %v12630_v59 = vmax.f32 %v4463_v63, %v4541_v25  ;;  %4854 = vmatpush.msra.mxu0 %v7711_v62  ;;  %4876 = vmatpush.msrb.mxu3 %v7712_v43  ;;  %v7739_v63 = vld [vmem:[%s14464_s26 + $0x18] sm:$0xff]  ;;  %v7762_v25 = vld [vmem:[%s14465_s27 + $0xe0] sm:$0xff]  ;;  %v7766_v62 = vld [vmem:[%s14465_s27 + $0xd0] sm:$0xff]  ;;  %s14725_s26 = sld [smem:[#allocation31_spill]] }
 0x815   :  { %v12632_v35 = vmax.f32 %v4512_v10, %v4590_v8  ;;  %4956 = vmatpush.msra.mxu2 %v7713_v12  ;;  %v7758_v10 = vld [vmem:[%s14465_s27 + $0xf0] sm:$0xff]  ;;  %v7763_v8 = vld [vmem:[%s14465_s27 + $0xe8] sm:$0xff]  ;;  %v7768_v12 = vld [vmem:[%s14465_s27 + $0xc0] sm:$0xff] }
 0x816   :  { %4636 = vmatmul.f32.gmra.mxu0 %v12630_v59  ;;  %4877 = vmatpush.msrb.mxu3 %v7715_v61  ;;  %v7767_v43 = vld [vmem:[%s14465_s27 + $0x208] sm:$0xff] }
 0x817   :  { %7231 = vmatmul.msk.f32.gmra.mxu3 %vm14633_vm11, %v12632_v35  ;;  %4714 = vmatmul.f32.gmra.mxu1 %v12630_v59  ;;  %v7773_v61 = vld [vmem:[%s14465_s27 + $0xc8] sm:$0xff]  ;;  %vm14649_vm11 = vmmov %vm14647_vm5 }
 0x818   :  { %7234 = vmatmul.msk.f32.gmra.mxu2 %vm14634_vm14, %v12632_v35  ;;  %4855 = vmatpush.msra.mxu0 %v7714_v40  ;;  %v7769_v40 = vld [vmem:[%s14465_s27 + $0xd8] sm:$0xff]  ;;  %vm14650_vm14 = vmmov %vm14647_vm5 }
 0x819   :  { %4957 = vmatpush.msra.mxu2 %v7716_v53  ;;  %4878 = vmatpush.msrb.mxu3 %v7718_v0  ;;  %v7774_v53 = vld [vmem:[%s14465_s27 + $0x1e8] sm:$0xff]  ;;  %v7777_v0 = vld [vmem:[%s14465_s27 + $0xb8] sm:$0xff] }
 0x81a   :  { %v4515_v9 = vpop.f32.mrf.mxu0  ;;  %4856 = vmatpush.msra.mxu0 %v7717_v27  ;;  %v7776_v27 = vld [vmem:[%s14465_s27 + $0xa0] sm:$0xff] }
 0x81b   :  { %4958 = vmatpush.msra.mxu2 %v7719_v58  ;;  %4879 = vmatpush.msrb.mxu3 %v7721_v38  ;;  %v7779_v58 = vld [vmem:[%s14465_s27 + $0x1c8] sm:$0xff] }
 0x81c   :  { %v4593_v42 = vpop.f32.mrf.mxu1  ;;  %4857 = vmatpush.msra.mxu0 %v7720_v41  ;;  %v7780_v41 = vld [vmem:[%s14465_s27 + $0x90] sm:$0xff]  ;;  %v7781_v38 = vld [vmem:[%s14465_s27 + $0xa8] sm:$0xff] }
 0x81d   :  { %v12667_v19 = vmax.f32 %v4515_v9, %v4593_v42  ;;  %4959 = vmatpush.msra.mxu2 %v7722_v56  ;;  %4880 = vmatpush.msrb.mxu3 %v7724_v7  ;;  %v7775_v9 = vld [vmem:[%s14465_s27 + $0x100] sm:$0xff]  ;;  %v7778_v42 = vld [vmem:[%s14465_s27 + $0x1d8] sm:$0xff]  ;;  %v7785_v56 = vld [vmem:[%s14465_s27 + $0x1a8] sm:$0xff] }
 0x81e   :  { %4734 = vmatmul.f32.vlgmr.msrb.gmra.mxu0 %v12541_v48  ;;  %v7787_v7 = vld [vmem:[%s14465_s27 + $0x88] sm:$0xff] }
 0x81f   :  { %7232 = vmatmul.msk.f32.gmra.mxu3 %vm14635_vm3, %v12667_v19  ;;  %4812 = vmatmul.f32.vlgmr.msrb.gmra.mxu1 %v12541_v48  ;;  %vm14651_vm3 = vmmov %vm14647_vm5 }
 0x820   :  { %7235 = vmatmul.msk.f32.gmra.mxu2 %vm14636_vm4, %v12667_v19  ;;  %4858 = vmatpush.msra.mxu0 %v7723_v31  ;;  %v7786_v31 = vld [vmem:[%s14465_s27 + $0x70] sm:$0xff]  ;;  %vm14652_vm4 = vmmov %vm14643_vm0 }
 0x821   :  { %4960 = vmatpush.msra.mxu2 %v7725_v2  ;;  %5035 = vmatpush.msrb.mxu1 %v7726_v5  ;;  %v7788_v2 = vld [vmem:[%s14465_s27 + $0x198] sm:$0xff]  ;;  %v7789_v5 = vld [vmem:[%s14465_s27 + $0x60] sm:$0xff] }
 0x822   :  { %4859 = vmatpush.msra.mxu0 %v7727_v21  ;;  %4881 = vmatpush.msrb.mxu3 %v7728_v30  ;;  %v7790_v21 = vld [vmem:[%s14465_s27 + $0x188] sm:$0xff]  ;;  %v7791_v30 = vld [vmem:[%s14465_s27 + $0x78] sm:$0xff] }
 0x823   :  { %4961 = vmatpush.msra.mxu2 %v7729_v22  ;;  %5036 = vmatpush.msrb.mxu1 %v7730_v45  ;;  %v7792_v22 = vld [vmem:[%s14465_s27 + $0x50] sm:$0xff]  ;;  %v7794_v45 = vld [vmem:[%s14465_s27 + $0x68] sm:$0xff] }
 0x824   :  { %4860 = vmatpush.msra.mxu0 %v7731_v39  ;;  %4882 = vmatpush.msrb.mxu3 %v7732_v49  ;;  %v7795_v39 = vld [vmem:[%s14465_s27 + $0x40] sm:$0xff]  ;;  %v7796_v49 = vld [vmem:[%s14465_s27 + $0x168] sm:$0xff] }
 0x825   :  { %4962 = vmatpush.msra.mxu2 %v7733_v55  ;;  %5037 = vmatpush.msrb.mxu1 %v7734_v11  ;;  %v7797_v55 = vld [vmem:[%s14465_s27 + $0x58] sm:$0xff]  ;;  %v7798_v11 = vld [vmem:[%s14465_s27 + $0x30] sm:$0xff] }
 0x826   :  { %4737 = vmatmul.f32.gmra.mxu0 %v12553_v4  ;;  %4883 = vmatpush.msrb.mxu3 %v7736_v3  ;;  %v7800_v3 = vld [vmem:[%s14465_s27 + $0x48] sm:$0xff] }
 0x827   :  { %4786 = vmatmul.f32.vlgmr.msra.gmra.mxu3 %v12568_v29  ;;  %4815 = vmatmul.f32.gmra.mxu1 %v12553_v4 }
 0x828   :  { %7236 = vmatmul.msk.f32.vlgmr.msrb.gmra.mxu2 %vm14637_vm10, %v12592_v36  ;;  %4861 = vmatpush.msra.mxu0 %v7735_v17  ;;  %v7799_v17 = vld [vmem:[%s14465_s27 + $0x158] sm:$0xff]  ;;  %vm14653_vm10 = vmmov %vm14651_vm3 }
 0x829   :  { %4963 = vmatpush.msra.mxu2 %v7737_v50  ;;  %5038 = vmatpush.msrb.mxu1 %v7738_v14  ;;  %v7801_v50 = vld [vmem:[%s14465_s27 + $0x20] sm:$0xff]  ;;  %v7802_v14 = vld [vmem:[%s14465_s27 + $0x148] sm:$0xff] }
 0x82a   :  { %4862 = vmatpush.msra.mxu0 %v7739_v63  ;;  %4884 = vmatpush.msrb.mxu3 %v7740_v1  ;;  %v7803_v63 = vld [vmem:[%s14465_s27 + $0x38] sm:$0xff] }
 0x82b   :  { %4964 = vmatpush.msra.mxu2 %v7741_v15  ;;  %v7804_v1 = vld [vmem:[%s14465_s27 + $0x138] sm:$0xff]  ;;  %v7805_v15 = vld [vmem:[%s14465_s27 + $0x10] sm:$0xff] }
 0x82c   :  { %4863 = vmatpush.msra.mxu0 %v7742_v60  ;;  %4885 = vmatpush.msrb.mxu3 %v7743_v26  ;;  %v7806_v60 = vld [vmem:[%s14465_s27 + $0x28] sm:$0xff] }
 0x82d   :  { %4965 = vmatpush.msra.mxu2 %v7744_v57  ;;  %v7807_v26 = vld [vmem:[%s14465_s27 + $0x128] sm:$0xff]  ;;  %v7808_v57 = vld [vmem:[%s14465_s27] sm:$0xff] }
 0x82e   :  { %4989 = vmatpush.msrb.mxu0 %v7745_v34  ;;  %4886 = vmatpush.msrb.mxu3 %v7746_v47  ;;  %v7809_v34 = vld [vmem:[%s14465_s27 + $0x18] sm:$0xff] }
 0x82f   :  { %4740 = vmatmul.f32.gmra.mxu0 %v12565_v13  ;;  %4789 = vmatmul.f32.gmra.mxu3 %v12590_v20  ;;  %v7810_v47 = vld [vmem:[%s14465_s27 + $0x118] sm:$0xff] }
 0x830   :  { %4818 = vmatmul.f32.gmra.mxu1 %v12565_v13  ;;  %7237 = vmatmul.msk.f32.gmra.mxu2 %vm14638_vm6, %v12632_v35  ;;  %vm14654_vm6 = vmmov %vm14651_vm3 }
 0x831   :  { %4966 = vmatpush.msra.mxu2 %v7747_v28  ;;  %4990 = vmatpush.msrb.mxu0 %v7748_v54  ;;  %v7811_v28 = vld [vmem:[%s14465_s27 + $0x8] sm:$0xff] }
 0x832   :  { %4887 = vmatpush.msrb.mxu3 %v7749_v18  ;;  %v7812_v54 = vld [vmem:[%s14465_s27 + $0x108] sm:$0xff] }
 0x833   :  { %4967 = vmatpush.msra.mxu2 %v7750_v6  ;;  %4991 = vmatpush.msrb.mxu0 %v7751_v32 }
 0x834   :  { %4888 = vmatpush.msrb.mxu3 %v7752_v33 }
 0x835   :  { %4968 = vmatpush.msra.mxu2 %v7753_v16  ;;  %4992 = vmatpush.msrb.mxu0 %v7754_v23 }
 0x836   :  { %4889 = vmatpush.msrb.mxu3 %v7755_v51 }
 0x837   :  { %4792 = vmatmul.f32.gmra.mxu3 %v12630_v59  ;;  %4864 = vmatmul.f32.vlgmr.msra.gmra.mxu0 %v12568_v29  ;;  %v7757_v29 = vld [vmem:[%s14465_s27 + $0x238] sm:$0xff] }
 0x838   :  { %7238 = vmatmul.msk.f32.gmra.mxu2 %vm14639_vm1, %v12667_v19  ;;  %7239 = vmatmul.msk.f32.vlgmr.msra.gmra.mxu1 %vm14640_vm9, %v12592_v36  ;;  %v7759_v36 = vld [vmem:[%s14465_s27 + $0xf8] sm:$0xff]  ;;  %vm14655_vm1 = vcmask 1045504   ;;  %vm14656_vm9 = vmmov %vm14651_vm3 }
 0x839   :  { %4969 = vmatpush.msra.mxu2 %v7756_v46  ;;  %5000 = vmatpush.msra.mxu3 %v7757_v29 }
 0x83a   :  { %5096 = vmatpush.msra.mxu1 %v7759_v36  ;;  %5085 = vmatpush.msra.mxu0 %v7760_v44 }
 0x83b   :  { %5050 = vmatpush.msrb.mxu2 %v7758_v10  ;;  %5001 = vmatpush.msra.mxu3 %v7761_v24 }
 0x83c   :  { %5097 = vmatpush.msra.mxu1 %v7763_v8  ;;  %5086 = vmatpush.msra.mxu0 %v7764_v52 }
 0x83d   :  { %5051 = vmatpush.msrb.mxu2 %v7762_v25  ;;  %5002 = vmatpush.msra.mxu3 %v7765_v37 }
 0x83e   :  { %5098 = vmatpush.msra.mxu1 %v7769_v40 }
 0x83f   :  { %5052 = vmatpush.msrb.mxu2 %v7766_v62  ;;  %4867 = vmatmul.f32.gmra.mxu0 %v12590_v20  ;;  %v7771_v20 = vld [vmem:[%s14465_s27 + $0x110] sm:$0xff] }
 0x840   :  { %4890 = vmatmul.f32.vlgmr.msrb.gmra.mxu3 %v12541_v48  ;;  %7240 = vmatmul.msk.f32.gmra.mxu1 %vm14641_vm2, %v12632_v35  ;;  %v7770_v48 = vld [vmem:[%s14465_s27 + $0x1f8] sm:$0xff]  ;;  %v7772_v35 = vld [vmem:[%s14465_s27 + $0xb0] sm:$0xff]  ;;  %vm14657_vm2 = vmmov %vm14655_vm1 }
 0x841   :  { %5003 = vmatpush.msra.mxu3 %v7767_v43  ;;  %5053 = vmatpush.msrb.mxu2 %v7768_v12 }
 0x842   :  { %5087 = vmatpush.msra.mxu0 %v7771_v20  ;;  %5099 = vmatpush.msra.mxu1 %v7773_v61 }
 0x843   :  { %5004 = vmatpush.msra.mxu3 %v7770_v48  ;;  %5054 = vmatpush.msrb.mxu2 %v7772_v35 }
 0x844   :  { %5088 = vmatpush.msra.mxu0 %v7775_v9  ;;  %5100 = vmatpush.msra.mxu1 %v7777_v0 }
 0x845   :  { %5005 = vmatpush.msra.mxu3 %v7774_v53  ;;  %5055 = vmatpush.msrb.mxu2 %v7776_v27 }
 0x846   :  { %5101 = vmatpush.msra.mxu1 %v7781_v38 }
 0x847   :  { %5006 = vmatpush.msra.mxu3 %v7778_v42  ;;  %4870 = vmatmul.f32.gmra.mxu0 %v12630_v59  ;;  %v7783_v59 = vld [vmem:[%s14465_s27 + $0x80] sm:$0xff] }
 0x848   :  { %4893 = vmatmul.f32.gmra.mxu3 %v12553_v4  ;;  %7241 = vmatmul.msk.f32.gmra.mxu1 %vm14642_vm8, %v12667_v19  ;;  %v7782_v4 = vld [vmem:[%s14465_s27 + $0x1b8] sm:$0xff]  ;;  %vm14658_vm8 = vmmov %vm14651_vm3 }
 0x849   :  { %5007 = vmatpush.msra.mxu3 %v7779_v58  ;;  %5056 = vmatpush.msrb.mxu2 %v7780_v41  ;;  %v7784_v19 = vld [vmem:[%s14465_s27 + $0x98] sm:$0xff] }
 0x84a   :  { %5102 = vmatpush.msra.mxu1 %v7784_v19 }
 0x84b   :  { %5008 = vmatpush.msra.mxu3 %v7782_v4  ;;  %5057 = vmatpush.msrb.mxu2 %v7783_v59 }
 0x84c   :  { %5103 = vmatpush.msra.mxu1 %v7787_v7 }
 0x84d   :  { %5009 = vmatpush.msra.mxu3 %v7785_v56  ;;  %5058 = vmatpush.msrb.mxu2 %v7786_v31 }
 0x84e   :  { %5104 = vmatpush.msra.mxu1 %v7791_v30 }
 0x84f   :  { %5010 = vmatpush.msra.mxu3 %v7788_v2  ;;  %5059 = vmatpush.msrb.mxu2 %v7789_v5 }
 0x850   :  { %4896 = vmatmul.f32.gmra.mxu3 %v12565_v13  ;;  %v7793_v13 = vld [vmem:[%s14465_s27 + $0x178] sm:$0xff]  ;;  %5105 = vmatpush.msra.mxu1 %v7794_v45 }
 0x851   :  { %5011 = vmatpush.msra.mxu3 %v7790_v21  ;;  %5060 = vmatpush.msrb.mxu2 %v7792_v22 }
 0x852   :  { %5106 = vmatpush.msra.mxu1 %v7797_v55  ;;  %v7814_v55 = vld [vmem:[%s14465_s27 + $0x3b0] sm:$0xff] }
 0x853   :  { %5012 = vmatpush.msra.mxu3 %v7793_v13  ;;  %5061 = vmatpush.msrb.mxu2 %v7795_v39 }
 0x854   :  { %5107 = vmatpush.msra.mxu1 %v7800_v3  ;;  %v7815_v3 = vld [vmem:[%s14465_s27 + $0x368] sm:$0xff] }
 0x855   :  { %5013 = vmatpush.msra.mxu3 %v7796_v49  ;;  %5062 = vmatpush.msrb.mxu2 %v7798_v11  ;;  %v7813_v49 = vld [vmem:[%s14465_s27 + $0x378] sm:$0xff] }
 0x856   :  { %5108 = vmatpush.msra.mxu1 %v7803_v63  ;;  %v7817_v63 = vld [vmem:[%s14465_s27 + $0x358] sm:$0xff] }
 0x857   :  { %5014 = vmatpush.msra.mxu3 %v7799_v17  ;;  %5063 = vmatpush.msrb.mxu2 %v7801_v50  ;;  %v7816_v50 = vld [vmem:[%s14465_s27 + $0x3a0] sm:$0xff] }
 0x858   :  { %5109 = vmatpush.msra.mxu1 %v7806_v60 }
 0x859   :  { %5015 = vmatpush.msra.mxu3 %v7802_v14  ;;  %5064 = vmatpush.msrb.mxu2 %v7805_v15  ;;  %v7818_v15 = vld [vmem:[%s14465_s27 + $0x390] sm:$0xff] }
 0x85a   :  { %5110 = vmatpush.msra.mxu1 %v7809_v34  ;;  %v7819_v34 = vld [vmem:[%s14465_s27 + $0x348] sm:$0xff] }
 0x85b   :  { %5131 = vmatpush.msrb.mxu3 %v7804_v1  ;;  %5065 = vmatpush.msrb.mxu2 %v7808_v57 }
 0x85c   :  { %5111 = vmatpush.msra.mxu1 %v7811_v28  ;;  %v7820_v28 = vld [vmem:[%s14465_s27 + $0x380] sm:$0xff] }
 0x85d   :  { %5132 = vmatpush.msrb.mxu3 %v7807_v26 }
 0x85f   :  { %5133 = vmatpush.msrb.mxu3 %v7810_v47 }
 0x861   :  { %5134 = vmatpush.msrb.mxu3 %v7812_v54 }
 0x873   :  { %v4657_v18 = vpop.f32.mrf.mxu2 }
 0x87b   :  { %v4660_v6 = vpop.f32.mrf.mxu2 }
 0x883   :  { %v4631_v32 = vpop.f32.mrf.mxu0  ;;  %v12979_v33 = vpop.f32.mrf.mxu1 }
 0x884   :  { %v4663_v16 = vpop.f32.mrf.mxu2  ;;  %v4658_v20 = vadd.f32 %v4657_v18, %v4631_v32 }
 0x88b   :  { %v4634_v23 = vpop.f32.mrf.mxu0 }
 0x88c   :  { %v12981_v51 = vpop.f32.mrf.mxu1  ;;  %v4661_v53 = vadd.f32 %v4660_v6, %v4634_v23  ;;  %v7821_v6 = vld [vmem:[%s14465_s27 + $0x338] sm:$0xff] }
 0x891   :  { %v4683_v46 = vpop.f32.mrf.mxu3 }
 0x892   :  { %v12983_v29 = vpop.f32.mrf.mxu2  ;;  %v4684_v9 = vadd.f32 %v4683_v46, %v4658_v20 }
 0x893   :  { %v4637_v10 = vpop.f32.mrf.mxu0 }
 0x894   :  { %v12985_v36 = vpop.f32.mrf.mxu1  ;;  %v4664_v5 = vadd.f32 %v4663_v16, %v4637_v10  ;;  %v7822_v16 = vld [vmem:[%s14465_s27 + $0x328] sm:$0xff]  ;;  %v7823_v10 = vld [vmem:[%s14465_s27 + $0x318] sm:$0xff] }
 0x89a   :  { %v4686_v44 = vpop.f32.mrf.mxu3 }
 0x89b   :  { %v12987_v24 = vpop.f32.mrf.mxu2  ;;  %v4735_v25 = vpop.f32.mrf.mxu0  ;;  %v4687_v58 = vadd.f32 %v4686_v44, %v4661_v53 }
 0x89c   :  { %v4813_v8 = vpop.f32.mrf.mxu1  ;;  %v4736_v54 = vadd.f32 %v4735_v25, %v12979_v33 }
 0x89e   :  { %v4762_v23 = vadd.f32 %v12983_v29, %v4736_v54 }
 0x8a2   :  { %v4689_v52 = vpop.f32.mrf.mxu3 }
 0x8a3   :  { %v12989_v37 = vpop.f32.mrf.mxu2  ;;  %v12991_v62 = vpop.f32.mrf.mxu0  ;;  %v4690_v45 = vadd.f32 %v4689_v52, %v4664_v5  ;;  %v7836_v5 = vld [vmem:[%s14465_s27 + $0x3b8] sm:$0xff] }
 0x8a4   :  { %v4816_v40 = vpop.f32.mrf.mxu1  ;;  %v4739_v33 = vadd.f32 %v12991_v62, %v12981_v51  ;;  %v7825_v62 = vld [vmem:[%s14465_s27 + $0x2f8] sm:$0xff] }
 0x8a6   :  { %v4765_v51 = vadd.f32 %v12987_v24, %v4739_v33  ;;  %v7828_v24 = vld [vmem:[%s14465_s27 + $0x4a0] sm:$0xff]  ;;  %v7855_v33 = vld [vmem:[%s14465_s27 + $0x4d8] sm:$0xff] }
 0x8aa   :  { %v4787_v43 = vpop.f32.mrf.mxu3 }
 0x8ab   :  { %v4839_v12 = vpop.f32.mrf.mxu2  ;;  %v4814_v48 = vadd.f32 %v4813_v8, %v4787_v43  ;;  %v7824_v43 = vld [vmem:[%s14465_s27 + $0x308] sm:$0xff] }
 0x8ac   :  { %v12993_v42 = vpop.f32.mrf.mxu0 }
 0x8ad   :  { %v4840_v35 = vadd.f32 %v4839_v12, %v4814_v48  ;;  %v4819_v4 = vpop.f32.mrf.mxu1  ;;  %v7826_v12 = vld [vmem:[%s14465_s27 + $0x4b0] sm:$0xff]  ;;  %v7827_v48 = vld [vmem:[%s14465_s27 + $0x2e8] sm:$0xff]  ;;  %v4742_v20 = vadd.f32 %v12993_v42, %v12985_v36  ;;  %v7832_v42 = vld [vmem:[%s14465_s27 + $0x480] sm:$0xff] }
 0x8ae   :  { %v7831_v36 = vld [vmem:[%s14465_s27 + $0x2c8] sm:$0xff] }
 0x8af   :  { %v12995_v41 = vmax.f32 %v4684_v9, %v4840_v35  ;;  %v7829_v35 = vld [vmem:[%s14465_s27 + $0x2d8] sm:$0xff] }
 0x8b1   :  { %v4938_v19 = vrot.slane %v12995_v41, 1  ;;  %v5366_v7 = vrot.slane %v12995_v41, 4 }
 0x8b2   :  { %v4790_v61 = vpop.f32.mrf.mxu3 }
 0x8b3   :  { %v4817_v27 = vadd.f32 %v4816_v40, %v4790_v61  ;;  %v4842_v0 = vpop.f32.mrf.mxu2  ;;  %v7830_v61 = vld [vmem:[%s14465_s27 + $0x490] sm:$0xff] }
 0x8b4   :  { %v4865_v11 = vpop.f32.mrf.mxu0 }
 0x8b5   :  { %v4843_v38 = vadd.f32 %v4842_v0, %v4817_v27  ;;  %v4917_v14 = vpop.f32.mrf.mxu1 }
 0x8b7   :  { %v12997_v59 = vmax.f32 %v4687_v58, %v4843_v38 }
 0x8b9   :  { %v4939_v56 = vrot.slane %v12997_v59, 1  ;;  %v5367_v2 = vrot.slane %v12997_v59, 4 }
 0x8ba   :  { %v4793_v31 = vpop.f32.mrf.mxu3 }
 0x8bb   :  { %v4820_v21 = vadd.f32 %v4819_v4, %v4793_v31  ;;  %v4940_v30 = vsel %vm14643_vm0, %v4938_v19, %v4939_v56  ;;  %v4845_v22 = vpop.f32.mrf.mxu2  ;;  %v13005_v13 = vsel %vm14644_vm12, %v5366_v7, %v5367_v2  ;;  %v4768_v19 = vadd.f32 %v12989_v37, %v4742_v20  ;;  %v7833_v31 = vld [vmem:[%s14465_s27 + $0x370] sm:$0xff]  ;;  %v7834_v7 = vld [vmem:[%s14465_s27 + $0x2b8] sm:$0xff]  ;;  %vm14659_vm0 = vmmov %vm14655_vm1 }
 0x8bc   :  { %4970 = vmatmul.f32.vlgmr.msra.gmra.mxu2 %v4940_v30  ;;  %5016 = vmatmul.f32.vlgmr.msra.gmra.mxu3 %v4940_v30  ;;  %v4868_v46 = vpop.f32.mrf.mxu0  ;;  %v7835_v37 = vld [vmem:[%s14465_s27 + $0x470] sm:$0xff]  ;;  %v7838_v30 = vld [vmem:[%s14465_s27 + $0x2a8] sm:$0xff]  ;;  %vm14660_vm12 = vmmov %vm14651_vm3 }
 0x8bd   :  { %v4846_v39 = vadd.f32 %v4845_v22, %v4820_v21  ;;  %5204 = vmatpush.msra.mxu3 %v7813_v49  ;;  %5193 = vmatpush.msra.mxu2 %v7814_v55  ;;  %v4920_v44 = vpop.f32.mrf.mxu1  ;;  %v7837_v21 = vld [vmem:[%s14465_s27 + $0x360] sm:$0xff]  ;;  %v7841_v49 = vld [vmem:[%s14465_s27 + $0x350] sm:$0xff]  ;;  %v7842_v55 = vld [vmem:[%s14465_s27 + $0x298] sm:$0xff] }
 0x8be   :  { %v7839_v22 = vld [vmem:[%s14465_s27 + $0x460] sm:$0xff]  ;;  %v7863_v20 = vld [vmem:[%s14465_s27 + $0x3f0] sm:$0xff] }
 0x8bf   :  { %v13013_v17 = vmax.f32 %v4690_v45, %v4846_v39  ;;  %5205 = vmatpush.msra.mxu3 %v7815_v3  ;;  %5194 = vmatpush.msra.mxu2 %v7816_v50  ;;  %v7840_v39 = vld [vmem:[%s14465_s27 + $0x3a8] sm:$0xff]  ;;  %v7843_v3 = vld [vmem:[%s14465_s27 + $0x450] sm:$0xff] }
 0x8c1   :  { %5206 = vmatpush.msra.mxu3 %v7817_v63  ;;  %v4944_v1 = vrot.slane %v13013_v17, 1  ;;  %5195 = vmatpush.msra.mxu2 %v7818_v15  ;;  %v5372_v26 = vrot.slane %v13013_v17, 4  ;;  %v7844_v63 = vld [vmem:[%s14465_s27 + $0x398] sm:$0xff]  ;;  %v7846_v15 = vld [vmem:[%s14465_s27 + $0x288] sm:$0xff] }
 0x8c3   :  { %v4891_v60 = vpop.f32.mrf.mxu3  ;;  %5207 = vmatpush.msra.mxu3 %v7819_v34  ;;  %v4945_v47 = vsel %vm14645_vm13, %v4939_v56, %v4944_v1  ;;  %5196 = vmatpush.msra.mxu2 %v7820_v28  ;;  %v13038_v18 = vsel %vm14646_vm7, %v5367_v2, %v5372_v26  ;;  %v7845_v1 = vld [vmem:[%s14465_s27 + $0x340] sm:$0xff]  ;;  %v5142_v34 = vrot.slane %v12995_v41, 2  ;;  %v7849_v28 = vld [vmem:[%s14465_s27 + $0x330] sm:$0xff]  ;;  %vm14661_vm13 = vmmov %vm14659_vm0 }
 0x8c4   :  { %v4892_v57 = vadd.f32 %v4891_v60, %v4865_v11  ;;  %4973 = vmatmul.f32.gmra.mxu2 %v4945_v47  ;;  %5019 = vmatmul.f32.gmra.mxu3 %v4945_v47  ;;  %v4871_v27 = vpop.f32.mrf.mxu0  ;;  %v7847_v26 = vld [vmem:[%s14465_s27 + $0x440] sm:$0xff]  ;;  %vm14662_vm7 = vmmov %vm14651_vm3 }
 0x8c5   :  { %5208 = vmatpush.msra.mxu3 %v7821_v6  ;;  %v4923_v4 = vpop.f32.mrf.mxu1  ;;  %v7850_v6 = vld [vmem:[%s14465_s27 + $0x430] sm:$0xff] }
 0x8c6   :  { %v4918_v32 = vadd.f32 %v4917_v14, %v4892_v57  ;;  %v5143_v14 = vrot.slane %v12997_v59, 2  ;;  %v7848_v57 = vld [vmem:[%s14465_s27 + $0x4f8] sm:$0xff] }
 0x8c7   :  { %5209 = vmatpush.msra.mxu3 %v7822_v16  ;;  %v7852_v16 = vld [vmem:[%s14465_s27 + $0x320] sm:$0xff] }
 0x8c8   :  { %v13052_v25 = vmax.f32 %v4762_v23, %v4918_v32  ;;  %v13165_v54 = vsel %vm14657_vm2, %v5142_v34, %v5143_v14  ;;  %v7851_v32 = vld [vmem:[%s14465_s27 + $0x4e8] sm:$0xff]  ;;  %v7853_v23 = vld [vmem:[%s14465_s27 + $0x420] sm:$0xff]  ;;  %vm14672_vm2 = vmmov %vm14651_vm3 }
 0x8c9   :  { %5210 = vmatpush.msra.mxu3 %v7823_v10  ;;  %v7856_v10 = vld [vmem:[%s14465_s27 + $0x310] sm:$0xff] }
 0x8ca   :  { %v4941_v53 = vrot.slane %v13052_v25, 1  ;;  %v5145_v60 = vrot.slane %v13052_v25, 2 }
 0x8cb   :  { %v4894_v8 = vpop.f32.mrf.mxu3  ;;  %5211 = vmatpush.msra.mxu3 %v7824_v43  ;;  %v7858_v43 = vld [vmem:[%s14465_s27 + $0x4c8] sm:$0xff] }
 0x8cc   :  { %v4895_v52 = vadd.f32 %v4894_v8, %v4868_v46  ;;  %5066 = vmatmul.f32.vlgmr.msrb.gmra.mxu2 %v12995_v41  ;;  %7248 = vmatmul.msk.f32.vlgmr.msrb.gmra.mxu3 %vm14647_vm5, %v13052_v25  ;;  %v7854_v46 = vld [vmem:[%s14465_s27 + $0x388] sm:$0xff]  ;;  %v7857_v8 = vld [vmem:[%s14465_s27 + $0x410] sm:$0xff]  ;;  %vm14663_vm5 = vcmask 1044480  }
 0x8cd   :  { %5212 = vmatpush.msra.mxu3 %v7825_v62  ;;  %5270 = vmatpush.msrb.mxu2 %v7826_v12  ;;  %v7861_v62 = vld [vmem:[%s14465_s27 + $0x400] sm:$0xff] }
 0x8ce   :  { %v4921_v29 = vadd.f32 %v4920_v44, %v4895_v52  ;;  %v5148_v52 = vrot.slane %v13013_v17, 2 }
 0x8cf   :  { %5213 = vmatpush.msra.mxu3 %v7827_v48  ;;  %5271 = vmatpush.msrb.mxu2 %v7828_v24  ;;  %v7862_v48 = vld [vmem:[%s14465_s27 + $0x2f0] sm:$0xff] }
 0x8d0   :  { %v13067_v40 = vmax.f32 %v4765_v51, %v4921_v29  ;;  %v7859_v51 = vld [vmem:[%s14465_s27 + $0x300] sm:$0xff]  ;;  %v7860_v29 = vld [vmem:[%s14465_s27 + $0x5f8] sm:$0xff]  ;;  %v13218_v24 = vsel %vm14661_vm13, %v5143_v14, %v5148_v52 }
 0x8d1   :  { %5214 = vmatpush.msra.mxu3 %v7829_v35  ;;  %5272 = vmatpush.msrb.mxu2 %v7830_v61  ;;  %v7864_v35 = vld [vmem:[%s14465_s27 + $0x5e8] sm:$0xff]  ;;  %v7865_v61 = vld [vmem:[%s14465_s27 + $0x4b8] sm:$0xff] }
 0x8d2   :  { %v4942_v9 = vrot.slane %v13067_v40, 1  ;;  %v5146_v11 = vrot.slane %v13067_v40, 2  ;;  %v7886_v14 = vld [vmem:[%s14465_s27 + $0x458] sm:$0xff] }
 0x8d3   :  { %v4897_v0 = vpop.f32.mrf.mxu3  ;;  %5215 = vmatpush.msra.mxu3 %v7831_v36  ;;  %5273 = vmatpush.msrb.mxu2 %v7832_v42  ;;  %v7871_v36 = vld [vmem:[%s14465_s27 + $0x3d0] sm:$0xff]  ;;  %v5255_v42 = vrot.slane %v12997_v59, 3  ;;  %v7903_v52 = vld [vmem:[%s14465_s27 + $0x418] sm:$0xff] }
 0x8d4   :  { %v4898_v58 = vadd.f32 %v4897_v0, %v4871_v27  ;;  %v4943_v38 = vsel %vm14648_vm15, %v4941_v53, %v4942_v9  ;;  %5069 = vmatmul.f32.gmra.mxu2 %v12997_v59  ;;  %7249 = vmatmul.msk.f32.gmra.mxu3 %vm14651_vm3, %v13067_v40  ;;  %v13157_v47 = vsel %vm14655_vm1, %v5145_v60, %v5146_v11  ;;  %v7866_v53 = vld [vmem:[%s14465_s27 + $0x2e0] sm:$0xff]  ;;  %v7868_v27 = vld [vmem:[%s14465_s27 + $0x5d8] sm:$0xff]  ;;  %v7869_v0 = vld [vmem:[%s14465_s27 + $0x4a8] sm:$0xff]  ;;  %vm14670_vm1 = vcmask 1043456  }
 0x8d5   :  { %7242 = vmatmul.msk.f32.vlgmr.msrb.gmra.mxu0 %vm14649_vm11, %v4943_v38  ;;  %7244 = vmatmul.msk.f32.vlgmr.msrb.gmra.mxu1 %vm14650_vm14, %v4943_v38  ;;  %v7872_v38 = vld [vmem:[%s14465_s27 + $0x5c8] sm:$0xff]  ;;  %vm14664_vm15 = vmmov %vm14663_vm5  ;;  %v7890_v60 = vld [vmem:[%s14465_s27 + $0x4f0] sm:$0xff] }
 0x8d6   :  { %v4924_v56 = vadd.f32 %v4923_v4, %v4898_v58  ;;  %5158 = vmatpush.msrb.mxu0 %v7833_v31  ;;  %5216 = vmatpush.msra.mxu3 %v7834_v7  ;;  %v7870_v58 = vld [vmem:[%s14465_s27 + $0x2d0] sm:$0xff]  ;;  %v7873_v4 = vld [vmem:[%s14465_s27 + $0x498] sm:$0xff]  ;;  %v7875_v31 = vld [vmem:[%s14465_s27 + $0x3c0] sm:$0xff]  ;;  %v5254_v7 = vrot.slane %v12995_v41, 3 }
 0x8d7   :  { %5274 = vmatpush.msrb.mxu2 %v7835_v37  ;;  %5239 = vmatpush.msrb.mxu1 %v7836_v5  ;;  %v7876_v37 = vld [vmem:[%s14465_s27 + $0x5b8] sm:$0xff]  ;;  %v7877_v5 = vld [vmem:[%s14465_s27 + $0x488] sm:$0xff]  ;;  %vm14665_vm11 = vmmov %vm14651_vm3 }
 0x8d8   :  { %v13104_v2 = vmax.f32 %v4768_v19, %v4924_v56  ;;  %5159 = vmatpush.msrb.mxu0 %v7837_v21  ;;  %5217 = vmatpush.msra.mxu3 %v7838_v30  ;;  %v5258_v19 = vrot.slane %v13067_v40, 3  ;;  %v7874_v56 = vld [vmem:[%s14465_s27 + $0x2c0] sm:$0xff]  ;;  %v5257_v21 = vrot.slane %v13052_v25, 3  ;;  %v13274_v30 = vsel %vm14663_vm5, %v5254_v7, %v5255_v42  ;;  %vm14666_vm14 = vmmov %vm14663_vm5  ;;  %v7925_v7 = vld [vmem:[%s14465_s27 + $0x618] sm:$0xff] }
 0x8d9   :  { %5275 = vmatpush.msrb.mxu2 %v7839_v22  ;;  %5240 = vmatpush.msrb.mxu1 %v7840_v39  ;;  %v7881_v39 = vld [vmem:[%s14465_s27 + $0x2a0] sm:$0xff] }
 0x8da   :  { %v4946_v45 = vrot.slane %v13104_v2, 1  ;;  %5160 = vmatpush.msrb.mxu0 %v7841_v49  ;;  %5218 = vmatpush.msra.mxu3 %v7842_v55  ;;  %v5150_v44 = vrot.slane %v13104_v2, 2  ;;  %v13281_v22 = vsel %vm14664_vm15, %v5257_v21, %v5258_v19  ;;  %v7882_v49 = vld [vmem:[%s14465_s27 + $0x468] sm:$0xff]  ;;  %v7883_v55 = vld [vmem:[%s14465_s27 + $0x630] sm:$0xff]  ;;  %v7928_v21 = vld [vmem:[%s14465_s27 + $0x560] sm:$0xff] }
 0x8db   :  { %5276 = vmatpush.msrb.mxu2 %v7843_v3  ;;  %5241 = vmatpush.msrb.mxu1 %v7844_v63  ;;  %v7885_v3 = vld [vmem:[%s14465_s27 + $0x290] sm:$0xff]  ;;  %v5262_v63 = vrot.slane %v13104_v2, 3 }
 0x8dc   :  { %v4947_v50 = vsel %vm14652_vm4, %v4942_v9, %v4946_v45  ;;  %5161 = vmatpush.msrb.mxu0 %v7845_v1  ;;  %5219 = vmatpush.msra.mxu3 %v7846_v15  ;;  %v13210_v12 = vsel %vm14659_vm0, %v5146_v11, %v5150_v44  ;;  %v7867_v9 = vld [vmem:[%s14465_s27 + $0x3e0] sm:$0xff]  ;;  %v7880_v45 = vld [vmem:[%s14465_s27 + $0x5a8] sm:$0xff]  ;;  %v7884_v11 = vld [vmem:[%s14465_s27 + $0x598] sm:$0xff]  ;;  %v5370_v44 = vrot.slane %v13067_v40, 4 }
 0x8dd   :  { %5277 = vmatpush.msrb.mxu2 %v7847_v26  ;;  %7243 = vmatmul.msk.f32.gmra.mxu0 %vm14653_vm10, %v4947_v50  ;;  %v7887_v1 = vld [vmem:[%s14465_s27 + $0x620] sm:$0xff]  ;;  %v7888_v15 = vld [vmem:[%s14465_s27 + $0x588] sm:$0xff]  ;;  %vm14667_vm4 = vmmov %vm14663_vm5 }
 0x8de   :  { %5351 = vmatpush.msrb.mxu3 %v7848_v57  ;;  %7245 = vmatmul.msk.f32.gmra.mxu1 %vm14654_vm6, %v4947_v50  ;;  %v5260_v50 = vrot.slane %v13013_v17, 3  ;;  %v7889_v17 = vld [vmem:[%s14465_s27 + $0x280] sm:$0xff]  ;;  %v7891_v26 = vld [vmem:[%s14465_s27 + $0x448] sm:$0xff]  ;;  %v7892_v57 = vld [vmem:[%s14465_s27 + $0x578] sm:$0xff] }
 0x8df   :  { %5162 = vmatpush.msrb.mxu0 %v7849_v28  ;;  %7250 = vmatmul.msk.f32.vlgmr.msra.gmra.mxu2 %vm14656_vm9, %v13157_v47  ;;  %v13337_v28 = vsel %vm14667_vm4, %v5258_v19, %v5262_v63  ;;  %vm14668_vm10 = vmmov %vm14651_vm3  ;;  %v7922_v19 = vld [vmem:[%s14465_s27 + $0x628] sm:$0xff]  ;;  %v7941_v63 = vld [vmem:[%s14343_s13 + $0x70] sm:$0xff] }
 0x8e0   :  { %5220 = vmatmul.f32.vlgmr.msra.gmra.mxu3 %v13165_v54  ;;  %5278 = vmatpush.msrb.mxu2 %v7850_v6  ;;  %v13331_v34 = vsel %vm14666_vm14, %v5255_v42, %v5260_v50  ;;  %v7893_v6 = vld [vmem:[%s14465_s27 + $0x4e0] sm:$0xff]  ;;  %vm14669_vm6 = vmmov %vm14651_vm3  ;;  %v7919_v42 = vld [vmem:[%s14465_s27 + $0x638] sm:$0xff] }
 0x8e1   :  { %5352 = vmatpush.msrb.mxu3 %v7851_v32  ;;  %5163 = vmatpush.msrb.mxu0 %v7852_v16  ;;  %v7896_v32 = vld [vmem:[%s14465_s27 + $0x4d0] sm:$0xff]  ;;  %vm14671_vm9 = vmmov %vm14651_vm3  ;;  %v7939_v50 = vld [vmem:[%s14343_s13 + $0x80] sm:$0xff] }
 0x8e2   :  { %5279 = vmatpush.msrb.mxu2 %v7853_v23  ;;  %5242 = vmatpush.msrb.mxu1 %v7854_v46  ;;  %v7897_v16 = vld [vmem:[%s14465_s27 + $0x610] sm:$0xff]  ;;  %v7898_v23 = vld [vmem:[%s14465_s27 + $0x558] sm:$0xff]  ;;  %v7899_v46 = vld [vmem:[%s14465_s27 + $0x428] sm:$0xff] }
 0x8e3   :  { %5353 = vmatpush.msrb.mxu3 %v7855_v33  ;;  %5164 = vmatpush.msrb.mxu0 %v7856_v10  ;;  %v7900_v33 = vld [vmem:[%s14465_s27 + $0x4c0] sm:$0xff]  ;;  %vm14674_vm0 = vmmov %vm14672_vm2 }
 0x8e4   :  { %5280 = vmatpush.msrb.mxu2 %v7857_v8  ;;  %v7901_v10 = vld [vmem:[%s14465_s27 + $0x600] sm:$0xff]  ;;  %v7902_v8 = vld [vmem:[%s14465_s27 + $0x548] sm:$0xff]  ;;  %vm14676_vm13 = vmmov %vm14674_vm0 }
 0x8e5   :  { %5354 = vmatpush.msrb.mxu3 %v7858_v43  ;;  %5165 = vmatpush.msrb.mxu0 %v7859_v51  ;;  %v7904_v43 = vld [vmem:[%s14465_s27 + $0x5f0] sm:$0xff]  ;;  %v5369_v51 = vrot.slane %v13052_v25, 4 }
 0x8e6   :  { %5281 = vmatpush.msrb.mxu2 %v7861_v62  ;;  %7246 = vmatmul.msk.f32.vlgmr.msra.gmra.mxu0 %vm14658_vm8, %v13052_v25  ;;  %v7907_v25 = vld [vmem:[%s14465_s27 + $0x5e0] sm:$0xff]  ;;  %vm14673_vm8 = vmmov %vm14670_vm1 }
 0x8e7   :  { %5428 = vmatpush.msra.mxu3 %v7860_v29  ;;  %5112 = vmatmul.f32.vlgmr.msra.gmra.mxu1 %v12995_v41  ;;  %v7878_v41 = vld [vmem:[%s14465_s27 + $0x2b0] sm:$0xff]  ;;  %v7906_v29 = vld [vmem:[%s14465_s27 + $0x408] sm:$0xff]  ;;  %v13389_v62 = vsel %vm14670_vm1, %v5369_v51, %v5370_v44 }
 0x8e8   :  { %5166 = vmatpush.msrb.mxu0 %v7862_v48  ;;  %7251 = vmatmul.msk.f32.gmra.mxu2 %vm14660_vm12, %v13210_v12  ;;  %v7908_v48 = vld [vmem:[%s14465_s27 + $0x528] sm:$0xff]  ;;  %vm14675_vm12 = vmmov %vm14674_vm0  ;;  %v7963_v51 = vld [vmem:[%s14344_s14 + $0x10] sm:$0xff] }
 0x8e9   :  { %5223 = vmatmul.f32.gmra.mxu3 %v13218_v24  ;;  %5282 = vmatpush.msrb.mxu2 %v7863_v20  ;;  %v7911_v20 = vld [vmem:[%s14465_s27 + $0x518] sm:$0xff] }
 0x8ea   :  { %5429 = vmatpush.msra.mxu3 %v7864_v35  ;;  %5316 = vmatpush.msra.mxu1 %v7865_v61  ;;  %v7912_v35 = vld [vmem:[%s14465_s27 + $0x3e8] sm:$0xff]  ;;  %v7913_v61 = vld [vmem:[%s14465_s27 + $0x5c0] sm:$0xff] }
 0x8eb   :  { %5167 = vmatpush.msrb.mxu0 %v7866_v53  ;;  %5283 = vmatpush.msrb.mxu2 %v7867_v9  ;;  %v5374_v53 = vrot.slane %v13104_v2, 4  ;;  %v7914_v9 = vld [vmem:[%s14465_s27 + $0x508] sm:$0xff] }
 0x8ec   :  { %5430 = vmatpush.msra.mxu3 %v7868_v27  ;;  %5317 = vmatpush.msra.mxu1 %v7869_v0  ;;  %v7915_v27 = vld [vmem:[%s14465_s27 + $0x3d8] sm:$0xff]  ;;  %v7916_v0 = vld [vmem:[%s14465_s27 + $0x5b0] sm:$0xff]  ;;  %v7917_v2 = vld [vmem:[%s14465_s27 + $0x3c8] sm:$0xff] }
 0x8ed   :  { %5168 = vmatpush.msrb.mxu0 %v7870_v58  ;;  %5284 = vmatpush.msrb.mxu2 %v7871_v36  ;;  %v7918_v58 = vld [vmem:[%s14465_s27 + $0x5a0] sm:$0xff]  ;;  %v5375_v36 = vsel %vm14673_vm8, %v5370_v44, %v5374_v53  ;;  %v7961_v44 = vld [vmem:[%s14344_s14 + $0x30] sm:$0xff] }
 0x8ee   :  { %5431 = vmatpush.msra.mxu3 %v7872_v38  ;;  %5318 = vmatpush.msra.mxu1 %v7873_v4  ;;  %v7920_v38 = vld [vmem:[%s14465_s27 + $0x590] sm:$0xff] }
 0x8ef   :  { %5169 = vmatpush.msrb.mxu0 %v7874_v56  ;;  %5285 = vmatpush.msrb.mxu2 %v7875_v31  ;;  %v7921_v4 = vld [vmem:[%s14343_s13 + $0xf0] sm:$0xff]  ;;  %v7923_v56 = vld [vmem:[%s14465_s27 + $0x580] sm:$0xff] }
 0x8f0   :  { %5432 = vmatpush.msra.mxu3 %v7876_v37  ;;  %5319 = vmatpush.msra.mxu1 %v7877_v5  ;;  %v7924_v31 = vld [vmem:[%s14343_s13 + $0xe0] sm:$0xff]  ;;  %v7926_v37 = vld [vmem:[%s14465_s27 + $0x570] sm:$0xff]  ;;  %v7927_v5 = vld [vmem:[%s14465_s27 + $0x608] sm:$0xff] }
 0x8f1   :  { %7247 = vmatmul.msk.f32.gmra.mxu0 %vm14662_vm7, %v13067_v40  ;;  %5115 = vmatmul.f32.gmra.mxu1 %v12997_v59  ;;  %v7879_v59 = vld [vmem:[%s14465_s27 + $0x478] sm:$0xff]  ;;  %vm14677_vm7 = vmmov %vm14674_vm0 }
 0x8f2   :  { %5170 = vmatpush.msrb.mxu0 %v7878_v41  ;;  %5286 = vmatmul.f32.vlgmr.msrb.gmra.mxu2 %v13274_v30  ;;  %v7905_v40 = vld [vmem:[%s14465_s27 + $0x538] sm:$0xff]  ;;  %v7930_v41 = vld [vmem:[%s14465_s27 + $0x550] sm:$0xff] }
 0x8f3   :  { %7256 = vmatmul.msk.f32.vlgmr.msrb.gmra.mxu3 %vm14665_vm11, %v13281_v22  ;;  %5320 = vmatpush.msra.mxu1 %v7879_v59  ;;  %v7932_v59 = vld [vmem:[%s14465_s27 + $0x540] sm:$0xff] }
 0x8f4   :  { %5433 = vmatpush.msra.mxu3 %v7880_v45  ;;  %5171 = vmatpush.msrb.mxu0 %v7881_v39  ;;  %v7933_v45 = vld [vmem:[%s14343_s13 + $0xb0] sm:$0xff] }
 0x8f5   :  { %5321 = vmatpush.msra.mxu1 %v7882_v49  ;;  %5417 = vmatpush.msra.mxu2 %v7883_v55  ;;  %v7934_v39 = vld [vmem:[%s14465_s27 + $0x530] sm:$0xff]  ;;  %v7935_v49 = vld [vmem:[%s14343_s13 + $0xa0] sm:$0xff] }
 0x8f6   :  { %5434 = vmatpush.msra.mxu3 %v7884_v11  ;;  %5172 = vmatpush.msrb.mxu0 %v7885_v3  ;;  %v7936_v55 = vld [vmem:[%s14465_s27 + $0x520] sm:$0xff]  ;;  %v7937_v11 = vld [vmem:[%s14343_s13 + $0x90] sm:$0xff] }
 0x8f7   :  { %5322 = vmatpush.msra.mxu1 %v7886_v14  ;;  %5418 = vmatpush.msra.mxu2 %v7887_v1  ;;  %v7938_v3 = vld [vmem:[%s14465_s27 + $0x510] sm:$0xff]  ;;  %v7940_v14 = vld [vmem:[%s14465_s27 + $0x500] sm:$0xff] }
 0x8f8   :  { %5435 = vmatpush.msra.mxu3 %v7888_v15  ;;  %5173 = vmatpush.msrb.mxu0 %v7889_v17  ;;  %v7942_v1 = vld [vmem:[%s14343_s13 + $0x60] sm:$0xff]  ;;  %v7943_v15 = vld [vmem:[%s14343_s13 + $0x50] sm:$0xff] }
 0x8f9   :  { %5323 = vmatpush.msra.mxu1 %v7891_v26  ;;  %5174 = vmatmul.f32.vlgmr.msrb.gmra.mxu0 %v13165_v54  ;;  %v7894_v54 = vld [vmem:[%s14465_s27 + $0x568] sm:$0xff]  ;;  %v7945_v17 = vld [vmem:[%s14343_s13 + $0x30] sm:$0xff] }
 0x8fa   :  { %5305 = vmatpush.msra.mxu0 %v7890_v60  ;;  %5436 = vmatpush.msra.mxu3 %v7892_v57  ;;  %v7946_v60 = vld [vmem:[%s14343_s13 + $0x20] sm:$0xff]  ;;  %v7947_v26 = vld [vmem:[%s14343_s13 + $0x10] sm:$0xff] }
 0x8fb   :  { %7252 = vmatmul.msk.f32.vlgmr.msrb.gmra.mxu1 %vm14651_vm3, %v13157_v47  ;;  %5289 = vmatmul.f32.gmra.mxu2 %v13331_v34  ;;  %v7895_v47 = vld [vmem:[%s14465_s27 + $0x438] sm:$0xff]  ;;  %v7948_v57 = vld [vmem:[%s14343_s13] sm:$0xff] }
 0x8fc   :  { %7257 = vmatmul.msk.f32.gmra.mxu3 %vm14668_vm10, %v13337_v28  ;;  %5306 = vmatpush.msra.mxu0 %v7893_v6  ;;  %v7952_v6 = vld [vmem:[%s14344_s14 + $0xc0] sm:$0xff] }
 0x8fd   :  { %5437 = vmatpush.msra.mxu3 %v7894_v54  ;;  %5324 = vmatpush.msra.mxu1 %v7895_v47  ;;  %v7953_v54 = vld [vmem:[%s14344_s14 + $0xb0] sm:$0xff]  ;;  %v7954_v47 = vld [vmem:[%s14344_s14 + $0xa0] sm:$0xff] }
 0x8fe   :  { %5307 = vmatpush.msra.mxu0 %v7896_v32  ;;  %5419 = vmatpush.msra.mxu2 %v7897_v16  ;;  %v7955_v32 = vld [vmem:[%s14344_s14 + $0x90] sm:$0xff]  ;;  %v7956_v16 = vld [vmem:[%s14344_s14 + $0x80] sm:$0xff] }
 0x8ff   :  { %5438 = vmatpush.msra.mxu3 %v7898_v23  ;;  %5325 = vmatpush.msra.mxu1 %v7899_v46  ;;  %v7957_v23 = vld [vmem:[%s14344_s14 + $0x70] sm:$0xff]  ;;  %v7958_v46 = vld [vmem:[%s14344_s14 + $0x60] sm:$0xff] }
 0x900   :  { %5308 = vmatpush.msra.mxu0 %v7900_v33  ;;  %5420 = vmatpush.msra.mxu2 %v7901_v10  ;;  %v7959_v33 = vld [vmem:[%s14344_s14 + $0x50] sm:$0xff]  ;;  %v7960_v10 = vld [vmem:[%s14344_s14 + $0x40] sm:$0xff] }
 0x901   :  { %5439 = vmatpush.msra.mxu3 %v7902_v8  ;;  %5326 = vmatpush.msra.mxu1 %v7903_v52  ;;  %v7962_v52 = vld [vmem:[%s14344_s14 + $0x20] sm:$0xff] }
 0x902   :  { %5382 = vmatpush.msrb.mxu0 %v7904_v43 }
 0x903   :  { %5440 = vmatpush.msra.mxu3 %v7905_v40  ;;  %5327 = vmatpush.msra.mxu1 %v7906_v29  ;;  %v7964_v40 = vld [vmem:[%s14344_s14] sm:$0xff] }
 0x904   :  { %5177 = vmatmul.f32.gmra.mxu0 %v13218_v24  ;;  %7253 = vmatmul.msk.f32.gmra.mxu1 %vm14669_vm6, %v13210_v12  ;;  %v7909_v12 = vld [vmem:[%s14465_s27 + $0x3f8] sm:$0xff]  ;;  %v7910_v24 = vld [vmem:[%s14465_s27 + $0x5d0] sm:$0xff] }
 0x905   :  { %5383 = vmatpush.msrb.mxu0 %v7907_v25  ;;  %7258 = vmatmul.msk.f32.vlgmr.msra.gmra.mxu2 %vm14671_vm9, %v13389_v62 }
 0x906   :  { %5441 = vmatpush.msra.mxu3 %v7908_v48  ;;  %5328 = vmatpush.msra.mxu1 %v7909_v12 }
 0x907   :  { %5384 = vmatpush.msrb.mxu0 %v7910_v24 }
 0x908   :  { %5442 = vmatpush.msra.mxu3 %v7911_v20  ;;  %5329 = vmatpush.msra.mxu1 %v7912_v35 }
 0x909   :  { %5385 = vmatpush.msrb.mxu0 %v7913_v61 }
 0x90a   :  { %5443 = vmatpush.msra.mxu3 %v7914_v9  ;;  %5330 = vmatpush.msra.mxu1 %v7915_v27 }
 0x90b   :  { %5444 = vmatmul.f32.vlgmr.msra.gmra.mxu3 %v13005_v13  ;;  %5386 = vmatpush.msrb.mxu0 %v7916_v0 }
 0x90c   :  { %5331 = vmatpush.msra.mxu1 %v7917_v2  ;;  %7254 = vmatmul.msk.f32.vlgmr.msra.gmra.mxu0 %vm14672_vm2, %v13281_v22  ;;  %v7931_v22 = vld [vmem:[%s14343_s13 + $0xc0] sm:$0xff] }
 0x90d   :  { %5332 = vmatmul.f32.vlgmr.msra.gmra.mxu1 %v13274_v30  ;;  %5387 = vmatpush.msrb.mxu0 %v7918_v58  ;;  %v7929_v30 = vld [vmem:[%s14343_s13 + $0xd0] sm:$0xff] }
 0x90e   :  { %7259 = vmatmul.msk.f32.gmra.mxu2 %vm14674_vm0, %v5375_v36  ;;  %5463 = vmatpush.msrb.mxu1 %v7919_v42 }
 0x90f   :  { %5388 = vmatpush.msrb.mxu0 %v7920_v38  ;;  %5658 = vmatpush.msrb.mxu3 %v7921_v4 }
 0x910   :  { %5464 = vmatpush.msrb.mxu1 %v7922_v19 }
 0x911   :  { %5389 = vmatpush.msrb.mxu0 %v7923_v56  ;;  %5659 = vmatpush.msrb.mxu3 %v7924_v31 }
 0x912   :  { %5465 = vmatpush.msrb.mxu1 %v7925_v7 }
 0x913   :  { %5447 = vmatmul.f32.gmra.mxu3 %v13038_v18  ;;  %5390 = vmatpush.msrb.mxu0 %v7926_v37 }
 0x914   :  { %7255 = vmatmul.msk.f32.gmra.mxu0 %vm14675_vm12, %v13337_v28  ;;  %5466 = vmatpush.msrb.mxu1 %v7927_v5  ;;  %v7951_v28 = vld [vmem:[%s14344_s14 + $0xd0] sm:$0xff] }
 0x915   :  { %5335 = vmatmul.f32.gmra.mxu1 %v13331_v34  ;;  %5391 = vmatpush.msrb.mxu0 %v7928_v21  ;;  %v7950_v34 = vld [vmem:[%s14344_s14 + $0xe0] sm:$0xff] }
 0x916   :  { %5660 = vmatpush.msrb.mxu3 %v7929_v30 }
 0x917   :  { %5392 = vmatpush.msrb.mxu0 %v7930_v41 }
 0x918   :  { %5661 = vmatpush.msrb.mxu3 %v7931_v22 }
 0x919   :  { %5393 = vmatpush.msrb.mxu0 %v7932_v59 }
 0x91a   :  { %5662 = vmatpush.msrb.mxu3 %v7933_v45 }
 0x91b   :  { %5394 = vmatpush.msrb.mxu0 %v7934_v39 }
 0x91c   :  { %5663 = vmatpush.msrb.mxu3 %v7935_v49 }
 0x91d   :  { %5395 = vmatpush.msrb.mxu0 %v7936_v55  ;;  %7260 = vmatmul.msk.f32.vlgmr.msrb.gmra.mxu1 %vm14676_vm13, %v13389_v62 }
 0x91e   :  { %5664 = vmatpush.msrb.mxu3 %v7937_v11 }
 0x91f   :  { %5396 = vmatpush.msrb.mxu0 %v7938_v3 }
 0x920   :  { %5665 = vmatpush.msrb.mxu3 %v7939_v50 }
 0x921   :  { %5397 = vmatpush.msrb.mxu0 %v7940_v14 }
 0x922   :  { %5398 = vmatmul.f32.vlgmr.msrb.gmra.mxu0 %v13005_v13  ;;  %5666 = vmatpush.msrb.mxu3 %v7941_v63  ;;  %v7944_v13 = vld [vmem:[%s14343_s13 + $0x40] sm:$0xff] }
 0x924   :  { %5667 = vmatpush.msrb.mxu3 %v7942_v1 }
 0x925   :  { %7261 = vmatmul.msk.f32.gmra.mxu1 %vm14677_vm7, %v5375_v36 }
 0x926   :  { %5668 = vmatpush.msrb.mxu3 %v7943_v15 }
 0x928   :  { %5669 = vmatpush.msrb.mxu3 %v7944_v13 }
 0x92a   :  { %5401 = vmatmul.f32.gmra.mxu0 %v13038_v18  ;;  %5670 = vmatpush.msrb.mxu3 %v7945_v17  ;;  %v7949_v18 = vld [vmem:[%s14344_s14 + $0xf0] sm:$0xff] }
 0x92c   :  { %5671 = vmatpush.msrb.mxu3 %v7946_v60 }
 0x92e   :  { %5672 = vmatpush.msrb.mxu3 %v7947_v26 }
 0x930   :  { %5673 = vmatpush.msrb.mxu3 %v7948_v57 }
 0x932   :  { %5750 = vmatpush.msra.mxu3 %v7949_v18 }
 0x934   :  { %5751 = vmatpush.msra.mxu3 %v7950_v34 }
 0x936   :  { %5752 = vmatpush.msra.mxu3 %v7951_v28 }
 0x938   :  { %5753 = vmatpush.msra.mxu3 %v7952_v6 }
 0x93a   :  { %5754 = vmatpush.msra.mxu3 %v7953_v54 }
 0x93c   :  { %5755 = vmatpush.msra.mxu3 %v7954_v47 }
 0x93e   :  { %5756 = vmatpush.msra.mxu3 %v7955_v32 }
 0x93f   :  { %v5017_v8 = vpop.f32.mrf.mxu3  ;;  %v4971_v43 = vpop.f32.mrf.mxu2 }
 0x940   :  { %5757 = vmatpush.msra.mxu3 %v7956_v16 }
 0x942   :  { %5758 = vmatpush.msra.mxu3 %v7957_v23  ;;  %v14678_v23 = vld [vmem:[#allocation10_spill] sm:$0xff] }
 0x944   :  { %5759 = vmatpush.msra.mxu3 %v7958_v46 }
 0x946   :  { %5760 = vmatpush.msra.mxu3 %v7959_v33 }
 0x947   :  { %v5020_v25 = vpop.f32.mrf.mxu3  ;;  %v4974_v48 = vpop.f32.mrf.mxu2 }
 0x948   :  { %5761 = vmatpush.msra.mxu3 %v7960_v10 }
 0x94a   :  { %5762 = vmatpush.msra.mxu3 %v7961_v44 }
 0x94c   :  { %5763 = vmatpush.msra.mxu3 %v7962_v52 }
 0x94e   :  { %5764 = vmatpush.msra.mxu3 %v7963_v51 }
 0x94f   :  { %v5136_v20 = vpop.f32.mrf.mxu3  ;;  %v5067_v35 = vpop.f32.mrf.mxu2 }
 0x950   :  { %5765 = vmatpush.msra.mxu3 %v7964_v40 }
 0x952   :  { %v4994_v29 = vpop.f32.mrf.mxu0  ;;  %v5040_v62 = vpop.f32.mrf.mxu1 }
 0x953   :  { %v5041_v41 = vadd.f32 %v5040_v62, %v5017_v8  ;;  %v4995_v49 = vadd.f32 %v4994_v29, %v4971_v43 }
 0x955   :  { %v5068_v1 = vadd.f32 %v5067_v35, %v4995_v49 }
 0x957   :  { %v5139_v9 = vpop.f32.mrf.mxu3  ;;  %v5070_v27 = vpop.f32.mrf.mxu2 }
 0x95a   :  { %v4997_v12 = vpop.f32.mrf.mxu0 }
 0x95b   :  { %v5043_v24 = vpop.f32.mrf.mxu1  ;;  %v4998_v54 = vadd.f32 %v4997_v12, %v4974_v48 }
 0x95c   :  { %v5044_v14 = vadd.f32 %v5043_v24, %v5020_v25 }
 0x95d   :  { %v5071_v43 = vadd.f32 %v5070_v27, %v4998_v54 }
 0x962   :  { %v5198_v36 = vpop.f32.mrf.mxu2 }
 0x963   :  { %v5090_v53 = vpop.f32.mrf.mxu0  ;;  %v5221_v58 = vpop.f32.mrf.mxu3 }
 0x964   :  { %v5113_v61 = vpop.f32.mrf.mxu1  ;;  %v5091_v57 = vadd.f32 %v5090_v53, %v5068_v1 }
 0x965   :  { %v5114_v59 = vadd.f32 %v5113_v61, %v5041_v41 }
 0x967   :  { %v5137_v55 = vadd.f32 %v5136_v20, %v5114_v59  ;;  %v14679_v20 = vld [vmem:[#allocation9_spill] sm:$0xff] }
 0x96b   :  { %v5201_v19 = vpop.f32.mrf.mxu2 }
 0x96c   :  { %v5224_v4 = vpop.f32.mrf.mxu3 }
 0x96e   :  { %v5116_v0 = vpop.f32.mrf.mxu1  ;;  %v5093_v2 = vpop.f32.mrf.mxu0 }
 0x96f   :  { %v5117_v17 = vadd.f32 %v5116_v0, %v5044_v14  ;;  %v5094_v12 = vadd.f32 %v5093_v2, %v5071_v43 }
 0x971   :  { %v5140_v32 = vadd.f32 %v5139_v9, %v5117_v17 }
 0x975   :  { %v5287_v37 = vpop.f32.mrf.mxu2 }
 0x976   :  { %v5175_v38 = vpop.f32.mrf.mxu0  ;;  %v5356_v7 = vpop.f32.mrf.mxu3 }
 0x977   :  { %v5199_v15 = vadd.f32 %v5198_v36, %v5175_v38 }
 0x978   :  { %v5244_v42 = vpop.f32.mrf.mxu1 }
 0x979   :  { %v5245_v39 = vadd.f32 %v5244_v42, %v5221_v58  ;;  %v5250_v47 = vadd.f32 %v5199_v15, %v5091_v57 }
 0x97b   :  { %v5251_v63 = vadd.f32 %v5245_v39, %v5137_v55 }
 0x97e   :  { %v5290_v45 = vpop.f32.mrf.mxu2 }
 0x97f   :  { %v5359_v30 = vpop.f32.mrf.mxu3 }
 0x981   :  { %v5247_v56 = vpop.f32.mrf.mxu1  ;;  %v5178_v31 = vpop.f32.mrf.mxu0 }
 0x982   :  { %v5248_v34 = vadd.f32 %v5247_v56, %v5224_v4  ;;  %v5202_v51 = vadd.f32 %v5201_v19, %v5178_v31 }
 0x984   :  { %v5253_v8 = vadd.f32 %v5248_v34, %v5140_v32  ;;  %v5252_v53 = vadd.f32 %v5202_v51, %v5094_v12 }
 0x988   :  { %v5422_v28 = vpop.f32.mrf.mxu2 }
 0x989   :  { %v5310_v21 = vpop.f32.mrf.mxu0 }
 0x98a   :  { %v5333_v5 = vpop.f32.mrf.mxu1  ;;  %v5311_v18 = vadd.f32 %v5310_v21, %v5287_v37 }
 0x98b   :  { %v5357_v11 = vadd.f32 %v5356_v7, %v5333_v5 }
 0x98c   :  { %v5362_v10 = vadd.f32 %v5311_v18, %v5250_v47  ;;  %v8001_v18 = vld [vmem:[%s14343_s13 + $0x168] sm:$0xff] }
 0x98d   :  { %v5363_v60 = vadd.f32 %v5357_v11, %v5251_v63 }
 0x98e   :  { %v5445_v50 = vpop.f32.mrf.mxu3 }
 0x991   :  { %v5313_v3 = vpop.f32.mrf.mxu0  ;;  %v5425_v0 = vpop.f32.mrf.mxu2 }
 0x992   :  { %v5336_v22 = vpop.f32.mrf.mxu1  ;;  %v5314_v24 = vadd.f32 %v5313_v3, %v5290_v45 }
 0x993   :  { %v5360_v16 = vadd.f32 %v5359_v30, %v5336_v22 }
 0x994   :  { %v5364_v36 = vadd.f32 %v5314_v24, %v5252_v53 }
 0x995   :  { %v5365_v25 = vadd.f32 %v5360_v16, %v5253_v8 }
 0x996   :  { %v5448_v40 = vpop.f32.mrf.mxu3 }
 0x99a   :  { %v5468_v13 = vpop.f32.mrf.mxu1 }
 0x99b   :  { %v5469_v26 = vadd.f32 %v5468_v13, %v5445_v50 }
 0x99d   :  { %v5475_v6 = vadd.f32 %v5469_v26, %v5363_v60 }
 0x99f   :  { %v13584_v46 = vadd.f32 %v5475_v6, %v14678_v23  ;;  %v5399_v33 = vpop.f32.mrf.mxu0 }
 0x9a0   :  { %v5423_v44 = vadd.f32 %v5422_v28, %v5399_v33  ;;  %v8003_v28 = vld [vmem:[%s14343_s13 + $0x48] sm:$0xff] }
 0x9a1   :  { %v7263_v52 = vmul.f32 -1.442695, %v13584_v46 }
 0x9a2   :  { %v5474_v29 = vadd.f32 %v5423_v44, %v5362_v10  ;;  %v5471_v62 = vpop.f32.mrf.mxu1 }
 0x9a3   :  { %7482 = vpow2.f32 %v7263_v52  ;;  %v5472_v48 = vadd.f32 %v5471_v62, %v5448_v40 }
 0x9a4   :  { %v13588_v35 = vadd.f32 %v5474_v29, %v14679_v20 }
 0x9a5   :  { %v5477_v61 = vadd.f32 %v5472_v48, %v5365_v25 }
 0x9a6   :  { %v7262_v9 = vmul.f32 -1.442695, %v13588_v35 }
 0x9a7   :  { %v13592_v58 = vadd.f32 %v5477_v61, %v14678_v23  ;;  %v5402_v27 = vpop.f32.mrf.mxu0 }
 0x9a8   :  { %7484 = vpow2.f32 %v7262_v9  ;;  %v5426_v42 = vadd.f32 %v5425_v0, %v5402_v27  ;;  %v7965_v0 = vld [vmem:[%s14341_s11] sm:$0xff] }
 0x9a9   :  { %v7483_v38 = vpop.eup %7482  ;;  %v7265_v4 = vmul.f32 -1.442695, %v13592_v58  ;;  %v7967_v27 = vld [vmem:[%s14343_s13 + $0x1e0] sm:$0xff] }
 0x9aa   :  { %v5495_v2 = vadd.f32 1.0, %v7483_v38  ;;  %v5476_v19 = vadd.f32 %v5426_v42, %v5364_v36  ;;  %v7968_v36 = vld [vmem:[%s14342_s12] sm:$0xff]  ;;  %v7970_v42 = vld [vmem:[%s14343_s13 + $0x1d0] sm:$0xff]  ;;  %v7971_v38 = vld [vmem:[%s14341_s11 + $0x8] sm:$0x1] }
 0x9ab   :  { %7486 = vpow2.f32 %v7265_v4  ;;  %v7972_v4 = vld [vmem:[%s14343_s13 + $0xe8] sm:$0xff] }
 0x9ac   :  { %7488 = vrcp.f32 %v5495_v2  ;;  %v13596_v56 = vadd.f32 %v5476_v19, %v14679_v20  ;;  %v5522_v14 = vand.u32 2147483647, %v5495_v2  ;;  %v5524_v63 = vand.u32 2147483648, %v5495_v2  ;;  %v7974_v19 = vld [vmem:[%s14343_s13 + $0x1c0] sm:$0xff] }
 0x9ad   :  { %vm5518_vm15 = vweird.f32 %v5495_v2 }
 0x9ae   :  { %v7485_v31 = vpop.eup %7484  ;;  %v7264_v7 = vmul.f32 -1.442695, %v13596_v56  ;;  %vm13603_vm14 = vcmp.eq.f32.partialorder %v5522_v14, 8.507059e+37  ;;  %v5525_v6 = vor.u32 1.1754944e-38, %v5524_v63  ;;  %v7992_v14 = vld [vmem:[%s14343_s13 + $0x198] sm:$0xff]  ;;  %v7993_v63 = vld [vmem:[%s14343_s13 + $0x160] sm:$0xff] }
 0x9af   :  { %v13599_v37 = vadd.f32 1.0, %v7485_v31  ;;  %v7976_v31 = vld [vmem:[%s14343_s13 + $0x1e8] sm:$0xff] }
 0x9b0   :  { %7490 = vpow2.f32 %v7264_v7  ;;  %v7977_v7 = vld [vmem:[%s14343_s13 + $0x1b0] sm:$0xff] }
 0x9b1   :  { %v7487_v5 = vpop.eup %7486  ;;  %7492 = vrcp.f32 %v13599_v37  ;;  %vm5503_vm4 = vweird.f32 %v13599_v37  ;;  %v5507_v54 = vand.u32 2147483647, %v13599_v37  ;;  %v5509_v16 = vand.u32 2147483648, %v13599_v37 }
 0x9b2   :  { %v7489_v21 = vpop.eup %7488  ;;  %v5497_v30 = vadd.f32 1.0, %v7487_v5  ;;  %v7979_v5 = vld [vmem:[%s14343_s13 + $0xc8] sm:$0xff] }
 0x9b3   :  { %v5514_v41 = vmul.f32 %v7489_v21, %v5495_v2  ;;  %vm5519_vm5 = vweird.f32 %v7489_v21  ;;  %v5510_v24 = vor.u32 1.1754944e-38, %v5509_v16  ;;  %vm5508_vm7 = vcmp.eq.f32.partialorder %v5507_v54, 8.507059e+37  ;;  %v7973_v2 = vld [vmem:[%s14343_s13 + $0x1f8] sm:$0xff]  ;;  %v8005_v54 = vld [vmem:[%s14343_s13 + $0x120] sm:$0xff]  ;;  %v8008_v16 = vld [vmem:[%s14343_s13 + $0x110] sm:$0xff] }
 0x9b4   :  { %7494 = vrcp.f32 %v5497_v30  ;;  %v5554_v13 = vand.u32 2147483648, %v5497_v30  ;;  %v5552_v57 = vand.u32 2147483647, %v5497_v30  ;;  %vm13607_vm3 = vmor %vm5518_vm15, %vm5519_vm5  ;;  %vm5548_vm10 = vweird.f32 %v5497_v30 }
 0x9b5   :  { %v5515_v22 = vsub.f32 1.0, %v5514_v41  ;;  %vm14684_vm5 = vcmask 130048   ;;  %v7982_v41 = vld [vmem:[%s14343_s13 + $0xb8] sm:$0xff] }
 0x9b6   :  { %v7491_v59 = vpop.eup %7490  ;;  %v5555_v23 = vor.u32 1.1754944e-38, %v5554_v13  ;;  %vm5553_vm9 = vcmp.eq.f32.partialorder %v5552_v57, 8.507059e+37  ;;  %vm14685_vm15 = vmmov %vm14684_vm5  ;;  %v7996_v13 = vld [vmem:[%s14343_s13 + $0x150] sm:$0xff]  ;;  %v8000_v57 = vld [vmem:[%s14343_s13 + $0x58] sm:$0xff] }
 0x9b7   :  { %v7493_v45 = vpop.eup %7492  ;;  %v5496_v39 = vadd.f32 1.0, %v7491_v59  ;;  %v5516_v55 = vmul.f32 %v7489_v21, %v5515_v22  ;;  %v7983_v22 = vld [vmem:[%s14343_s13 + $0x1c8] sm:$0xff]  ;;  %v7984_v59 = vld [vmem:[%s14343_s13 + $0x190] sm:$0xff] }
 0x9b8   :  { %v5499_v49 = vmul.f32 %v7493_v45, %v13599_v37  ;;  %vm5504_vm1 = vweird.f32 %v7493_v45  ;;  %v7978_v37 = vld [vmem:[%s14342_s12 + $0x8] sm:$0x1] }
 0x9b9   :  { %7496 = vrcp.f32 %v5496_v39  ;;  %v5517_v15 = vadd.f32 %v7489_v21, %v5516_v55  ;;  %v5537_v8 = vand.u32 2147483647, %v5496_v39  ;;  %v5539_v52 = vand.u32 2147483648, %v5496_v39  ;;  %vm5505_vm8 = vmor %vm5503_vm4, %vm5504_vm1  ;;  %v7988_v55 = vld [vmem:[%s14343_s13 + $0x98] sm:$0xff] }
 0x9ba   :  { %v7495_v11 = vpop.eup %7494  ;;  %v5500_v3 = vsub.f32 1.0, %v5499_v49  ;;  %vm5533_vm0 = vweird.f32 %v5496_v39  ;;  %v7987_v49 = vld [vmem:[%s14343_s13 + $0x180] sm:$0xff] }
 0x9bb   :  { %v5544_v50 = vmul.f32 %v7495_v11, %v5497_v30  ;;  %vm5549_vm11 = vweird.f32 %v7495_v11  ;;  %v5521_v32 = vsel %vm13607_vm3, %v7489_v21, %v5517_v15  ;;  %v5540_v48 = vor.u32 1.1754944e-38, %v5539_v52  ;;  %vm14688_vm3 = vmmov %vm14684_vm5  ;;  %v7980_v21 = vld [vmem:[%s14343_s13 + $0x1d8] sm:$0xff]  ;;  %v7981_v30 = vld [vmem:[%s14343_s13 + $0x1a0] sm:$0xff] }
 0x9bc   :  { %v5501_v17 = vmul.f32 %v7493_v45, %v5500_v3  ;;  %vm5550_vm6 = vmor %vm5548_vm10, %vm5549_vm11  ;;  %v5526_v40 = vsel %vm13603_vm14, %v5525_v6, %v5521_v32  ;;  %vm5538_vm13 = vcmp.eq.f32.partialorder %v5537_v8, 8.507059e+37  ;;  %v7990_v3 = vld [vmem:[%s14343_s13 + $0x170] sm:$0xff]  ;;  %v7995_v15 = vld [vmem:[%s14343_s13 + $0x188] sm:$0xff] }
 0x9bd   :  { %v5545_v1 = vsub.f32 1.0, %v5544_v50  ;;  %v5559_v12 = vmul.f32 %v5526_v40, %v13584_v46  ;;  %vm14686_vm11 = vmmov %vm14684_vm5  ;;  %v7991_v50 = vld [vmem:[%s14343_s13 + $0x88] sm:$0xff]  ;;  %v8004_v6 = vld [vmem:[%s14343_s13 + $0x158] sm:$0xff] }
 0x9be   :  { %v5502_v10 = vadd.f32 %v7493_v45, %v5501_v17  ;;  %vm14687_vm14 = vmmov %vm14684_vm5  ;;  %v7997_v17 = vld [vmem:[%s14343_s13 + $0x68] sm:$0xff]  ;;  %v8014_v52 = vld [vmem:[%s14344_s14 + $0x1f0] sm:$0xff] }
 0x9bf   :  { %v7497_v60 = vpop.eup %7496  ;;  %v5546_v26 = vmul.f32 %v7495_v11, %v5545_v1  ;;  %vm14689_vm4 = vmmov %vm14688_vm3  ;;  %v7994_v1 = vld [vmem:[%s14343_s13 + $0x78] sm:$0xff]  ;;  %v8007_v32 = vld [vmem:[%s14343_s13 + $0x148] sm:$0xff] }
 0x9c0   :  { %v5529_v34 = vmul.f32 %v7497_v60, %v5496_v39  ;;  %vm5534_vm2 = vweird.f32 %v7497_v60  ;;  %v5506_v25 = vsel %vm5505_vm8, %v7493_v45, %v5502_v10  ;;  %v7985_v45 = vld [vmem:[%s14343_s13 + $0xa8] sm:$0xff]  ;;  %v7986_v39 = vld [vmem:[%s14343_s13 + $0x1b8] sm:$0xff]  ;;  %vm14690_vm10 = vmmov %vm14688_vm3 }
 0x9c1   :  { %v5547_v47 = vadd.f32 %v7495_v11, %v5546_v26  ;;  %vm5535_vm12 = vmor %vm5533_vm0, %vm5534_vm2  ;;  %v5511_v53 = vsel %vm5508_vm7, %v5510_v24, %v5506_v25  ;;  %v7999_v26 = vld [vmem:[%s14343_s13 + $0x140] sm:$0xff]  ;;  %v8013_v8 = vld [vmem:[%s14343_s13 + $0x128] sm:$0xff] }
 0x9c2   :  { %v5530_v33 = vsub.f32 1.0, %v5529_v34  ;;  %v5558_v46 = vmul.f32 %v5511_v53, %v13588_v35  ;;  %v7969_v35 = vld [vmem:[%s14343_s13 + $0xf8] sm:$0xff]  ;;  %v8002_v34 = vld [vmem:[%s14343_s13 + $0x130] sm:$0xff]  ;;  %v8011_v10 = vld [vmem:[%s14343_s13 + $0x100] sm:$0xff] }
 0x9c3   :  { %v5551_v44 = vsel %vm5550_vm6, %v7495_v11, %v5547_v47  ;;  %v7989_v11 = vld [vmem:[%s14343_s13 + $0x1a8] sm:$0xff]  ;;  %vm14691_vm6 = vmmov %vm14688_vm3  ;;  %v8006_v47 = vld [vmem:[%s14343_s13 + $0x38] sm:$0xff] }
 0x9c4   :  { %v5556_v43 = vsel %vm5553_vm9, %v5555_v23, %v5551_v44  ;;  %v5531_v51 = vmul.f32 %v7497_v60, %v5530_v33  ;;  %v8009_v23 = vld [vmem:[%s14343_s13 + $0x28] sm:$0xff]  ;;  %v8010_v33 = vld [vmem:[%s14343_s13 + $0x138] sm:$0xff] }
 0x9c5   :  { %v5561_v29 = vmul.f32 %v5556_v43, %v13592_v58  ;;  %v7966_v58 = vld [vmem:[%s14343_s13 + $0x1f0] sm:$0xff]  ;;  %v8012_v44 = vld [vmem:[%s14343_s13 + $0x18] sm:$0xff]  ;;  %v8015_v43 = vld [vmem:[%s14343_s13 + $0x8] sm:$0xff] }
 0x9c6   :  { %v5532_v62 = vadd.f32 %v7497_v60, %v5531_v51  ;;  %v8016_v51 = vld [vmem:[%s14343_s13 + $0x118] sm:$0xff]  ;;  %v8020_v25 = vld [vmem:[%s14344_s14 + $0xe8] sm:$0xff] }
 0x9c7   :  { %5599 = vmatpush.msra.mxu0 %v5561_v29  ;;  %v8017_v40 = vld [vmem:[%s14344_s14 + $0xf8] sm:$0xff]  ;;  %v8026_v53 = vld [vmem:[%s14344_s14 + $0xc8] sm:$0xff] }
 0x9c8   :  { %v5536_v20 = vsel %vm5535_vm12, %v7497_v60, %v5532_v62  ;;  %v7998_v60 = vld [vmem:[%s14343_s13 + $0x178] sm:$0xff]  ;;  %v8019_v62 = vld [vmem:[%s14343_s13 + $0x108] sm:$0xff] }
 0x9c9   :  { %v5541_v61 = vsel %vm5538_vm13, %v5540_v48, %v5536_v20  ;;  %5600 = vmatpush.msra.mxu0 %v5559_v12  ;;  %v8021_v48 = vld [vmem:[%s14344_s14 + $0x1f8] sm:$0xff]  ;;  %v8024_v20 = vld [vmem:[%s14344_s14 + $0x1e8] sm:$0xff] }
 0x9ca   :  { %v5560_v9 = vmul.f32 %v5541_v61, %v13596_v56  ;;  %7268 = vmatmul.msk.f32.vlgmr.msra.gmra.mxu0 %vm14684_vm5, %v7965_v0  ;;  %v7975_v56 = vld [vmem:[%s14343_s13 + $0xd8] sm:$0xff]  ;;  %v8025_v61 = vld [vmem:[%s14344_s14 + $0x1c0] sm:$0xff]  ;;  %vm14692_vm5 = vmmov %vm14688_vm3 }
 0x9cb   :  { %5681 = vmatpush.msrb.mxu0 %v7966_v58  ;;  %v8023_v24 = vld [vmem:[%s14344_s14 + $0xd8] sm:$0xff] }
 0x9cc   :  { %5576 = vmatpush.msrb.mxu2 %v5560_v9  ;;  %5622 = vmatpush.msra.mxu1 %v5560_v9  ;;  %v8027_v9 = vld [vmem:[%s14344_s14 + $0x1d8] sm:$0xff] }
 0x9cd   :  { %5682 = vmatpush.msrb.mxu0 %v7967_v27  ;;  %v8029_v58 = vld [vmem:[%s14344_s14 + $0xb8] sm:$0xff]  ;;  %v8031_v27 = vld [vmem:[%s14344_s14 + $0x1a0] sm:$0xff] }
 0x9ce   :  { %5577 = vmatpush.msrb.mxu2 %v5558_v46  ;;  %5623 = vmatpush.msra.mxu1 %v5558_v46  ;;  %v8030_v46 = vld [vmem:[%s14344_s14 + $0x1c8] sm:$0xff] }
 0x9cf   :  { %7266 = vmatmul.msk.f32.vlgmr.msrb.gmra.mxu2 %vm14685_vm15, %v7965_v0  ;;  %7270 = vmatmul.msk.f32.vlgmr.msra.gmra.mxu1 %vm14686_vm11, %v7968_v36  ;;  %v8028_v0 = vld [vmem:[%s14344_s14 + $0x1b0] sm:$0xff]  ;;  %vm14693_vm15 = vmmov %vm14688_vm3 }
 0x9d0   :  { %5645 = vmatpush.msra.mxu2 %v5561_v29  ;;  %5704 = vmatpush.msrb.mxu1 %v7969_v35  ;;  %v8018_v29 = vld [vmem:[%s14344_s14 + $0x1e0] sm:$0xff]  ;;  %v8033_v35 = vld [vmem:[%s14344_s14 + $0x1b8] sm:$0xff] }
 0x9d1   :  { %5683 = vmatpush.msrb.mxu0 %v7970_v42  ;;  %v8034_v42 = vld [vmem:[%s14344_s14 + $0x190] sm:$0xff] }
 0x9d2   :  { %5646 = vmatpush.msra.mxu2 %v5559_v12  ;;  %7269 = vmatmul.msk.f32.gmra.mxu0 %vm14687_vm14, %v7971_v38  ;;  %v8022_v12 = vld [vmem:[%s14344_s14 + $0x1d0] sm:$0xff]  ;;  %vm14694_vm14 = vmmov %vm14688_vm3 }
 0x9d3   :  { %5705 = vmatpush.msrb.mxu1 %v7972_v4  ;;  %5684 = vmatpush.msrb.mxu0 %v7974_v19  ;;  %v8036_v4 = vld [vmem:[%s14344_s14 + $0x1a8] sm:$0xff] }
 0x9d4   :  { %5727 = vmatpush.msrb.mxu2 %v7973_v2  ;;  %v8037_v2 = vld [vmem:[%s14344_s14 + $0x180] sm:$0xff]  ;;  %v8038_v19 = vld [vmem:[%s14344_s14 + $0x88] sm:$0xff] }
 0x9d5   :  { %5706 = vmatpush.msrb.mxu1 %v7975_v56  ;;  %5685 = vmatpush.msrb.mxu0 %v7977_v7  ;;  %v8039_v56 = vld [vmem:[%s14344_s14 + $0x198] sm:$0xff] }
 0x9d6   :  { %5728 = vmatpush.msrb.mxu2 %v7976_v31  ;;  %v8040_v31 = vld [vmem:[%s14344_s14 + $0x170] sm:$0xff]  ;;  %v8041_v7 = vld [vmem:[%s14344_s14 + $0x78] sm:$0xff] }
 0x9d7   :  { %7267 = vmatmul.msk.f32.gmra.mxu2 %vm14688_vm3, %v7971_v38  ;;  %7271 = vmatmul.msk.f32.gmra.mxu1 %vm14689_vm4, %v7978_v37  ;;  %v8035_v38 = vld [vmem:[%s14344_s14 + $0x98] sm:$0xff] }
 0x9d8   :  { %5707 = vmatpush.msrb.mxu1 %v7979_v5  ;;  %5729 = vmatpush.msrb.mxu2 %v7980_v21  ;;  %v8043_v5 = vld [vmem:[%s14344_s14 + $0x160] sm:$0xff]  ;;  %v8044_v21 = vld [vmem:[%s14344_s14 + $0x68] sm:$0xff] }
 0x9d9   :  { %5686 = vmatpush.msrb.mxu0 %v7981_v30  ;;  %v8045_v30 = vld [vmem:[%s14344_s14 + $0x178] sm:$0xff] }
 0x9da   :  { %5708 = vmatpush.msrb.mxu1 %v7982_v41  ;;  %5730 = vmatpush.msrb.mxu2 %v7983_v22  ;;  %v8046_v41 = vld [vmem:[%s14344_s14 + $0x150] sm:$0xff]  ;;  %v8047_v22 = vld [vmem:[%s14344_s14 + $0x58] sm:$0xff] }
 0x9db   :  { %5687 = vmatpush.msrb.mxu0 %v7984_v59  ;;  %v8048_v59 = vld [vmem:[%s14344_s14 + $0x168] sm:$0xff] }
 0x9dc   :  { %5709 = vmatpush.msrb.mxu1 %v7985_v45  ;;  %5731 = vmatpush.msrb.mxu2 %v7986_v39  ;;  %v8049_v45 = vld [vmem:[%s14344_s14 + $0x140] sm:$0xff]  ;;  %v8050_v39 = vld [vmem:[%s14344_s14 + $0x48] sm:$0xff] }
 0x9dd   :  { %5688 = vmatpush.msrb.mxu0 %v7987_v49  ;;  %v8051_v49 = vld [vmem:[%s14344_s14 + $0x158] sm:$0xff] }
 0x9de   :  { %5710 = vmatpush.msrb.mxu1 %v7988_v55  ;;  %5732 = vmatpush.msrb.mxu2 %v7989_v11  ;;  %v8052_v55 = vld [vmem:[%s14344_s14 + $0x130] sm:$0xff]  ;;  %v8053_v11 = vld [vmem:[%s14344_s14 + $0x38] sm:$0xff] }
 0x9df   :  { %7272 = vmatmul.msk.f32.vlgmr.msra.gmra.mxu2 %vm14690_vm10, %v7968_v36  ;;  %5689 = vmatpush.msrb.mxu0 %v7990_v3  ;;  %v8032_v36 = vld [vmem:[%s14344_s14 + $0xa8] sm:$0xff]  ;;  %vm14697_vm10 = vmmov %vm14692_vm5 }
 0x9e0   :  { %5711 = vmatpush.msrb.mxu1 %v7991_v50  ;;  %5733 = vmatpush.msrb.mxu2 %v7992_v14  ;;  %v8054_v3 = vld [vmem:[%s14344_s14 + $0x148] sm:$0xff]  ;;  %v8055_v50 = vld [vmem:[%s14344_s14 + $0x120] sm:$0xff] }
 0x9e1   :  { %5690 = vmatpush.msrb.mxu0 %v7993_v63  ;;  %v8056_v14 = vld [vmem:[%s14344_s14 + $0x28] sm:$0xff]  ;;  %v8057_v63 = vld [vmem:[%s14344_s14 + $0x138] sm:$0xff] }
 0x9e2   :  { %5712 = vmatpush.msrb.mxu1 %v7994_v1  ;;  %5734 = vmatpush.msrb.mxu2 %v7995_v15  ;;  %v8058_v1 = vld [vmem:[%s14344_s14 + $0x110] sm:$0xff]  ;;  %v8059_v15 = vld [vmem:[%s14344_s14 + $0x18] sm:$0xff] }
 0x9e3   :  { %5691 = vmatpush.msrb.mxu0 %v7996_v13  ;;  %v8060_v13 = vld [vmem:[%s14344_s14 + $0x128] sm:$0xff] }
 0x9e4   :  { %5713 = vmatpush.msrb.mxu1 %v7997_v17  ;;  %5735 = vmatpush.msrb.mxu2 %v7998_v60  ;;  %v8061_v17 = vld [vmem:[%s14344_s14 + $0x100] sm:$0xff]  ;;  %v8062_v60 = vld [vmem:[%s14344_s14 + $0x8] sm:$0xff] }
 0x9e5   :  { %5692 = vmatpush.msrb.mxu0 %v7999_v26  ;;  %v8063_v26 = vld [vmem:[%s14344_s14 + $0x118] sm:$0xff] }
 0x9e6   :  { %5714 = vmatpush.msrb.mxu1 %v8000_v57  ;;  %5736 = vmatpush.msrb.mxu2 %v8001_v18  ;;  %v8064_v57 = vld [vmem:[%s14344_s14 + $0x108] sm:$0xff] }
 0x9e7   :  { %7273 = vmatmul.msk.f32.gmra.mxu2 %vm14691_vm6, %v7978_v37  ;;  %5693 = vmatpush.msrb.mxu0 %v8002_v34  ;;  %v8042_v37 = vld [vmem:[%s14344_s14 + $0x188] sm:$0xff]  ;;  %vm14698_vm6 = vmmov %vm14692_vm5 }
 0x9e8   :  { %5715 = vmatpush.msrb.mxu1 %v8003_v28  ;;  %5737 = vmatpush.msrb.mxu2 %v8004_v6  ;;  %v8065_v6 = vld [vmem:[#allocation2 + $0x210] sm:$0xff] }
 0x9e9   :  { %5694 = vmatpush.msrb.mxu0 %v8005_v54  ;;  %v8066_v54 = vld [vmem:[#allocation2 + $0x218] sm:$0xff] }
 0x9ea   :  { %5716 = vmatpush.msrb.mxu1 %v8006_v47  ;;  %5738 = vmatpush.msrb.mxu2 %v8007_v32  ;;  %v8067_v32 = vld [vmem:[#allocation2 + $0x200] sm:$0xff] }
 0x9eb   :  { %5695 = vmatpush.msrb.mxu0 %v8008_v16  ;;  %v8068_v16 = vld [vmem:[#allocation2 + $0x208] sm:$0xff] }
 0x9ec   :  { %5717 = vmatpush.msrb.mxu1 %v8009_v23  ;;  %5739 = vmatpush.msrb.mxu2 %v8010_v33  ;;  %v8069_v33 = vld [vmem:[#allocation2 + $0x1f0] sm:$0xff] }
 0x9ed   :  { %5696 = vmatpush.msrb.mxu0 %v8011_v10  ;;  %v8070_v10 = vld [vmem:[#allocation2 + $0x1f8] sm:$0xff] }
 0x9ee   :  { %5718 = vmatpush.msrb.mxu1 %v8012_v44  ;;  %5740 = vmatpush.msrb.mxu2 %v8013_v8  ;;  %v8071_v8 = vld [vmem:[#allocation2 + $0x1e0] sm:$0xff] }
 0x9ef   :  { %5773 = vmatpush.msra.mxu0 %v8014_v52  ;;  %v8072_v52 = vld [vmem:[#allocation2 + $0x1e8] sm:$0xff] }
 0x9f0   :  { %5719 = vmatpush.msrb.mxu1 %v8015_v43  ;;  %5741 = vmatpush.msrb.mxu2 %v8016_v51  ;;  %v8073_v51 = vld [vmem:[#allocation2 + $0x1d0] sm:$0xff] }
 0x9f1   :  { %5774 = vmatpush.msra.mxu0 %v8018_v29  ;;  %v8075_v29 = vld [vmem:[#allocation2 + $0x1c0] sm:$0xff] }
 0x9f2   :  { %5796 = vmatpush.msra.mxu1 %v8017_v40  ;;  %5742 = vmatpush.msrb.mxu2 %v8019_v62  ;;  %v8074_v40 = vld [vmem:[#allocation2 + $0x1d8] sm:$0xff]  ;;  %v8076_v62 = vld [vmem:[#allocation2 + $0x1c8] sm:$0xff] }
 0x9f3   :  { %5775 = vmatpush.msra.mxu0 %v8022_v12  ;;  %v8078_v12 = vld [vmem:[#allocation2 + $0x1b8] sm:$0xff] }
 0x9f4   :  { %5797 = vmatpush.msra.mxu1 %v8020_v25  ;;  %5819 = vmatpush.msra.mxu2 %v8021_v48  ;;  %v8077_v48 = vld [vmem:[#allocation2 + $0x1b0] sm:$0xff] }
 0x9f5   :  { %5776 = vmatpush.msra.mxu0 %v8025_v61  ;;  %v8080_v61 = vld [vmem:[#allocation2 + $0x1a8] sm:$0xff] }
 0x9f6   :  { %5798 = vmatpush.msra.mxu1 %v8023_v24  ;;  %5820 = vmatpush.msra.mxu2 %v8024_v20  ;;  %v8079_v20 = vld [vmem:[#allocation2 + $0x1a0] sm:$0xff] }
 0x9f7   :  { %5777 = vmatpush.msra.mxu0 %v8028_v0 }
 0x9f8   :  { %5799 = vmatpush.msra.mxu1 %v8026_v53  ;;  %5821 = vmatpush.msra.mxu2 %v8027_v9  ;;  %v8081_v53 = vld [vmem:[#allocation2 + $0xf0] sm:$0xff] }
 0x9f9   :  { %5778 = vmatpush.msra.mxu0 %v8031_v27  ;;  %v8082_v9 = vld [vmem:[#allocation2 + $0x190] sm:$0xff]  ;;  %v8085_v27 = vld [vmem:[#allocation2 + $0xe0] sm:$0xff] }
 0x9fa   :  { %5800 = vmatpush.msra.mxu1 %v8029_v58  ;;  %5822 = vmatpush.msra.mxu2 %v8030_v46  ;;  %v8083_v58 = vld [vmem:[#allocation2 + $0x198] sm:$0xff]  ;;  %v8084_v46 = vld [vmem:[#allocation2 + $0x230] sm:$0xff] }
 0x9fb   :  { %5779 = vmatpush.msra.mxu0 %v8034_v42  ;;  %v8087_v42 = vld [vmem:[#allocation2 + $0x188] sm:$0xff] }
 0x9fc   :  { %5801 = vmatpush.msra.mxu1 %v8032_v36  ;;  %5823 = vmatpush.msra.mxu2 %v8033_v35  ;;  %v8086_v36 = vld [vmem:[#allocation2 + $0x180] sm:$0xff] }
 0x9fd   :  { %5780 = vmatpush.msra.mxu0 %v8037_v2  ;;  %v8089_v2 = vld [vmem:[#allocation2 + $0xd0] sm:$0xff] }
 0x9fe   :  { %5802 = vmatpush.msra.mxu1 %v8035_v38  ;;  %5824 = vmatpush.msra.mxu2 %v8036_v4  ;;  %v8088_v38 = vld [vmem:[#allocation2 + $0x220] sm:$0xff] }
 0x9ff   :  { %5781 = vmatpush.msra.mxu0 %v8040_v31  ;;  %v8092_v31 = vld [vmem:[#allocation2 + $0xc0] sm:$0xff] }
 0xa00   :  { %5803 = vmatpush.msra.mxu1 %v8038_v19  ;;  %5825 = vmatpush.msra.mxu2 %v8039_v56  ;;  %v8090_v19 = vld [vmem:[#allocation2 + $0x170] sm:$0xff]  ;;  %v8091_v56 = vld [vmem:[#allocation2 + $0x178] sm:$0xff] }
 0xa01   :  { %5782 = vmatpush.msra.mxu0 %v8043_v5  ;;  %v8095_v5 = vld [vmem:[#allocation2 + $0xb0] sm:$0xff] }
 0xa02   :  { %5804 = vmatpush.msra.mxu1 %v8041_v7  ;;  %5826 = vmatpush.msra.mxu2 %v8042_v37  ;;  %v8093_v7 = vld [vmem:[#allocation2 + $0x160] sm:$0xff]  ;;  %v8094_v37 = vld [vmem:[#allocation2 + $0x168] sm:$0xff] }
 0xa03   :  { %5783 = vmatpush.msra.mxu0 %v8046_v41  ;;  %v8098_v41 = vld [vmem:[#allocation2 + $0xa0] sm:$0xff] }
 0xa04   :  { %5805 = vmatpush.msra.mxu1 %v8044_v21  ;;  %5827 = vmatpush.msra.mxu2 %v8045_v30  ;;  %v8096_v21 = vld [vmem:[#allocation2 + $0x150] sm:$0xff]  ;;  %v8097_v30 = vld [vmem:[#allocation2 + $0x158] sm:$0xff] }
 0xa05   :  { %5784 = vmatpush.msra.mxu0 %v8049_v45  ;;  %v8101_v45 = vld [vmem:[#allocation2 + $0x90] sm:$0xff] }
 0xa06   :  { %5806 = vmatpush.msra.mxu1 %v8047_v22  ;;  %5828 = vmatpush.msra.mxu2 %v8048_v59  ;;  %v8099_v22 = vld [vmem:[#allocation2 + $0x140] sm:$0xff]  ;;  %v8100_v59 = vld [vmem:[#allocation2 + $0x148] sm:$0xff] }
 0xa07   :  { %5785 = vmatpush.msra.mxu0 %v8052_v55  ;;  %v8104_v55 = vld [vmem:[#allocation2 + $0x238] sm:$0xff] }
 0xa08   :  { %5807 = vmatpush.msra.mxu1 %v8050_v39  ;;  %5829 = vmatpush.msra.mxu2 %v8051_v49  ;;  %v8102_v39 = vld [vmem:[#allocation2 + $0x130] sm:$0xff]  ;;  %v8103_v49 = vld [vmem:[#allocation2 + $0x138] sm:$0xff] }
 0xa09   :  { %5786 = vmatpush.msra.mxu0 %v8055_v50  ;;  %v8107_v50 = vld [vmem:[#allocation2 + $0xf8] sm:$0xff] }
 0xa0a   :  { %5808 = vmatpush.msra.mxu1 %v8053_v11  ;;  %5830 = vmatpush.msra.mxu2 %v8054_v3  ;;  %v8105_v11 = vld [vmem:[#allocation2 + $0x80] sm:$0xff] }
 0xa0b   :  { %5787 = vmatpush.msra.mxu0 %v8058_v1  ;;  %v8106_v3 = vld [vmem:[#allocation2 + $0x120] sm:$0xff]  ;;  %v8110_v1 = vld [vmem:[#allocation2 + $0x350] sm:$0xff] }
 0xa0c   :  { %5809 = vmatpush.msra.mxu1 %v8056_v14  ;;  %5831 = vmatpush.msra.mxu2 %v8057_v63  ;;  %v8108_v14 = vld [vmem:[#allocation2 + $0x128] sm:$0xff]  ;;  %v8109_v63 = vld [vmem:[#allocation2 + $0x70] sm:$0xff] }
 0xa0d   :  { %5788 = vmatpush.msra.mxu0 %v8061_v17  ;;  %v8113_v17 = vld [vmem:[#allocation2 + $0x60] sm:$0xff] }
 0xa0e   :  { %5810 = vmatpush.msra.mxu1 %v8059_v15  ;;  %5832 = vmatpush.msra.mxu2 %v8060_v13  ;;  %v8111_v15 = vld [vmem:[#allocation2 + $0xe8] sm:$0xff] }
 0xa0f   :  { %v8112_v13 = vld [vmem:[#allocation2 + $0x228] sm:$0xff] }
 0xa10   :  { %5811 = vmatpush.msra.mxu1 %v8062_v60  ;;  %5833 = vmatpush.msra.mxu2 %v8063_v26  ;;  %v8114_v60 = vld [vmem:[#allocation2 + $0x340] sm:$0xff]  ;;  %v8115_v26 = vld [vmem:[#allocation2 + $0x50] sm:$0xff] }
 0xa12   :  { %5834 = vmatpush.msra.mxu2 %v8064_v57  ;;  %v8116_v57 = vld [vmem:[#allocation2 + $0xd8] sm:$0xff] }
 0xa47   :  { %v5602_v43 = vpop.f32.mrf.mxu0 }
 0xa4c   :  { %v5625_v18 = vpop.f32.mrf.mxu1 }
 0xa4f   :  { %v5605_v0 = vpop.f32.mrf.mxu0 }
 0xa52   :  { %v5579_v34 = vpop.f32.mrf.mxu2 }
 0xa53   :  { %v5654_v28 = vmax.f32 %v5579_v34, %v5625_v18  ;;  %v8117_v18 = vld [vmem:[#allocation2 + $0x40] sm:$0xff]  ;;  %v8118_v34 = vld [vmem:[#allocation2 + $0xc8] sm:$0xff] }
 0xa54   :  { %v5628_v47 = vpop.f32.mrf.mxu1 }
 0xa55   :  { %5674 = vmatmul.f32.vlgmr.msrb.gmra.mxu3 %v5654_v28  ;;  %5720 = vmatmul.f32.vlgmr.msrb.gmra.mxu1 %v5654_v28 }
 0xa56   :  { %5933 = vmatpush.msrb.mxu3 %v8065_v6  ;;  %5973 = vmatpush.msrb.mxu1 %v8066_v54  ;;  %v8120_v6 = vld [vmem:[#allocation2 + $0xb8] sm:$0xff]  ;;  %v8121_v54 = vld [vmem:[#allocation2 + $0x20] sm:$0xff] }
 0xa58   :  { %5934 = vmatpush.msrb.mxu3 %v8067_v32  ;;  %5974 = vmatpush.msrb.mxu1 %v8068_v16  ;;  %v8123_v32 = vld [vmem:[#allocation2 + $0x10] sm:$0xff]  ;;  %v8124_v16 = vld [vmem:[#allocation2 + $0x98] sm:$0xff] }
 0xa5a   :  { %v5582_v23 = vpop.f32.mrf.mxu2  ;;  %5935 = vmatpush.msrb.mxu3 %v8069_v33  ;;  %5975 = vmatpush.msrb.mxu1 %v8070_v10  ;;  %v8126_v33 = vld [vmem:[#allocation2 + $0x88] sm:$0xff]  ;;  %v8127_v10 = vld [vmem:[#allocation2 + $0x338] sm:$0xff] }
 0xa5b   :  { %v5656_v44 = vmax.f32 %v5582_v23, %v5628_v47  ;;  %v8122_v47 = vld [vmem:[#allocation2 + $0xa8] sm:$0xff]  ;;  %v8125_v23 = vld [vmem:[#allocation2] sm:$0xff] }
 0xa5c   :  { %5936 = vmatpush.msrb.mxu3 %v8071_v8  ;;  %5976 = vmatpush.msrb.mxu1 %v8072_v52  ;;  %v8129_v8 = vld [vmem:[#allocation2 + $0x328] sm:$0xff] }
 0xa5d   :  { %5677 = vmatmul.f32.gmra.mxu3 %v5656_v44  ;;  %5723 = vmatmul.f32.gmra.mxu1 %v5656_v44  ;;  %v8130_v52 = vld [vmem:[#allocation2 + $0x68] sm:$0xff] }
 0xa5e   :  { %5937 = vmatpush.msrb.mxu3 %v8073_v51  ;;  %5977 = vmatpush.msrb.mxu1 %v8074_v40  ;;  %v8132_v51 = vld [vmem:[#allocation2 + $0x58] sm:$0xff]  ;;  %v8133_v40 = vld [vmem:[#allocation2 + $0x308] sm:$0xff] }
 0xa60   :  { %5938 = vmatpush.msrb.mxu3 %v8075_v29  ;;  %5978 = vmatpush.msrb.mxu1 %v8076_v62  ;;  %v8134_v29 = vld [vmem:[#allocation2 + $0x48] sm:$0xff]  ;;  %v8135_v62 = vld [vmem:[#allocation2 + $0x2f8] sm:$0xff] }
 0xa62   :  { %v5648_v25 = vpop.f32.mrf.mxu2  ;;  %5939 = vmatpush.msrb.mxu3 %v8077_v48  ;;  %5979 = vmatpush.msrb.mxu1 %v8078_v12  ;;  %v8137_v48 = vld [vmem:[#allocation2 + $0x2e8] sm:$0xff] }
 0xa63   :  { %v5655_v24 = vmax.f32 %v5602_v43, %v5648_v25  ;;  %v8131_v43 = vld [vmem:[#allocation2 + $0x318] sm:$0xff]  ;;  %v8138_v12 = vld [vmem:[#allocation2 + $0x28] sm:$0xff] }
 0xa64   :  { %5940 = vmatpush.msrb.mxu3 %v8079_v20  ;;  %5980 = vmatpush.msrb.mxu1 %v8080_v61  ;;  %v8136_v25 = vld [vmem:[#allocation2 + $0x38] sm:$0xff]  ;;  %v8141_v61 = vld [vmem:[#allocation2 + $0x2c8] sm:$0xff] }
 0xa65   :  { %5697 = vmatmul.f32.vlgmr.msrb.gmra.mxu0 %v5655_v24  ;;  %5743 = vmatmul.f32.vlgmr.msrb.gmra.mxu2 %v5655_v24  ;;  %v8140_v20 = vld [vmem:[#allocation2 + $0x18] sm:$0xff] }
 0xa66   :  { %5766 = vmatmul.f32.vlgmr.msra.gmra.mxu3 %v5654_v28  ;;  %5812 = vmatmul.f32.vlgmr.msra.gmra.mxu1 %v5654_v28  ;;  %v8119_v28 = vld [vmem:[#allocation2 + $0x30] sm:$0xff] }
 0xa67   :  { %6015 = vmatpush.msrb.mxu2 %v8081_v53  ;;  %5941 = vmatpush.msrb.mxu3 %v8082_v9  ;;  %v8142_v53 = vld [vmem:[#allocation2 + $0x8] sm:$0xff]  ;;  %v8143_v9 = vld [vmem:[#allocation2 + $0x2b8] sm:$0xff] }
 0xa68   :  { %5981 = vmatpush.msrb.mxu1 %v8083_v58  ;;  %5967 = vmatpush.msrb.mxu0 %v8084_v46  ;;  %v8145_v58 = vld [vmem:[#allocation2 + $0x298] sm:$0xff]  ;;  %v8146_v46 = vld [vmem:[#allocation2 + $0x288] sm:$0xff] }
 0xa69   :  { %6016 = vmatpush.msrb.mxu2 %v8085_v27  ;;  %5942 = vmatpush.msrb.mxu3 %v8086_v36  ;;  %v8147_v27 = vld [vmem:[#allocation2 + $0x278] sm:$0xff]  ;;  %v8148_v36 = vld [vmem:[#allocation2 + $0x268] sm:$0xff] }
 0xa6a   :  { %v5651_v35 = vpop.f32.mrf.mxu2  ;;  %5982 = vmatpush.msrb.mxu1 %v8087_v42  ;;  %5968 = vmatpush.msrb.mxu0 %v8088_v38  ;;  %v8150_v42 = vld [vmem:[#allocation2 + $0x248] sm:$0xff] }
 0xa6b   :  { %v5657_v4 = vmax.f32 %v5605_v0, %v5651_v35  ;;  %6017 = vmatpush.msrb.mxu2 %v8089_v2  ;;  %5943 = vmatpush.msrb.mxu3 %v8090_v19  ;;  %v8144_v0 = vld [vmem:[#allocation2 + $0x2a8] sm:$0xff]  ;;  %v8149_v35 = vld [vmem:[#allocation2 + $0x258] sm:$0xff] }
 0xa6c   :  { %5983 = vmatpush.msrb.mxu1 %v8091_v56 }
 0xa6d   :  { %5700 = vmatmul.f32.gmra.mxu0 %v5657_v4  ;;  %5746 = vmatmul.f32.gmra.mxu2 %v5657_v4 }
 0xa6e   :  { %5769 = vmatmul.f32.gmra.mxu3 %v5656_v44  ;;  %5815 = vmatmul.f32.gmra.mxu1 %v5656_v44  ;;  %v8128_v44 = vld [vmem:[#allocation2 + $0x78] sm:$0xff] }
 0xa6f   :  { %6018 = vmatpush.msrb.mxu2 %v8092_v31  ;;  %5944 = vmatpush.msrb.mxu3 %v8093_v7 }
 0xa70   :  { %5984 = vmatpush.msrb.mxu1 %v8094_v37 }
 0xa71   :  { %6019 = vmatpush.msrb.mxu2 %v8095_v5  ;;  %5945 = vmatpush.msrb.mxu3 %v8096_v21 }
 0xa72   :  { %5985 = vmatpush.msrb.mxu1 %v8097_v30 }
 0xa73   :  { %6020 = vmatpush.msrb.mxu2 %v8098_v41  ;;  %5946 = vmatpush.msrb.mxu3 %v8099_v22 }
 0xa74   :  { %5986 = vmatpush.msrb.mxu1 %v8100_v59 }
 0xa75   :  { %5789 = vmatmul.f32.vlgmr.msra.gmra.mxu0 %v5655_v24  ;;  %5835 = vmatmul.f32.vlgmr.msra.gmra.mxu2 %v5655_v24  ;;  %v8139_v24 = vld [vmem:[#allocation2 + $0x2d8] sm:$0xff] }
 0xa76   :  { %6021 = vmatpush.msrb.mxu2 %v8101_v45  ;;  %5947 = vmatpush.msrb.mxu3 %v8102_v39 }
 0xa77   :  { %5987 = vmatpush.msrb.mxu1 %v8103_v49  ;;  %6007 = vmatpush.msra.mxu0 %v8104_v55 }
 0xa78   :  { %6022 = vmatpush.msrb.mxu2 %v8105_v11  ;;  %5948 = vmatpush.msrb.mxu3 %v8106_v3 }
 0xa79   :  { %5988 = vmatpush.msrb.mxu1 %v8108_v14  ;;  %6008 = vmatpush.msra.mxu0 %v8112_v13 }
 0xa7a   :  { %6055 = vmatpush.msra.mxu3 %v8107_v50  ;;  %6023 = vmatpush.msrb.mxu2 %v8109_v63 }
 0xa7b   :  { %6134 = vmatpush.msra.mxu1 %v8110_v1 }
 0xa7c   :  { %6056 = vmatpush.msra.mxu3 %v8111_v15  ;;  %6024 = vmatpush.msrb.mxu2 %v8113_v17 }
 0xa7d   :  { %6135 = vmatpush.msra.mxu1 %v8114_v60  ;;  %5792 = vmatmul.f32.gmra.mxu0 %v5657_v4 }
 0xa7e   :  { %5838 = vmatmul.f32.gmra.mxu2 %v5657_v4  ;;  %6057 = vmatpush.msra.mxu3 %v8116_v57 }
 0xa7f   :  { %6025 = vmatpush.msrb.mxu2 %v8115_v26 }
 0xa80   :  { %6058 = vmatpush.msra.mxu3 %v8118_v34 }
 0xa81   :  { %6026 = vmatpush.msrb.mxu2 %v8117_v18 }
 0xa82   :  { %6059 = vmatpush.msra.mxu3 %v8120_v6 }
 0xa83   :  { %6027 = vmatpush.msrb.mxu2 %v8119_v28 }
 0xa84   :  { %6060 = vmatpush.msra.mxu3 %v8122_v47 }
 0xa85   :  { %6028 = vmatpush.msrb.mxu2 %v8121_v54 }
 0xa86   :  { %6061 = vmatpush.msra.mxu3 %v8124_v16 }
 0xa87   :  { %6029 = vmatpush.msrb.mxu2 %v8123_v32 }
 0xa88   :  { %6062 = vmatpush.msra.mxu3 %v8126_v33 }
 0xa89   :  { %6030 = vmatpush.msrb.mxu2 %v8125_v23 }
 0xa8a   :  { %6063 = vmatpush.msra.mxu3 %v8128_v44 }
 0xa8b   :  { %6140 = vmatpush.msra.mxu2 %v8127_v10 }
 0xa8c   :  { %6064 = vmatpush.msra.mxu3 %v8130_v52 }
 0xa8d   :  { %6141 = vmatpush.msra.mxu2 %v8129_v8 }
 0xa8e   :  { %6065 = vmatpush.msra.mxu3 %v8132_v51 }
 0xa8f   :  { %6142 = vmatpush.msra.mxu2 %v8131_v43 }
 0xa90   :  { %6066 = vmatpush.msra.mxu3 %v8134_v29 }
 0xa91   :  { %6143 = vmatpush.msra.mxu2 %v8133_v40 }
 0xa92   :  { %6067 = vmatpush.msra.mxu3 %v8136_v25 }
 0xa93   :  { %6144 = vmatpush.msra.mxu2 %v8135_v62 }
 0xa94   :  { %6068 = vmatpush.msra.mxu3 %v8138_v12 }
 0xa95   :  { %6145 = vmatpush.msra.mxu2 %v8137_v48 }
 0xa96   :  { %6069 = vmatpush.msra.mxu3 %v8140_v20 }
 0xa97   :  { %6146 = vmatpush.msra.mxu2 %v8139_v24 }
 0xa98   :  { %6070 = vmatpush.msra.mxu3 %v8142_v53 }
 0xa99   :  { %6147 = vmatpush.msra.mxu2 %v8141_v61 }
 0xa9b   :  { %6148 = vmatpush.msra.mxu2 %v8143_v9 }
 0xa9d   :  { %6149 = vmatpush.msra.mxu2 %v8144_v0 }
 0xa9f   :  { %6150 = vmatpush.msra.mxu2 %v8145_v58 }
 0xaa1   :  { %6151 = vmatpush.msra.mxu2 %v8146_v46  ;;  %v8151_v46 = vld [vmem:[#allocation2 + $0x570] sm:$0xff] }
 0xaa3   :  { %6152 = vmatpush.msra.mxu2 %v8147_v27 }
 0xaa5   :  { %6153 = vmatpush.msra.mxu2 %v8148_v36 }
 0xaa7   :  { %6154 = vmatpush.msra.mxu2 %v8149_v35 }
 0xaa9   :  { %6155 = vmatpush.msra.mxu2 %v8150_v42  ;;  %v8152_v42 = vld [vmem:[#allocation2 + $0x560] sm:$0xff] }
 0xad2   :  { %v5721_v2 = vpop.f32.mrf.mxu1 }
 0xad8   :  { %v5675_v38 = vpop.f32.mrf.mxu3 }
 0xada   :  { %v5724_v7 = vpop.f32.mrf.mxu1 }
 0xae0   :  { %v5678_v19 = vpop.f32.mrf.mxu3 }
 0xae2   :  { %v5698_v4 = vpop.f32.mrf.mxu0 }
 0xae3   :  { %v5699_v30 = vadd.f32 %v5698_v4, %v5675_v38  ;;  %v5813_v45 = vpop.f32.mrf.mxu1  ;;  %v8153_v38 = vld [vmem:[#allocation2 + $0x358] sm:$0xff] }
 0xae8   :  { %v5744_v56 = vpop.f32.mrf.mxu2 }
 0xae9   :  { %v5767_v37 = vpop.f32.mrf.mxu3  ;;  %v5745_v49 = vadd.f32 %v5744_v56, %v5721_v2  ;;  %v8154_v2 = vld [vmem:[#allocation2 + $0x470] sm:$0xff] }
 0xaea   :  { %v5701_v31 = vpop.f32.mrf.mxu0  ;;  %v8155_v56 = vld [vmem:[#allocation2 + $0x550] sm:$0xff] }
 0xaeb   :  { %v5702_v50 = vadd.f32 %v5701_v31, %v5678_v19  ;;  %v5816_v28 = vpop.f32.mrf.mxu1  ;;  %v8156_v31 = vld [vmem:[#allocation2 + $0x348] sm:$0xff] }
 0xaf0   :  { %v5747_v5 = vpop.f32.mrf.mxu2 }
 0xaf1   :  { %v5770_v11 = vpop.f32.mrf.mxu3  ;;  %v5748_v32 = vadd.f32 %v5747_v5, %v5724_v7  ;;  %v8157_v5 = vld [vmem:[#allocation2 + $0x460] sm:$0xff] }
 0xaf2   :  { %v5790_v21 = vpop.f32.mrf.mxu0 }
 0xaf3   :  { %v5791_v41 = vadd.f32 %v5790_v21, %v5767_v37 }
 0xaf5   :  { %v5842_v22 = vmax.f32 %v5699_v30, %v5791_v41  ;;  %v8158_v30 = vld [vmem:[#allocation2 + $0x540] sm:$0xff] }
 0xaf7   :  { %v7274_v59 = vmul.f32 -1.442695, %v5842_v22 }
 0xaf8   :  { %v5836_v39 = vpop.f32.mrf.mxu2 }
 0xaf9   :  { %7498 = vpow2.f32 %v7274_v59  ;;  %v5837_v55 = vadd.f32 %v5836_v39, %v5813_v45  ;;  %v8159_v59 = vld [vmem:[#allocation2 + $0x530] sm:$0xff] }
 0xafa   :  { %v5793_v3 = vpop.f32.mrf.mxu0  ;;  %v8160_v45 = vld [vmem:[#allocation2 + $0x110] sm:$0xff] }
 0xafb   :  { %v13932_v14 = vmax.f32 %v5745_v49, %v5837_v55  ;;  %v5794_v63 = vadd.f32 %v5793_v3, %v5770_v11  ;;  %v8161_v49 = vld [vmem:[#allocation2 + $0x450] sm:$0xff]  ;;  %v8162_v55 = vld [vmem:[#allocation2 + $0x458] sm:$0xff]  ;;  %v8163_v11 = vld [vmem:[#allocation2 + $0x520] sm:$0xff] }
 0xafc   :  { %v8164_v3 = vld [vmem:[#allocation2 + $0x100] sm:$0xff] }
 0xafd   :  { %v7275_v1 = vmul.f32 -1.442695, %v13932_v14  ;;  %v13935_v15 = vmax.f32 %v5702_v50, %v5794_v63  ;;  %v8165_v50 = vld [vmem:[#allocation2 + $0x440] sm:$0xff]  ;;  %v8167_v63 = vld [vmem:[#allocation2 + $0x510] sm:$0xff] }
 0xaff   :  { %v7499_v13 = vpop.eup %7498  ;;  %7500 = vpow2.f32 %v7275_v1  ;;  %v7276_v17 = vmul.f32 -1.442695, %v13935_v15 }
 0xb00   :  { %v5858_v60 = vadd.f32 1.0, %v7499_v13  ;;  %v8168_v13 = vld [vmem:[#allocation2 + $0x430] sm:$0xff] }
 0xb01   :  { %7502 = vpow2.f32 %v7276_v17  ;;  %v5839_v57 = vpop.f32.mrf.mxu2  ;;  %v8169_v17 = vld [vmem:[#allocation2 + $0x438] sm:$0xff] }
 0xb02   :  { %7504 = vrcp.f32 %v5858_v60  ;;  %v5840_v54 = vadd.f32 %v5839_v57, %v5816_v28  ;;  %v5873_v33 = vand.u32 2147483648, %v5858_v60  ;;  %v5871_v8 = vand.u32 2147483647, %v5858_v60 }
 0xb03   :  { %vm5867_vm9 = vweird.f32 %v5858_v60 }
 0xb04   :  { %v13940_v10 = vmax.f32 %v5748_v32, %v5840_v54  ;;  %v5874_v40 = vor.u32 1.1754944e-38, %v5873_v33  ;;  %vm5872_vm8 = vcmp.eq.f32.partialorder %v5871_v8, 8.507059e+37  ;;  %v8175_v33 = vld [vmem:[#allocation2 + $0x418] sm:$0xff] }
 0xb05   :  { %v7501_v26 = vpop.eup %7500 }
 0xb06   :  { %v5859_v18 = vadd.f32 1.0, %v7501_v26  ;;  %v7277_v29 = vmul.f32 -1.442695, %v13940_v10  ;;  %v8170_v26 = vld [vmem:[#allocation2 + $0x500] sm:$0xff] }
 0xb07   :  { %v7503_v34 = vpop.eup %7502 }
 0xb08   :  { %v7505_v6 = vpop.eup %7504  ;;  %7506 = vrcp.f32 %v5859_v18  ;;  %v13938_v23 = vadd.f32 1.0, %v7503_v34  ;;  %v5888_v12 = vand.u32 2147483648, %v5859_v18  ;;  %v5886_v61 = vand.u32 2147483647, %v5859_v18  ;;  %v8172_v34 = vld [vmem:[#allocation2 + $0x428] sm:$0xff] }
 0xb09   :  { %v5863_v47 = vmul.f32 %v7505_v6, %v5858_v60  ;;  %vm5868_vm1 = vweird.f32 %v7505_v6  ;;  %vm5882_vm12 = vweird.f32 %v5859_v18 }
 0xb0a   :  { %7508 = vrcp.f32 %v13938_v23  ;;  %vm5869_vm2 = vmor %vm5867_vm9, %vm5868_vm1  ;;  %v5889_v58 = vor.u32 1.1754944e-38, %v5888_v12  ;;  %vm5887_vm7 = vcmp.eq.f32.partialorder %v5886_v61, 8.507059e+37  ;;  %v5903_v60 = vand.u32 2147483648, %v13938_v23  ;;  %v8184_v12 = vld [vmem:[#allocation2 + $0x4c0] sm:$0xff] }
 0xb0b   :  { %v5864_v16 = vsub.f32 1.0, %v5863_v47  ;;  %7510 = vpow2.f32 %v7277_v29  ;;  %vm5897_vm3 = vweird.f32 %v13938_v23  ;;  %v5901_v57 = vand.u32 2147483647, %v13938_v23  ;;  %v8173_v47 = vld [vmem:[#allocation2 + $0x4f0] sm:$0xff]  ;;  %vm14699_vm9 = vmmov %vm14692_vm5 }
 0xb0c   :  { %v8180_v29 = vld [vmem:[#allocation2 + $0x4d0] sm:$0xff] }
 0xb0d   :  { %v5865_v44 = vmul.f32 %v7505_v6, %v5864_v16  ;;  %v8174_v16 = vld [vmem:[#allocation2 + $0x410] sm:$0xff]  ;;  %vm5902_vm1 = vcmp.eq.f32.partialorder %v5901_v57, 8.507059e+37  ;;  %v8210_v57 = vld [vmem:[#allocation2 + $0x2c0] sm:$0xff] }
 0xb0e   :  { %v7507_v52 = vpop.eup %7506 }
 0xb0f   :  { %v5866_v43 = vadd.f32 %v7505_v6, %v5865_v44  ;;  %v5878_v51 = vmul.f32 %v7507_v52, %v5859_v18  ;;  %vm5883_vm0 = vweird.f32 %v7507_v52  ;;  %v8171_v18 = vld [vmem:[#allocation2 + $0x420] sm:$0xff] }
 0xb10   :  { %v13946_v53 = vpop.eup %7508  ;;  %vm5884_vm13 = vmor %vm5882_vm12, %vm5883_vm0  ;;  %v8176_v44 = vld [vmem:[#allocation2 + $0x4e0] sm:$0xff] }
 0xb11   :  { %v5870_v62 = vsel %vm5869_vm2, %v7505_v6, %v5866_v43  ;;  %v5879_v25 = vsub.f32 1.0, %v5878_v51  ;;  %v5893_v35 = vmul.f32 %v13946_v53, %v13938_v23  ;;  %v7511_v19 = vpop.eup %7510  ;;  %vm5898_vm11 = vweird.f32 %v13946_v53  ;;  %v8178_v43 = vld [vmem:[#allocation2 + $0x118] sm:$0xff]  ;;  %vm14701_vm0 = vmmov %vm14692_vm5 }
 0xb12   :  { %v5875_v48 = vsel %vm5872_vm8, %v5874_v40, %v5870_v62  ;;  %v13957_v41 = vadd.f32 1.0, %v7511_v19  ;;  %vm13978_vm4 = vmor %vm5897_vm3, %vm5898_vm11  ;;  %v5904_v23 = vor.u32 1.1754944e-38, %v5903_v60  ;;  %v8179_v40 = vld [vmem:[#allocation2 + $0x408] sm:$0xff]  ;;  %v8181_v62 = vld [vmem:[#allocation2 + $0x3f0] sm:$0xff]  ;;  %vm14700_vm8 = vcmask 1043456  }
 0xb13   :  { %v13944_v24 = vmul.f32 %v5875_v48, %v5842_v22  ;;  %v5880_v20 = vmul.f32 %v7507_v52, %v5879_v25  ;;  %v5894_v21 = vsub.f32 1.0, %v5893_v35  ;;  %v8182_v25 = vld [vmem:[#allocation2 + $0x108] sm:$0xff]  ;;  %v8183_v48 = vld [vmem:[#allocation2 + $0x3f8] sm:$0xff]  ;;  %vm14706_vm11 = vmmov %vm14701_vm0 }
 0xb14   :  { %7512 = vrcp.f32 %v13957_v41  ;;  %v8195_v19 = vld [vmem:[#allocation2 + $0x3c8] sm:$0xff]  ;;  %vm5912_vm12 = vweird.f32 %v13957_v41 }
 0xb15   :  { %v5881_v9 = vadd.f32 %v7507_v52, %v5880_v20  ;;  %6031 = vmatmul.f32.vlgmr.msrb.gmra.mxu2 %v13944_v24  ;;  %v5928_v0 = vrot.slane %v13944_v24, 1  ;;  %v6095_v37 = vrot.slane %v13944_v24, 2  ;;  %v5895_v39 = vmul.f32 %v13946_v53, %v5894_v21  ;;  %v8199_v21 = vld [vmem:[#allocation2 + $0x3b8] sm:$0xff]  ;;  %v8209_v60 = vld [vmem:[#allocation2 + $0x388] sm:$0xff] }
 0xb16   :  { %6280 = vmatpush.msrb.mxu2 %v8151_v46  ;;  %v8189_v46 = vld [vmem:[#allocation2 + $0x3d0] sm:$0xff]  ;;  %v6182_v54 = vrot.slane %v13944_v24, 3 }
 0xb17   :  { %v5885_v27 = vsel %vm5884_vm13, %v7507_v52, %v5881_v9  ;;  %5949 = vmatmul.f32.vlgmr.msrb.gmra.mxu3 %v5928_v0  ;;  %5989 = vmatmul.f32.vlgmr.msrb.gmra.mxu1 %v5928_v0  ;;  %v5896_v1 = vadd.f32 %v13946_v53, %v5895_v39  ;;  %v8177_v52 = vld [vmem:[#allocation2 + $0x400] sm:$0xff]  ;;  %v8186_v9 = vld [vmem:[#allocation2 + $0x330] sm:$0xff]  ;;  %v8187_v0 = vld [vmem:[#allocation2 + $0x3e8] sm:$0xff] }
 0xb18   :  { %v5890_v36 = vsel %vm5887_vm7, %v5889_v58, %v5885_v27  ;;  %6281 = vmatpush.msrb.mxu2 %v8152_v42  ;;  %6174 = vmatpush.msrb.mxu1 %v8153_v38  ;;  %v8188_v58 = vld [vmem:[#allocation2 + $0x4b0] sm:$0xff]  ;;  %v8190_v27 = vld [vmem:[#allocation2 + $0x320] sm:$0xff] }
 0xb19   :  { %v13953_v4 = vmul.f32 %v5890_v36, %v13932_v14  ;;  %6221 = vmatpush.msrb.mxu3 %v8154_v2  ;;  %v8166_v14 = vld [vmem:[#allocation2 + $0x448] sm:$0xff]  ;;  %v5900_v32 = vsel %vm13978_vm4, %v13946_v53, %v5896_v1  ;;  %v8185_v53 = vld [vmem:[#allocation2 + $0x3e0] sm:$0xff]  ;;  %v8191_v36 = vld [vmem:[#allocation2 + $0x3d8] sm:$0xff] }
 0xb1a   :  { %6282 = vmatpush.msrb.mxu2 %v8155_v56  ;;  %6175 = vmatpush.msrb.mxu1 %v8156_v31  ;;  %v13974_v6 = vpop.eup %7512  ;;  %v5905_v51 = vsel %vm5902_vm1, %v5904_v23, %v5900_v32  ;;  %v8192_v42 = vld [vmem:[#allocation2 + $0x4a0] sm:$0xff]  ;;  %v8194_v2 = vld [vmem:[#allocation2 + $0x310] sm:$0xff]  ;;  %v8206_v1 = vld [vmem:[#allocation2 + $0x398] sm:$0xff]  ;;  %vm14711_vm1 = vcmask 1044480  }
 0xb1b   :  { %v5929_v7 = vrot.slane %v13953_v4, 1  ;;  %6222 = vmatpush.msrb.mxu3 %v8157_v5  ;;  %v6096_v22 = vrot.slane %v13953_v4, 2  ;;  %v6183_v28 = vrot.slane %v13953_v4, 3  ;;  %v5908_v8 = vmul.f32 %v13974_v6, %v13957_v41  ;;  %v8193_v38 = vld [vmem:[#allocation2 + $0x3c0] sm:$0xff]  ;;  %v8196_v56 = vld [vmem:[#allocation2 + $0x490] sm:$0xff] }
 0xb1c   :  { %6283 = vmatpush.msrb.mxu2 %v8158_v30  ;;  %v5924_v20 = vmul.f32 %v5905_v51, %v13935_v15  ;;  %v8197_v31 = vld [vmem:[#allocation2 + $0x3b0] sm:$0xff]  ;;  %v8198_v5 = vld [vmem:[#allocation2 + $0x300] sm:$0xff]  ;;  %vm5913_vm2 = vweird.f32 %v13974_v6  ;;  %v6274_v51 = vrot.slane %v13953_v4, 4 }
 0xb1d   :  { %7278 = vmatmul.msk.f32.vlgmr.msrb.gmra.mxu0 %vm14692_vm5, %v5929_v7  ;;  %6156 = vmatmul.f32.vlgmr.msra.gmra.mxu2 %v6095_v37  ;;  %v5909_v61 = vsub.f32 1.0, %v5908_v8  ;;  %v8201_v39 = vld [vmem:[#allocation2 + $0x2f0] sm:$0xff]  ;;  %vm14009_vm13 = vmor %vm5912_vm12, %vm5913_vm2  ;;  %v8214_v32 = vld [vmem:[#allocation2 + $0x360] sm:$0xff]  ;;  %vm14713_vm2 = vcmask 39936  }
 0xb1e   :  { %6284 = vmatpush.msrb.mxu2 %v8159_v59  ;;  %6049 = vmatpush.msrb.mxu0 %v8160_v45  ;;  %v6272_v35 = vrot.slane %v5924_v20, 4  ;;  %v5918_v45 = vand.u32 2147483648, %v13957_v41  ;;  %v8216_v23 = vld [vmem:[#allocation2 + $0x2a0] sm:$0xff]  ;;  %v8218_v8 = vld [vmem:[#allocation2 + $0x290] sm:$0xff]  ;;  %vm14704_vm5 = vmmov %vm14700_vm8 }
 0xb1f   :  { %6071 = vmatmul.f32.vlgmr.msra.gmra.mxu3 %v13944_v24  ;;  %7282 = vmatmul.msk.f32.vlgmr.msra.gmra.mxu1 %vm14693_vm15, %v6096_v22  ;;  %v5910_v15 = vmul.f32 %v13974_v6, %v5909_v61  ;;  %vm14705_vm15 = vmmov %vm14701_vm0  ;;  %v8227_v20 = vld [vmem:[#allocation2 + $0x590] sm:$0xff]  ;;  %v8228_v61 = vld [vmem:[#allocation2 + $0x580] sm:$0xff] }
 0xb20   :  { %6187 = vmatpush.msra.mxu1 %v8161_v49  ;;  %6227 = vmatpush.msra.mxu3 %v8162_v55  ;;  %v5916_v49 = vand.u32 2147483647, %v13957_v41  ;;  %v8202_v55 = vld [vmem:[#allocation2 + $0x3a0] sm:$0xff]  ;;  %v5919_v41 = vor.u32 1.1754944e-38, %v5918_v45 }
 0xb21   :  { %6285 = vmatpush.msrb.mxu2 %v8163_v11  ;;  %6050 = vmatpush.msrb.mxu0 %v8164_v3  ;;  %v5911_v30 = vadd.f32 %v13974_v6, %v5910_v15  ;;  %v8203_v11 = vld [vmem:[#allocation2 + $0x3a8] sm:$0xff]  ;;  %v8241_v15 = vld [vmem:[#allocation2 + $0x4b8] sm:$0xff] }
 0xb22   :  { %6188 = vmatpush.msra.mxu1 %v8165_v50  ;;  %6228 = vmatpush.msra.mxu3 %v8166_v14  ;;  %v8204_v50 = vld [vmem:[#allocation2 + $0x2e0] sm:$0xff]  ;;  %vm5917_vm7 = vcmp.eq.f32.partialorder %v5916_v49, 8.507059e+37 }
 0xb23   :  { %6286 = vmatpush.msrb.mxu2 %v8167_v63  ;;  %v5915_v14 = vsel %vm14009_vm13, %v13974_v6, %v5911_v30  ;;  %v8205_v63 = vld [vmem:[#allocation2 + $0x390] sm:$0xff] }
 0xb24   :  { %6189 = vmatpush.msra.mxu1 %v8168_v13  ;;  %6229 = vmatpush.msra.mxu3 %v8169_v17  ;;  %v8207_v13 = vld [vmem:[#allocation2 + $0x2d0] sm:$0xff]  ;;  %v8208_v17 = vld [vmem:[#allocation2 + $0x380] sm:$0xff] }
 0xb25   :  { %6287 = vmatpush.msrb.mxu2 %v8170_v26  ;;  %7279 = vmatmul.msk.f32.vlgmr.msra.gmra.mxu0 %vm14694_vm14, %v5929_v7  ;;  %v6271_v7 = vrot.slane %v13944_v24, 4  ;;  %v5920_v26 = vsel %vm5917_vm7, %v5919_v41, %v5915_v14  ;;  %v8213_v6 = vld [vmem:[#allocation2 + $0x2b0] sm:$0xff]  ;;  %v8232_v24 = vld [vmem:[#allocation2 + $0x548] sm:$0xff]  ;;  %vm14707_vm14 = vmmov %vm14701_vm0 }
 0xb26   :  { %6190 = vmatpush.msra.mxu1 %v8171_v18  ;;  %6230 = vmatpush.msra.mxu3 %v8172_v34  ;;  %v8211_v18 = vld [vmem:[#allocation2 + $0x370] sm:$0xff]  ;;  %v8212_v34 = vld [vmem:[#allocation2 + $0x378] sm:$0xff] }
 0xb27   :  { %6288 = vmatpush.msrb.mxu2 %v8173_v47  ;;  %7283 = vmatmul.msk.f32.vlgmr.msrb.gmra.mxu1 %vm14697_vm10, %v6096_v22  ;;  %v8200_v22 = vld [vmem:[#allocation2 + $0x480] sm:$0xff]  ;;  %v13999_v59 = vsel %vm14700_vm8, %v6271_v7, %v6272_v35  ;;  %v5925_v47 = vmul.f32 %v5920_v26, %v13940_v10  ;;  %v8221_v10 = vld [vmem:[#allocation2 + $0x270] sm:$0xff]  ;;  %v8240_v35 = vld [vmem:[#allocation2 + $0x4c8] sm:$0xff] }
 0xb28   :  { %6191 = vmatpush.msra.mxu1 %v8174_v16  ;;  %7284 = vmatmul.msk.f32.vlgmr.msrb.gmra.mxu3 %vm14698_vm6, %v6183_v28  ;;  %v8215_v16 = vld [vmem:[#allocation2 + $0x368] sm:$0xff]  ;;  %v8248_v7 = vld [vmem:[%s14348_s18 + $0x80] sm:$0xff]  ;;  %vm14714_vm8 = vmmov %vm14713_vm2 }
 0xb29   :  { %6231 = vmatpush.msra.mxu3 %v8175_v33  ;;  %6289 = vmatpush.msrb.mxu2 %v8176_v44  ;;  %v8217_v33 = vld [vmem:[#allocation2 + $0x598] sm:$0xff]  ;;  %v6275_v44 = vrot.slane %v5925_v47, 4 }
 0xb2a   :  { %6192 = vmatpush.msra.mxu1 %v8177_v52  ;;  %6089 = vmatpush.msra.mxu0 %v8178_v43  ;;  %v8219_v52 = vld [vmem:[#allocation2 + $0x588] sm:$0xff]  ;;  %v8220_v43 = vld [vmem:[#allocation2 + $0x280] sm:$0xff] }
 0xb2b   :  { %6232 = vmatpush.msra.mxu3 %v8179_v40  ;;  %6290 = vmatpush.msrb.mxu2 %v8180_v29  ;;  %v6276_v40 = vsel %vm14704_vm5, %v6274_v51, %v6275_v44  ;;  %v8222_v29 = vld [vmem:[#allocation2 + $0x260] sm:$0xff]  ;;  %vm14715_vm5 = vmmov %vm14711_vm1 }
 0xb2c   :  { %6193 = vmatpush.msra.mxu1 %v8181_v62  ;;  %6090 = vmatpush.msra.mxu0 %v8182_v25  ;;  %v8223_v62 = vld [vmem:[#allocation2 + $0x250] sm:$0xff]  ;;  %v8224_v25 = vld [vmem:[#allocation2 + $0x240] sm:$0xff] }
 0xb2d   :  { %6233 = vmatpush.msra.mxu3 %v8183_v48  ;;  %6291 = vmatpush.msrb.mxu2 %v8184_v12  ;;  %v8225_v48 = vld [vmem:[#allocation2 + $0x478] sm:$0xff]  ;;  %v8226_v12 = vld [vmem:[#allocation2 + $0x468] sm:$0xff] }
 0xb2e   :  { %7280 = vmatmul.msk.f32.vlgmr.msrb.gmra.mxu0 %vm14699_vm9, %v13953_v4  ;;  %6194 = vmatpush.msra.mxu1 %v8185_v53  ;;  %v8229_v53 = vld [vmem:[#allocation2 + $0x578] sm:$0xff]  ;;  %vm14712_vm9 = vmmov %vm14711_vm1 }
 0xb2f   :  { %6100 = vmatpush.msrb.mxu0 %v8186_v9  ;;  %6234 = vmatpush.msra.mxu3 %v8187_v0  ;;  %v8230_v9 = vld [vmem:[#allocation2 + $0x568] sm:$0xff]  ;;  %v8231_v0 = vld [vmem:[#allocation2 + $0x558] sm:$0xff] }
 0xb30   :  { %6292 = vmatpush.msrb.mxu2 %v8188_v58  ;;  %6195 = vmatpush.msra.mxu1 %v8189_v46  ;;  %v8234_v58 = vld [vmem:[#allocation2 + $0x528] sm:$0xff]  ;;  %v8235_v46 = vld [vmem:[#allocation2 + $0x518] sm:$0xff] }
 0xb31   :  { %6101 = vmatpush.msrb.mxu0 %v8190_v27  ;;  %6235 = vmatpush.msra.mxu3 %v8191_v36  ;;  %v8236_v27 = vld [vmem:[#allocation2 + $0x508] sm:$0xff]  ;;  %v8239_v36 = vld [vmem:[#allocation2 + $0x4d8] sm:$0xff] }
 0xb32   :  { %6293 = vmatpush.msrb.mxu2 %v8192_v42  ;;  %6196 = vmatpush.msra.mxu1 %v8193_v38  ;;  %v8242_v42 = vld [vmem:[#allocation2 + $0x4a8] sm:$0xff]  ;;  %v8243_v38 = vld [vmem:[#allocation2 + $0x498] sm:$0xff] }
 0xb33   :  { %6102 = vmatpush.msrb.mxu0 %v8194_v2  ;;  %6236 = vmatpush.msra.mxu3 %v8195_v19  ;;  %v8244_v2 = vld [vmem:[#allocation2 + $0x488] sm:$0xff]  ;;  %v8245_v19 = vld [vmem:[%s14348_s18 + $0x98] sm:$0xff] }
 0xb34   :  { %6294 = vmatpush.msrb.mxu2 %v8196_v56  ;;  %6197 = vmatpush.msra.mxu1 %v8197_v31  ;;  %v8246_v56 = vld [vmem:[%s14348_s18 + $0x90] sm:$0xff]  ;;  %v8247_v31 = vld [vmem:[%s14348_s18 + $0x88] sm:$0xff] }
 0xb35   :  { %6103 = vmatpush.msrb.mxu0 %v8198_v5  ;;  %6237 = vmatpush.msra.mxu3 %v8199_v21 }
 0xb36   :  { %6295 = vmatpush.msrb.mxu2 %v8200_v22  ;;  %7281 = vmatmul.msk.f32.vlgmr.msra.gmra.mxu0 %vm14701_vm0, %v13953_v4  ;;  %v8237_v4 = vld [vmem:[#allocation2 + $0x4f8] sm:$0xff] }
 0xb37   :  { %6296 = vmatmul.f32.vlgmr.msrb.gmra.mxu2 %v13999_v59  ;;  %6104 = vmatpush.msrb.mxu0 %v8201_v39 }
 0xb38   :  { %6198 = vmatpush.msra.mxu1 %v8202_v55  ;;  %6238 = vmatpush.msra.mxu3 %v8203_v11 }
 0xb39   :  { %6105 = vmatpush.msrb.mxu0 %v8204_v50 }
 0xb3a   :  { %6199 = vmatpush.msra.mxu1 %v8205_v63  ;;  %6239 = vmatpush.msra.mxu3 %v8206_v1 }
 0xb3b   :  { %6106 = vmatpush.msrb.mxu0 %v8207_v13 }
 0xb3c   :  { %6200 = vmatpush.msra.mxu1 %v8208_v17  ;;  %6240 = vmatpush.msra.mxu3 %v8209_v60 }
 0xb3d   :  { %6107 = vmatpush.msrb.mxu0 %v8210_v57 }
 0xb3e   :  { %6201 = vmatpush.msra.mxu1 %v8211_v18  ;;  %6241 = vmatpush.msra.mxu3 %v8212_v34 }
 0xb3f   :  { %6108 = vmatpush.msrb.mxu0 %v8213_v6 }
 0xb40   :  { %6202 = vmatpush.msra.mxu1 %v8214_v32  ;;  %6242 = vmatpush.msra.mxu3 %v8215_v16  ;;  %v14708_v32 = vld [vmem:[#allocation11_spill] sm:$0xff] }
 0xb41   :  { %6203 = vmatmul.f32.vlgmr.msra.gmra.mxu1 %v6182_v54  ;;  %6243 = vmatmul.f32.vlgmr.msra.gmra.mxu3 %v6182_v54  ;;  %v14709_v16 = vperm.slane %v14708_v32, 0 }
 0xb42   :  { %6109 = vmatpush.msrb.mxu0 %v8216_v23  ;;  %6354 = vmatpush.msrb.mxu1 %v8217_v33 }
 0xb44   :  { %6110 = vmatpush.msrb.mxu0 %v8218_v8  ;;  %6355 = vmatpush.msrb.mxu1 %v8219_v52 }
 0xb46   :  { %6111 = vmatpush.msrb.mxu0 %v8220_v43 }
 0xb48   :  { %6112 = vmatpush.msrb.mxu0 %v8221_v10 }
 0xb49   :  { %7287 = vmatmul.msk.f32.vlgmr.msrb.gmra.mxu1 %vm14705_vm15, %v6276_v40  ;;  %vm14716_vm15 = vmmov %vm14711_vm1 }
 0xb4a   :  { %6113 = vmatpush.msrb.mxu0 %v8222_v29 }
 0xb4c   :  { %6114 = vmatpush.msrb.mxu0 %v8223_v62 }
 0xb4e   :  { %6115 = vmatpush.msrb.mxu0 %v8224_v25 }
 0xb4f   :  { %6116 = vmatmul.f32.vlgmr.msrb.gmra.mxu0 %v6095_v37  ;;  %v8233_v37 = vld [vmem:[#allocation2 + $0x538] sm:$0xff] }
 0xb50   :  { %6261 = vmatpush.msra.mxu0 %v8225_v48 }
 0xb52   :  { %6262 = vmatpush.msra.mxu0 %v8226_v12 }
 0xb54   :  { %6314 = vmatpush.msrb.mxu0 %v8227_v20 }
 0xb56   :  { %6315 = vmatpush.msrb.mxu0 %v8228_v61 }
 0xb57   :  { %7285 = vmatmul.msk.f32.vlgmr.msra.gmra.mxu0 %vm14706_vm11, %v6183_v28  ;;  %v8238_v28 = vld [vmem:[#allocation2 + $0x4e8] sm:$0xff]  ;;  %vm14717_vm11 = vmmov %vm14713_vm2 }
 0xb58   :  { %6320 = vmatpush.msra.mxu0 %v8229_v53 }
 0xb5a   :  { %6321 = vmatpush.msra.mxu0 %v8230_v9 }
 0xb5c   :  { %6322 = vmatpush.msra.mxu0 %v8231_v0 }
 0xb5e   :  { %6323 = vmatpush.msra.mxu0 %v8232_v24 }
 0xb5f   :  { %7286 = vmatmul.msk.f32.vlgmr.msrb.gmra.mxu0 %vm14707_vm14, %v6276_v40  ;;  %vm14718_vm14 = vmmov %vm14713_vm2 }
 0xb60   :  { %6324 = vmatpush.msra.mxu0 %v8233_v37 }
 0xb62   :  { %6325 = vmatpush.msra.mxu0 %v8234_v58 }
 0xb64   :  { %6326 = vmatpush.msra.mxu0 %v8235_v46  ;;  %v14710_v46 = vperm.slane %v14708_v32, 1  ;;  %v8268_v32 = vld [vmem:[%s14348_s18 + $0x48] sm:$0xff] }
 0xb66   :  { %6327 = vmatpush.msra.mxu0 %v8236_v27 }
 0xb68   :  { %6328 = vmatpush.msra.mxu0 %v8237_v4 }
 0xb6a   :  { %6329 = vmatpush.msra.mxu0 %v8238_v28 }
 0xb6c   :  { %6330 = vmatpush.msra.mxu0 %v8239_v36 }
 0xb6e   :  { %6331 = vmatpush.msra.mxu0 %v8240_v35 }
 0xb70   :  { %6332 = vmatpush.msra.mxu0 %v8241_v15 }
 0xb72   :  { %6333 = vmatpush.msra.mxu0 %v8242_v42 }
 0xb74   :  { %6334 = vmatpush.msra.mxu0 %v8243_v38 }
 0xb76   :  { %6335 = vmatpush.msra.mxu0 %v8244_v2  ;;  %v8249_v2 = vld [vmem:[%s14345_s15] sm:$0x3] }
 0xb77   :  { %6336 = vmatmul.f32.vlgmr.msra.gmra.mxu0 %v13999_v59 }
 0xb78   :  { %6567 = vmatpush.msrb.mxu0 %v8245_v19 }
 0xb7a   :  { %6568 = vmatpush.msrb.mxu0 %v8246_v56  ;;  %v8250_v56 = vld [vmem:[%s14347_s17 + $0x98] sm:$0xff] }
 0xb7c   :  { %6569 = vmatpush.msrb.mxu0 %v8247_v31  ;;  %v8251_v31 = vld [vmem:[%s14347_s17 + $0x90] sm:$0xff] }
 0xb7e   :  { %6570 = vmatpush.msrb.mxu0 %v8248_v7  ;;  %v8252_v7 = vld [vmem:[%s14347_s17 + $0x88] sm:$0xff] }
 0xb94   :  { %v5990_v22 = vpop.f32.mrf.mxu1 }
 0xb98   :  { %v6032_v49 = vpop.f32.mrf.mxu2 }
 0xb9a   :  { %v5970_v5 = vpop.f32.mrf.mxu0  ;;  %v5950_v45 = vpop.f32.mrf.mxu3 }
 0xb9b   :  { %v5971_v50 = vadd.f32 %v5970_v5, %v5950_v45  ;;  %v8253_v5 = vld [vmem:[%s14347_s17 + $0x80] sm:$0xff] }
 0xb9c   :  { %v6137_v39 = vpop.f32.mrf.mxu1 }
 0xb9d   :  { %v6033_v1 = vadd.f32 %v6032_v49, %v5971_v50 }
 0xba0   :  { %v6157_v14 = vpop.f32.mrf.mxu2 }
 0xba2   :  { %v6010_v21 = vpop.f32.mrf.mxu0  ;;  %v6072_v11 = vpop.f32.mrf.mxu3 }
 0xba3   :  { %v6011_v44 = vadd.f32 %v6010_v21, %v5990_v22  ;;  %v8254_v21 = vld [vmem:[%s14346_s16] sm:$0x3] }
 0xba4   :  { %v6177_v3 = vpop.f32.mrf.mxu1 }
 0xba5   :  { %v6073_v43 = vadd.f32 %v6072_v11, %v6011_v44  ;;  %v6178_v40 = vadd.f32 %v6177_v3, %v6157_v14  ;;  %v8272_v44 = vld [vmem:[%s14348_s18 + $0x38] sm:$0xff] }
 0xbab   :  { %v6052_v30 = vpop.f32.mrf.mxu0  ;;  %v6224_v26 = vpop.f32.mrf.mxu3 }
 0xbac   :  { %v6053_v13 = vadd.f32 %v6052_v30, %v6033_v1  ;;  %v8256_v1 = vld [vmem:[%s14348_s18 + $0x78] sm:$0xff] }
 0xbb3   :  { %v6092_v59 = vpop.f32.mrf.mxu0 }
 0xbb4   :  { %v6093_v51 = vadd.f32 %v6092_v59, %v6073_v43  ;;  %v8275_v43 = vld [vmem:[%s14347_s17 + $0x28] sm:$0xff] }
 0xbb6   :  { %v6181_v62 = vadd.f32 %v6178_v40, %v6093_v51  ;;  %v8276_v51 = vld [vmem:[%s14348_s18 + $0x28] sm:$0xff]  ;;  %v8278_v40 = vld [vmem:[%s14348_s18 + $0x20] sm:$0xff] }
 0xbba   :  { %v6297_v18 = vpop.f32.mrf.mxu2 }
 0xbbe   :  { %v6204_v17 = vpop.f32.mrf.mxu1 }
 0xbbf   :  { %v6225_v57 = vadd.f32 %v6224_v26, %v6204_v17  ;;  %v8259_v17 = vld [vmem:[%s14347_s17 + $0x68] sm:$0xff]  ;;  %v8261_v26 = vld [vmem:[%s14347_s17 + $0x60] sm:$0xff] }
 0xbc4   :  { %v6244_v10 = vpop.f32.mrf.mxu3 }
 0xbc6   :  { %v6357_v48 = vpop.f32.mrf.mxu1 }
 0xbcc   :  { %v6117_v55 = vpop.f32.mrf.mxu0 }
 0xbcd   :  { %v6138_v41 = vadd.f32 %v6137_v39, %v6117_v55 }
 0xbcf   :  { %v6180_v60 = vadd.f32 %v6138_v41, %v6053_v13  ;;  %v8257_v41 = vld [vmem:[%s14347_s17 + $0x70] sm:$0xff] }
 0xbd0   :  { %v8258_v13 = vld [vmem:[%s14348_s18 + $0x70] sm:$0xff] }
 0xbd1   :  { %v6267_v6 = vadd.f32 %v6225_v57, %v6180_v60  ;;  %v8260_v60 = vld [vmem:[%s14348_s18 + $0x68] sm:$0xff]  ;;  %v8262_v57 = vld [vmem:[%s14348_s18 + $0x60] sm:$0xff] }
 0xbd4   :  { %v6264_v63 = vpop.f32.mrf.mxu0 }
 0xbd5   :  { %v6265_v29 = vadd.f32 %v6264_v63, %v6244_v10  ;;  %v8255_v63 = vld [vmem:[%s14347_s17 + $0x78] sm:$0xff]  ;;  %v8277_v10 = vld [vmem:[%s14347_s17 + $0x20] sm:$0xff] }
 0xbd7   :  { %v6268_v20 = vadd.f32 %v6265_v29, %v6181_v62  ;;  %v8279_v29 = vld [vmem:[%s14347_s17 + $0x18] sm:$0xff] }
 0xbd8   :  { %v8280_v62 = vld [vmem:[%s14348_s18 + $0x18] sm:$0xff] }
 0xbdc   :  { %v6317_v34 = vpop.f32.mrf.mxu0 }
 0xbdd   :  { %v6318_v54 = vadd.f32 %v6317_v34, %v6297_v18  ;;  %v8263_v18 = vld [vmem:[%s14347_s17 + $0x58] sm:$0xff] }
 0xbde   :  { %v8264_v34 = vld [vmem:[%s14348_s18 + $0x58] sm:$0xff] }
 0xbdf   :  { %v6360_v47 = vadd.f32 %v6318_v54, %v6267_v6  ;;  %v8265_v6 = vld [vmem:[%s14347_s17 + $0x50] sm:$0xff] }
 0xbe0   :  { %v8266_v54 = vld [vmem:[%s14348_s18 + $0x50] sm:$0xff] }
 0xbe1   :  { %v6362_v23 = vadd.f32 %v6360_v47, %v14709_v16  ;;  %v8267_v47 = vld [vmem:[%s14347_s17 + $0x48] sm:$0xff]  ;;  %v8269_v16 = vld [vmem:[%s14347_s17 + $0x40] sm:$0xff] }
 0xbe3   :  { %v7288_v33 = vmul.f32 -1.442695, %v6362_v23 }
 0xbe5   :  { %7514 = vpow2.f32 %v7288_v33  ;;  %v8271_v33 = vld [vmem:[%s14347_s17 + $0x38] sm:$0xff] }
 0xbeb   :  { %v7515_v8 = vpop.eup %7514 }
 0xbec   :  { %v6370_v52 = vadd.f32 1.0, %v7515_v8  ;;  %v8273_v8 = vld [vmem:[%s14347_s17 + $0x30] sm:$0xff] }
 0xbee   :  { %7516 = vrcp.f32 %v6370_v52  ;;  %v6383_v24 = vand.u32 2147483648, %v6370_v52  ;;  %v6381_v58 = vand.u32 2147483647, %v6370_v52  ;;  %vm6377_vm4 = vweird.f32 %v6370_v52 }
 0xbf0   :  { %v6384_v36 = vor.u32 1.1754944e-38, %v6383_v24  ;;  %vm6382_vm6 = vcmp.eq.f32.partialorder %v6381_v58, 8.507059e+37  ;;  %v6599_v24 = vld [vmem:[%s14350_s20 + $0x30] sm:$0xff] }
 0xbf1   :  { %v6591_v58 = vld [vmem:[%s14349_s19 + $0x30] sm:$0xff] }
 0xbf4   :  { %v7517_v25 = vpop.eup %7516  ;;  %v6337_v12 = vpop.f32.mrf.mxu0 }
 0xbf5   :  { %v6373_v61 = vmul.f32 %v7517_v25, %v6370_v52  ;;  %v6358_v53 = vadd.f32 %v6357_v48, %v6337_v12  ;;  %vm6378_vm3 = vweird.f32 %v7517_v25  ;;  %v8274_v52 = vld [vmem:[%s14348_s18 + $0x30] sm:$0xff]  ;;  %v8283_v12 = vld [vmem:[%s14347_s17 + $0x8] sm:$0xff] }
 0xbf6   :  { %vm6379_vm10 = vmor %vm6377_vm4, %vm6378_vm3  ;;  %v8282_v48 = vld [vmem:[%s14348_s18 + $0x10] sm:$0xff]  ;;  %vm14719_vm3 = vcmask 261120  }
 0xbf7   :  { %v6374_v9 = vsub.f32 1.0, %v6373_v61  ;;  %v6361_v0 = vadd.f32 %v6358_v53, %v6268_v20  ;;  %v8284_v20 = vld [vmem:[%s14348_s18 + $0x8] sm:$0xff]  ;;  %v8285_v61 = vld [vmem:[%s14347_s17] sm:$0xff]  ;;  %vm14720_vm4 = vmmov %vm14719_vm3 }
 0xbf8   :  { %v8286_v53 = vld [vmem:[%s14348_s18] sm:$0xff] }
 0xbf9   :  { %v6375_v37 = vmul.f32 %v7517_v25, %v6374_v9  ;;  %v6363_v27 = vadd.f32 %v6361_v0, %v14710_v46  ;;  %v6600_v0 = vld [vmem:[%s14350_s20 + $0x38] sm:$0xff]  ;;  %v6598_v46 = vld [vmem:[%s14350_s20 + $0x28] sm:$0xff] }
 0xbfb   :  { %v6376_v4 = vadd.f32 %v7517_v25, %v6375_v37  ;;  %v7289_v28 = vmul.f32 -1.442695, %v6363_v27  ;;  %v6592_v37 = vld [vmem:[%s14349_s19 + $0x38] sm:$0xff] }
 0xbfc   :  { %6636 = vmatpush.msra.mxu0 %v6592_v37 }
 0xbfd   :  { %v6380_v35 = vsel %vm6379_vm10, %v7517_v25, %v6376_v4  ;;  %7518 = vpow2.f32 %v7289_v28  ;;  %v8281_v25 = vld [vmem:[%s14347_s17 + $0x10] sm:$0xff]  ;;  %v6597_v4 = vld [vmem:[%s14350_s20 + $0x20] sm:$0xff]  ;;  %vm6579_vm10 = vcmask 1040384  }
 0xbfe   :  { %v6385_v15 = vsel %vm6382_vm6, %v6384_v36, %v6380_v35  ;;  %6637 = vmatpush.msra.mxu0 %v6591_v58  ;;  %v6589_v28 = vld [vmem:[%s14349_s19 + $0x20] sm:$0xff]  ;;  %v6596_v36 = vld [vmem:[%s14350_s20 + $0x18] sm:$0xff]  ;;  %vm6601_vm6 = vcmask 523264  }
 0xbff   :  { %v6402_v42 = vmul.f32 %v6385_v15, %v6362_v23  ;;  %v8270_v23 = vld [vmem:[%s14348_s18 + $0x40] sm:$0xff] }
 0xc01   :  { %7290 = vmatpush.msk.msra.mxu1 %vm14711_vm1, %v6402_v42 }
 0xc02   :  { %7291 = vmatmul.msk.f32.vlgmr.msra.gmra.mxu1 %vm14713_vm2, %v8249_v2 }
 0xc03   :  { %7294 = vmatpush.msk.msrb.mxu1 %vm14712_vm9, %v6402_v42  ;;  %v7519_v38 = vpop.eup %7518 }
 0xc04   :  { %v6371_v19 = vadd.f32 1.0, %v7519_v38 }
 0xc05   :  { %6527 = vmatpush.msra.mxu1 %v8250_v56  ;;  %v6588_v56 = vld [vmem:[%s14349_s19 + $0x18] sm:$0xff] }
 0xc06   :  { %7520 = vrcp.f32 %v6371_v19  ;;  %v6398_v45 = vand.u32 2147483648, %v6371_v19  ;;  %v6396_v49 = vand.u32 2147483647, %v6371_v19  ;;  %vm6392_vm12 = vweird.f32 %v6371_v19 }
 0xc07   :  { %6528 = vmatpush.msra.mxu1 %v8251_v31  ;;  %v6594_v31 = vld [vmem:[%s14350_s20 + $0x8] sm:$0xff] }
 0xc08   :  { %v6399_v11 = vor.u32 1.1754944e-38, %v6398_v45  ;;  %vm6397_vm7 = vcmp.eq.f32.partialorder %v6396_v49, 8.507059e+37  ;;  %v14724_v49 = vld [vmem:[#allocation13_spill] sm:$0xff] }
 0xc09   :  { %6529 = vmatpush.msra.mxu1 %v8252_v7  ;;  %v6587_v7 = vld [vmem:[%s14349_s19 + $0x10] sm:$0xff] }
 0xc0a   :  { %7295 = vmatmul.msk.f32.vlgmr.msrb.gmra.mxu1 %vm14714_vm8, %v8254_v21 }
 0xc0b   :  { %6530 = vmatpush.msra.mxu1 %v8253_v5  ;;  %v6593_v5 = vld [vmem:[%s14350_s20] sm:$0xff] }
 0xc0c   :  { %v7521_v30 = vpop.eup %7520 }
 0xc0d   :  { %v6388_v22 = vmul.f32 %v7521_v30, %v6371_v19  ;;  %vm6393_vm0 = vweird.f32 %v7521_v30  ;;  %6613 = vmatpush.msrb.mxu1 %v6600_v0  ;;  %v6595_v19 = vld [vmem:[%s14350_s20 + $0x10] sm:$0xff] }
 0xc0e   :  { %vm6394_vm13 = vmor %vm6392_vm12, %vm6393_vm0 }
 0xc0f   :  { %v6389_v59 = vsub.f32 1.0, %v6388_v22  ;;  %6614 = vmatpush.msrb.mxu1 %v6599_v24  ;;  %v14721_v22 = vld [vmem:[#allocation14_spill] sm:$0xff] }
 0xc11   :  { %v6390_v39 = vmul.f32 %v7521_v30, %v6389_v59  ;;  %6615 = vmatpush.msrb.mxu1 %v6598_v46  ;;  %v14722_v59 = vld [vmem:[#allocation12_spill] sm:$0xff] }
 0xc12   :  { %v3691_v45 = vadd.f32 %v14722_v59, %v14721_v22  ;;  %v6740_v59 = vld [vmem:[%s14354_s24 + $0x38] sm:$0xff] }
 0xc13   :  { %v6391_v55 = vadd.f32 %v7521_v30, %v6390_v39  ;;  %6616 = vmatpush.msrb.mxu1 %v6597_v4  ;;  %v14723_v39 = vld [vmem:[#allocation15_spill] sm:$0xff] }
 0xc15   :  { %v6395_v3 = vsel %vm6394_vm13, %v7521_v30, %v6391_v55  ;;  %6617 = vmatpush.msrb.mxu1 %v6596_v36  ;;  %v6585_v30 = vld [vmem:[%s14349_s19] sm:$0xff]  ;;  %v3751_v55 = vadd.f32 %v14724_v49, %v14723_v39  ;;  %v6738_v39 = vld [vmem:[%s14354_s24 + $0x28] sm:$0xff] }
 0xc16   :  { %v6400_v50 = vsel %vm6397_vm7, %v6399_v11, %v6395_v3  ;;  %v6737_v49 = vld [vmem:[%s14354_s24 + $0x20] sm:$0xff] }
 0xc17   :  { %v6403_v14 = vmul.f32 %v6400_v50, %v6363_v27  ;;  %v6590_v27 = vld [vmem:[%s14349_s19 + $0x28] sm:$0xff]  ;;  %6618 = vmatpush.msrb.mxu1 %v6595_v19  ;;  %v3753_v11 = vmax.f32 %v3691_v45, %v3751_v55  ;;  %v7320_v19 = vld [vmem:[%s14353_s23] ss:$0 sm:$0xff]  ;;  %v6739_v45 = vld [vmem:[%s14354_s24 + $0x30] sm:$0xff] }
 0xc18   :  { %6638 = vmatpush.msra.mxu0 %v6590_v27 }
 0xc19   :  { %7292 = vmatpush.msk.msrb.mxu3 %vm14715_vm5, %v6403_v14  ;;  %7296 = vmatpush.msk.msra.mxu2 %vm14716_vm15, %v6403_v14  ;;  %vm6773_vm5 = vcmask 16384   ;;  %vm6776_vm15 = vcmask 17409  }
 0xc1a   :  { %7293 = vmatmul.msk.f32.vlgmr.msrb.gmra.mxu3 %vm14717_vm11, %v8249_v2  ;;  %7297 = vmatmul.msk.f32.vlgmr.msra.gmra.mxu2 %vm14718_vm14, %v8254_v21  ;;  %v6586_v21 = vld [vmem:[%s14349_s19 + $0x8] sm:$0xff] }
 0xc1b   :  { %6495 = vmatpush.msra.mxu3 %v8255_v63  ;;  %6535 = vmatpush.msrb.mxu2 %v8256_v1 }
 0xc1c   :  { %6639 = vmatpush.msra.mxu0 %v6589_v28  ;;  %6619 = vmatpush.msrb.mxu1 %v6594_v31  ;;  %v6743_v31 = vld [vmem:[%s14354_s24 + $0x50] sm:$0xff] }
 0xc1d   :  { %6496 = vmatpush.msra.mxu3 %v8257_v41  ;;  %6536 = vmatpush.msrb.mxu2 %v8258_v13  ;;  %v6582_v13 = vrot.slane %v3753_v11, 1 }
 0xc1e   :  { %6640 = vmatpush.msra.mxu0 %v6588_v56  ;;  %6620 = vmatpush.msrb.mxu1 %v6593_v5  ;;  %v6744_v56 = vld [vmem:[%s14354_s24 + $0x58] sm:$0xff] }
 0xc1f   :  { %6497 = vmatpush.msra.mxu3 %v8259_v17  ;;  %6537 = vmatpush.msrb.mxu2 %v8260_v60 }
 0xc20   :  { %6641 = vmatpush.msra.mxu0 %v6587_v7  ;;  %v6742_v7 = vld [vmem:[%s14354_s24 + $0x48] sm:$0xff] }
 0xc21   :  { %6498 = vmatpush.msra.mxu3 %v8261_v26  ;;  %6538 = vmatpush.msrb.mxu2 %v8262_v57 }
 0xc22   :  { %6642 = vmatpush.msra.mxu0 %v6586_v21 }
 0xc23   :  { %6499 = vmatpush.msra.mxu3 %v8263_v18  ;;  %6539 = vmatpush.msrb.mxu2 %v8264_v34  ;;  %v6688_v18 = vld [vmem:[%s14352_s22 + $0x78] sm:$0xff]  ;;  %v6687_v34 = vld [vmem:[%s14352_s22 + $0x70] sm:$0xff] }
 0xc24   :  { %6643 = vmatpush.msra.mxu0 %v6585_v30  ;;  %v6741_v30 = vld [vmem:[%s14354_s24 + $0x40] sm:$0xff] }
 0xc25   :  { %6500 = vmatpush.msra.mxu3 %v8265_v6  ;;  %6540 = vmatpush.msrb.mxu2 %v8266_v54  ;;  %v6686_v6 = vld [vmem:[%s14352_s22 + $0x68] sm:$0xff]  ;;  %v6685_v54 = vld [vmem:[%s14352_s22 + $0x60] sm:$0xff] }
 0xc27   :  { %6501 = vmatpush.msra.mxu3 %v8267_v47  ;;  %6541 = vmatpush.msrb.mxu2 %v8268_v32  ;;  %v7319_v47 = vld [vmem:[%s14351_s21] ss:$0 sm:$0xff]  ;;  %v6684_v32 = vld [vmem:[%s14352_s22 + $0x58] sm:$0xff]  ;;  %s8343_s21 = smov 1  }
 0xc29   :  { %6502 = vmatpush.msra.mxu3 %v8269_v16  ;;  %6542 = vmatpush.msrb.mxu2 %v8270_v23 }
 0xc2b   :  { %6503 = vmatpush.msra.mxu3 %v8271_v33  ;;  %6543 = vmatpush.msrb.mxu2 %v8272_v44  ;;  %v6683_v44 = vld [vmem:[%s14352_s22 + $0x50] sm:$0xff] }
 0xc2d   :  { %6504 = vmatpush.msra.mxu3 %v8273_v8  ;;  %6544 = vmatpush.msrb.mxu2 %v8274_v52  ;;  %v6682_v8 = vld [vmem:[%s14352_s22 + $0x48] sm:$0xff] }
 0xc2f   :  { %6505 = vmatpush.msra.mxu3 %v8275_v43  ;;  %6545 = vmatpush.msrb.mxu2 %v8276_v51  ;;  %v6681_v43 = vld [vmem:[%s14352_s22 + $0x40] sm:$0xff] }
 0xc31   :  { %6506 = vmatpush.msra.mxu3 %v8277_v10  ;;  %6546 = vmatpush.msrb.mxu2 %v8278_v40  ;;  %v6680_v10 = vld [vmem:[%s14352_s22 + $0x38] sm:$0xff]  ;;  %v6679_v40 = vld [vmem:[%s14352_s22 + $0x30] sm:$0xff] }
 0xc33   :  { %6507 = vmatpush.msra.mxu3 %v8279_v29  ;;  %6547 = vmatpush.msrb.mxu2 %v8280_v62  ;;  %v6678_v29 = vld [vmem:[%s14352_s22 + $0x28] sm:$0xff]  ;;  %v6677_v62 = vld [vmem:[%s14352_s22 + $0x20] sm:$0xff] }
 0xc35   :  { %6508 = vmatpush.msra.mxu3 %v8281_v25  ;;  %6548 = vmatpush.msrb.mxu2 %v8282_v48  ;;  %v6676_v48 = vld [vmem:[%s14352_s22 + $0x18] sm:$0xff] }
 0xc37   :  { %6509 = vmatpush.msra.mxu3 %v8283_v12  ;;  %6549 = vmatpush.msrb.mxu2 %v8284_v20  ;;  %v6675_v20 = vld [vmem:[%s14352_s22 + $0x10] sm:$0xff] }
 0xc39   :  { %6510 = vmatpush.msra.mxu3 %v8285_v61  ;;  %6550 = vmatpush.msrb.mxu2 %v8286_v53  ;;  %v6674_v61 = vld [vmem:[%s14352_s22 + $0x8] sm:$0xff]  ;;  %v6673_v53 = vld [vmem:[%s14352_s22] sm:$0xff] }
 0xc7f   :  { %v6427_v9 = vpop.f32.mrf.mxu1 }
 0xc87   :  { %v6467_v35 = vpop.f32.mrf.mxu1 }
 0xc88   :  { %v6490_v15 = vmax.f32 %v6427_v9, %v6467_v35 }
 0xc8a   :  { %6511 = vmatmul.f32.vlgmr.msra.gmra.mxu3 %v6490_v15  ;;  %6551 = vmatmul.f32.vlgmr.msrb.gmra.mxu2 %v6490_v15  ;;  %v6748_v15 = vld [vmem:[%s14354_s24 + $0x78] sm:$0xff] }
 0xc8b   :  { %6753 = vmatpush.msrb.mxu3 %v6748_v15 }
 0xc9d   :  { %v6447_v42 = vpop.f32.mrf.mxu3  ;;  %v6487_v38 = vpop.f32.mrf.mxu2 }
 0xc9e   :  { %v6491_v2 = vmax.f32 %v6447_v42, %v6487_v38  ;;  %v6747_v42 = vld [vmem:[%s14354_s24 + $0x70] sm:$0xff]  ;;  %v6746_v38 = vld [vmem:[%s14354_s24 + $0x68] sm:$0xff] }
 0xc9f   :  { %6754 = vmatpush.msrb.mxu3 %v6747_v42 }
 0xca0   :  { %7298 = vmatmul.msk.f32.vlgmr.msra.gmra.mxu1 %vm14719_vm3, %v6491_v2  ;;  %7299 = vmatmul.msk.f32.vlgmr.msrb.gmra.mxu0 %vm14720_vm4, %v6491_v2  ;;  %v6745_v2 = vld [vmem:[%s14354_s24 + $0x60] sm:$0xff] }
 0xca1   :  { %6693 = vmatpush.msra.mxu1 %v6688_v18  ;;  %6755 = vmatpush.msrb.mxu3 %v6746_v38 }
 0xca3   :  { %6694 = vmatpush.msra.mxu1 %v6687_v34  ;;  %6756 = vmatpush.msrb.mxu3 %v6745_v2 }
 0xca5   :  { %6695 = vmatpush.msra.mxu1 %v6686_v6  ;;  %6757 = vmatpush.msrb.mxu3 %v6744_v56 }
 0xca7   :  { %6696 = vmatpush.msra.mxu1 %v6685_v54  ;;  %6758 = vmatpush.msrb.mxu3 %v6743_v31 }
 0xca9   :  { %6697 = vmatpush.msra.mxu1 %v6684_v32  ;;  %6759 = vmatpush.msrb.mxu3 %v6742_v7 }
 0xcab   :  { %6698 = vmatpush.msra.mxu1 %v6683_v44  ;;  %6760 = vmatpush.msrb.mxu3 %v6741_v30 }
 0xcad   :  { %6699 = vmatpush.msra.mxu1 %v6682_v8  ;;  %6761 = vmatpush.msrb.mxu3 %v6740_v59 }
 0xcaf   :  { %6700 = vmatpush.msra.mxu1 %v6681_v43  ;;  %6762 = vmatpush.msrb.mxu3 %v6739_v45 }
 0xcb1   :  { %6701 = vmatpush.msra.mxu1 %v6680_v10  ;;  %6763 = vmatpush.msrb.mxu3 %v6738_v39 }
 0xcb3   :  { %6702 = vmatpush.msra.mxu1 %v6679_v40  ;;  %6764 = vmatpush.msrb.mxu3 %v6737_v49 }
 0xcb5   :  { %6703 = vmatpush.msra.mxu1 %v6678_v29 }
 0xcb7   :  { %6704 = vmatpush.msra.mxu1 %v6677_v62 }
 0xcb9   :  { %6705 = vmatpush.msra.mxu1 %v6676_v48 }
 0xcbb   :  { %6706 = vmatpush.msra.mxu1 %v6675_v20 }
 0xcbd   :  { %6707 = vmatpush.msra.mxu1 %v6674_v61 }
 0xcbf   :  { %6708 = vmatpush.msra.mxu1 %v6673_v53 }
 0xd0d   :  { %v6512_v3 = vpop.f32.mrf.mxu3  ;;  %v6552_v50 = vpop.f32.mrf.mxu2 }
 0xd1d   :  { %v6532_v14 = vpop.f32.mrf.mxu1  ;;  %v6572_v63 = vpop.f32.mrf.mxu0 }
 0xd1e   :  { %v6533_v1 = vadd.f32 %v6532_v14, %v6512_v3  ;;  %v6573_v41 = vadd.f32 %v6572_v63, %v6552_v50  ;;  %v6735_v50 = vld [vmem:[%s14354_s24 + $0x10] sm:$0xff]  ;;  %v6734_v14 = vld [vmem:[%s14354_s24 + $0x8] sm:$0xff]  ;;  %v6733_v63 = vld [vmem:[%s14354_s24] sm:$0xff] }
 0xd20   :  { %v6575_v17 = vmax.f32 %v6533_v1, %v6573_v41 }
 0xd22   :  { %v6577_v60 = vrot.slane %v6575_v17, 7  ;;  %v6584_v26 = vsel %vm6579_vm10, %v6582_v13, %v6575_v17 }
 0xd23   :  { %7300 = vmatmul.msk.f32.vlgmr.msrb.gmra.mxu1 %vm6601_vm6, %v6584_v26 }
 0xd24   :  { %v6580_v57 = vsel %vm6579_vm10, %v3753_v11, %v6577_v60  ;;  %v6736_v11 = vld [vmem:[%s14354_s24 + $0x18] sm:$0xff] }
 0xd25   :  { %7301 = vmatmul.msk.f32.vlgmr.msra.gmra.mxu0 %vm6601_vm6, %v6580_v57  ;;  %6765 = vmatpush.msrb.mxu3 %v6736_v11 }
 0xd27   :  { %6766 = vmatpush.msrb.mxu3 %v6735_v50 }
 0xd29   :  { %6767 = vmatpush.msrb.mxu3 %v6734_v14 }
 0xd2b   :  { %6768 = vmatpush.msrb.mxu3 %v6733_v63 }
 0xda0   :  { %v6622_v16 = vpop.f32.mrf.mxu1 }
 0xda2   :  { %v6645_v23 = vpop.f32.mrf.mxu0 }
 0xda3   :  { %v6646_v33 = vadd.f32 %v6645_v23, %v6622_v16 }
 0xda5   :  { %v6652_v52 = vadd.f32 %v7319_v47, %v6646_v33  ;;  %v7321_v47 = vld [vmem:[%s14725_s26] ss:$0 sm:$0xff] }
 0xda7   :  { %v7302_v51 = vmul.f32 -1.442695, %v6652_v52 }
 0xda9   :  { %7522 = vpow2.f32 %v7302_v51 }
 0xdaf   :  { %v7523_v25 = vpop.eup %7522 }
 0xdb0   :  { %v6656_v12 = vadd.f32 1.0, %v7523_v25 }
 0xdb2   :  { %7524 = vrcp.f32 %v6656_v12  ;;  %v6668_v37 = vand.u32 2147483648, %v6656_v12  ;;  %v6666_v46 = vand.u32 2147483647, %v6656_v12  ;;  %vm6662_vm9 = vweird.f32 %v6656_v12 }
 0xdb4   :  { %v6669_v4 = vor.u32 1.1754944e-38, %v6668_v37  ;;  %vm6667_vm8 = vcmp.eq.f32.partialorder %v6666_v46, 8.507059e+37 }
 0xdb8   :  { %v7525_v9 = vpop.eup %7524 }
 0xdb9   :  { %v6658_v0 = vmul.f32 %v7525_v9, %v6656_v12  ;;  %vm6663_vm1 = vweird.f32 %v7525_v9 }
 0xdba   :  { %vm6664_vm2 = vmor %vm6662_vm9, %vm6663_vm1 }
 0xdbb   :  { %v6659_v24 = vsub.f32 1.0, %v6658_v0 }
 0xdbd   :  { %v6660_v58 = vmul.f32 %v7525_v9, %v6659_v24 }
 0xdbf   :  { %v6661_v27 = vadd.f32 %v7525_v9, %v6660_v58 }
 0xdc1   :  { %v6665_v28 = vsel %vm6664_vm2, %v7525_v9, %v6661_v27 }
 0xdc2   :  { %v6670_v36 = vsel %vm6667_vm8, %v6669_v4, %v6665_v28 }
 0xdc3   :  { %v6672_v35 = vmul.f32 %v6670_v36, %v6652_v52 }
 0xdc5   :  { %6709 = vmatmul.f32.vlgmr.msra.gmra.mxu1 %v6672_v35 }
 0xe42   :  { %v6710_v5 = vpop.f32.mrf.mxu1 }
 0xe43   :  { %v6711_v21 = vadd.f32 %v7320_v19, %v6710_v5 }
 0xe45   :  { %v7303_v22 = vmul.f32 -1.442695, %v6711_v21 }
 0xe47   :  { %7526 = vpow2.f32 %v7303_v22 }
 0xe4d   :  { %v7527_v55 = vpop.eup %7526 }
 0xe4e   :  { %v6716_v3 = vadd.f32 1.0, %v7527_v55 }
 0xe50   :  { %7528 = vrcp.f32 %v6716_v3  ;;  %v6728_v17 = vand.u32 2147483648, %v6716_v3  ;;  %v6726_v26 = vand.u32 2147483647, %v6716_v3  ;;  %vm6722_vm12 = vweird.f32 %v6716_v3 }
 0xe52   :  { %v6729_v18 = vor.u32 1.1754944e-38, %v6728_v17  ;;  %vm6727_vm7 = vcmp.eq.f32.partialorder %v6726_v26, 8.507059e+37 }
 0xe56   :  { %v7529_v1 = vpop.eup %7528 }
 0xe57   :  { %v6718_v41 = vmul.f32 %v7529_v1, %v6716_v3  ;;  %vm6723_vm0 = vweird.f32 %v7529_v1 }
 0xe58   :  { %vm6724_vm13 = vmor %vm6722_vm12, %vm6723_vm0 }
 0xe59   :  { %v6719_v13 = vsub.f32 1.0, %v6718_v41 }
 0xe5b   :  { %v6720_v60 = vmul.f32 %v7529_v1, %v6719_v13 }
 0xe5d   :  { %v6721_v57 = vadd.f32 %v7529_v1, %v6720_v60 }
 0xe5f   :  { %v6725_v34 = vsel %vm6724_vm13, %v7529_v1, %v6721_v57 }
 0xe60   :  { %v6730_v6 = vsel %vm6727_vm7, %v6729_v18, %v6725_v34 }
 0xe61   :  { %v6732_v54 = vmul.f32 %v6730_v6, %v6711_v21 }
 0xe63   :  { %6769 = vmatmul.f32.vlgmr.msrb.gmra.mxu3 %v6732_v54 }
 0xee6   :  { %v6770_v32 = vpop.f32.mrf.mxu3 }
 0xee7   :  { %v6771_v16 = vadd.f32 %v7321_v47, %v6770_v32 }
 0xee9   :  { %6774 = vst.msk [vmem:[#allocation5] sm:$0x1] %vm6773_vm5, %v6771_v16 }
 0xeea   :  { %6777 = vst.msk [vmem:[#allocation5] sm:$0x2] %vm6776_vm15, %v6771_v16 }
 0xeeb   :  { %6790 = dma.vmem_to_hbm [thread:$0]  %s6783_s25, 32, %s6785_s8, [#allocation4], %s14727_s30, %s14727_s30, %s8343_s21  }
 0xeec   :  { %8337 = dma.done.wait [#allocation4], 32  }
 0xeed   :  { %8338 = vsyncadd [#allocation4], 4294967264 }
 0xeee   :  { %6795 = vsyncpa [#allocation3], 1 }
 0xeef   :  { %6796 = vsyncpa [#allocation4], 1 }

</bundles_post_ra>
